<compile_context>
chip_gen: v7x
topology: tpu7x:2x2x1
jax: 0.10.0
libtpu: 0.0.40
codegen_flags: <defaults>
</compile_context>

<pallas_src>
import math

import jax
import jax.numpy as jnp
from jax.experimental import pallas as pl
from jax.experimental.pallas import tpu as pltpu

# --------------------- small synthetic config (Config analogue) --------------
N_LAYERS = 2           # config.n_layers (scaled down)
FRAME_INPUT_DIM = 256  # config.frame_input_dim (scaled down)
N_FRAMES = 8           # config.n_frames
QA_INPUT_DIM = 128     # config.qa_input_dim (scaled down)
N_HEADS = 4            # config.n_heads
D_MODEL = 128          # config.d_model
D_FF = 128             # config.d_model_ff
S_TXT = 8              # qa sequence length
BATCH = 2
LN_EPS = 1e-5
NEG = -1e30            # additive mask value for cross-batch attention scores

BF = BATCH * N_FRAMES
BT = BATCH * S_TXT
HEAD_DIM = D_MODEL // N_HEADS

# Slab-packing layout assumes 128-row weight blocks.
assert D_MODEL == 128 and D_FF == 128 and QA_INPUT_DIM == 128
assert FRAME_INPUT_DIM % 128 == 0


# ----------------------------- parameter packing ------------------------------
class _Packer:
    """Packs all parameters into two flat VMEM-resident slabs.

    wslab : bf16 (128, total_cols) — every matmul weight, column-concatenated.
    fslab : f32  (rows, 128)       — biases / LayerNorm params / folded PE rows.
    Static column/row offsets are recorded and baked into the kernel closure.
    """

    def __init__(self):
        self._w, self._f = [], []
        self.woff, self.foff = {}, {}
        self._wc, self._fr = 0, 0

    def add_w(self, name, w):
        assert w.shape[0] == 128 and w.shape[1] % 128 == 0
        self.woff[name] = self._wc
        self._wc += w.shape[1]
        self._w.append(w)

    def add_f(self, name, rows):
        assert rows.ndim == 2 and rows.shape[1] == 128
        self.foff[name] = self._fr
        self._fr += rows.shape[0]
        self._f.append(rows)

    def finish(self):
        wslab = jnp.concatenate(self._w, axis=1).astype(jnp.bfloat16)
        fslab = jnp.concatenate(self._f, axis=0).astype(jnp.float32)
        pad = (-fslab.shape[0]) % 8                    # sublane-align the f32 slab
        if pad:
            fslab = jnp.concatenate(
                [fslab, jnp.zeros((pad, fslab.shape[1]), jnp.float32)], axis=0)
        return wslab, fslab, dict(self.woff), dict(self.foff)


def _dense(key, din, dout, scale=0.05):
    kw, kb = jax.random.split(key)
    w = jax.random.normal(kw, (din, dout), jnp.float32) * scale
    b = jax.random.normal(kb, (1, dout), jnp.float32) * scale
    return w, b


def _pack_mha(pk, key, name, qk_only=False):
    ks = jax.random.split(key, 4)
    wq, bq = _dense(ks[0], D_MODEL, D_MODEL)
    wk, bk = _dense(ks[1], D_MODEL, D_MODEL)
    wv, bv = _dense(ks[2], D_MODEL, D_MODEL)
    wo, bo = _dense(ks[3], D_MODEL, D_MODEL)
    s = 1.0 / math.sqrt(HEAD_DIM)          # fold 1/sqrt(head_dim) into the q proj
    wq, bq = wq * s, bq * s
    if qk_only:                            # logits head: v / out-proj never needed
        pk.add_w(name + ".qk", jnp.concatenate([wq, wk], axis=1))
        pk.add_f(name + ".bq", bq)
        pk.add_f(name + ".bk", bk)
    else:
        pk.add_w(name + ".qkv", jnp.concatenate([wq, wk, wv], axis=1))
        pk.add_f(name + ".bq", bq)
        pk.add_f(name + ".bk", bk)
        pk.add_f(name + ".bv", bv)
        pk.add_w(name + ".o", wo)
        pk.add_f(name + ".bo", bo)


def _pack_encoder(pk, key, name):
    k1, k2, k3 = jax.random.split(key, 3)
    _pack_mha(pk, k1, name + ".attn")
    pk.add_f(name + ".ln1_g", jnp.ones((1, D_MODEL), jnp.float32))
    pk.add_f(name + ".ln1_b", jnp.zeros((1, D_MODEL), jnp.float32))
    w1, b1 = _dense(k2, D_MODEL, D_FF)
    w2, b2 = _dense(k3, D_FF, D_MODEL)
    pk.add_w(name + ".ffn1", w1)
    pk.add_f(name + ".b1", b1)
    pk.add_w(name + ".ffn2", w2)
    pk.add_f(name + ".b2", b2)
    pk.add_f(name + ".ln2_g", jnp.ones((1, D_MODEL), jnp.float32))
    pk.add_f(name + ".ln2_b", jnp.zeros((1, D_MODEL), jnp.float32))


def _temporal_encoding_pe(max_len, d):
    position = jnp.arange(max_len, dtype=jnp.float32)[:, None]
    div_term = jnp.exp(jnp.arange(0, d, 2, dtype=jnp.float32) *
                       (-math.log(10000.0) / d))
    pe = jnp.zeros((max_len, d), jnp.float32)
    pe = pe.at[:, 0::2].set(jnp.sin(position * div_term))
    pe = pe.at[:, 1::2].set(jnp.cos(position * div_term))
    return pe


def build_params(key):
    pk = _Packer()
    k_fp, k_qp, k_layers, k_logits = jax.random.split(key, 4)

    fw, fb = _dense(k_fp, FRAME_INPUT_DIM, D_MODEL)
    for blk in range(FRAME_INPUT_DIM // 128):
        pk.add_w(f"frame_proj.{blk}", fw[blk * 128:(blk + 1) * 128, :])
    # Fold the temporal PE (and the frame-proj bias) through the projection and
    # pre-tile it over the folded batch dimension (exact; removes a wide f32 add
    # and one input DMA from the kernel critical path).
    pe = _temporal_encoding_pe(N_FRAMES, FRAME_INPUT_DIM)
    pe_proj = pe @ fw + fb                                  # (F, D_MODEL)
    pk.add_f("pe", jnp.tile(pe_proj, (BATCH, 1)))           # (B*F, D_MODEL)

    qw, qb = _dense(k_qp, QA_INPUT_DIM, D_MODEL)
    pk.add_w("qa_proj", qw)
    pk.add_f("qa_proj.b", qb)

    for i, lk in enumerate(jax.random.split(k_layers, N_LAYERS)):
        k1, k2, k3, k4 = jax.random.split(lk, 4)
        _pack_encoder(pk, k1, f"L{i}.qa_enc")
        _pack_encoder(pk, k2, f"L{i}.frame_enc")
        _pack_mha(pk, k3, f"L{i}.fq")      # frame_qa_condition
        _pack_mha(pk, k4, f"L{i}.qf")      # qa_frame_condition

    _pack_mha(pk, k_logits, "logits", qk_only=True)
    # TODO(synk): ModalityEmbeddings is constructed in __init__ but never used in
    # forward(); dropout is identity at inference — both omitted.
    return pk.finish()


# ----------------------------- fused forward pass -----------------------------
def make_forward(woff, foff):
    D, H, dh = D_MODEL, N_HEADS, HEAD_DIM

    def kernel(xv_ref, xt_ref, w_ref, f_ref, out_ref):
        # ---- static-offset views into the two parameter slabs ----
        def wcol(name, ncols, skip=0):
            o = woff[name] + skip
            return w_ref[:, o:o + ncols]                   # bf16 (128, ncols)

        def frow(name, nrows=1):
            o = foff[name]
            return f_ref[o:o + nrows, :]                   # f32 (nrows, 128)

        def mm(x, w):                                      # bf16 matmul, f32 acc
            return jnp.dot(x.astype(jnp.bfloat16), w,
                           preferred_element_type=jnp.float32)

        def layernorm(x, prefix):
            mu = jnp.mean(x, axis=-1, keepdims=True)
            var = jnp.mean((x - mu) ** 2, axis=-1, keepdims=True)
            return ((x - mu) * jax.lax.rsqrt(var + LN_EPS)
                    * frow(prefix + "_g") + frow(prefix + "_b"))

        def block_mask(nq, nk, gq, gk):
            # True where the query row and key column belong to the same batch
            # element (batch is folded into the row dimension).  Float-based
            # group ids (exact for these magnitudes) avoid vector integer division.
            r = jax.lax.broadcasted_iota(jnp.int32, (nq, nk), 0).astype(jnp.float32)
            c = jax.lax.broadcasted_iota(jnp.int32, (nq, nk), 1).astype(jnp.float32)
            return (jnp.floor((r + 0.5) * (1.0 / gq))
                    == jnp.floor((c + 0.5) * (1.0 / gk)))

        def softmax_rows(s, mask, exact):
            s = jnp.where(mask, s, NEG)
            s = s - jnp.max(s, axis=-1, keepdims=True)
            e = jnp.exp(s)
            d = jnp.sum(e, axis=-1, keepdims=True)
            return e / d if exact else e * pl.reciprocal(d, approx=True)

        def mha(name, xq, xkv, mask, *, self_attn, need_out=True,
                need_attn=False, exact=False):
            # nn.MultiheadAttention; 1/sqrt(head_dim) folded into q weights/bias.
            if need_out:
                if self_attn:
                    qkv = mm(xq, wcol(name + ".qkv", 3 * D))
                    q = qkv[:, :D] + frow(name + ".bq")
                    k = qkv[:, D:2 * D] + frow(name + ".bk")
                    v = qkv[:, 2 * D:] + frow(name + ".bv")
                else:
                    q = mm(xq, wcol(name + ".qkv", D)) + frow(name + ".bq")
                    kv = mm(xkv, wcol(name + ".qkv", 2 * D, skip=D))
                    k = kv[:, :D] + frow(name + ".bk")
                    v = kv[:, D:] + frow(name + ".bv")
            else:   # attention-weights-only head: v / out-proj are dead work
                q = mm(xq, wcol(name + ".qk", D)) + frow(name + ".bq")
                k = mm(xkv, wcol(name + ".qk", D, skip=D)) + frow(name + ".bk")
                v = None

            o_off = woff[name + ".o"] if need_out else 0
            att_sum = None
            out = None
            for h in range(H):                             # static head loop
                sl = slice(h * dh, (h + 1) * dh)
                s = jax.lax.dot_general(q[:, sl].astype(jnp.bfloat16),
                                        k[:, sl].astype(jnp.bfloat16),
                                        (((1,), (1,)), ((), ())),
                                        preferred_element_type=jnp.float32)
                p = softmax_rows(s, mask, exact)
                if need_attn:
                    att_sum = p if att_sum is None else att_sum + p
                if need_out:
                    oh = jnp.dot(p.astype(jnp.bfloat16),
                                 v[:, sl].astype(jnp.bfloat16),
                                 preferred_element_type=jnp.float32)
                    # Per-head output projection via a sublane slice of Wo —
                    # avoids the lane-dim concat of head outputs.
                    wo_h = w_ref[h * dh:(h + 1) * dh, o_off:o_off + D]
                    c = jnp.dot(oh.astype(jnp.bfloat16), wo_h,
                                preferred_element_type=jnp.float32)
                    out = c if out is None else out + c
            if need_out:
                out = out + frow(name + ".bo")
            return out, att_sum

        def encoder(x, mask, name):
            # Post-norm nn.TransformerEncoderLayer (relu, dropout = identity).
            sa, _ = mha(name + ".attn", x, x, mask, self_attn=True)
            x = layernorm(x + sa, name + ".ln1")
            hdn = jnp.maximum(mm(x, wcol(name + ".ffn1", D_FF))
                              + frow(name + ".b1"), 0.0)
            y = x + mm(hdn, wcol(name + ".ffn2", D)) + frow(name + ".b2")
            return layernorm(y, name + ".ln2")

        # ---- batch-block masks (computed once, reused by every attention) ----
        m_qq = block_mask(BT, BT, S_TXT, S_TXT)
        m_ff = block_mask(BF, BF, N_FRAMES, N_FRAMES)
        m_fq = block_mask(BF, BT, N_FRAMES, S_TXT)
        m_qf = block_mask(BT, BF, S_TXT, N_FRAMES)

        # ---- input projections (PE + frame-proj bias pre-folded into "pe") ----
        frame = frow("pe", BF)
        for blk in range(FRAME_INPUT_DIM // 128):
            frame = frame + mm(xv_ref[:, blk * 128:(blk + 1) * 128],
                               wcol(f"frame_proj.{blk}", D))
        qa = mm(xt_ref[...], wcol("qa_proj", D)) + frow("qa_proj.b")

        # ---- reasoning layers ----
        for i in range(N_LAYERS):                          # static layer loop
            lp = f"L{i}"
            qa = encoder(qa, m_qq, lp + ".qa_enc")
            fc, _ = mha(lp + ".fq", frame, qa, m_fq, self_attn=False)
            frame = frame + fc
            frame = encoder(frame, m_ff, lp + ".frame_enc")
            qc, _ = mha(lp + ".qf", qa, frame, m_qf, self_attn=False)
            qa = qa + qc

        # ---- logits head: head-summed attention map, summed over frame rows,
        # one combined scale 1/(H*F); exact softmax since it feeds the output.
        _, att = mha("logits", frame, qa, m_fq, self_attn=False,
                     need_out=False, need_attn=True, exact=True)
        out_ref[...] = (jnp.sum(att, axis=0, keepdims=True)
                        * (1.0 / (H * N_FRAMES)))          # (1, B*T)

    vmem = pl.BlockSpec(memory_space=pltpu.MemorySpace.VMEM)

    @jax.jit
    def forward(x_vis_seq, x_txt_qa, wslab, fslab):
        xv = x_vis_seq.reshape(BF, FRAME_INPUT_DIM)        # batch folded into rows
        xt = x_txt_qa.reshape(BT, QA_INPUT_DIM)
        out = pl.pallas_call(
            kernel,
            out_shape=jax.ShapeDtypeStruct((1, BT), jnp.float32),
            in_specs=[vmem, vmem, vmem, vmem],
            out_specs=vmem,
        )(xv, xt, wslab, fslab)
        return out.reshape(BATCH, S_TXT)

    return forward


# ------------------------------------ main ------------------------------------
if __name__ == "__main__":
    key = jax.random.PRNGKey(0)
    k_params, k_vis, k_txt = jax.random.split(key, 3)
    wslab, fslab, woff, foff = build_params(k_params)

    x_vis_seq = jax.random.normal(k_vis, (BATCH, N_FRAMES, FRAME_INPUT_DIM),
                                  jnp.float32)
    x_txt_qa = jax.random.normal(k_txt, (BATCH, S_TXT, QA_INPUT_DIM), jnp.float32)

    fwd = make_forward(woff, foff)
    logits = fwd(x_vis_seq, x_txt_qa, wslab, fslab)
    jax.block_until_ready(logits)

    assert logits.shape == (BATCH, S_TXT)
    assert bool(jnp.all(jnp.isfinite(logits)))
    # Attention probabilities averaged over heads/frames must sum to ~1 per batch.
    assert bool(jnp.all(jnp.abs(jnp.sum(logits, axis=-1) - 1.0) < 1e-2))
    # Batch isolation: zeroing batch element 1 must not change batch element 0
    # (validates the block-diagonal mask used after folding batch into rows).
    logits_b0 = fwd(x_vis_seq.at[1].set(0.0), x_txt_qa.at[1].set(0.0),
                    wslab, fslab)[0]
    assert bool(jnp.all(jnp.abs(logits_b0 - logits[0]) < 1e-5))
    print("KERNEL_OK")
</pallas_src>

<mosaic_0001>
module attributes {stable_mosaic.version = 11 : i64} {
  func.func @kernel(%arg0: memref<16x256xf32, #tpu.memory_space<vmem>>, %arg1: memref<16x128xf32, #tpu.memory_space<vmem>>, %arg2: memref<128x5760xbf16, #tpu.memory_space<vmem>>, %arg3: memref<80x128xf32, #tpu.memory_space<vmem>>, %arg4: memref<1x16xf32, #tpu.memory_space<vmem>>) attributes {dimension_semantics = [], scalar_prefetch = 0 : i64, scratch_operands = 0 : i64, tpu.core_type = #tpu.core_type<tc>} {
    %0 = tpu.iota {dimensions = array<i32: 0>} : vector<16x16xi32>
    %1 = arith.sitofp %0 : vector<16x16xi32> to vector<16x16xf32>
    %2 = tpu.iota {dimensions = array<i32: 1>} : vector<16x16xi32>
    %3 = arith.sitofp %2 : vector<16x16xi32> to vector<16x16xf32>
    %cst = arith.constant 5.000000e-01 : f32
    %4 = vector.broadcast %cst : f32 to vector<16x16xf32>
    %5 = arith.addf %1, %4 : vector<16x16xf32>
    %cst_0 = arith.constant 1.250000e-01 : f32
    %6 = vector.broadcast %cst_0 : f32 to vector<16x16xf32>
    %7 = arith.mulf %5, %6 : vector<16x16xf32>
    %8 = math.floor %7 : vector<16x16xf32>
    %cst_1 = arith.constant 5.000000e-01 : f32
    %9 = vector.broadcast %cst_1 : f32 to vector<16x16xf32>
    %10 = arith.addf %3, %9 : vector<16x16xf32>
    %cst_2 = arith.constant 1.250000e-01 : f32
    %11 = vector.broadcast %cst_2 : f32 to vector<16x16xf32>
    %12 = arith.mulf %10, %11 : vector<16x16xf32>
    %13 = math.floor %12 : vector<16x16xf32>
    %14 = arith.cmpf oeq, %8, %13 : vector<16x16xf32>
    %15 = tpu.iota {dimensions = array<i32: 0>} : vector<16x16xi32>
    %16 = arith.sitofp %15 : vector<16x16xi32> to vector<16x16xf32>
    %17 = tpu.iota {dimensions = array<i32: 1>} : vector<16x16xi32>
    %18 = arith.sitofp %17 : vector<16x16xi32> to vector<16x16xf32>
    %cst_3 = arith.constant 5.000000e-01 : f32
    %19 = vector.broadcast %cst_3 : f32 to vector<16x16xf32>
    %20 = arith.addf %16, %19 : vector<16x16xf32>
    %cst_4 = arith.constant 1.250000e-01 : f32
    %21 = vector.broadcast %cst_4 : f32 to vector<16x16xf32>
    %22 = arith.mulf %20, %21 : vector<16x16xf32>
    %23 = math.floor %22 : vector<16x16xf32>
    %cst_5 = arith.constant 5.000000e-01 : f32
    %24 = vector.broadcast %cst_5 : f32 to vector<16x16xf32>
    %25 = arith.addf %18, %24 : vector<16x16xf32>
    %cst_6 = arith.constant 1.250000e-01 : f32
    %26 = vector.broadcast %cst_6 : f32 to vector<16x16xf32>
    %27 = arith.mulf %25, %26 : vector<16x16xf32>
    %28 = math.floor %27 : vector<16x16xf32>
    %29 = arith.cmpf oeq, %23, %28 : vector<16x16xf32>
    %30 = tpu.iota {dimensions = array<i32: 0>} : vector<16x16xi32>
    %31 = arith.sitofp %30 : vector<16x16xi32> to vector<16x16xf32>
    %32 = tpu.iota {dimensions = array<i32: 1>} : vector<16x16xi32>
    %33 = arith.sitofp %32 : vector<16x16xi32> to vector<16x16xf32>
    %cst_7 = arith.constant 5.000000e-01 : f32
    %34 = vector.broadcast %cst_7 : f32 to vector<16x16xf32>
    %35 = arith.addf %31, %34 : vector<16x16xf32>
    %cst_8 = arith.constant 1.250000e-01 : f32
    %36 = vector.broadcast %cst_8 : f32 to vector<16x16xf32>
    %37 = arith.mulf %35, %36 : vector<16x16xf32>
    %38 = math.floor %37 : vector<16x16xf32>
    %cst_9 = arith.constant 5.000000e-01 : f32
    %39 = vector.broadcast %cst_9 : f32 to vector<16x16xf32>
    %40 = arith.addf %33, %39 : vector<16x16xf32>
    %cst_10 = arith.constant 1.250000e-01 : f32
    %41 = vector.broadcast %cst_10 : f32 to vector<16x16xf32>
    %42 = arith.mulf %40, %41 : vector<16x16xf32>
    %43 = math.floor %42 : vector<16x16xf32>
    %44 = arith.cmpf oeq, %38, %43 : vector<16x16xf32>
    %45 = tpu.iota {dimensions = array<i32: 0>} : vector<16x16xi32>
    %46 = arith.sitofp %45 : vector<16x16xi32> to vector<16x16xf32>
    %47 = tpu.iota {dimensions = array<i32: 1>} : vector<16x16xi32>
    %48 = arith.sitofp %47 : vector<16x16xi32> to vector<16x16xf32>
    %cst_11 = arith.constant 5.000000e-01 : f32
    %49 = vector.broadcast %cst_11 : f32 to vector<16x16xf32>
    %50 = arith.addf %46, %49 : vector<16x16xf32>
    %cst_12 = arith.constant 1.250000e-01 : f32
    %51 = vector.broadcast %cst_12 : f32 to vector<16x16xf32>
    %52 = arith.mulf %50, %51 : vector<16x16xf32>
    %53 = math.floor %52 : vector<16x16xf32>
    %cst_13 = arith.constant 5.000000e-01 : f32
    %54 = vector.broadcast %cst_13 : f32 to vector<16x16xf32>
    %55 = arith.addf %48, %54 : vector<16x16xf32>
    %cst_14 = arith.constant 1.250000e-01 : f32
    %56 = vector.broadcast %cst_14 : f32 to vector<16x16xf32>
    %57 = arith.mulf %55, %56 : vector<16x16xf32>
    %58 = math.floor %57 : vector<16x16xf32>
    %59 = arith.cmpf oeq, %53, %58 : vector<16x16xf32>
    %c0 = arith.constant 0 : index
    %c0_15 = arith.constant 0 : index
    %60 = vector.load %arg3[%c0, %c0_15] : memref<80x128xf32, #tpu.memory_space<vmem>>, vector<16x128xf32>
    %c0_16 = arith.constant 0 : index
    %c0_17 = arith.constant 0 : index
    %61 = vector.load %arg0[%c0_16, %c0_17] : memref<16x256xf32, #tpu.memory_space<vmem>>, vector<16x128xf32>
    %c0_18 = arith.constant 0 : index
    %c0_19 = arith.constant 0 : index
    %62 = vector.load %arg2[%c0_18, %c0_19] : memref<128x5760xbf16, #tpu.memory_space<vmem>>, vector<128x128xbf16>
    %63 = arith.truncf %61 : vector<16x128xf32> to vector<16x128xbf16>
    %cst_20 = arith.constant dense<0.000000e+00> : vector<16x128xf32>
    %64 = tpu.matmul %63, %62, %cst_20 {dimension_numbers = #tpu.dot_dimension_numbers<[1], [0], [0], [1], [0, 0, 1, 1], [], []>} : vector<16x128xbf16>, vector<128x128xbf16>, vector<16x128xf32> -> vector<16x128xf32>
    %65 = arith.addf %60, %64 : vector<16x128xf32>
    %c0_21 = arith.constant 0 : index
    %c128 = arith.constant 128 : index
    %66 = vector.load %arg0[%c0_21, %c128] : memref<16x256xf32, #tpu.memory_space<vmem>>, vector<16x128xf32>
    %c0_22 = arith.constant 0 : index
    %c128_23 = arith.constant 128 : index
    %67 = vector.load %arg2[%c0_22, %c128_23] : memref<128x5760xbf16, #tpu.memory_space<vmem>>, vector<128x128xbf16>
    %68 = arith.truncf %66 : vector<16x128xf32> to vector<16x128xbf16>
    %cst_24 = arith.constant dense<0.000000e+00> : vector<16x128xf32>
    %69 = tpu.matmul %68, %67, %cst_24 {dimension_numbers = #tpu.dot_dimension_numbers<[1], [0], [0], [1], [0, 0, 1, 1], [], []>} : vector<16x128xbf16>, vector<128x128xbf16>, vector<16x128xf32> -> vector<16x128xf32>
    %70 = arith.addf %65, %69 : vector<16x128xf32>
    %c0_25 = arith.constant 0 : index
    %c0_26 = arith.constant 0 : index
    %71 = vector.load %arg1[%c0_25, %c0_26] : memref<16x128xf32, #tpu.memory_space<vmem>>, vector<16x128xf32>
    %c0_27 = arith.constant 0 : index
    %c256 = arith.constant 256 : index
    %72 = vector.load %arg2[%c0_27, %c256] : memref<128x5760xbf16, #tpu.memory_space<vmem>>, vector<128x128xbf16>
    %73 = arith.truncf %71 : vector<16x128xf32> to vector<16x128xbf16>
    %cst_28 = arith.constant dense<0.000000e+00> : vector<16x128xf32>
    %74 = tpu.matmul %73, %72, %cst_28 {dimension_numbers = #tpu.dot_dimension_numbers<[1], [0], [0], [1], [0, 0, 1, 1], [], []>} : vector<16x128xbf16>, vector<128x128xbf16>, vector<16x128xf32> -> vector<16x128xf32>
    %c16 = arith.constant 16 : index
    %c0_29 = arith.constant 0 : index
    %75 = vector.load %arg3[%c16, %c0_29] : memref<80x128xf32, #tpu.memory_space<vmem>>, vector<1x128xf32>
    %76 = vector.broadcast %75 : vector<1x128xf32> to vector<16x128xf32>
    %77 = arith.addf %74, %76 : vector<16x128xf32>
    %c0_30 = arith.constant 0 : index
    %c384 = arith.constant 384 : index
    %78 = vector.load %arg2[%c0_30, %c384] : memref<128x5760xbf16, #tpu.memory_space<vmem>>, vector<128x384xbf16>
    %79 = arith.truncf %77 : vector<16x128xf32> to vector<16x128xbf16>
    %cst_31 = arith.constant dense<0.000000e+00> : vector<16x384xf32>
    %80 = tpu.matmul %79, %78, %cst_31 {dimension_numbers = #tpu.dot_dimension_numbers<[1], [0], [0], [1], [0, 0, 1, 1], [], []>} : vector<16x128xbf16>, vector<128x384xbf16>, vector<16x384xf32> -> vector<16x384xf32>
    %81 = vector.extract_strided_slice %80 {offsets = [0, 0], sizes = [16, 128], strides = [1, 1]} : vector<16x384xf32> to vector<16x128xf32>
    %c17 = arith.constant 17 : index
    %c0_32 = arith.constant 0 : index
    %82 = vector.load %arg3[%c17, %c0_32] : memref<80x128xf32, #tpu.memory_space<vmem>>, vector<1x128xf32>
    %83 = vector.broadcast %82 : vector<1x128xf32> to vector<16x128xf32>
    %84 = arith.addf %81, %83 : vector<16x128xf32>
    %85 = vector.extract_strided_slice %80 {offsets = [0, 128], sizes = [16, 128], strides = [1, 1]} : vector<16x384xf32> to vector<16x128xf32>
    %c18 = arith.constant 18 : index
    %c0_33 = arith.constant 0 : index
    %86 = vector.load %arg3[%c18, %c0_33] : memref<80x128xf32, #tpu.memory_space<vmem>>, vector<1x128xf32>
    %87 = vector.broadcast %86 : vector<1x128xf32> to vector<16x128xf32>
    %88 = arith.addf %85, %87 : vector<16x128xf32>
    %89 = vector.extract_strided_slice %80 {offsets = [0, 256], sizes = [16, 128], strides = [1, 1]} : vector<16x384xf32> to vector<16x128xf32>
    %c19 = arith.constant 19 : index
    %c0_34 = arith.constant 0 : index
    %90 = vector.load %arg3[%c19, %c0_34] : memref<80x128xf32, #tpu.memory_space<vmem>>, vector<1x128xf32>
    %91 = vector.broadcast %90 : vector<1x128xf32> to vector<16x128xf32>
    %92 = arith.addf %89, %91 : vector<16x128xf32>
    %93 = vector.extract_strided_slice %84 {offsets = [0, 0], sizes = [16, 32], strides = [1, 1]} : vector<16x128xf32> to vector<16x32xf32>
    %94 = arith.truncf %93 : vector<16x32xf32> to vector<16x32xbf16>
    %95 = vector.extract_strided_slice %88 {offsets = [0, 0], sizes = [16, 32], strides = [1, 1]} : vector<16x128xf32> to vector<16x32xf32>
    %96 = arith.truncf %95 : vector<16x32xf32> to vector<16x32xbf16>
    %cst_35 = arith.constant dense<0.000000e+00> : vector<16x16xf32>
    %97 = tpu.matmul %94, %96, %cst_35 {dimension_numbers = #tpu.dot_dimension_numbers<[1], [1], [0], [0], [0, 0, 1, 0], [], []>} : vector<16x32xbf16>, vector<16x32xbf16>, vector<16x16xf32> -> vector<16x16xf32>
    %cst_36 = arith.constant -1.000000e+30 : f32
    %98 = vector.broadcast %cst_36 : f32 to vector<16x16xf32>
    %99 = arith.select %14, %97, %98 : vector<16x16xi1>, vector<16x16xf32>
    %cst_37 = arith.constant dense<0xFF800000> : vector<16xf32>
    %100 = vector.multi_reduction <maximumf>, %99, %cst_37 [1] : vector<16x16xf32> to vector<16xf32>
    %101 = vector.shape_cast %100 : vector<16xf32> to vector<16x1xf32>
    %102 = vector.broadcast %101 : vector<16x1xf32> to vector<16x16xf32>
    %103 = arith.subf %99, %102 : vector<16x16xf32>
    %104 = math.exp %103 : vector<16x16xf32>
    %cst_38 = arith.constant dense<0.000000e+00> : vector<16xf32>
    %105 = vector.multi_reduction <add>, %104, %cst_38 [1] : vector<16x16xf32> to vector<16xf32>
    %106 = vector.shape_cast %105 : vector<16xf32> to vector<16x1xf32>
    %107 = tpu.reciprocal %106 {approx = true} : vector<16x1xf32> -> vector<16x1xf32>
    %108 = vector.broadcast %107 : vector<16x1xf32> to vector<16x16xf32>
    %109 = arith.mulf %104, %108 : vector<16x16xf32>
    %110 = arith.truncf %109 : vector<16x16xf32> to vector<16x16xbf16>
    %111 = vector.extract_strided_slice %92 {offsets = [0, 0], sizes = [16, 32], strides = [1, 1]} : vector<16x128xf32> to vector<16x32xf32>
    %112 = arith.truncf %111 : vector<16x32xf32> to vector<16x32xbf16>
    %cst_39 = arith.constant dense<0.000000e+00> : vector<16x32xf32>
    %113 = tpu.matmul %110, %112, %cst_39 {dimension_numbers = #tpu.dot_dimension_numbers<[1], [0], [0], [1], [0, 0, 1, 1], [], []>} : vector<16x16xbf16>, vector<16x32xbf16>, vector<16x32xf32> -> vector<16x32xf32>
    %c0_40 = arith.constant 0 : index
    %c768 = arith.constant 768 : index
    %114 = vector.load %arg2[%c0_40, %c768] : memref<128x5760xbf16, #tpu.memory_space<vmem>>, vector<32x128xbf16>
    %115 = arith.truncf %113 : vector<16x32xf32> to vector<16x32xbf16>
    %cst_41 = arith.constant dense<0.000000e+00> : vector<16x128xf32>
    %116 = tpu.matmul %115, %114, %cst_41 {dimension_numbers = #tpu.dot_dimension_numbers<[1], [0], [0], [1], [0, 0, 1, 1], [], []>} : vector<16x32xbf16>, vector<32x128xbf16>, vector<16x128xf32> -> vector<16x128xf32>
    %117 = vector.extract_strided_slice %84 {offsets = [0, 32], sizes = [16, 32], strides = [1, 1]} : vector<16x128xf32> to vector<16x32xf32>
    %118 = arith.truncf %117 : vector<16x32xf32> to vector<16x32xbf16>
    %119 = vector.extract_strided_slice %88 {offsets = [0, 32], sizes = [16, 32], strides = [1, 1]} : vector<16x128xf32> to vector<16x32xf32>
    %120 = arith.truncf %119 : vector<16x32xf32> to vector<16x32xbf16>
    %cst_42 = arith.constant dense<0.000000e+00> : vector<16x16xf32>
    %121 = tpu.matmul %118, %120, %cst_42 {dimension_numbers = #tpu.dot_dimension_numbers<[1], [1], [0], [0], [0, 0, 1, 0], [], []>} : vector<16x32xbf16>, vector<16x32xbf16>, vector<16x16xf32> -> vector<16x16xf32>
    %cst_43 = arith.constant -1.000000e+30 : f32
    %122 = vector.broadcast %cst_43 : f32 to vector<16x16xf32>
    %123 = arith.select %14, %121, %122 : vector<16x16xi1>, vector<16x16xf32>
    %cst_44 = arith.constant dense<0xFF800000> : vector<16xf32>
    %124 = vector.multi_reduction <maximumf>, %123, %cst_44 [1] : vector<16x16xf32> to vector<16xf32>
    %125 = vector.shape_cast %124 : vector<16xf32> to vector<16x1xf32>
    %126 = vector.broadcast %125 : vector<16x1xf32> to vector<16x16xf32>
    %127 = arith.subf %123, %126 : vector<16x16xf32>
    %128 = math.exp %127 : vector<16x16xf32>
    %cst_45 = arith.constant dense<0.000000e+00> : vector<16xf32>
    %129 = vector.multi_reduction <add>, %128, %cst_45 [1] : vector<16x16xf32> to vector<16xf32>
    %130 = vector.shape_cast %129 : vector<16xf32> to vector<16x1xf32>
    %131 = tpu.reciprocal %130 {approx = true} : vector<16x1xf32> -> vector<16x1xf32>
    %132 = vector.broadcast %131 : vector<16x1xf32> to vector<16x16xf32>
    %133 = arith.mulf %128, %132 : vector<16x16xf32>
    %134 = arith.truncf %133 : vector<16x16xf32> to vector<16x16xbf16>
    %135 = vector.extract_strided_slice %92 {offsets = [0, 32], sizes = [16, 32], strides = [1, 1]} : vector<16x128xf32> to vector<16x32xf32>
    %136 = arith.truncf %135 : vector<16x32xf32> to vector<16x32xbf16>
    %cst_46 = arith.constant dense<0.000000e+00> : vector<16x32xf32>
    %137 = tpu.matmul %134, %136, %cst_46 {dimension_numbers = #tpu.dot_dimension_numbers<[1], [0], [0], [1], [0, 0, 1, 1], [], []>} : vector<16x16xbf16>, vector<16x32xbf16>, vector<16x32xf32> -> vector<16x32xf32>
    %c32 = arith.constant 32 : index
    %c768_47 = arith.constant 768 : index
    %138 = vector.load %arg2[%c32, %c768_47] : memref<128x5760xbf16, #tpu.memory_space<vmem>>, vector<32x128xbf16>
    %139 = arith.truncf %137 : vector<16x32xf32> to vector<16x32xbf16>
    %cst_48 = arith.constant dense<0.000000e+00> : vector<16x128xf32>
    %140 = tpu.matmul %139, %138, %cst_48 {dimension_numbers = #tpu.dot_dimension_numbers<[1], [0], [0], [1], [0, 0, 1, 1], [], []>} : vector<16x32xbf16>, vector<32x128xbf16>, vector<16x128xf32> -> vector<16x128xf32>
    %141 = arith.addf %116, %140 : vector<16x128xf32>
    %142 = vector.extract_strided_slice %84 {offsets = [0, 64], sizes = [16, 32], strides = [1, 1]} : vector<16x128xf32> to vector<16x32xf32>
    %143 = arith.truncf %142 : vector<16x32xf32> to vector<16x32xbf16>
    %144 = vector.extract_strided_slice %88 {offsets = [0, 64], sizes = [16, 32], strides = [1, 1]} : vector<16x128xf32> to vector<16x32xf32>
    %145 = arith.truncf %144 : vector<16x32xf32> to vector<16x32xbf16>
    %cst_49 = arith.constant dense<0.000000e+00> : vector<16x16xf32>
    %146 = tpu.matmul %143, %145, %cst_49 {dimension_numbers = #tpu.dot_dimension_numbers<[1], [1], [0], [0], [0, 0, 1, 0], [], []>} : vector<16x32xbf16>, vector<16x32xbf16>, vector<16x16xf32> -> vector<16x16xf32>
    %cst_50 = arith.constant -1.000000e+30 : f32
    %147 = vector.broadcast %cst_50 : f32 to vector<16x16xf32>
    %148 = arith.select %14, %146, %147 : vector<16x16xi1>, vector<16x16xf32>
    %cst_51 = arith.constant dense<0xFF800000> : vector<16xf32>
    %149 = vector.multi_reduction <maximumf>, %148, %cst_51 [1] : vector<16x16xf32> to vector<16xf32>
    %150 = vector.shape_cast %149 : vector<16xf32> to vector<16x1xf32>
    %151 = vector.broadcast %150 : vector<16x1xf32> to vector<16x16xf32>
    %152 = arith.subf %148, %151 : vector<16x16xf32>
    %153 = math.exp %152 : vector<16x16xf32>
    %cst_52 = arith.constant dense<0.000000e+00> : vector<16xf32>
    %154 = vector.multi_reduction <add>, %153, %cst_52 [1] : vector<16x16xf32> to vector<16xf32>
    %155 = vector.shape_cast %154 : vector<16xf32> to vector<16x1xf32>
    %156 = tpu.reciprocal %155 {approx = true} : vector<16x1xf32> -> vector<16x1xf32>
    %157 = vector.broadcast %156 : vector<16x1xf32> to vector<16x16xf32>
    %158 = arith.mulf %153, %157 : vector<16x16xf32>
    %159 = arith.truncf %158 : vector<16x16xf32> to vector<16x16xbf16>
    %160 = vector.extract_strided_slice %92 {offsets = [0, 64], sizes = [16, 32], strides = [1, 1]} : vector<16x128xf32> to vector<16x32xf32>
    %161 = arith.truncf %160 : vector<16x32xf32> to vector<16x32xbf16>
    %cst_53 = arith.constant dense<0.000000e+00> : vector<16x32xf32>
    %162 = tpu.matmul %159, %161, %cst_53 {dimension_numbers = #tpu.dot_dimension_numbers<[1], [0], [0], [1], [0, 0, 1, 1], [], []>} : vector<16x16xbf16>, vector<16x32xbf16>, vector<16x32xf32> -> vector<16x32xf32>
    %c64 = arith.constant 64 : index
    %c768_54 = arith.constant 768 : index
    %163 = vector.load %arg2[%c64, %c768_54] : memref<128x5760xbf16, #tpu.memory_space<vmem>>, vector<32x128xbf16>
    %164 = arith.truncf %162 : vector<16x32xf32> to vector<16x32xbf16>
    %cst_55 = arith.constant dense<0.000000e+00> : vector<16x128xf32>
    %165 = tpu.matmul %164, %163, %cst_55 {dimension_numbers = #tpu.dot_dimension_numbers<[1], [0], [0], [1], [0, 0, 1, 1], [], []>} : vector<16x32xbf16>, vector<32x128xbf16>, vector<16x128xf32> -> vector<16x128xf32>
    %166 = arith.addf %141, %165 : vector<16x128xf32>
    %167 = vector.extract_strided_slice %84 {offsets = [0, 96], sizes = [16, 32], strides = [1, 1]} : vector<16x128xf32> to vector<16x32xf32>
    %168 = arith.truncf %167 : vector<16x32xf32> to vector<16x32xbf16>
    %169 = vector.extract_strided_slice %88 {offsets = [0, 96], sizes = [16, 32], strides = [1, 1]} : vector<16x128xf32> to vector<16x32xf32>
    %170 = arith.truncf %169 : vector<16x32xf32> to vector<16x32xbf16>
    %cst_56 = arith.constant dense<0.000000e+00> : vector<16x16xf32>
    %171 = tpu.matmul %168, %170, %cst_56 {dimension_numbers = #tpu.dot_dimension_numbers<[1], [1], [0], [0], [0, 0, 1, 0], [], []>} : vector<16x32xbf16>, vector<16x32xbf16>, vector<16x16xf32> -> vector<16x16xf32>
    %cst_57 = arith.constant -1.000000e+30 : f32
    %172 = vector.broadcast %cst_57 : f32 to vector<16x16xf32>
    %173 = arith.select %14, %171, %172 : vector<16x16xi1>, vector<16x16xf32>
    %cst_58 = arith.constant dense<0xFF800000> : vector<16xf32>
    %174 = vector.multi_reduction <maximumf>, %173, %cst_58 [1] : vector<16x16xf32> to vector<16xf32>
    %175 = vector.shape_cast %174 : vector<16xf32> to vector<16x1xf32>
    %176 = vector.broadcast %175 : vector<16x1xf32> to vector<16x16xf32>
    %177 = arith.subf %173, %176 : vector<16x16xf32>
    %178 = math.exp %177 : vector<16x16xf32>
    %cst_59 = arith.constant dense<0.000000e+00> : vector<16xf32>
    %179 = vector.multi_reduction <add>, %178, %cst_59 [1] : vector<16x16xf32> to vector<16xf32>
    %180 = vector.shape_cast %179 : vector<16xf32> to vector<16x1xf32>
    %181 = tpu.reciprocal %180 {approx = true} : vector<16x1xf32> -> vector<16x1xf32>
    %182 = vector.broadcast %181 : vector<16x1xf32> to vector<16x16xf32>
    %183 = arith.mulf %178, %182 : vector<16x16xf32>
    %184 = arith.truncf %183 : vector<16x16xf32> to vector<16x16xbf16>
    %185 = vector.extract_strided_slice %92 {offsets = [0, 96], sizes = [16, 32], strides = [1, 1]} : vector<16x128xf32> to vector<16x32xf32>
    %186 = arith.truncf %185 : vector<16x32xf32> to vector<16x32xbf16>
    %cst_60 = arith.constant dense<0.000000e+00> : vector<16x32xf32>
    %187 = tpu.matmul %184, %186, %cst_60 {dimension_numbers = #tpu.dot_dimension_numbers<[1], [0], [0], [1], [0, 0, 1, 1], [], []>} : vector<16x16xbf16>, vector<16x32xbf16>, vector<16x32xf32> -> vector<16x32xf32>
    %c96 = arith.constant 96 : index
    %c768_61 = arith.constant 768 : index
    %188 = vector.load %arg2[%c96, %c768_61] : memref<128x5760xbf16, #tpu.memory_space<vmem>>, vector<32x128xbf16>
    %189 = arith.truncf %187 : vector<16x32xf32> to vector<16x32xbf16>
    %cst_62 = arith.constant dense<0.000000e+00> : vector<16x128xf32>
    %190 = tpu.matmul %189, %188, %cst_62 {dimension_numbers = #tpu.dot_dimension_numbers<[1], [0], [0], [1], [0, 0, 1, 1], [], []>} : vector<16x32xbf16>, vector<32x128xbf16>, vector<16x128xf32> -> vector<16x128xf32>
    %191 = arith.addf %166, %190 : vector<16x128xf32>
    %c20 = arith.constant 20 : index
    %c0_63 = arith.constant 0 : index
    %192 = vector.load %arg3[%c20, %c0_63] : memref<80x128xf32, #tpu.memory_space<vmem>>, vector<1x128xf32>
    %193 = vector.broadcast %192 : vector<1x128xf32> to vector<16x128xf32>
    %194 = arith.addf %191, %193 : vector<16x128xf32>
    %195 = arith.addf %77, %194 : vector<16x128xf32>
    %cst_64 = arith.constant dense<0.000000e+00> : vector<16xf32>
    %196 = vector.multi_reduction <add>, %195, %cst_64 [1] : vector<16x128xf32> to vector<16xf32>
    %197 = vector.shape_cast %196 : vector<16xf32> to vector<16x1xf32>
    %cst_65 = arith.constant 1.280000e+02 : f32
    %198 = vector.broadcast %cst_65 : f32 to vector<16x1xf32>
    %199 = arith.divf %197, %198 : vector<16x1xf32>
    %200 = vector.broadcast %199 : vector<16x1xf32> to vector<16x128xf32>
    %201 = arith.subf %195, %200 : vector<16x128xf32>
    %202 = arith.mulf %201, %201 : vector<16x128xf32>
    %cst_66 = arith.constant dense<0.000000e+00> : vector<16xf32>
    %203 = vector.multi_reduction <add>, %202, %cst_66 [1] : vector<16x128xf32> to vector<16xf32>
    %204 = vector.shape_cast %203 : vector<16xf32> to vector<16x1xf32>
    %cst_67 = arith.constant 1.280000e+02 : f32
    %205 = vector.broadcast %cst_67 : f32 to vector<16x1xf32>
    %206 = arith.divf %204, %205 : vector<16x1xf32>
    %207 = vector.broadcast %199 : vector<16x1xf32> to vector<16x128xf32>
    %208 = arith.subf %195, %207 : vector<16x128xf32>
    %cst_68 = arith.constant 9.99999974E-6 : f32
    %209 = vector.broadcast %cst_68 : f32 to vector<16x1xf32>
    %210 = arith.addf %206, %209 : vector<16x1xf32>
    %211 = math.rsqrt %210 : vector<16x1xf32>
    %212 = vector.broadcast %211 : vector<16x1xf32> to vector<16x128xf32>
    %213 = arith.mulf %208, %212 : vector<16x128xf32>
    %c21 = arith.constant 21 : index
    %c0_69 = arith.constant 0 : index
    %214 = vector.load %arg3[%c21, %c0_69] : memref<80x128xf32, #tpu.memory_space<vmem>>, vector<1x128xf32>
    %215 = vector.broadcast %214 : vector<1x128xf32> to vector<16x128xf32>
    %216 = arith.mulf %213, %215 : vector<16x128xf32>
    %c22 = arith.constant 22 : index
    %c0_70 = arith.constant 0 : index
    %217 = vector.load %arg3[%c22, %c0_70] : memref<80x128xf32, #tpu.memory_space<vmem>>, vector<1x128xf32>
    %218 = vector.broadcast %217 : vector<1x128xf32> to vector<16x128xf32>
    %219 = arith.addf %216, %218 : vector<16x128xf32>
    %c0_71 = arith.constant 0 : index
    %c896 = arith.constant 896 : index
    %220 = vector.load %arg2[%c0_71, %c896] : memref<128x5760xbf16, #tpu.memory_space<vmem>>, vector<128x128xbf16>
    %221 = arith.truncf %219 : vector<16x128xf32> to vector<16x128xbf16>
    %cst_72 = arith.constant dense<0.000000e+00> : vector<16x128xf32>
    %222 = tpu.matmul %221, %220, %cst_72 {dimension_numbers = #tpu.dot_dimension_numbers<[1], [0], [0], [1], [0, 0, 1, 1], [], []>} : vector<16x128xbf16>, vector<128x128xbf16>, vector<16x128xf32> -> vector<16x128xf32>
    %c23 = arith.constant 23 : index
    %c0_73 = arith.constant 0 : index
    %223 = vector.load %arg3[%c23, %c0_73] : memref<80x128xf32, #tpu.memory_space<vmem>>, vector<1x128xf32>
    %224 = vector.broadcast %223 : vector<1x128xf32> to vector<16x128xf32>
    %225 = arith.addf %222, %224 : vector<16x128xf32>
    %cst_74 = arith.constant 0.000000e+00 : f32
    %226 = vector.broadcast %cst_74 : f32 to vector<16x128xf32>
    %227 = arith.maximumf %225, %226 : vector<16x128xf32>
    %c0_75 = arith.constant 0 : index
    %c1024 = arith.constant 1024 : index
    %228 = vector.load %arg2[%c0_75, %c1024] : memref<128x5760xbf16, #tpu.memory_space<vmem>>, vector<128x128xbf16>
    %229 = arith.truncf %227 : vector<16x128xf32> to vector<16x128xbf16>
    %cst_76 = arith.constant dense<0.000000e+00> : vector<16x128xf32>
    %230 = tpu.matmul %229, %228, %cst_76 {dimension_numbers = #tpu.dot_dimension_numbers<[1], [0], [0], [1], [0, 0, 1, 1], [], []>} : vector<16x128xbf16>, vector<128x128xbf16>, vector<16x128xf32> -> vector<16x128xf32>
    %231 = arith.addf %219, %230 : vector<16x128xf32>
    %c24 = arith.constant 24 : index
    %c0_77 = arith.constant 0 : index
    %232 = vector.load %arg3[%c24, %c0_77] : memref<80x128xf32, #tpu.memory_space<vmem>>, vector<1x128xf32>
    %233 = vector.broadcast %232 : vector<1x128xf32> to vector<16x128xf32>
    %234 = arith.addf %231, %233 : vector<16x128xf32>
    %cst_78 = arith.constant dense<0.000000e+00> : vector<16xf32>
    %235 = vector.multi_reduction <add>, %234, %cst_78 [1] : vector<16x128xf32> to vector<16xf32>
    %236 = vector.shape_cast %235 : vector<16xf32> to vector<16x1xf32>
    %cst_79 = arith.constant 1.280000e+02 : f32
    %237 = vector.broadcast %cst_79 : f32 to vector<16x1xf32>
    %238 = arith.divf %236, %237 : vector<16x1xf32>
    %239 = vector.broadcast %238 : vector<16x1xf32> to vector<16x128xf32>
    %240 = arith.subf %234, %239 : vector<16x128xf32>
    %241 = arith.mulf %240, %240 : vector<16x128xf32>
    %cst_80 = arith.constant dense<0.000000e+00> : vector<16xf32>
    %242 = vector.multi_reduction <add>, %241, %cst_80 [1] : vector<16x128xf32> to vector<16xf32>
    %243 = vector.shape_cast %242 : vector<16xf32> to vector<16x1xf32>
    %cst_81 = arith.constant 1.280000e+02 : f32
    %244 = vector.broadcast %cst_81 : f32 to vector<16x1xf32>
    %245 = arith.divf %243, %244 : vector<16x1xf32>
    %246 = vector.broadcast %238 : vector<16x1xf32> to vector<16x128xf32>
    %247 = arith.subf %234, %246 : vector<16x128xf32>
    %cst_82 = arith.constant 9.99999974E-6 : f32
    %248 = vector.broadcast %cst_82 : f32 to vector<16x1xf32>
    %249 = arith.addf %245, %248 : vector<16x1xf32>
    %250 = math.rsqrt %249 : vector<16x1xf32>
    %251 = vector.broadcast %250 : vector<16x1xf32> to vector<16x128xf32>
    %252 = arith.mulf %247, %251 : vector<16x128xf32>
    %c25 = arith.constant 25 : index
    %c0_83 = arith.constant 0 : index
    %253 = vector.load %arg3[%c25, %c0_83] : memref<80x128xf32, #tpu.memory_space<vmem>>, vector<1x128xf32>
    %254 = vector.broadcast %253 : vector<1x128xf32> to vector<16x128xf32>
    %255 = arith.mulf %252, %254 : vector<16x128xf32>
    %c26 = arith.constant 26 : index
    %c0_84 = arith.constant 0 : index
    %256 = vector.load %arg3[%c26, %c0_84] : memref<80x128xf32, #tpu.memory_space<vmem>>, vector<1x128xf32>
    %257 = vector.broadcast %256 : vector<1x128xf32> to vector<16x128xf32>
    %258 = arith.addf %255, %257 : vector<16x128xf32>
    %c0_85 = arith.constant 0 : index
    %c1920 = arith.constant 1920 : index
    %259 = vector.load %arg2[%c0_85, %c1920] : memref<128x5760xbf16, #tpu.memory_space<vmem>>, vector<128x128xbf16>
    %260 = arith.truncf %70 : vector<16x128xf32> to vector<16x128xbf16>
    %cst_86 = arith.constant dense<0.000000e+00> : vector<16x128xf32>
    %261 = tpu.matmul %260, %259, %cst_86 {dimension_numbers = #tpu.dot_dimension_numbers<[1], [0], [0], [1], [0, 0, 1, 1], [], []>} : vector<16x128xbf16>, vector<128x128xbf16>, vector<16x128xf32> -> vector<16x128xf32>
    %c37 = arith.constant 37 : index
    %c0_87 = arith.constant 0 : index
    %262 = vector.load %arg3[%c37, %c0_87] : memref<80x128xf32, #tpu.memory_space<vmem>>, vector<1x128xf32>
    %263 = vector.broadcast %262 : vector<1x128xf32> to vector<16x128xf32>
    %264 = arith.addf %261, %263 : vector<16x128xf32>
    %c0_88 = arith.constant 0 : index
    %c2048 = arith.constant 2048 : index
    %265 = vector.load %arg2[%c0_88, %c2048] : memref<128x5760xbf16, #tpu.memory_space<vmem>>, vector<128x256xbf16>
    %266 = arith.truncf %258 : vector<16x128xf32> to vector<16x128xbf16>
    %cst_89 = arith.constant dense<0.000000e+00> : vector<16x256xf32>
    %267 = tpu.matmul %266, %265, %cst_89 {dimension_numbers = #tpu.dot_dimension_numbers<[1], [0], [0], [1], [0, 0, 1, 1], [], []>} : vector<16x128xbf16>, vector<128x256xbf16>, vector<16x256xf32> -> vector<16x256xf32>
    %268 = vector.extract_strided_slice %267 {offsets = [0, 0], sizes = [16, 128], strides = [1, 1]} : vector<16x256xf32> to vector<16x128xf32>
    %c38 = arith.constant 38 : index
    %c0_90 = arith.constant 0 : index
    %269 = vector.load %arg3[%c38, %c0_90] : memref<80x128xf32, #tpu.memory_space<vmem>>, vector<1x128xf32>
    %270 = vector.broadcast %269 : vector<1x128xf32> to vector<16x128xf32>
    %271 = arith.addf %268, %270 : vector<16x128xf32>
    %272 = vector.extract_strided_slice %267 {offsets = [0, 128], sizes = [16, 128], strides = [1, 1]} : vector<16x256xf32> to vector<16x128xf32>
    %c39 = arith.constant 39 : index
    %c0_91 = arith.constant 0 : index
    %273 = vector.load %arg3[%c39, %c0_91] : memref<80x128xf32, #tpu.memory_space<vmem>>, vector<1x128xf32>
    %274 = vector.broadcast %273 : vector<1x128xf32> to vector<16x128xf32>
    %275 = arith.addf %272, %274 : vector<16x128xf32>
    %276 = vector.extract_strided_slice %264 {offsets = [0, 0], sizes = [16, 32], strides = [1, 1]} : vector<16x128xf32> to vector<16x32xf32>
    %277 = arith.truncf %276 : vector<16x32xf32> to vector<16x32xbf16>
    %278 = vector.extract_strided_slice %271 {offsets = [0, 0], sizes = [16, 32], strides = [1, 1]} : vector<16x128xf32> to vector<16x32xf32>
    %279 = arith.truncf %278 : vector<16x32xf32> to vector<16x32xbf16>
    %cst_92 = arith.constant dense<0.000000e+00> : vector<16x16xf32>
    %280 = tpu.matmul %277, %279, %cst_92 {dimension_numbers = #tpu.dot_dimension_numbers<[1], [1], [0], [0], [0, 0, 1, 0], [], []>} : vector<16x32xbf16>, vector<16x32xbf16>, vector<16x16xf32> -> vector<16x16xf32>
    %cst_93 = arith.constant -1.000000e+30 : f32
    %281 = vector.broadcast %cst_93 : f32 to vector<16x16xf32>
    %282 = arith.select %44, %280, %281 : vector<16x16xi1>, vector<16x16xf32>
    %cst_94 = arith.constant dense<0xFF800000> : vector<16xf32>
    %283 = vector.multi_reduction <maximumf>, %282, %cst_94 [1] : vector<16x16xf32> to vector<16xf32>
    %284 = vector.shape_cast %283 : vector<16xf32> to vector<16x1xf32>
    %285 = vector.broadcast %284 : vector<16x1xf32> to vector<16x16xf32>
    %286 = arith.subf %282, %285 : vector<16x16xf32>
    %287 = math.exp %286 : vector<16x16xf32>
    %cst_95 = arith.constant dense<0.000000e+00> : vector<16xf32>
    %288 = vector.multi_reduction <add>, %287, %cst_95 [1] : vector<16x16xf32> to vector<16xf32>
    %289 = vector.shape_cast %288 : vector<16xf32> to vector<16x1xf32>
    %290 = tpu.reciprocal %289 {approx = true} : vector<16x1xf32> -> vector<16x1xf32>
    %291 = vector.broadcast %290 : vector<16x1xf32> to vector<16x16xf32>
    %292 = arith.mulf %287, %291 : vector<16x16xf32>
    %293 = arith.truncf %292 : vector<16x16xf32> to vector<16x16xbf16>
    %294 = vector.extract_strided_slice %275 {offsets = [0, 0], sizes = [16, 32], strides = [1, 1]} : vector<16x128xf32> to vector<16x32xf32>
    %295 = arith.truncf %294 : vector<16x32xf32> to vector<16x32xbf16>
    %cst_96 = arith.constant dense<0.000000e+00> : vector<16x32xf32>
    %296 = tpu.matmul %293, %295, %cst_96 {dimension_numbers = #tpu.dot_dimension_numbers<[1], [0], [0], [1], [0, 0, 1, 1], [], []>} : vector<16x16xbf16>, vector<16x32xbf16>, vector<16x32xf32> -> vector<16x32xf32>
    %c0_97 = arith.constant 0 : index
    %c2304 = arith.constant 2304 : index
    %297 = vector.load %arg2[%c0_97, %c2304] : memref<128x5760xbf16, #tpu.memory_space<vmem>>, vector<32x128xbf16>
    %298 = arith.truncf %296 : vector<16x32xf32> to vector<16x32xbf16>
    %cst_98 = arith.constant dense<0.000000e+00> : vector<16x128xf32>
    %299 = tpu.matmul %298, %297, %cst_98 {dimension_numbers = #tpu.dot_dimension_numbers<[1], [0], [0], [1], [0, 0, 1, 1], [], []>} : vector<16x32xbf16>, vector<32x128xbf16>, vector<16x128xf32> -> vector<16x128xf32>
    %300 = vector.extract_strided_slice %264 {offsets = [0, 32], sizes = [16, 32], strides = [1, 1]} : vector<16x128xf32> to vector<16x32xf32>
    %301 = arith.truncf %300 : vector<16x32xf32> to vector<16x32xbf16>
    %302 = vector.extract_strided_slice %271 {offsets = [0, 32], sizes = [16, 32], strides = [1, 1]} : vector<16x128xf32> to vector<16x32xf32>
    %303 = arith.truncf %302 : vector<16x32xf32> to vector<16x32xbf16>
    %cst_99 = arith.constant dense<0.000000e+00> : vector<16x16xf32>
    %304 = tpu.matmul %301, %303, %cst_99 {dimension_numbers = #tpu.dot_dimension_numbers<[1], [1], [0], [0], [0, 0, 1, 0], [], []>} : vector<16x32xbf16>, vector<16x32xbf16>, vector<16x16xf32> -> vector<16x16xf32>
    %cst_100 = arith.constant -1.000000e+30 : f32
    %305 = vector.broadcast %cst_100 : f32 to vector<16x16xf32>
    %306 = arith.select %44, %304, %305 : vector<16x16xi1>, vector<16x16xf32>
    %cst_101 = arith.constant dense<0xFF800000> : vector<16xf32>
    %307 = vector.multi_reduction <maximumf>, %306, %cst_101 [1] : vector<16x16xf32> to vector<16xf32>
    %308 = vector.shape_cast %307 : vector<16xf32> to vector<16x1xf32>
    %309 = vector.broadcast %308 : vector<16x1xf32> to vector<16x16xf32>
    %310 = arith.subf %306, %309 : vector<16x16xf32>
    %311 = math.exp %310 : vector<16x16xf32>
    %cst_102 = arith.constant dense<0.000000e+00> : vector<16xf32>
    %312 = vector.multi_reduction <add>, %311, %cst_102 [1] : vector<16x16xf32> to vector<16xf32>
    %313 = vector.shape_cast %312 : vector<16xf32> to vector<16x1xf32>
    %314 = tpu.reciprocal %313 {approx = true} : vector<16x1xf32> -> vector<16x1xf32>
    %315 = vector.broadcast %314 : vector<16x1xf32> to vector<16x16xf32>
    %316 = arith.mulf %311, %315 : vector<16x16xf32>
    %317 = arith.truncf %316 : vector<16x16xf32> to vector<16x16xbf16>
    %318 = vector.extract_strided_slice %275 {offsets = [0, 32], sizes = [16, 32], strides = [1, 1]} : vector<16x128xf32> to vector<16x32xf32>
    %319 = arith.truncf %318 : vector<16x32xf32> to vector<16x32xbf16>
    %cst_103 = arith.constant dense<0.000000e+00> : vector<16x32xf32>
    %320 = tpu.matmul %317, %319, %cst_103 {dimension_numbers = #tpu.dot_dimension_numbers<[1], [0], [0], [1], [0, 0, 1, 1], [], []>} : vector<16x16xbf16>, vector<16x32xbf16>, vector<16x32xf32> -> vector<16x32xf32>
    %c32_104 = arith.constant 32 : index
    %c2304_105 = arith.constant 2304 : index
    %321 = vector.load %arg2[%c32_104, %c2304_105] : memref<128x5760xbf16, #tpu.memory_space<vmem>>, vector<32x128xbf16>
    %322 = arith.truncf %320 : vector<16x32xf32> to vector<16x32xbf16>
    %cst_106 = arith.constant dense<0.000000e+00> : vector<16x128xf32>
    %323 = tpu.matmul %322, %321, %cst_106 {dimension_numbers = #tpu.dot_dimension_numbers<[1], [0], [0], [1], [0, 0, 1, 1], [], []>} : vector<16x32xbf16>, vector<32x128xbf16>, vector<16x128xf32> -> vector<16x128xf32>
    %324 = arith.addf %299, %323 : vector<16x128xf32>
    %325 = vector.extract_strided_slice %264 {offsets = [0, 64], sizes = [16, 32], strides = [1, 1]} : vector<16x128xf32> to vector<16x32xf32>
    %326 = arith.truncf %325 : vector<16x32xf32> to vector<16x32xbf16>
    %327 = vector.extract_strided_slice %271 {offsets = [0, 64], sizes = [16, 32], strides = [1, 1]} : vector<16x128xf32> to vector<16x32xf32>
    %328 = arith.truncf %327 : vector<16x32xf32> to vector<16x32xbf16>
    %cst_107 = arith.constant dense<0.000000e+00> : vector<16x16xf32>
    %329 = tpu.matmul %326, %328, %cst_107 {dimension_numbers = #tpu.dot_dimension_numbers<[1], [1], [0], [0], [0, 0, 1, 0], [], []>} : vector<16x32xbf16>, vector<16x32xbf16>, vector<16x16xf32> -> vector<16x16xf32>
    %cst_108 = arith.constant -1.000000e+30 : f32
    %330 = vector.broadcast %cst_108 : f32 to vector<16x16xf32>
    %331 = arith.select %44, %329, %330 : vector<16x16xi1>, vector<16x16xf32>
    %cst_109 = arith.constant dense<0xFF800000> : vector<16xf32>
    %332 = vector.multi_reduction <maximumf>, %331, %cst_109 [1] : vector<16x16xf32> to vector<16xf32>
    %333 = vector.shape_cast %332 : vector<16xf32> to vector<16x1xf32>
    %334 = vector.broadcast %333 : vector<16x1xf32> to vector<16x16xf32>
    %335 = arith.subf %331, %334 : vector<16x16xf32>
    %336 = math.exp %335 : vector<16x16xf32>
    %cst_110 = arith.constant dense<0.000000e+00> : vector<16xf32>
    %337 = vector.multi_reduction <add>, %336, %cst_110 [1] : vector<16x16xf32> to vector<16xf32>
    %338 = vector.shape_cast %337 : vector<16xf32> to vector<16x1xf32>
    %339 = tpu.reciprocal %338 {approx = true} : vector<16x1xf32> -> vector<16x1xf32>
    %340 = vector.broadcast %339 : vector<16x1xf32> to vector<16x16xf32>
    %341 = arith.mulf %336, %340 : vector<16x16xf32>
    %342 = arith.truncf %341 : vector<16x16xf32> to vector<16x16xbf16>
    %343 = vector.extract_strided_slice %275 {offsets = [0, 64], sizes = [16, 32], strides = [1, 1]} : vector<16x128xf32> to vector<16x32xf32>
    %344 = arith.truncf %343 : vector<16x32xf32> to vector<16x32xbf16>
    %cst_111 = arith.constant dense<0.000000e+00> : vector<16x32xf32>
    %345 = tpu.matmul %342, %344, %cst_111 {dimension_numbers = #tpu.dot_dimension_numbers<[1], [0], [0], [1], [0, 0, 1, 1], [], []>} : vector<16x16xbf16>, vector<16x32xbf16>, vector<16x32xf32> -> vector<16x32xf32>
    %c64_112 = arith.constant 64 : index
    %c2304_113 = arith.constant 2304 : index
    %346 = vector.load %arg2[%c64_112, %c2304_113] : memref<128x5760xbf16, #tpu.memory_space<vmem>>, vector<32x128xbf16>
    %347 = arith.truncf %345 : vector<16x32xf32> to vector<16x32xbf16>
    %cst_114 = arith.constant dense<0.000000e+00> : vector<16x128xf32>
    %348 = tpu.matmul %347, %346, %cst_114 {dimension_numbers = #tpu.dot_dimension_numbers<[1], [0], [0], [1], [0, 0, 1, 1], [], []>} : vector<16x32xbf16>, vector<32x128xbf16>, vector<16x128xf32> -> vector<16x128xf32>
    %349 = arith.addf %324, %348 : vector<16x128xf32>
    %350 = vector.extract_strided_slice %264 {offsets = [0, 96], sizes = [16, 32], strides = [1, 1]} : vector<16x128xf32> to vector<16x32xf32>
    %351 = arith.truncf %350 : vector<16x32xf32> to vector<16x32xbf16>
    %352 = vector.extract_strided_slice %271 {offsets = [0, 96], sizes = [16, 32], strides = [1, 1]} : vector<16x128xf32> to vector<16x32xf32>
    %353 = arith.truncf %352 : vector<16x32xf32> to vector<16x32xbf16>
    %cst_115 = arith.constant dense<0.000000e+00> : vector<16x16xf32>
    %354 = tpu.matmul %351, %353, %cst_115 {dimension_numbers = #tpu.dot_dimension_numbers<[1], [1], [0], [0], [0, 0, 1, 0], [], []>} : vector<16x32xbf16>, vector<16x32xbf16>, vector<16x16xf32> -> vector<16x16xf32>
    %cst_116 = arith.constant -1.000000e+30 : f32
    %355 = vector.broadcast %cst_116 : f32 to vector<16x16xf32>
    %356 = arith.select %44, %354, %355 : vector<16x16xi1>, vector<16x16xf32>
    %cst_117 = arith.constant dense<0xFF800000> : vector<16xf32>
    %357 = vector.multi_reduction <maximumf>, %356, %cst_117 [1] : vector<16x16xf32> to vector<16xf32>
    %358 = vector.shape_cast %357 : vector<16xf32> to vector<16x1xf32>
    %359 = vector.broadcast %358 : vector<16x1xf32> to vector<16x16xf32>
    %360 = arith.subf %356, %359 : vector<16x16xf32>
    %361 = math.exp %360 : vector<16x16xf32>
    %cst_118 = arith.constant dense<0.000000e+00> : vector<16xf32>
    %362 = vector.multi_reduction <add>, %361, %cst_118 [1] : vector<16x16xf32> to vector<16xf32>
    %363 = vector.shape_cast %362 : vector<16xf32> to vector<16x1xf32>
    %364 = tpu.reciprocal %363 {approx = true} : vector<16x1xf32> -> vector<16x1xf32>
    %365 = vector.broadcast %364 : vector<16x1xf32> to vector<16x16xf32>
    %366 = arith.mulf %361, %365 : vector<16x16xf32>
    %367 = arith.truncf %366 : vector<16x16xf32> to vector<16x16xbf16>
    %368 = vector.extract_strided_slice %275 {offsets = [0, 96], sizes = [16, 32], strides = [1, 1]} : vector<16x128xf32> to vector<16x32xf32>
    %369 = arith.truncf %368 : vector<16x32xf32> to vector<16x32xbf16>
    %cst_119 = arith.constant dense<0.000000e+00> : vector<16x32xf32>
    %370 = tpu.matmul %367, %369, %cst_119 {dimension_numbers = #tpu.dot_dimension_numbers<[1], [0], [0], [1], [0, 0, 1, 1], [], []>} : vector<16x16xbf16>, vector<16x32xbf16>, vector<16x32xf32> -> vector<16x32xf32>
    %c96_120 = arith.constant 96 : index
    %c2304_121 = arith.constant 2304 : index
    %371 = vector.load %arg2[%c96_120, %c2304_121] : memref<128x5760xbf16, #tpu.memory_space<vmem>>, vector<32x128xbf16>
    %372 = arith.truncf %370 : vector<16x32xf32> to vector<16x32xbf16>
    %cst_122 = arith.constant dense<0.000000e+00> : vector<16x128xf32>
    %373 = tpu.matmul %372, %371, %cst_122 {dimension_numbers = #tpu.dot_dimension_numbers<[1], [0], [0], [1], [0, 0, 1, 1], [], []>} : vector<16x32xbf16>, vector<32x128xbf16>, vector<16x128xf32> -> vector<16x128xf32>
    %374 = arith.addf %349, %373 : vector<16x128xf32>
    %c40 = arith.constant 40 : index
    %c0_123 = arith.constant 0 : index
    %375 = vector.load %arg3[%c40, %c0_123] : memref<80x128xf32, #tpu.memory_space<vmem>>, vector<1x128xf32>
    %376 = vector.broadcast %375 : vector<1x128xf32> to vector<16x128xf32>
    %377 = arith.addf %374, %376 : vector<16x128xf32>
    %378 = arith.addf %70, %377 : vector<16x128xf32>
    %c0_124 = arith.constant 0 : index
    %c1152 = arith.constant 1152 : index
    %379 = vector.load %arg2[%c0_124, %c1152] : memref<128x5760xbf16, #tpu.memory_space<vmem>>, vector<128x384xbf16>
    %380 = arith.truncf %378 : vector<16x128xf32> to vector<16x128xbf16>
    %cst_125 = arith.constant dense<0.000000e+00> : vector<16x384xf32>
    %381 = tpu.matmul %380, %379, %cst_125 {dimension_numbers = #tpu.dot_dimension_numbers<[1], [0], [0], [1], [0, 0, 1, 1], [], []>} : vector<16x128xbf16>, vector<128x384xbf16>, vector<16x384xf32> -> vector<16x384xf32>
    %382 = vector.extract_strided_slice %381 {offsets = [0, 0], sizes = [16, 128], strides = [1, 1]} : vector<16x384xf32> to vector<16x128xf32>
    %c27 = arith.constant 27 : index
    %c0_126 = arith.constant 0 : index
    %383 = vector.load %arg3[%c27, %c0_126] : memref<80x128xf32, #tpu.memory_space<vmem>>, vector<1x128xf32>
    %384 = vector.broadcast %383 : vector<1x128xf32> to vector<16x128xf32>
    %385 = arith.addf %382, %384 : vector<16x128xf32>
    %386 = vector.extract_strided_slice %381 {offsets = [0, 128], sizes = [16, 128], strides = [1, 1]} : vector<16x384xf32> to vector<16x128xf32>
    %c28 = arith.constant 28 : index
    %c0_127 = arith.constant 0 : index
    %387 = vector.load %arg3[%c28, %c0_127] : memref<80x128xf32, #tpu.memory_space<vmem>>, vector<1x128xf32>
    %388 = vector.broadcast %387 : vector<1x128xf32> to vector<16x128xf32>
    %389 = arith.addf %386, %388 : vector<16x128xf32>
    %390 = vector.extract_strided_slice %381 {offsets = [0, 256], sizes = [16, 128], strides = [1, 1]} : vector<16x384xf32> to vector<16x128xf32>
    %c29 = arith.constant 29 : index
    %c0_128 = arith.constant 0 : index
    %391 = vector.load %arg3[%c29, %c0_128] : memref<80x128xf32, #tpu.memory_space<vmem>>, vector<1x128xf32>
    %392 = vector.broadcast %391 : vector<1x128xf32> to vector<16x128xf32>
    %393 = arith.addf %390, %392 : vector<16x128xf32>
    %394 = vector.extract_strided_slice %385 {offsets = [0, 0], sizes = [16, 32], strides = [1, 1]} : vector<16x128xf32> to vector<16x32xf32>
    %395 = arith.truncf %394 : vector<16x32xf32> to vector<16x32xbf16>
    %396 = vector.extract_strided_slice %389 {offsets = [0, 0], sizes = [16, 32], strides = [1, 1]} : vector<16x128xf32> to vector<16x32xf32>
    %397 = arith.truncf %396 : vector<16x32xf32> to vector<16x32xbf16>
    %cst_129 = arith.constant dense<0.000000e+00> : vector<16x16xf32>
    %398 = tpu.matmul %395, %397, %cst_129 {dimension_numbers = #tpu.dot_dimension_numbers<[1], [1], [0], [0], [0, 0, 1, 0], [], []>} : vector<16x32xbf16>, vector<16x32xbf16>, vector<16x16xf32> -> vector<16x16xf32>
    %cst_130 = arith.constant -1.000000e+30 : f32
    %399 = vector.broadcast %cst_130 : f32 to vector<16x16xf32>
    %400 = arith.select %29, %398, %399 : vector<16x16xi1>, vector<16x16xf32>
    %cst_131 = arith.constant dense<0xFF800000> : vector<16xf32>
    %401 = vector.multi_reduction <maximumf>, %400, %cst_131 [1] : vector<16x16xf32> to vector<16xf32>
    %402 = vector.shape_cast %401 : vector<16xf32> to vector<16x1xf32>
    %403 = vector.broadcast %402 : vector<16x1xf32> to vector<16x16xf32>
    %404 = arith.subf %400, %403 : vector<16x16xf32>
    %405 = math.exp %404 : vector<16x16xf32>
    %cst_132 = arith.constant dense<0.000000e+00> : vector<16xf32>
    %406 = vector.multi_reduction <add>, %405, %cst_132 [1] : vector<16x16xf32> to vector<16xf32>
    %407 = vector.shape_cast %406 : vector<16xf32> to vector<16x1xf32>
    %408 = tpu.reciprocal %407 {approx = true} : vector<16x1xf32> -> vector<16x1xf32>
    %409 = vector.broadcast %408 : vector<16x1xf32> to vector<16x16xf32>
    %410 = arith.mulf %405, %409 : vector<16x16xf32>
    %411 = arith.truncf %410 : vector<16x16xf32> to vector<16x16xbf16>
    %412 = vector.extract_strided_slice %393 {offsets = [0, 0], sizes = [16, 32], strides = [1, 1]} : vector<16x128xf32> to vector<16x32xf32>
    %413 = arith.truncf %412 : vector<16x32xf32> to vector<16x32xbf16>
    %cst_133 = arith.constant dense<0.000000e+00> : vector<16x32xf32>
    %414 = tpu.matmul %411, %413, %cst_133 {dimension_numbers = #tpu.dot_dimension_numbers<[1], [0], [0], [1], [0, 0, 1, 1], [], []>} : vector<16x16xbf16>, vector<16x32xbf16>, vector<16x32xf32> -> vector<16x32xf32>
    %c0_134 = arith.constant 0 : index
    %c1536 = arith.constant 1536 : index
    %415 = vector.load %arg2[%c0_134, %c1536] : memref<128x5760xbf16, #tpu.memory_space<vmem>>, vector<32x128xbf16>
    %416 = arith.truncf %414 : vector<16x32xf32> to vector<16x32xbf16>
    %cst_135 = arith.constant dense<0.000000e+00> : vector<16x128xf32>
    %417 = tpu.matmul %416, %415, %cst_135 {dimension_numbers = #tpu.dot_dimension_numbers<[1], [0], [0], [1], [0, 0, 1, 1], [], []>} : vector<16x32xbf16>, vector<32x128xbf16>, vector<16x128xf32> -> vector<16x128xf32>
    %418 = vector.extract_strided_slice %385 {offsets = [0, 32], sizes = [16, 32], strides = [1, 1]} : vector<16x128xf32> to vector<16x32xf32>
    %419 = arith.truncf %418 : vector<16x32xf32> to vector<16x32xbf16>
    %420 = vector.extract_strided_slice %389 {offsets = [0, 32], sizes = [16, 32], strides = [1, 1]} : vector<16x128xf32> to vector<16x32xf32>
    %421 = arith.truncf %420 : vector<16x32xf32> to vector<16x32xbf16>
    %cst_136 = arith.constant dense<0.000000e+00> : vector<16x16xf32>
    %422 = tpu.matmul %419, %421, %cst_136 {dimension_numbers = #tpu.dot_dimension_numbers<[1], [1], [0], [0], [0, 0, 1, 0], [], []>} : vector<16x32xbf16>, vector<16x32xbf16>, vector<16x16xf32> -> vector<16x16xf32>
    %cst_137 = arith.constant -1.000000e+30 : f32
    %423 = vector.broadcast %cst_137 : f32 to vector<16x16xf32>
    %424 = arith.select %29, %422, %423 : vector<16x16xi1>, vector<16x16xf32>
    %cst_138 = arith.constant dense<0xFF800000> : vector<16xf32>
    %425 = vector.multi_reduction <maximumf>, %424, %cst_138 [1] : vector<16x16xf32> to vector<16xf32>
    %426 = vector.shape_cast %425 : vector<16xf32> to vector<16x1xf32>
    %427 = vector.broadcast %426 : vector<16x1xf32> to vector<16x16xf32>
    %428 = arith.subf %424, %427 : vector<16x16xf32>
    %429 = math.exp %428 : vector<16x16xf32>
    %cst_139 = arith.constant dense<0.000000e+00> : vector<16xf32>
    %430 = vector.multi_reduction <add>, %429, %cst_139 [1] : vector<16x16xf32> to vector<16xf32>
    %431 = vector.shape_cast %430 : vector<16xf32> to vector<16x1xf32>
    %432 = tpu.reciprocal %431 {approx = true} : vector<16x1xf32> -> vector<16x1xf32>
    %433 = vector.broadcast %432 : vector<16x1xf32> to vector<16x16xf32>
    %434 = arith.mulf %429, %433 : vector<16x16xf32>
    %435 = arith.truncf %434 : vector<16x16xf32> to vector<16x16xbf16>
    %436 = vector.extract_strided_slice %393 {offsets = [0, 32], sizes = [16, 32], strides = [1, 1]} : vector<16x128xf32> to vector<16x32xf32>
    %437 = arith.truncf %436 : vector<16x32xf32> to vector<16x32xbf16>
    %cst_140 = arith.constant dense<0.000000e+00> : vector<16x32xf32>
    %438 = tpu.matmul %435, %437, %cst_140 {dimension_numbers = #tpu.dot_dimension_numbers<[1], [0], [0], [1], [0, 0, 1, 1], [], []>} : vector<16x16xbf16>, vector<16x32xbf16>, vector<16x32xf32> -> vector<16x32xf32>
    %c32_141 = arith.constant 32 : index
    %c1536_142 = arith.constant 1536 : index
    %439 = vector.load %arg2[%c32_141, %c1536_142] : memref<128x5760xbf16, #tpu.memory_space<vmem>>, vector<32x128xbf16>
    %440 = arith.truncf %438 : vector<16x32xf32> to vector<16x32xbf16>
    %cst_143 = arith.constant dense<0.000000e+00> : vector<16x128xf32>
    %441 = tpu.matmul %440, %439, %cst_143 {dimension_numbers = #tpu.dot_dimension_numbers<[1], [0], [0], [1], [0, 0, 1, 1], [], []>} : vector<16x32xbf16>, vector<32x128xbf16>, vector<16x128xf32> -> vector<16x128xf32>
    %442 = arith.addf %417, %441 : vector<16x128xf32>
    %443 = vector.extract_strided_slice %385 {offsets = [0, 64], sizes = [16, 32], strides = [1, 1]} : vector<16x128xf32> to vector<16x32xf32>
    %444 = arith.truncf %443 : vector<16x32xf32> to vector<16x32xbf16>
    %445 = vector.extract_strided_slice %389 {offsets = [0, 64], sizes = [16, 32], strides = [1, 1]} : vector<16x128xf32> to vector<16x32xf32>
    %446 = arith.truncf %445 : vector<16x32xf32> to vector<16x32xbf16>
    %cst_144 = arith.constant dense<0.000000e+00> : vector<16x16xf32>
    %447 = tpu.matmul %444, %446, %cst_144 {dimension_numbers = #tpu.dot_dimension_numbers<[1], [1], [0], [0], [0, 0, 1, 0], [], []>} : vector<16x32xbf16>, vector<16x32xbf16>, vector<16x16xf32> -> vector<16x16xf32>
    %cst_145 = arith.constant -1.000000e+30 : f32
    %448 = vector.broadcast %cst_145 : f32 to vector<16x16xf32>
    %449 = arith.select %29, %447, %448 : vector<16x16xi1>, vector<16x16xf32>
    %cst_146 = arith.constant dense<0xFF800000> : vector<16xf32>
    %450 = vector.multi_reduction <maximumf>, %449, %cst_146 [1] : vector<16x16xf32> to vector<16xf32>
    %451 = vector.shape_cast %450 : vector<16xf32> to vector<16x1xf32>
    %452 = vector.broadcast %451 : vector<16x1xf32> to vector<16x16xf32>
    %453 = arith.subf %449, %452 : vector<16x16xf32>
    %454 = math.exp %453 : vector<16x16xf32>
    %cst_147 = arith.constant dense<0.000000e+00> : vector<16xf32>
    %455 = vector.multi_reduction <add>, %454, %cst_147 [1] : vector<16x16xf32> to vector<16xf32>
    %456 = vector.shape_cast %455 : vector<16xf32> to vector<16x1xf32>
    %457 = tpu.reciprocal %456 {approx = true} : vector<16x1xf32> -> vector<16x1xf32>
    %458 = vector.broadcast %457 : vector<16x1xf32> to vector<16x16xf32>
    %459 = arith.mulf %454, %458 : vector<16x16xf32>
    %460 = arith.truncf %459 : vector<16x16xf32> to vector<16x16xbf16>
    %461 = vector.extract_strided_slice %393 {offsets = [0, 64], sizes = [16, 32], strides = [1, 1]} : vector<16x128xf32> to vector<16x32xf32>
    %462 = arith.truncf %461 : vector<16x32xf32> to vector<16x32xbf16>
    %cst_148 = arith.constant dense<0.000000e+00> : vector<16x32xf32>
    %463 = tpu.matmul %460, %462, %cst_148 {dimension_numbers = #tpu.dot_dimension_numbers<[1], [0], [0], [1], [0, 0, 1, 1], [], []>} : vector<16x16xbf16>, vector<16x32xbf16>, vector<16x32xf32> -> vector<16x32xf32>
    %c64_149 = arith.constant 64 : index
    %c1536_150 = arith.constant 1536 : index
    %464 = vector.load %arg2[%c64_149, %c1536_150] : memref<128x5760xbf16, #tpu.memory_space<vmem>>, vector<32x128xbf16>
    %465 = arith.truncf %463 : vector<16x32xf32> to vector<16x32xbf16>
    %cst_151 = arith.constant dense<0.000000e+00> : vector<16x128xf32>
    %466 = tpu.matmul %465, %464, %cst_151 {dimension_numbers = #tpu.dot_dimension_numbers<[1], [0], [0], [1], [0, 0, 1, 1], [], []>} : vector<16x32xbf16>, vector<32x128xbf16>, vector<16x128xf32> -> vector<16x128xf32>
    %467 = arith.addf %442, %466 : vector<16x128xf32>
    %468 = vector.extract_strided_slice %385 {offsets = [0, 96], sizes = [16, 32], strides = [1, 1]} : vector<16x128xf32> to vector<16x32xf32>
    %469 = arith.truncf %468 : vector<16x32xf32> to vector<16x32xbf16>
    %470 = vector.extract_strided_slice %389 {offsets = [0, 96], sizes = [16, 32], strides = [1, 1]} : vector<16x128xf32> to vector<16x32xf32>
    %471 = arith.truncf %470 : vector<16x32xf32> to vector<16x32xbf16>
    %cst_152 = arith.constant dense<0.000000e+00> : vector<16x16xf32>
    %472 = tpu.matmul %469, %471, %cst_152 {dimension_numbers = #tpu.dot_dimension_numbers<[1], [1], [0], [0], [0, 0, 1, 0], [], []>} : vector<16x32xbf16>, vector<16x32xbf16>, vector<16x16xf32> -> vector<16x16xf32>
    %cst_153 = arith.constant -1.000000e+30 : f32
    %473 = vector.broadcast %cst_153 : f32 to vector<16x16xf32>
    %474 = arith.select %29, %472, %473 : vector<16x16xi1>, vector<16x16xf32>
    %cst_154 = arith.constant dense<0xFF800000> : vector<16xf32>
    %475 = vector.multi_reduction <maximumf>, %474, %cst_154 [1] : vector<16x16xf32> to vector<16xf32>
    %476 = vector.shape_cast %475 : vector<16xf32> to vector<16x1xf32>
    %477 = vector.broadcast %476 : vector<16x1xf32> to vector<16x16xf32>
    %478 = arith.subf %474, %477 : vector<16x16xf32>
    %479 = math.exp %478 : vector<16x16xf32>
    %cst_155 = arith.constant dense<0.000000e+00> : vector<16xf32>
    %480 = vector.multi_reduction <add>, %479, %cst_155 [1] : vector<16x16xf32> to vector<16xf32>
    %481 = vector.shape_cast %480 : vector<16xf32> to vector<16x1xf32>
    %482 = tpu.reciprocal %481 {approx = true} : vector<16x1xf32> -> vector<16x1xf32>
    %483 = vector.broadcast %482 : vector<16x1xf32> to vector<16x16xf32>
    %484 = arith.mulf %479, %483 : vector<16x16xf32>
    %485 = arith.truncf %484 : vector<16x16xf32> to vector<16x16xbf16>
    %486 = vector.extract_strided_slice %393 {offsets = [0, 96], sizes = [16, 32], strides = [1, 1]} : vector<16x128xf32> to vector<16x32xf32>
    %487 = arith.truncf %486 : vector<16x32xf32> to vector<16x32xbf16>
    %cst_156 = arith.constant dense<0.000000e+00> : vector<16x32xf32>
    %488 = tpu.matmul %485, %487, %cst_156 {dimension_numbers = #tpu.dot_dimension_numbers<[1], [0], [0], [1], [0, 0, 1, 1], [], []>} : vector<16x16xbf16>, vector<16x32xbf16>, vector<16x32xf32> -> vector<16x32xf32>
    %c96_157 = arith.constant 96 : index
    %c1536_158 = arith.constant 1536 : index
    %489 = vector.load %arg2[%c96_157, %c1536_158] : memref<128x5760xbf16, #tpu.memory_space<vmem>>, vector<32x128xbf16>
    %490 = arith.truncf %488 : vector<16x32xf32> to vector<16x32xbf16>
    %cst_159 = arith.constant dense<0.000000e+00> : vector<16x128xf32>
    %491 = tpu.matmul %490, %489, %cst_159 {dimension_numbers = #tpu.dot_dimension_numbers<[1], [0], [0], [1], [0, 0, 1, 1], [], []>} : vector<16x32xbf16>, vector<32x128xbf16>, vector<16x128xf32> -> vector<16x128xf32>
    %492 = arith.addf %467, %491 : vector<16x128xf32>
    %c30 = arith.constant 30 : index
    %c0_160 = arith.constant 0 : index
    %493 = vector.load %arg3[%c30, %c0_160] : memref<80x128xf32, #tpu.memory_space<vmem>>, vector<1x128xf32>
    %494 = vector.broadcast %493 : vector<1x128xf32> to vector<16x128xf32>
    %495 = arith.addf %492, %494 : vector<16x128xf32>
    %496 = arith.addf %378, %495 : vector<16x128xf32>
    %cst_161 = arith.constant dense<0.000000e+00> : vector<16xf32>
    %497 = vector.multi_reduction <add>, %496, %cst_161 [1] : vector<16x128xf32> to vector<16xf32>
    %498 = vector.shape_cast %497 : vector<16xf32> to vector<16x1xf32>
    %cst_162 = arith.constant 1.280000e+02 : f32
    %499 = vector.broadcast %cst_162 : f32 to vector<16x1xf32>
    %500 = arith.divf %498, %499 : vector<16x1xf32>
    %501 = vector.broadcast %500 : vector<16x1xf32> to vector<16x128xf32>
    %502 = arith.subf %496, %501 : vector<16x128xf32>
    %503 = arith.mulf %502, %502 : vector<16x128xf32>
    %cst_163 = arith.constant dense<0.000000e+00> : vector<16xf32>
    %504 = vector.multi_reduction <add>, %503, %cst_163 [1] : vector<16x128xf32> to vector<16xf32>
    %505 = vector.shape_cast %504 : vector<16xf32> to vector<16x1xf32>
    %cst_164 = arith.constant 1.280000e+02 : f32
    %506 = vector.broadcast %cst_164 : f32 to vector<16x1xf32>
    %507 = arith.divf %505, %506 : vector<16x1xf32>
    %508 = vector.broadcast %500 : vector<16x1xf32> to vector<16x128xf32>
    %509 = arith.subf %496, %508 : vector<16x128xf32>
    %cst_165 = arith.constant 9.99999974E-6 : f32
    %510 = vector.broadcast %cst_165 : f32 to vector<16x1xf32>
    %511 = arith.addf %507, %510 : vector<16x1xf32>
    %512 = math.rsqrt %511 : vector<16x1xf32>
    %513 = vector.broadcast %512 : vector<16x1xf32> to vector<16x128xf32>
    %514 = arith.mulf %509, %513 : vector<16x128xf32>
    %c31 = arith.constant 31 : index
    %c0_166 = arith.constant 0 : index
    %515 = vector.load %arg3[%c31, %c0_166] : memref<80x128xf32, #tpu.memory_space<vmem>>, vector<1x128xf32>
    %516 = vector.broadcast %515 : vector<1x128xf32> to vector<16x128xf32>
    %517 = arith.mulf %514, %516 : vector<16x128xf32>
    %c32_167 = arith.constant 32 : index
    %c0_168 = arith.constant 0 : index
    %518 = vector.load %arg3[%c32_167, %c0_168] : memref<80x128xf32, #tpu.memory_space<vmem>>, vector<1x128xf32>
    %519 = vector.broadcast %518 : vector<1x128xf32> to vector<16x128xf32>
    %520 = arith.addf %517, %519 : vector<16x128xf32>
    %c0_169 = arith.constant 0 : index
    %c1664 = arith.constant 1664 : index
    %521 = vector.load %arg2[%c0_169, %c1664] : memref<128x5760xbf16, #tpu.memory_space<vmem>>, vector<128x128xbf16>
    %522 = arith.truncf %520 : vector<16x128xf32> to vector<16x128xbf16>
    %cst_170 = arith.constant dense<0.000000e+00> : vector<16x128xf32>
    %523 = tpu.matmul %522, %521, %cst_170 {dimension_numbers = #tpu.dot_dimension_numbers<[1], [0], [0], [1], [0, 0, 1, 1], [], []>} : vector<16x128xbf16>, vector<128x128xbf16>, vector<16x128xf32> -> vector<16x128xf32>
    %c33 = arith.constant 33 : index
    %c0_171 = arith.constant 0 : index
    %524 = vector.load %arg3[%c33, %c0_171] : memref<80x128xf32, #tpu.memory_space<vmem>>, vector<1x128xf32>
    %525 = vector.broadcast %524 : vector<1x128xf32> to vector<16x128xf32>
    %526 = arith.addf %523, %525 : vector<16x128xf32>
    %cst_172 = arith.constant 0.000000e+00 : f32
    %527 = vector.broadcast %cst_172 : f32 to vector<16x128xf32>
    %528 = arith.maximumf %526, %527 : vector<16x128xf32>
    %c0_173 = arith.constant 0 : index
    %c1792 = arith.constant 1792 : index
    %529 = vector.load %arg2[%c0_173, %c1792] : memref<128x5760xbf16, #tpu.memory_space<vmem>>, vector<128x128xbf16>
    %530 = arith.truncf %528 : vector<16x128xf32> to vector<16x128xbf16>
    %cst_174 = arith.constant dense<0.000000e+00> : vector<16x128xf32>
    %531 = tpu.matmul %530, %529, %cst_174 {dimension_numbers = #tpu.dot_dimension_numbers<[1], [0], [0], [1], [0, 0, 1, 1], [], []>} : vector<16x128xbf16>, vector<128x128xbf16>, vector<16x128xf32> -> vector<16x128xf32>
    %532 = arith.addf %520, %531 : vector<16x128xf32>
    %c34 = arith.constant 34 : index
    %c0_175 = arith.constant 0 : index
    %533 = vector.load %arg3[%c34, %c0_175] : memref<80x128xf32, #tpu.memory_space<vmem>>, vector<1x128xf32>
    %534 = vector.broadcast %533 : vector<1x128xf32> to vector<16x128xf32>
    %535 = arith.addf %532, %534 : vector<16x128xf32>
    %cst_176 = arith.constant dense<0.000000e+00> : vector<16xf32>
    %536 = vector.multi_reduction <add>, %535, %cst_176 [1] : vector<16x128xf32> to vector<16xf32>
    %537 = vector.shape_cast %536 : vector<16xf32> to vector<16x1xf32>
    %cst_177 = arith.constant 1.280000e+02 : f32
    %538 = vector.broadcast %cst_177 : f32 to vector<16x1xf32>
    %539 = arith.divf %537, %538 : vector<16x1xf32>
    %540 = vector.broadcast %539 : vector<16x1xf32> to vector<16x128xf32>
    %541 = arith.subf %535, %540 : vector<16x128xf32>
    %542 = arith.mulf %541, %541 : vector<16x128xf32>
    %cst_178 = arith.constant dense<0.000000e+00> : vector<16xf32>
    %543 = vector.multi_reduction <add>, %542, %cst_178 [1] : vector<16x128xf32> to vector<16xf32>
    %544 = vector.shape_cast %543 : vector<16xf32> to vector<16x1xf32>
    %cst_179 = arith.constant 1.280000e+02 : f32
    %545 = vector.broadcast %cst_179 : f32 to vector<16x1xf32>
    %546 = arith.divf %544, %545 : vector<16x1xf32>
    %547 = vector.broadcast %539 : vector<16x1xf32> to vector<16x128xf32>
    %548 = arith.subf %535, %547 : vector<16x128xf32>
    %cst_180 = arith.constant 9.99999974E-6 : f32
    %549 = vector.broadcast %cst_180 : f32 to vector<16x1xf32>
    %550 = arith.addf %546, %549 : vector<16x1xf32>
    %551 = math.rsqrt %550 : vector<16x1xf32>
    %552 = vector.broadcast %551 : vector<16x1xf32> to vector<16x128xf32>
    %553 = arith.mulf %548, %552 : vector<16x128xf32>
    %c35 = arith.constant 35 : index
    %c0_181 = arith.constant 0 : index
    %554 = vector.load %arg3[%c35, %c0_181] : memref<80x128xf32, #tpu.memory_space<vmem>>, vector<1x128xf32>
    %555 = vector.broadcast %554 : vector<1x128xf32> to vector<16x128xf32>
    %556 = arith.mulf %553, %555 : vector<16x128xf32>
    %c36 = arith.constant 36 : index
    %c0_182 = arith.constant 0 : index
    %557 = vector.load %arg3[%c36, %c0_182] : memref<80x128xf32, #tpu.memory_space<vmem>>, vector<1x128xf32>
    %558 = vector.broadcast %557 : vector<1x128xf32> to vector<16x128xf32>
    %559 = arith.addf %556, %558 : vector<16x128xf32>
    %c0_183 = arith.constant 0 : index
    %c2432 = arith.constant 2432 : index
    %560 = vector.load %arg2[%c0_183, %c2432] : memref<128x5760xbf16, #tpu.memory_space<vmem>>, vector<128x128xbf16>
    %561 = arith.truncf %258 : vector<16x128xf32> to vector<16x128xbf16>
    %cst_184 = arith.constant dense<0.000000e+00> : vector<16x128xf32>
    %562 = tpu.matmul %561, %560, %cst_184 {dimension_numbers = #tpu.dot_dimension_numbers<[1], [0], [0], [1], [0, 0, 1, 1], [], []>} : vector<16x128xbf16>, vector<128x128xbf16>, vector<16x128xf32> -> vector<16x128xf32>
    %c41 = arith.constant 41 : index
    %c0_185 = arith.constant 0 : index
    %563 = vector.load %arg3[%c41, %c0_185] : memref<80x128xf32, #tpu.memory_space<vmem>>, vector<1x128xf32>
    %564 = vector.broadcast %563 : vector<1x128xf32> to vector<16x128xf32>
    %565 = arith.addf %562, %564 : vector<16x128xf32>
    %c0_186 = arith.constant 0 : index
    %c2560 = arith.constant 2560 : index
    %566 = vector.load %arg2[%c0_186, %c2560] : memref<128x5760xbf16, #tpu.memory_space<vmem>>, vector<128x256xbf16>
    %567 = arith.truncf %559 : vector<16x128xf32> to vector<16x128xbf16>
    %cst_187 = arith.constant dense<0.000000e+00> : vector<16x256xf32>
    %568 = tpu.matmul %567, %566, %cst_187 {dimension_numbers = #tpu.dot_dimension_numbers<[1], [0], [0], [1], [0, 0, 1, 1], [], []>} : vector<16x128xbf16>, vector<128x256xbf16>, vector<16x256xf32> -> vector<16x256xf32>
    %569 = vector.extract_strided_slice %568 {offsets = [0, 0], sizes = [16, 128], strides = [1, 1]} : vector<16x256xf32> to vector<16x128xf32>
    %c42 = arith.constant 42 : index
    %c0_188 = arith.constant 0 : index
    %570 = vector.load %arg3[%c42, %c0_188] : memref<80x128xf32, #tpu.memory_space<vmem>>, vector<1x128xf32>
    %571 = vector.broadcast %570 : vector<1x128xf32> to vector<16x128xf32>
    %572 = arith.addf %569, %571 : vector<16x128xf32>
    %573 = vector.extract_strided_slice %568 {offsets = [0, 128], sizes = [16, 128], strides = [1, 1]} : vector<16x256xf32> to vector<16x128xf32>
    %c43 = arith.constant 43 : index
    %c0_189 = arith.constant 0 : index
    %574 = vector.load %arg3[%c43, %c0_189] : memref<80x128xf32, #tpu.memory_space<vmem>>, vector<1x128xf32>
    %575 = vector.broadcast %574 : vector<1x128xf32> to vector<16x128xf32>
    %576 = arith.addf %573, %575 : vector<16x128xf32>
    %577 = vector.extract_strided_slice %565 {offsets = [0, 0], sizes = [16, 32], strides = [1, 1]} : vector<16x128xf32> to vector<16x32xf32>
    %578 = arith.truncf %577 : vector<16x32xf32> to vector<16x32xbf16>
    %579 = vector.extract_strided_slice %572 {offsets = [0, 0], sizes = [16, 32], strides = [1, 1]} : vector<16x128xf32> to vector<16x32xf32>
    %580 = arith.truncf %579 : vector<16x32xf32> to vector<16x32xbf16>
    %cst_190 = arith.constant dense<0.000000e+00> : vector<16x16xf32>
    %581 = tpu.matmul %578, %580, %cst_190 {dimension_numbers = #tpu.dot_dimension_numbers<[1], [1], [0], [0], [0, 0, 1, 0], [], []>} : vector<16x32xbf16>, vector<16x32xbf16>, vector<16x16xf32> -> vector<16x16xf32>
    %cst_191 = arith.constant -1.000000e+30 : f32
    %582 = vector.broadcast %cst_191 : f32 to vector<16x16xf32>
    %583 = arith.select %59, %581, %582 : vector<16x16xi1>, vector<16x16xf32>
    %cst_192 = arith.constant dense<0xFF800000> : vector<16xf32>
    %584 = vector.multi_reduction <maximumf>, %583, %cst_192 [1] : vector<16x16xf32> to vector<16xf32>
    %585 = vector.shape_cast %584 : vector<16xf32> to vector<16x1xf32>
    %586 = vector.broadcast %585 : vector<16x1xf32> to vector<16x16xf32>
    %587 = arith.subf %583, %586 : vector<16x16xf32>
    %588 = math.exp %587 : vector<16x16xf32>
    %cst_193 = arith.constant dense<0.000000e+00> : vector<16xf32>
    %589 = vector.multi_reduction <add>, %588, %cst_193 [1] : vector<16x16xf32> to vector<16xf32>
    %590 = vector.shape_cast %589 : vector<16xf32> to vector<16x1xf32>
    %591 = tpu.reciprocal %590 {approx = true} : vector<16x1xf32> -> vector<16x1xf32>
    %592 = vector.broadcast %591 : vector<16x1xf32> to vector<16x16xf32>
    %593 = arith.mulf %588, %592 : vector<16x16xf32>
    %594 = arith.truncf %593 : vector<16x16xf32> to vector<16x16xbf16>
    %595 = vector.extract_strided_slice %576 {offsets = [0, 0], sizes = [16, 32], strides = [1, 1]} : vector<16x128xf32> to vector<16x32xf32>
    %596 = arith.truncf %595 : vector<16x32xf32> to vector<16x32xbf16>
    %cst_194 = arith.constant dense<0.000000e+00> : vector<16x32xf32>
    %597 = tpu.matmul %594, %596, %cst_194 {dimension_numbers = #tpu.dot_dimension_numbers<[1], [0], [0], [1], [0, 0, 1, 1], [], []>} : vector<16x16xbf16>, vector<16x32xbf16>, vector<16x32xf32> -> vector<16x32xf32>
    %c0_195 = arith.constant 0 : index
    %c2816 = arith.constant 2816 : index
    %598 = vector.load %arg2[%c0_195, %c2816] : memref<128x5760xbf16, #tpu.memory_space<vmem>>, vector<32x128xbf16>
    %599 = arith.truncf %597 : vector<16x32xf32> to vector<16x32xbf16>
    %cst_196 = arith.constant dense<0.000000e+00> : vector<16x128xf32>
    %600 = tpu.matmul %599, %598, %cst_196 {dimension_numbers = #tpu.dot_dimension_numbers<[1], [0], [0], [1], [0, 0, 1, 1], [], []>} : vector<16x32xbf16>, vector<32x128xbf16>, vector<16x128xf32> -> vector<16x128xf32>
    %601 = vector.extract_strided_slice %565 {offsets = [0, 32], sizes = [16, 32], strides = [1, 1]} : vector<16x128xf32> to vector<16x32xf32>
    %602 = arith.truncf %601 : vector<16x32xf32> to vector<16x32xbf16>
    %603 = vector.extract_strided_slice %572 {offsets = [0, 32], sizes = [16, 32], strides = [1, 1]} : vector<16x128xf32> to vector<16x32xf32>
    %604 = arith.truncf %603 : vector<16x32xf32> to vector<16x32xbf16>
    %cst_197 = arith.constant dense<0.000000e+00> : vector<16x16xf32>
    %605 = tpu.matmul %602, %604, %cst_197 {dimension_numbers = #tpu.dot_dimension_numbers<[1], [1], [0], [0], [0, 0, 1, 0], [], []>} : vector<16x32xbf16>, vector<16x32xbf16>, vector<16x16xf32> -> vector<16x16xf32>
    %cst_198 = arith.constant -1.000000e+30 : f32
    %606 = vector.broadcast %cst_198 : f32 to vector<16x16xf32>
    %607 = arith.select %59, %605, %606 : vector<16x16xi1>, vector<16x16xf32>
    %cst_199 = arith.constant dense<0xFF800000> : vector<16xf32>
    %608 = vector.multi_reduction <maximumf>, %607, %cst_199 [1] : vector<16x16xf32> to vector<16xf32>
    %609 = vector.shape_cast %608 : vector<16xf32> to vector<16x1xf32>
    %610 = vector.broadcast %609 : vector<16x1xf32> to vector<16x16xf32>
    %611 = arith.subf %607, %610 : vector<16x16xf32>
    %612 = math.exp %611 : vector<16x16xf32>
    %cst_200 = arith.constant dense<0.000000e+00> : vector<16xf32>
    %613 = vector.multi_reduction <add>, %612, %cst_200 [1] : vector<16x16xf32> to vector<16xf32>
    %614 = vector.shape_cast %613 : vector<16xf32> to vector<16x1xf32>
    %615 = tpu.reciprocal %614 {approx = true} : vector<16x1xf32> -> vector<16x1xf32>
    %616 = vector.broadcast %615 : vector<16x1xf32> to vector<16x16xf32>
    %617 = arith.mulf %612, %616 : vector<16x16xf32>
    %618 = arith.truncf %617 : vector<16x16xf32> to vector<16x16xbf16>
    %619 = vector.extract_strided_slice %576 {offsets = [0, 32], sizes = [16, 32], strides = [1, 1]} : vector<16x128xf32> to vector<16x32xf32>
    %620 = arith.truncf %619 : vector<16x32xf32> to vector<16x32xbf16>
    %cst_201 = arith.constant dense<0.000000e+00> : vector<16x32xf32>
    %621 = tpu.matmul %618, %620, %cst_201 {dimension_numbers = #tpu.dot_dimension_numbers<[1], [0], [0], [1], [0, 0, 1, 1], [], []>} : vector<16x16xbf16>, vector<16x32xbf16>, vector<16x32xf32> -> vector<16x32xf32>
    %c32_202 = arith.constant 32 : index
    %c2816_203 = arith.constant 2816 : index
    %622 = vector.load %arg2[%c32_202, %c2816_203] : memref<128x5760xbf16, #tpu.memory_space<vmem>>, vector<32x128xbf16>
    %623 = arith.truncf %621 : vector<16x32xf32> to vector<16x32xbf16>
    %cst_204 = arith.constant dense<0.000000e+00> : vector<16x128xf32>
    %624 = tpu.matmul %623, %622, %cst_204 {dimension_numbers = #tpu.dot_dimension_numbers<[1], [0], [0], [1], [0, 0, 1, 1], [], []>} : vector<16x32xbf16>, vector<32x128xbf16>, vector<16x128xf32> -> vector<16x128xf32>
    %625 = arith.addf %600, %624 : vector<16x128xf32>
    %626 = vector.extract_strided_slice %565 {offsets = [0, 64], sizes = [16, 32], strides = [1, 1]} : vector<16x128xf32> to vector<16x32xf32>
    %627 = arith.truncf %626 : vector<16x32xf32> to vector<16x32xbf16>
    %628 = vector.extract_strided_slice %572 {offsets = [0, 64], sizes = [16, 32], strides = [1, 1]} : vector<16x128xf32> to vector<16x32xf32>
    %629 = arith.truncf %628 : vector<16x32xf32> to vector<16x32xbf16>
    %cst_205 = arith.constant dense<0.000000e+00> : vector<16x16xf32>
    %630 = tpu.matmul %627, %629, %cst_205 {dimension_numbers = #tpu.dot_dimension_numbers<[1], [1], [0], [0], [0, 0, 1, 0], [], []>} : vector<16x32xbf16>, vector<16x32xbf16>, vector<16x16xf32> -> vector<16x16xf32>
    %cst_206 = arith.constant -1.000000e+30 : f32
    %631 = vector.broadcast %cst_206 : f32 to vector<16x16xf32>
    %632 = arith.select %59, %630, %631 : vector<16x16xi1>, vector<16x16xf32>
    %cst_207 = arith.constant dense<0xFF800000> : vector<16xf32>
    %633 = vector.multi_reduction <maximumf>, %632, %cst_207 [1] : vector<16x16xf32> to vector<16xf32>
    %634 = vector.shape_cast %633 : vector<16xf32> to vector<16x1xf32>
    %635 = vector.broadcast %634 : vector<16x1xf32> to vector<16x16xf32>
    %636 = arith.subf %632, %635 : vector<16x16xf32>
    %637 = math.exp %636 : vector<16x16xf32>
    %cst_208 = arith.constant dense<0.000000e+00> : vector<16xf32>
    %638 = vector.multi_reduction <add>, %637, %cst_208 [1] : vector<16x16xf32> to vector<16xf32>
    %639 = vector.shape_cast %638 : vector<16xf32> to vector<16x1xf32>
    %640 = tpu.reciprocal %639 {approx = true} : vector<16x1xf32> -> vector<16x1xf32>
    %641 = vector.broadcast %640 : vector<16x1xf32> to vector<16x16xf32>
    %642 = arith.mulf %637, %641 : vector<16x16xf32>
    %643 = arith.truncf %642 : vector<16x16xf32> to vector<16x16xbf16>
    %644 = vector.extract_strided_slice %576 {offsets = [0, 64], sizes = [16, 32], strides = [1, 1]} : vector<16x128xf32> to vector<16x32xf32>
    %645 = arith.truncf %644 : vector<16x32xf32> to vector<16x32xbf16>
    %cst_209 = arith.constant dense<0.000000e+00> : vector<16x32xf32>
    %646 = tpu.matmul %643, %645, %cst_209 {dimension_numbers = #tpu.dot_dimension_numbers<[1], [0], [0], [1], [0, 0, 1, 1], [], []>} : vector<16x16xbf16>, vector<16x32xbf16>, vector<16x32xf32> -> vector<16x32xf32>
    %c64_210 = arith.constant 64 : index
    %c2816_211 = arith.constant 2816 : index
    %647 = vector.load %arg2[%c64_210, %c2816_211] : memref<128x5760xbf16, #tpu.memory_space<vmem>>, vector<32x128xbf16>
    %648 = arith.truncf %646 : vector<16x32xf32> to vector<16x32xbf16>
    %cst_212 = arith.constant dense<0.000000e+00> : vector<16x128xf32>
    %649 = tpu.matmul %648, %647, %cst_212 {dimension_numbers = #tpu.dot_dimension_numbers<[1], [0], [0], [1], [0, 0, 1, 1], [], []>} : vector<16x32xbf16>, vector<32x128xbf16>, vector<16x128xf32> -> vector<16x128xf32>
    %650 = arith.addf %625, %649 : vector<16x128xf32>
    %651 = vector.extract_strided_slice %565 {offsets = [0, 96], sizes = [16, 32], strides = [1, 1]} : vector<16x128xf32> to vector<16x32xf32>
    %652 = arith.truncf %651 : vector<16x32xf32> to vector<16x32xbf16>
    %653 = vector.extract_strided_slice %572 {offsets = [0, 96], sizes = [16, 32], strides = [1, 1]} : vector<16x128xf32> to vector<16x32xf32>
    %654 = arith.truncf %653 : vector<16x32xf32> to vector<16x32xbf16>
    %cst_213 = arith.constant dense<0.000000e+00> : vector<16x16xf32>
    %655 = tpu.matmul %652, %654, %cst_213 {dimension_numbers = #tpu.dot_dimension_numbers<[1], [1], [0], [0], [0, 0, 1, 0], [], []>} : vector<16x32xbf16>, vector<16x32xbf16>, vector<16x16xf32> -> vector<16x16xf32>
    %cst_214 = arith.constant -1.000000e+30 : f32
    %656 = vector.broadcast %cst_214 : f32 to vector<16x16xf32>
    %657 = arith.select %59, %655, %656 : vector<16x16xi1>, vector<16x16xf32>
    %cst_215 = arith.constant dense<0xFF800000> : vector<16xf32>
    %658 = vector.multi_reduction <maximumf>, %657, %cst_215 [1] : vector<16x16xf32> to vector<16xf32>
    %659 = vector.shape_cast %658 : vector<16xf32> to vector<16x1xf32>
    %660 = vector.broadcast %659 : vector<16x1xf32> to vector<16x16xf32>
    %661 = arith.subf %657, %660 : vector<16x16xf32>
    %662 = math.exp %661 : vector<16x16xf32>
    %cst_216 = arith.constant dense<0.000000e+00> : vector<16xf32>
    %663 = vector.multi_reduction <add>, %662, %cst_216 [1] : vector<16x16xf32> to vector<16xf32>
    %664 = vector.shape_cast %663 : vector<16xf32> to vector<16x1xf32>
    %665 = tpu.reciprocal %664 {approx = true} : vector<16x1xf32> -> vector<16x1xf32>
    %666 = vector.broadcast %665 : vector<16x1xf32> to vector<16x16xf32>
    %667 = arith.mulf %662, %666 : vector<16x16xf32>
    %668 = arith.truncf %667 : vector<16x16xf32> to vector<16x16xbf16>
    %669 = vector.extract_strided_slice %576 {offsets = [0, 96], sizes = [16, 32], strides = [1, 1]} : vector<16x128xf32> to vector<16x32xf32>
    %670 = arith.truncf %669 : vector<16x32xf32> to vector<16x32xbf16>
    %cst_217 = arith.constant dense<0.000000e+00> : vector<16x32xf32>
    %671 = tpu.matmul %668, %670, %cst_217 {dimension_numbers = #tpu.dot_dimension_numbers<[1], [0], [0], [1], [0, 0, 1, 1], [], []>} : vector<16x16xbf16>, vector<16x32xbf16>, vector<16x32xf32> -> vector<16x32xf32>
    %c96_218 = arith.constant 96 : index
    %c2816_219 = arith.constant 2816 : index
    %672 = vector.load %arg2[%c96_218, %c2816_219] : memref<128x5760xbf16, #tpu.memory_space<vmem>>, vector<32x128xbf16>
    %673 = arith.truncf %671 : vector<16x32xf32> to vector<16x32xbf16>
    %cst_220 = arith.constant dense<0.000000e+00> : vector<16x128xf32>
    %674 = tpu.matmul %673, %672, %cst_220 {dimension_numbers = #tpu.dot_dimension_numbers<[1], [0], [0], [1], [0, 0, 1, 1], [], []>} : vector<16x32xbf16>, vector<32x128xbf16>, vector<16x128xf32> -> vector<16x128xf32>
    %675 = arith.addf %650, %674 : vector<16x128xf32>
    %c44 = arith.constant 44 : index
    %c0_221 = arith.constant 0 : index
    %676 = vector.load %arg3[%c44, %c0_221] : memref<80x128xf32, #tpu.memory_space<vmem>>, vector<1x128xf32>
    %677 = vector.broadcast %676 : vector<1x128xf32> to vector<16x128xf32>
    %678 = arith.addf %675, %677 : vector<16x128xf32>
    %679 = arith.addf %258, %678 : vector<16x128xf32>
    %c0_222 = arith.constant 0 : index
    %c2944 = arith.constant 2944 : index
    %680 = vector.load %arg2[%c0_222, %c2944] : memref<128x5760xbf16, #tpu.memory_space<vmem>>, vector<128x384xbf16>
    %681 = arith.truncf %679 : vector<16x128xf32> to vector<16x128xbf16>
    %cst_223 = arith.constant dense<0.000000e+00> : vector<16x384xf32>
    %682 = tpu.matmul %681, %680, %cst_223 {dimension_numbers = #tpu.dot_dimension_numbers<[1], [0], [0], [1], [0, 0, 1, 1], [], []>} : vector<16x128xbf16>, vector<128x384xbf16>, vector<16x384xf32> -> vector<16x384xf32>
    %683 = vector.extract_strided_slice %682 {offsets = [0, 0], sizes = [16, 128], strides = [1, 1]} : vector<16x384xf32> to vector<16x128xf32>
    %c45 = arith.constant 45 : index
    %c0_224 = arith.constant 0 : index
    %684 = vector.load %arg3[%c45, %c0_224] : memref<80x128xf32, #tpu.memory_space<vmem>>, vector<1x128xf32>
    %685 = vector.broadcast %684 : vector<1x128xf32> to vector<16x128xf32>
    %686 = arith.addf %683, %685 : vector<16x128xf32>
    %687 = vector.extract_strided_slice %682 {offsets = [0, 128], sizes = [16, 128], strides = [1, 1]} : vector<16x384xf32> to vector<16x128xf32>
    %c46 = arith.constant 46 : index
    %c0_225 = arith.constant 0 : index
    %688 = vector.load %arg3[%c46, %c0_225] : memref<80x128xf32, #tpu.memory_space<vmem>>, vector<1x128xf32>
    %689 = vector.broadcast %688 : vector<1x128xf32> to vector<16x128xf32>
    %690 = arith.addf %687, %689 : vector<16x128xf32>
    %691 = vector.extract_strided_slice %682 {offsets = [0, 256], sizes = [16, 128], strides = [1, 1]} : vector<16x384xf32> to vector<16x128xf32>
    %c47 = arith.constant 47 : index
    %c0_226 = arith.constant 0 : index
    %692 = vector.load %arg3[%c47, %c0_226] : memref<80x128xf32, #tpu.memory_space<vmem>>, vector<1x128xf32>
    %693 = vector.broadcast %692 : vector<1x128xf32> to vector<16x128xf32>
    %694 = arith.addf %691, %693 : vector<16x128xf32>
    %695 = vector.extract_strided_slice %686 {offsets = [0, 0], sizes = [16, 32], strides = [1, 1]} : vector<16x128xf32> to vector<16x32xf32>
    %696 = arith.truncf %695 : vector<16x32xf32> to vector<16x32xbf16>
    %697 = vector.extract_strided_slice %690 {offsets = [0, 0], sizes = [16, 32], strides = [1, 1]} : vector<16x128xf32> to vector<16x32xf32>
    %698 = arith.truncf %697 : vector<16x32xf32> to vector<16x32xbf16>
    %cst_227 = arith.constant dense<0.000000e+00> : vector<16x16xf32>
    %699 = tpu.matmul %696, %698, %cst_227 {dimension_numbers = #tpu.dot_dimension_numbers<[1], [1], [0], [0], [0, 0, 1, 0], [], []>} : vector<16x32xbf16>, vector<16x32xbf16>, vector<16x16xf32> -> vector<16x16xf32>
    %cst_228 = arith.constant -1.000000e+30 : f32
    %700 = vector.broadcast %cst_228 : f32 to vector<16x16xf32>
    %701 = arith.select %14, %699, %700 : vector<16x16xi1>, vector<16x16xf32>
    %cst_229 = arith.constant dense<0xFF800000> : vector<16xf32>
    %702 = vector.multi_reduction <maximumf>, %701, %cst_229 [1] : vector<16x16xf32> to vector<16xf32>
    %703 = vector.shape_cast %702 : vector<16xf32> to vector<16x1xf32>
    %704 = vector.broadcast %703 : vector<16x1xf32> to vector<16x16xf32>
    %705 = arith.subf %701, %704 : vector<16x16xf32>
    %706 = math.exp %705 : vector<16x16xf32>
    %cst_230 = arith.constant dense<0.000000e+00> : vector<16xf32>
    %707 = vector.multi_reduction <add>, %706, %cst_230 [1] : vector<16x16xf32> to vector<16xf32>
    %708 = vector.shape_cast %707 : vector<16xf32> to vector<16x1xf32>
    %709 = tpu.reciprocal %708 {approx = true} : vector<16x1xf32> -> vector<16x1xf32>
    %710 = vector.broadcast %709 : vector<16x1xf32> to vector<16x16xf32>
    %711 = arith.mulf %706, %710 : vector<16x16xf32>
    %712 = arith.truncf %711 : vector<16x16xf32> to vector<16x16xbf16>
    %713 = vector.extract_strided_slice %694 {offsets = [0, 0], sizes = [16, 32], strides = [1, 1]} : vector<16x128xf32> to vector<16x32xf32>
    %714 = arith.truncf %713 : vector<16x32xf32> to vector<16x32xbf16>
    %cst_231 = arith.constant dense<0.000000e+00> : vector<16x32xf32>
    %715 = tpu.matmul %712, %714, %cst_231 {dimension_numbers = #tpu.dot_dimension_numbers<[1], [0], [0], [1], [0, 0, 1, 1], [], []>} : vector<16x16xbf16>, vector<16x32xbf16>, vector<16x32xf32> -> vector<16x32xf32>
    %c0_232 = arith.constant 0 : index
    %c3328 = arith.constant 3328 : index
    %716 = vector.load %arg2[%c0_232, %c3328] : memref<128x5760xbf16, #tpu.memory_space<vmem>>, vector<32x128xbf16>
    %717 = arith.truncf %715 : vector<16x32xf32> to vector<16x32xbf16>
    %cst_233 = arith.constant dense<0.000000e+00> : vector<16x128xf32>
    %718 = tpu.matmul %717, %716, %cst_233 {dimension_numbers = #tpu.dot_dimension_numbers<[1], [0], [0], [1], [0, 0, 1, 1], [], []>} : vector<16x32xbf16>, vector<32x128xbf16>, vector<16x128xf32> -> vector<16x128xf32>
    %719 = vector.extract_strided_slice %686 {offsets = [0, 32], sizes = [16, 32], strides = [1, 1]} : vector<16x128xf32> to vector<16x32xf32>
    %720 = arith.truncf %719 : vector<16x32xf32> to vector<16x32xbf16>
    %721 = vector.extract_strided_slice %690 {offsets = [0, 32], sizes = [16, 32], strides = [1, 1]} : vector<16x128xf32> to vector<16x32xf32>
    %722 = arith.truncf %721 : vector<16x32xf32> to vector<16x32xbf16>
    %cst_234 = arith.constant dense<0.000000e+00> : vector<16x16xf32>
    %723 = tpu.matmul %720, %722, %cst_234 {dimension_numbers = #tpu.dot_dimension_numbers<[1], [1], [0], [0], [0, 0, 1, 0], [], []>} : vector<16x32xbf16>, vector<16x32xbf16>, vector<16x16xf32> -> vector<16x16xf32>
    %cst_235 = arith.constant -1.000000e+30 : f32
    %724 = vector.broadcast %cst_235 : f32 to vector<16x16xf32>
    %725 = arith.select %14, %723, %724 : vector<16x16xi1>, vector<16x16xf32>
    %cst_236 = arith.constant dense<0xFF800000> : vector<16xf32>
    %726 = vector.multi_reduction <maximumf>, %725, %cst_236 [1] : vector<16x16xf32> to vector<16xf32>
    %727 = vector.shape_cast %726 : vector<16xf32> to vector<16x1xf32>
    %728 = vector.broadcast %727 : vector<16x1xf32> to vector<16x16xf32>
    %729 = arith.subf %725, %728 : vector<16x16xf32>
    %730 = math.exp %729 : vector<16x16xf32>
    %cst_237 = arith.constant dense<0.000000e+00> : vector<16xf32>
    %731 = vector.multi_reduction <add>, %730, %cst_237 [1] : vector<16x16xf32> to vector<16xf32>
    %732 = vector.shape_cast %731 : vector<16xf32> to vector<16x1xf32>
    %733 = tpu.reciprocal %732 {approx = true} : vector<16x1xf32> -> vector<16x1xf32>
    %734 = vector.broadcast %733 : vector<16x1xf32> to vector<16x16xf32>
    %735 = arith.mulf %730, %734 : vector<16x16xf32>
    %736 = arith.truncf %735 : vector<16x16xf32> to vector<16x16xbf16>
    %737 = vector.extract_strided_slice %694 {offsets = [0, 32], sizes = [16, 32], strides = [1, 1]} : vector<16x128xf32> to vector<16x32xf32>
    %738 = arith.truncf %737 : vector<16x32xf32> to vector<16x32xbf16>
    %cst_238 = arith.constant dense<0.000000e+00> : vector<16x32xf32>
    %739 = tpu.matmul %736, %738, %cst_238 {dimension_numbers = #tpu.dot_dimension_numbers<[1], [0], [0], [1], [0, 0, 1, 1], [], []>} : vector<16x16xbf16>, vector<16x32xbf16>, vector<16x32xf32> -> vector<16x32xf32>
    %c32_239 = arith.constant 32 : index
    %c3328_240 = arith.constant 3328 : index
    %740 = vector.load %arg2[%c32_239, %c3328_240] : memref<128x5760xbf16, #tpu.memory_space<vmem>>, vector<32x128xbf16>
    %741 = arith.truncf %739 : vector<16x32xf32> to vector<16x32xbf16>
    %cst_241 = arith.constant dense<0.000000e+00> : vector<16x128xf32>
    %742 = tpu.matmul %741, %740, %cst_241 {dimension_numbers = #tpu.dot_dimension_numbers<[1], [0], [0], [1], [0, 0, 1, 1], [], []>} : vector<16x32xbf16>, vector<32x128xbf16>, vector<16x128xf32> -> vector<16x128xf32>
    %743 = arith.addf %718, %742 : vector<16x128xf32>
    %744 = vector.extract_strided_slice %686 {offsets = [0, 64], sizes = [16, 32], strides = [1, 1]} : vector<16x128xf32> to vector<16x32xf32>
    %745 = arith.truncf %744 : vector<16x32xf32> to vector<16x32xbf16>
    %746 = vector.extract_strided_slice %690 {offsets = [0, 64], sizes = [16, 32], strides = [1, 1]} : vector<16x128xf32> to vector<16x32xf32>
    %747 = arith.truncf %746 : vector<16x32xf32> to vector<16x32xbf16>
    %cst_242 = arith.constant dense<0.000000e+00> : vector<16x16xf32>
    %748 = tpu.matmul %745, %747, %cst_242 {dimension_numbers = #tpu.dot_dimension_numbers<[1], [1], [0], [0], [0, 0, 1, 0], [], []>} : vector<16x32xbf16>, vector<16x32xbf16>, vector<16x16xf32> -> vector<16x16xf32>
    %cst_243 = arith.constant -1.000000e+30 : f32
    %749 = vector.broadcast %cst_243 : f32 to vector<16x16xf32>
    %750 = arith.select %14, %748, %749 : vector<16x16xi1>, vector<16x16xf32>
    %cst_244 = arith.constant dense<0xFF800000> : vector<16xf32>
    %751 = vector.multi_reduction <maximumf>, %750, %cst_244 [1] : vector<16x16xf32> to vector<16xf32>
    %752 = vector.shape_cast %751 : vector<16xf32> to vector<16x1xf32>
    %753 = vector.broadcast %752 : vector<16x1xf32> to vector<16x16xf32>
    %754 = arith.subf %750, %753 : vector<16x16xf32>
    %755 = math.exp %754 : vector<16x16xf32>
    %cst_245 = arith.constant dense<0.000000e+00> : vector<16xf32>
    %756 = vector.multi_reduction <add>, %755, %cst_245 [1] : vector<16x16xf32> to vector<16xf32>
    %757 = vector.shape_cast %756 : vector<16xf32> to vector<16x1xf32>
    %758 = tpu.reciprocal %757 {approx = true} : vector<16x1xf32> -> vector<16x1xf32>
    %759 = vector.broadcast %758 : vector<16x1xf32> to vector<16x16xf32>
    %760 = arith.mulf %755, %759 : vector<16x16xf32>
    %761 = arith.truncf %760 : vector<16x16xf32> to vector<16x16xbf16>
    %762 = vector.extract_strided_slice %694 {offsets = [0, 64], sizes = [16, 32], strides = [1, 1]} : vector<16x128xf32> to vector<16x32xf32>
    %763 = arith.truncf %762 : vector<16x32xf32> to vector<16x32xbf16>
    %cst_246 = arith.constant dense<0.000000e+00> : vector<16x32xf32>
    %764 = tpu.matmul %761, %763, %cst_246 {dimension_numbers = #tpu.dot_dimension_numbers<[1], [0], [0], [1], [0, 0, 1, 1], [], []>} : vector<16x16xbf16>, vector<16x32xbf16>, vector<16x32xf32> -> vector<16x32xf32>
    %c64_247 = arith.constant 64 : index
    %c3328_248 = arith.constant 3328 : index
    %765 = vector.load %arg2[%c64_247, %c3328_248] : memref<128x5760xbf16, #tpu.memory_space<vmem>>, vector<32x128xbf16>
    %766 = arith.truncf %764 : vector<16x32xf32> to vector<16x32xbf16>
    %cst_249 = arith.constant dense<0.000000e+00> : vector<16x128xf32>
    %767 = tpu.matmul %766, %765, %cst_249 {dimension_numbers = #tpu.dot_dimension_numbers<[1], [0], [0], [1], [0, 0, 1, 1], [], []>} : vector<16x32xbf16>, vector<32x128xbf16>, vector<16x128xf32> -> vector<16x128xf32>
    %768 = arith.addf %743, %767 : vector<16x128xf32>
    %769 = vector.extract_strided_slice %686 {offsets = [0, 96], sizes = [16, 32], strides = [1, 1]} : vector<16x128xf32> to vector<16x32xf32>
    %770 = arith.truncf %769 : vector<16x32xf32> to vector<16x32xbf16>
    %771 = vector.extract_strided_slice %690 {offsets = [0, 96], sizes = [16, 32], strides = [1, 1]} : vector<16x128xf32> to vector<16x32xf32>
    %772 = arith.truncf %771 : vector<16x32xf32> to vector<16x32xbf16>
    %cst_250 = arith.constant dense<0.000000e+00> : vector<16x16xf32>
    %773 = tpu.matmul %770, %772, %cst_250 {dimension_numbers = #tpu.dot_dimension_numbers<[1], [1], [0], [0], [0, 0, 1, 0], [], []>} : vector<16x32xbf16>, vector<16x32xbf16>, vector<16x16xf32> -> vector<16x16xf32>
    %cst_251 = arith.constant -1.000000e+30 : f32
    %774 = vector.broadcast %cst_251 : f32 to vector<16x16xf32>
    %775 = arith.select %14, %773, %774 : vector<16x16xi1>, vector<16x16xf32>
    %cst_252 = arith.constant dense<0xFF800000> : vector<16xf32>
    %776 = vector.multi_reduction <maximumf>, %775, %cst_252 [1] : vector<16x16xf32> to vector<16xf32>
    %777 = vector.shape_cast %776 : vector<16xf32> to vector<16x1xf32>
    %778 = vector.broadcast %777 : vector<16x1xf32> to vector<16x16xf32>
    %779 = arith.subf %775, %778 : vector<16x16xf32>
    %780 = math.exp %779 : vector<16x16xf32>
    %cst_253 = arith.constant dense<0.000000e+00> : vector<16xf32>
    %781 = vector.multi_reduction <add>, %780, %cst_253 [1] : vector<16x16xf32> to vector<16xf32>
    %782 = vector.shape_cast %781 : vector<16xf32> to vector<16x1xf32>
    %783 = tpu.reciprocal %782 {approx = true} : vector<16x1xf32> -> vector<16x1xf32>
    %784 = vector.broadcast %783 : vector<16x1xf32> to vector<16x16xf32>
    %785 = arith.mulf %780, %784 : vector<16x16xf32>
    %786 = arith.truncf %785 : vector<16x16xf32> to vector<16x16xbf16>
    %787 = vector.extract_strided_slice %694 {offsets = [0, 96], sizes = [16, 32], strides = [1, 1]} : vector<16x128xf32> to vector<16x32xf32>
    %788 = arith.truncf %787 : vector<16x32xf32> to vector<16x32xbf16>
    %cst_254 = arith.constant dense<0.000000e+00> : vector<16x32xf32>
    %789 = tpu.matmul %786, %788, %cst_254 {dimension_numbers = #tpu.dot_dimension_numbers<[1], [0], [0], [1], [0, 0, 1, 1], [], []>} : vector<16x16xbf16>, vector<16x32xbf16>, vector<16x32xf32> -> vector<16x32xf32>
    %c96_255 = arith.constant 96 : index
    %c3328_256 = arith.constant 3328 : index
    %790 = vector.load %arg2[%c96_255, %c3328_256] : memref<128x5760xbf16, #tpu.memory_space<vmem>>, vector<32x128xbf16>
    %791 = arith.truncf %789 : vector<16x32xf32> to vector<16x32xbf16>
    %cst_257 = arith.constant dense<0.000000e+00> : vector<16x128xf32>
    %792 = tpu.matmul %791, %790, %cst_257 {dimension_numbers = #tpu.dot_dimension_numbers<[1], [0], [0], [1], [0, 0, 1, 1], [], []>} : vector<16x32xbf16>, vector<32x128xbf16>, vector<16x128xf32> -> vector<16x128xf32>
    %793 = arith.addf %768, %792 : vector<16x128xf32>
    %c48 = arith.constant 48 : index
    %c0_258 = arith.constant 0 : index
    %794 = vector.load %arg3[%c48, %c0_258] : memref<80x128xf32, #tpu.memory_space<vmem>>, vector<1x128xf32>
    %795 = vector.broadcast %794 : vector<1x128xf32> to vector<16x128xf32>
    %796 = arith.addf %793, %795 : vector<16x128xf32>
    %797 = arith.addf %679, %796 : vector<16x128xf32>
    %cst_259 = arith.constant dense<0.000000e+00> : vector<16xf32>
    %798 = vector.multi_reduction <add>, %797, %cst_259 [1] : vector<16x128xf32> to vector<16xf32>
    %799 = vector.shape_cast %798 : vector<16xf32> to vector<16x1xf32>
    %cst_260 = arith.constant 1.280000e+02 : f32
    %800 = vector.broadcast %cst_260 : f32 to vector<16x1xf32>
    %801 = arith.divf %799, %800 : vector<16x1xf32>
    %802 = vector.broadcast %801 : vector<16x1xf32> to vector<16x128xf32>
    %803 = arith.subf %797, %802 : vector<16x128xf32>
    %804 = arith.mulf %803, %803 : vector<16x128xf32>
    %cst_261 = arith.constant dense<0.000000e+00> : vector<16xf32>
    %805 = vector.multi_reduction <add>, %804, %cst_261 [1] : vector<16x128xf32> to vector<16xf32>
    %806 = vector.shape_cast %805 : vector<16xf32> to vector<16x1xf32>
    %cst_262 = arith.constant 1.280000e+02 : f32
    %807 = vector.broadcast %cst_262 : f32 to vector<16x1xf32>
    %808 = arith.divf %806, %807 : vector<16x1xf32>
    %809 = vector.broadcast %801 : vector<16x1xf32> to vector<16x128xf32>
    %810 = arith.subf %797, %809 : vector<16x128xf32>
    %cst_263 = arith.constant 9.99999974E-6 : f32
    %811 = vector.broadcast %cst_263 : f32 to vector<16x1xf32>
    %812 = arith.addf %808, %811 : vector<16x1xf32>
    %813 = math.rsqrt %812 : vector<16x1xf32>
    %814 = vector.broadcast %813 : vector<16x1xf32> to vector<16x128xf32>
    %815 = arith.mulf %810, %814 : vector<16x128xf32>
    %c49 = arith.constant 49 : index
    %c0_264 = arith.constant 0 : index
    %816 = vector.load %arg3[%c49, %c0_264] : memref<80x128xf32, #tpu.memory_space<vmem>>, vector<1x128xf32>
    %817 = vector.broadcast %816 : vector<1x128xf32> to vector<16x128xf32>
    %818 = arith.mulf %815, %817 : vector<16x128xf32>
    %c50 = arith.constant 50 : index
    %c0_265 = arith.constant 0 : index
    %819 = vector.load %arg3[%c50, %c0_265] : memref<80x128xf32, #tpu.memory_space<vmem>>, vector<1x128xf32>
    %820 = vector.broadcast %819 : vector<1x128xf32> to vector<16x128xf32>
    %821 = arith.addf %818, %820 : vector<16x128xf32>
    %c0_266 = arith.constant 0 : index
    %c3456 = arith.constant 3456 : index
    %822 = vector.load %arg2[%c0_266, %c3456] : memref<128x5760xbf16, #tpu.memory_space<vmem>>, vector<128x128xbf16>
    %823 = arith.truncf %821 : vector<16x128xf32> to vector<16x128xbf16>
    %cst_267 = arith.constant dense<0.000000e+00> : vector<16x128xf32>
    %824 = tpu.matmul %823, %822, %cst_267 {dimension_numbers = #tpu.dot_dimension_numbers<[1], [0], [0], [1], [0, 0, 1, 1], [], []>} : vector<16x128xbf16>, vector<128x128xbf16>, vector<16x128xf32> -> vector<16x128xf32>
    %c51 = arith.constant 51 : index
    %c0_268 = arith.constant 0 : index
    %825 = vector.load %arg3[%c51, %c0_268] : memref<80x128xf32, #tpu.memory_space<vmem>>, vector<1x128xf32>
    %826 = vector.broadcast %825 : vector<1x128xf32> to vector<16x128xf32>
    %827 = arith.addf %824, %826 : vector<16x128xf32>
    %cst_269 = arith.constant 0.000000e+00 : f32
    %828 = vector.broadcast %cst_269 : f32 to vector<16x128xf32>
    %829 = arith.maximumf %827, %828 : vector<16x128xf32>
    %c0_270 = arith.constant 0 : index
    %c3584 = arith.constant 3584 : index
    %830 = vector.load %arg2[%c0_270, %c3584] : memref<128x5760xbf16, #tpu.memory_space<vmem>>, vector<128x128xbf16>
    %831 = arith.truncf %829 : vector<16x128xf32> to vector<16x128xbf16>
    %cst_271 = arith.constant dense<0.000000e+00> : vector<16x128xf32>
    %832 = tpu.matmul %831, %830, %cst_271 {dimension_numbers = #tpu.dot_dimension_numbers<[1], [0], [0], [1], [0, 0, 1, 1], [], []>} : vector<16x128xbf16>, vector<128x128xbf16>, vector<16x128xf32> -> vector<16x128xf32>
    %833 = arith.addf %821, %832 : vector<16x128xf32>
    %c52 = arith.constant 52 : index
    %c0_272 = arith.constant 0 : index
    %834 = vector.load %arg3[%c52, %c0_272] : memref<80x128xf32, #tpu.memory_space<vmem>>, vector<1x128xf32>
    %835 = vector.broadcast %834 : vector<1x128xf32> to vector<16x128xf32>
    %836 = arith.addf %833, %835 : vector<16x128xf32>
    %cst_273 = arith.constant dense<0.000000e+00> : vector<16xf32>
    %837 = vector.multi_reduction <add>, %836, %cst_273 [1] : vector<16x128xf32> to vector<16xf32>
    %838 = vector.shape_cast %837 : vector<16xf32> to vector<16x1xf32>
    %cst_274 = arith.constant 1.280000e+02 : f32
    %839 = vector.broadcast %cst_274 : f32 to vector<16x1xf32>
    %840 = arith.divf %838, %839 : vector<16x1xf32>
    %841 = vector.broadcast %840 : vector<16x1xf32> to vector<16x128xf32>
    %842 = arith.subf %836, %841 : vector<16x128xf32>
    %843 = arith.mulf %842, %842 : vector<16x128xf32>
    %cst_275 = arith.constant dense<0.000000e+00> : vector<16xf32>
    %844 = vector.multi_reduction <add>, %843, %cst_275 [1] : vector<16x128xf32> to vector<16xf32>
    %845 = vector.shape_cast %844 : vector<16xf32> to vector<16x1xf32>
    %cst_276 = arith.constant 1.280000e+02 : f32
    %846 = vector.broadcast %cst_276 : f32 to vector<16x1xf32>
    %847 = arith.divf %845, %846 : vector<16x1xf32>
    %848 = vector.broadcast %840 : vector<16x1xf32> to vector<16x128xf32>
    %849 = arith.subf %836, %848 : vector<16x128xf32>
    %cst_277 = arith.constant 9.99999974E-6 : f32
    %850 = vector.broadcast %cst_277 : f32 to vector<16x1xf32>
    %851 = arith.addf %847, %850 : vector<16x1xf32>
    %852 = math.rsqrt %851 : vector<16x1xf32>
    %853 = vector.broadcast %852 : vector<16x1xf32> to vector<16x128xf32>
    %854 = arith.mulf %849, %853 : vector<16x128xf32>
    %c53 = arith.constant 53 : index
    %c0_278 = arith.constant 0 : index
    %855 = vector.load %arg3[%c53, %c0_278] : memref<80x128xf32, #tpu.memory_space<vmem>>, vector<1x128xf32>
    %856 = vector.broadcast %855 : vector<1x128xf32> to vector<16x128xf32>
    %857 = arith.mulf %854, %856 : vector<16x128xf32>
    %c54 = arith.constant 54 : index
    %c0_279 = arith.constant 0 : index
    %858 = vector.load %arg3[%c54, %c0_279] : memref<80x128xf32, #tpu.memory_space<vmem>>, vector<1x128xf32>
    %859 = vector.broadcast %858 : vector<1x128xf32> to vector<16x128xf32>
    %860 = arith.addf %857, %859 : vector<16x128xf32>
    %c0_280 = arith.constant 0 : index
    %c4480 = arith.constant 4480 : index
    %861 = vector.load %arg2[%c0_280, %c4480] : memref<128x5760xbf16, #tpu.memory_space<vmem>>, vector<128x128xbf16>
    %862 = arith.truncf %559 : vector<16x128xf32> to vector<16x128xbf16>
    %cst_281 = arith.constant dense<0.000000e+00> : vector<16x128xf32>
    %863 = tpu.matmul %862, %861, %cst_281 {dimension_numbers = #tpu.dot_dimension_numbers<[1], [0], [0], [1], [0, 0, 1, 1], [], []>} : vector<16x128xbf16>, vector<128x128xbf16>, vector<16x128xf32> -> vector<16x128xf32>
    %c65 = arith.constant 65 : index
    %c0_282 = arith.constant 0 : index
    %864 = vector.load %arg3[%c65, %c0_282] : memref<80x128xf32, #tpu.memory_space<vmem>>, vector<1x128xf32>
    %865 = vector.broadcast %864 : vector<1x128xf32> to vector<16x128xf32>
    %866 = arith.addf %863, %865 : vector<16x128xf32>
    %c0_283 = arith.constant 0 : index
    %c4608 = arith.constant 4608 : index
    %867 = vector.load %arg2[%c0_283, %c4608] : memref<128x5760xbf16, #tpu.memory_space<vmem>>, vector<128x256xbf16>
    %868 = arith.truncf %860 : vector<16x128xf32> to vector<16x128xbf16>
    %cst_284 = arith.constant dense<0.000000e+00> : vector<16x256xf32>
    %869 = tpu.matmul %868, %867, %cst_284 {dimension_numbers = #tpu.dot_dimension_numbers<[1], [0], [0], [1], [0, 0, 1, 1], [], []>} : vector<16x128xbf16>, vector<128x256xbf16>, vector<16x256xf32> -> vector<16x256xf32>
    %870 = vector.extract_strided_slice %869 {offsets = [0, 0], sizes = [16, 128], strides = [1, 1]} : vector<16x256xf32> to vector<16x128xf32>
    %c66 = arith.constant 66 : index
    %c0_285 = arith.constant 0 : index
    %871 = vector.load %arg3[%c66, %c0_285] : memref<80x128xf32, #tpu.memory_space<vmem>>, vector<1x128xf32>
    %872 = vector.broadcast %871 : vector<1x128xf32> to vector<16x128xf32>
    %873 = arith.addf %870, %872 : vector<16x128xf32>
    %874 = vector.extract_strided_slice %869 {offsets = [0, 128], sizes = [16, 128], strides = [1, 1]} : vector<16x256xf32> to vector<16x128xf32>
    %c67 = arith.constant 67 : index
    %c0_286 = arith.constant 0 : index
    %875 = vector.load %arg3[%c67, %c0_286] : memref<80x128xf32, #tpu.memory_space<vmem>>, vector<1x128xf32>
    %876 = vector.broadcast %875 : vector<1x128xf32> to vector<16x128xf32>
    %877 = arith.addf %874, %876 : vector<16x128xf32>
    %878 = vector.extract_strided_slice %866 {offsets = [0, 0], sizes = [16, 32], strides = [1, 1]} : vector<16x128xf32> to vector<16x32xf32>
    %879 = arith.truncf %878 : vector<16x32xf32> to vector<16x32xbf16>
    %880 = vector.extract_strided_slice %873 {offsets = [0, 0], sizes = [16, 32], strides = [1, 1]} : vector<16x128xf32> to vector<16x32xf32>
    %881 = arith.truncf %880 : vector<16x32xf32> to vector<16x32xbf16>
    %cst_287 = arith.constant dense<0.000000e+00> : vector<16x16xf32>
    %882 = tpu.matmul %879, %881, %cst_287 {dimension_numbers = #tpu.dot_dimension_numbers<[1], [1], [0], [0], [0, 0, 1, 0], [], []>} : vector<16x32xbf16>, vector<16x32xbf16>, vector<16x16xf32> -> vector<16x16xf32>
    %cst_288 = arith.constant -1.000000e+30 : f32
    %883 = vector.broadcast %cst_288 : f32 to vector<16x16xf32>
    %884 = arith.select %44, %882, %883 : vector<16x16xi1>, vector<16x16xf32>
    %cst_289 = arith.constant dense<0xFF800000> : vector<16xf32>
    %885 = vector.multi_reduction <maximumf>, %884, %cst_289 [1] : vector<16x16xf32> to vector<16xf32>
    %886 = vector.shape_cast %885 : vector<16xf32> to vector<16x1xf32>
    %887 = vector.broadcast %886 : vector<16x1xf32> to vector<16x16xf32>
    %888 = arith.subf %884, %887 : vector<16x16xf32>
    %889 = math.exp %888 : vector<16x16xf32>
    %cst_290 = arith.constant dense<0.000000e+00> : vector<16xf32>
    %890 = vector.multi_reduction <add>, %889, %cst_290 [1] : vector<16x16xf32> to vector<16xf32>
    %891 = vector.shape_cast %890 : vector<16xf32> to vector<16x1xf32>
    %892 = tpu.reciprocal %891 {approx = true} : vector<16x1xf32> -> vector<16x1xf32>
    %893 = vector.broadcast %892 : vector<16x1xf32> to vector<16x16xf32>
    %894 = arith.mulf %889, %893 : vector<16x16xf32>
    %895 = arith.truncf %894 : vector<16x16xf32> to vector<16x16xbf16>
    %896 = vector.extract_strided_slice %877 {offsets = [0, 0], sizes = [16, 32], strides = [1, 1]} : vector<16x128xf32> to vector<16x32xf32>
    %897 = arith.truncf %896 : vector<16x32xf32> to vector<16x32xbf16>
    %cst_291 = arith.constant dense<0.000000e+00> : vector<16x32xf32>
    %898 = tpu.matmul %895, %897, %cst_291 {dimension_numbers = #tpu.dot_dimension_numbers<[1], [0], [0], [1], [0, 0, 1, 1], [], []>} : vector<16x16xbf16>, vector<16x32xbf16>, vector<16x32xf32> -> vector<16x32xf32>
    %c0_292 = arith.constant 0 : index
    %c4864 = arith.constant 4864 : index
    %899 = vector.load %arg2[%c0_292, %c4864] : memref<128x5760xbf16, #tpu.memory_space<vmem>>, vector<32x128xbf16>
    %900 = arith.truncf %898 : vector<16x32xf32> to vector<16x32xbf16>
    %cst_293 = arith.constant dense<0.000000e+00> : vector<16x128xf32>
    %901 = tpu.matmul %900, %899, %cst_293 {dimension_numbers = #tpu.dot_dimension_numbers<[1], [0], [0], [1], [0, 0, 1, 1], [], []>} : vector<16x32xbf16>, vector<32x128xbf16>, vector<16x128xf32> -> vector<16x128xf32>
    %902 = vector.extract_strided_slice %866 {offsets = [0, 32], sizes = [16, 32], strides = [1, 1]} : vector<16x128xf32> to vector<16x32xf32>
    %903 = arith.truncf %902 : vector<16x32xf32> to vector<16x32xbf16>
    %904 = vector.extract_strided_slice %873 {offsets = [0, 32], sizes = [16, 32], strides = [1, 1]} : vector<16x128xf32> to vector<16x32xf32>
    %905 = arith.truncf %904 : vector<16x32xf32> to vector<16x32xbf16>
    %cst_294 = arith.constant dense<0.000000e+00> : vector<16x16xf32>
    %906 = tpu.matmul %903, %905, %cst_294 {dimension_numbers = #tpu.dot_dimension_numbers<[1], [1], [0], [0], [0, 0, 1, 0], [], []>} : vector<16x32xbf16>, vector<16x32xbf16>, vector<16x16xf32> -> vector<16x16xf32>
    %cst_295 = arith.constant -1.000000e+30 : f32
    %907 = vector.broadcast %cst_295 : f32 to vector<16x16xf32>
    %908 = arith.select %44, %906, %907 : vector<16x16xi1>, vector<16x16xf32>
    %cst_296 = arith.constant dense<0xFF800000> : vector<16xf32>
    %909 = vector.multi_reduction <maximumf>, %908, %cst_296 [1] : vector<16x16xf32> to vector<16xf32>
    %910 = vector.shape_cast %909 : vector<16xf32> to vector<16x1xf32>
    %911 = vector.broadcast %910 : vector<16x1xf32> to vector<16x16xf32>
    %912 = arith.subf %908, %911 : vector<16x16xf32>
    %913 = math.exp %912 : vector<16x16xf32>
    %cst_297 = arith.constant dense<0.000000e+00> : vector<16xf32>
    %914 = vector.multi_reduction <add>, %913, %cst_297 [1] : vector<16x16xf32> to vector<16xf32>
    %915 = vector.shape_cast %914 : vector<16xf32> to vector<16x1xf32>
    %916 = tpu.reciprocal %915 {approx = true} : vector<16x1xf32> -> vector<16x1xf32>
    %917 = vector.broadcast %916 : vector<16x1xf32> to vector<16x16xf32>
    %918 = arith.mulf %913, %917 : vector<16x16xf32>
    %919 = arith.truncf %918 : vector<16x16xf32> to vector<16x16xbf16>
    %920 = vector.extract_strided_slice %877 {offsets = [0, 32], sizes = [16, 32], strides = [1, 1]} : vector<16x128xf32> to vector<16x32xf32>
    %921 = arith.truncf %920 : vector<16x32xf32> to vector<16x32xbf16>
    %cst_298 = arith.constant dense<0.000000e+00> : vector<16x32xf32>
    %922 = tpu.matmul %919, %921, %cst_298 {dimension_numbers = #tpu.dot_dimension_numbers<[1], [0], [0], [1], [0, 0, 1, 1], [], []>} : vector<16x16xbf16>, vector<16x32xbf16>, vector<16x32xf32> -> vector<16x32xf32>
    %c32_299 = arith.constant 32 : index
    %c4864_300 = arith.constant 4864 : index
    %923 = vector.load %arg2[%c32_299, %c4864_300] : memref<128x5760xbf16, #tpu.memory_space<vmem>>, vector<32x128xbf16>
    %924 = arith.truncf %922 : vector<16x32xf32> to vector<16x32xbf16>
    %cst_301 = arith.constant dense<0.000000e+00> : vector<16x128xf32>
    %925 = tpu.matmul %924, %923, %cst_301 {dimension_numbers = #tpu.dot_dimension_numbers<[1], [0], [0], [1], [0, 0, 1, 1], [], []>} : vector<16x32xbf16>, vector<32x128xbf16>, vector<16x128xf32> -> vector<16x128xf32>
    %926 = arith.addf %901, %925 : vector<16x128xf32>
    %927 = vector.extract_strided_slice %866 {offsets = [0, 64], sizes = [16, 32], strides = [1, 1]} : vector<16x128xf32> to vector<16x32xf32>
    %928 = arith.truncf %927 : vector<16x32xf32> to vector<16x32xbf16>
    %929 = vector.extract_strided_slice %873 {offsets = [0, 64], sizes = [16, 32], strides = [1, 1]} : vector<16x128xf32> to vector<16x32xf32>
    %930 = arith.truncf %929 : vector<16x32xf32> to vector<16x32xbf16>
    %cst_302 = arith.constant dense<0.000000e+00> : vector<16x16xf32>
    %931 = tpu.matmul %928, %930, %cst_302 {dimension_numbers = #tpu.dot_dimension_numbers<[1], [1], [0], [0], [0, 0, 1, 0], [], []>} : vector<16x32xbf16>, vector<16x32xbf16>, vector<16x16xf32> -> vector<16x16xf32>
    %cst_303 = arith.constant -1.000000e+30 : f32
    %932 = vector.broadcast %cst_303 : f32 to vector<16x16xf32>
    %933 = arith.select %44, %931, %932 : vector<16x16xi1>, vector<16x16xf32>
    %cst_304 = arith.constant dense<0xFF800000> : vector<16xf32>
    %934 = vector.multi_reduction <maximumf>, %933, %cst_304 [1] : vector<16x16xf32> to vector<16xf32>
    %935 = vector.shape_cast %934 : vector<16xf32> to vector<16x1xf32>
    %936 = vector.broadcast %935 : vector<16x1xf32> to vector<16x16xf32>
    %937 = arith.subf %933, %936 : vector<16x16xf32>
    %938 = math.exp %937 : vector<16x16xf32>
    %cst_305 = arith.constant dense<0.000000e+00> : vector<16xf32>
    %939 = vector.multi_reduction <add>, %938, %cst_305 [1] : vector<16x16xf32> to vector<16xf32>
    %940 = vector.shape_cast %939 : vector<16xf32> to vector<16x1xf32>
    %941 = tpu.reciprocal %940 {approx = true} : vector<16x1xf32> -> vector<16x1xf32>
    %942 = vector.broadcast %941 : vector<16x1xf32> to vector<16x16xf32>
    %943 = arith.mulf %938, %942 : vector<16x16xf32>
    %944 = arith.truncf %943 : vector<16x16xf32> to vector<16x16xbf16>
    %945 = vector.extract_strided_slice %877 {offsets = [0, 64], sizes = [16, 32], strides = [1, 1]} : vector<16x128xf32> to vector<16x32xf32>
    %946 = arith.truncf %945 : vector<16x32xf32> to vector<16x32xbf16>
    %cst_306 = arith.constant dense<0.000000e+00> : vector<16x32xf32>
    %947 = tpu.matmul %944, %946, %cst_306 {dimension_numbers = #tpu.dot_dimension_numbers<[1], [0], [0], [1], [0, 0, 1, 1], [], []>} : vector<16x16xbf16>, vector<16x32xbf16>, vector<16x32xf32> -> vector<16x32xf32>
    %c64_307 = arith.constant 64 : index
    %c4864_308 = arith.constant 4864 : index
    %948 = vector.load %arg2[%c64_307, %c4864_308] : memref<128x5760xbf16, #tpu.memory_space<vmem>>, vector<32x128xbf16>
    %949 = arith.truncf %947 : vector<16x32xf32> to vector<16x32xbf16>
    %cst_309 = arith.constant dense<0.000000e+00> : vector<16x128xf32>
    %950 = tpu.matmul %949, %948, %cst_309 {dimension_numbers = #tpu.dot_dimension_numbers<[1], [0], [0], [1], [0, 0, 1, 1], [], []>} : vector<16x32xbf16>, vector<32x128xbf16>, vector<16x128xf32> -> vector<16x128xf32>
    %951 = arith.addf %926, %950 : vector<16x128xf32>
    %952 = vector.extract_strided_slice %866 {offsets = [0, 96], sizes = [16, 32], strides = [1, 1]} : vector<16x128xf32> to vector<16x32xf32>
    %953 = arith.truncf %952 : vector<16x32xf32> to vector<16x32xbf16>
    %954 = vector.extract_strided_slice %873 {offsets = [0, 96], sizes = [16, 32], strides = [1, 1]} : vector<16x128xf32> to vector<16x32xf32>
    %955 = arith.truncf %954 : vector<16x32xf32> to vector<16x32xbf16>
    %cst_310 = arith.constant dense<0.000000e+00> : vector<16x16xf32>
    %956 = tpu.matmul %953, %955, %cst_310 {dimension_numbers = #tpu.dot_dimension_numbers<[1], [1], [0], [0], [0, 0, 1, 0], [], []>} : vector<16x32xbf16>, vector<16x32xbf16>, vector<16x16xf32> -> vector<16x16xf32>
    %cst_311 = arith.constant -1.000000e+30 : f32
    %957 = vector.broadcast %cst_311 : f32 to vector<16x16xf32>
    %958 = arith.select %44, %956, %957 : vector<16x16xi1>, vector<16x16xf32>
    %cst_312 = arith.constant dense<0xFF800000> : vector<16xf32>
    %959 = vector.multi_reduction <maximumf>, %958, %cst_312 [1] : vector<16x16xf32> to vector<16xf32>
    %960 = vector.shape_cast %959 : vector<16xf32> to vector<16x1xf32>
    %961 = vector.broadcast %960 : vector<16x1xf32> to vector<16x16xf32>
    %962 = arith.subf %958, %961 : vector<16x16xf32>
    %963 = math.exp %962 : vector<16x16xf32>
    %cst_313 = arith.constant dense<0.000000e+00> : vector<16xf32>
    %964 = vector.multi_reduction <add>, %963, %cst_313 [1] : vector<16x16xf32> to vector<16xf32>
    %965 = vector.shape_cast %964 : vector<16xf32> to vector<16x1xf32>
    %966 = tpu.reciprocal %965 {approx = true} : vector<16x1xf32> -> vector<16x1xf32>
    %967 = vector.broadcast %966 : vector<16x1xf32> to vector<16x16xf32>
    %968 = arith.mulf %963, %967 : vector<16x16xf32>
    %969 = arith.truncf %968 : vector<16x16xf32> to vector<16x16xbf16>
    %970 = vector.extract_strided_slice %877 {offsets = [0, 96], sizes = [16, 32], strides = [1, 1]} : vector<16x128xf32> to vector<16x32xf32>
    %971 = arith.truncf %970 : vector<16x32xf32> to vector<16x32xbf16>
    %cst_314 = arith.constant dense<0.000000e+00> : vector<16x32xf32>
    %972 = tpu.matmul %969, %971, %cst_314 {dimension_numbers = #tpu.dot_dimension_numbers<[1], [0], [0], [1], [0, 0, 1, 1], [], []>} : vector<16x16xbf16>, vector<16x32xbf16>, vector<16x32xf32> -> vector<16x32xf32>
    %c96_315 = arith.constant 96 : index
    %c4864_316 = arith.constant 4864 : index
    %973 = vector.load %arg2[%c96_315, %c4864_316] : memref<128x5760xbf16, #tpu.memory_space<vmem>>, vector<32x128xbf16>
    %974 = arith.truncf %972 : vector<16x32xf32> to vector<16x32xbf16>
    %cst_317 = arith.constant dense<0.000000e+00> : vector<16x128xf32>
    %975 = tpu.matmul %974, %973, %cst_317 {dimension_numbers = #tpu.dot_dimension_numbers<[1], [0], [0], [1], [0, 0, 1, 1], [], []>} : vector<16x32xbf16>, vector<32x128xbf16>, vector<16x128xf32> -> vector<16x128xf32>
    %976 = arith.addf %951, %975 : vector<16x128xf32>
    %c68 = arith.constant 68 : index
    %c0_318 = arith.constant 0 : index
    %977 = vector.load %arg3[%c68, %c0_318] : memref<80x128xf32, #tpu.memory_space<vmem>>, vector<1x128xf32>
    %978 = vector.broadcast %977 : vector<1x128xf32> to vector<16x128xf32>
    %979 = arith.addf %976, %978 : vector<16x128xf32>
    %980 = arith.addf %559, %979 : vector<16x128xf32>
    %c0_319 = arith.constant 0 : index
    %c3712 = arith.constant 3712 : index
    %981 = vector.load %arg2[%c0_319, %c3712] : memref<128x5760xbf16, #tpu.memory_space<vmem>>, vector<128x384xbf16>
    %982 = arith.truncf %980 : vector<16x128xf32> to vector<16x128xbf16>
    %cst_320 = arith.constant dense<0.000000e+00> : vector<16x384xf32>
    %983 = tpu.matmul %982, %981, %cst_320 {dimension_numbers = #tpu.dot_dimension_numbers<[1], [0], [0], [1], [0, 0, 1, 1], [], []>} : vector<16x128xbf16>, vector<128x384xbf16>, vector<16x384xf32> -> vector<16x384xf32>
    %984 = vector.extract_strided_slice %983 {offsets = [0, 0], sizes = [16, 128], strides = [1, 1]} : vector<16x384xf32> to vector<16x128xf32>
    %c55 = arith.constant 55 : index
    %c0_321 = arith.constant 0 : index
    %985 = vector.load %arg3[%c55, %c0_321] : memref<80x128xf32, #tpu.memory_space<vmem>>, vector<1x128xf32>
    %986 = vector.broadcast %985 : vector<1x128xf32> to vector<16x128xf32>
    %987 = arith.addf %984, %986 : vector<16x128xf32>
    %988 = vector.extract_strided_slice %983 {offsets = [0, 128], sizes = [16, 128], strides = [1, 1]} : vector<16x384xf32> to vector<16x128xf32>
    %c56 = arith.constant 56 : index
    %c0_322 = arith.constant 0 : index
    %989 = vector.load %arg3[%c56, %c0_322] : memref<80x128xf32, #tpu.memory_space<vmem>>, vector<1x128xf32>
    %990 = vector.broadcast %989 : vector<1x128xf32> to vector<16x128xf32>
    %991 = arith.addf %988, %990 : vector<16x128xf32>
    %992 = vector.extract_strided_slice %983 {offsets = [0, 256], sizes = [16, 128], strides = [1, 1]} : vector<16x384xf32> to vector<16x128xf32>
    %c57 = arith.constant 57 : index
    %c0_323 = arith.constant 0 : index
    %993 = vector.load %arg3[%c57, %c0_323] : memref<80x128xf32, #tpu.memory_space<vmem>>, vector<1x128xf32>
    %994 = vector.broadcast %993 : vector<1x128xf32> to vector<16x128xf32>
    %995 = arith.addf %992, %994 : vector<16x128xf32>
    %996 = vector.extract_strided_slice %987 {offsets = [0, 0], sizes = [16, 32], strides = [1, 1]} : vector<16x128xf32> to vector<16x32xf32>
    %997 = arith.truncf %996 : vector<16x32xf32> to vector<16x32xbf16>
    %998 = vector.extract_strided_slice %991 {offsets = [0, 0], sizes = [16, 32], strides = [1, 1]} : vector<16x128xf32> to vector<16x32xf32>
    %999 = arith.truncf %998 : vector<16x32xf32> to vector<16x32xbf16>
    %cst_324 = arith.constant dense<0.000000e+00> : vector<16x16xf32>
    %1000 = tpu.matmul %997, %999, %cst_324 {dimension_numbers = #tpu.dot_dimension_numbers<[1], [1], [0], [0], [0, 0, 1, 0], [], []>} : vector<16x32xbf16>, vector<16x32xbf16>, vector<16x16xf32> -> vector<16x16xf32>
    %cst_325 = arith.constant -1.000000e+30 : f32
    %1001 = vector.broadcast %cst_325 : f32 to vector<16x16xf32>
    %1002 = arith.select %29, %1000, %1001 : vector<16x16xi1>, vector<16x16xf32>
    %cst_326 = arith.constant dense<0xFF800000> : vector<16xf32>
    %1003 = vector.multi_reduction <maximumf>, %1002, %cst_326 [1] : vector<16x16xf32> to vector<16xf32>
    %1004 = vector.shape_cast %1003 : vector<16xf32> to vector<16x1xf32>
    %1005 = vector.broadcast %1004 : vector<16x1xf32> to vector<16x16xf32>
    %1006 = arith.subf %1002, %1005 : vector<16x16xf32>
    %1007 = math.exp %1006 : vector<16x16xf32>
    %cst_327 = arith.constant dense<0.000000e+00> : vector<16xf32>
    %1008 = vector.multi_reduction <add>, %1007, %cst_327 [1] : vector<16x16xf32> to vector<16xf32>
    %1009 = vector.shape_cast %1008 : vector<16xf32> to vector<16x1xf32>
    %1010 = tpu.reciprocal %1009 {approx = true} : vector<16x1xf32> -> vector<16x1xf32>
    %1011 = vector.broadcast %1010 : vector<16x1xf32> to vector<16x16xf32>
    %1012 = arith.mulf %1007, %1011 : vector<16x16xf32>
    %1013 = arith.truncf %1012 : vector<16x16xf32> to vector<16x16xbf16>
    %1014 = vector.extract_strided_slice %995 {offsets = [0, 0], sizes = [16, 32], strides = [1, 1]} : vector<16x128xf32> to vector<16x32xf32>
    %1015 = arith.truncf %1014 : vector<16x32xf32> to vector<16x32xbf16>
    %cst_328 = arith.constant dense<0.000000e+00> : vector<16x32xf32>
    %1016 = tpu.matmul %1013, %1015, %cst_328 {dimension_numbers = #tpu.dot_dimension_numbers<[1], [0], [0], [1], [0, 0, 1, 1], [], []>} : vector<16x16xbf16>, vector<16x32xbf16>, vector<16x32xf32> -> vector<16x32xf32>
    %c0_329 = arith.constant 0 : index
    %c4096 = arith.constant 4096 : index
    %1017 = vector.load %arg2[%c0_329, %c4096] : memref<128x5760xbf16, #tpu.memory_space<vmem>>, vector<32x128xbf16>
    %1018 = arith.truncf %1016 : vector<16x32xf32> to vector<16x32xbf16>
    %cst_330 = arith.constant dense<0.000000e+00> : vector<16x128xf32>
    %1019 = tpu.matmul %1018, %1017, %cst_330 {dimension_numbers = #tpu.dot_dimension_numbers<[1], [0], [0], [1], [0, 0, 1, 1], [], []>} : vector<16x32xbf16>, vector<32x128xbf16>, vector<16x128xf32> -> vector<16x128xf32>
    %1020 = vector.extract_strided_slice %987 {offsets = [0, 32], sizes = [16, 32], strides = [1, 1]} : vector<16x128xf32> to vector<16x32xf32>
    %1021 = arith.truncf %1020 : vector<16x32xf32> to vector<16x32xbf16>
    %1022 = vector.extract_strided_slice %991 {offsets = [0, 32], sizes = [16, 32], strides = [1, 1]} : vector<16x128xf32> to vector<16x32xf32>
    %1023 = arith.truncf %1022 : vector<16x32xf32> to vector<16x32xbf16>
    %cst_331 = arith.constant dense<0.000000e+00> : vector<16x16xf32>
    %1024 = tpu.matmul %1021, %1023, %cst_331 {dimension_numbers = #tpu.dot_dimension_numbers<[1], [1], [0], [0], [0, 0, 1, 0], [], []>} : vector<16x32xbf16>, vector<16x32xbf16>, vector<16x16xf32> -> vector<16x16xf32>
    %cst_332 = arith.constant -1.000000e+30 : f32
    %1025 = vector.broadcast %cst_332 : f32 to vector<16x16xf32>
    %1026 = arith.select %29, %1024, %1025 : vector<16x16xi1>, vector<16x16xf32>
    %cst_333 = arith.constant dense<0xFF800000> : vector<16xf32>
    %1027 = vector.multi_reduction <maximumf>, %1026, %cst_333 [1] : vector<16x16xf32> to vector<16xf32>
    %1028 = vector.shape_cast %1027 : vector<16xf32> to vector<16x1xf32>
    %1029 = vector.broadcast %1028 : vector<16x1xf32> to vector<16x16xf32>
    %1030 = arith.subf %1026, %1029 : vector<16x16xf32>
    %1031 = math.exp %1030 : vector<16x16xf32>
    %cst_334 = arith.constant dense<0.000000e+00> : vector<16xf32>
    %1032 = vector.multi_reduction <add>, %1031, %cst_334 [1] : vector<16x16xf32> to vector<16xf32>
    %1033 = vector.shape_cast %1032 : vector<16xf32> to vector<16x1xf32>
    %1034 = tpu.reciprocal %1033 {approx = true} : vector<16x1xf32> -> vector<16x1xf32>
    %1035 = vector.broadcast %1034 : vector<16x1xf32> to vector<16x16xf32>
    %1036 = arith.mulf %1031, %1035 : vector<16x16xf32>
    %1037 = arith.truncf %1036 : vector<16x16xf32> to vector<16x16xbf16>
    %1038 = vector.extract_strided_slice %995 {offsets = [0, 32], sizes = [16, 32], strides = [1, 1]} : vector<16x128xf32> to vector<16x32xf32>
    %1039 = arith.truncf %1038 : vector<16x32xf32> to vector<16x32xbf16>
    %cst_335 = arith.constant dense<0.000000e+00> : vector<16x32xf32>
    %1040 = tpu.matmul %1037, %1039, %cst_335 {dimension_numbers = #tpu.dot_dimension_numbers<[1], [0], [0], [1], [0, 0, 1, 1], [], []>} : vector<16x16xbf16>, vector<16x32xbf16>, vector<16x32xf32> -> vector<16x32xf32>
    %c32_336 = arith.constant 32 : index
    %c4096_337 = arith.constant 4096 : index
    %1041 = vector.load %arg2[%c32_336, %c4096_337] : memref<128x5760xbf16, #tpu.memory_space<vmem>>, vector<32x128xbf16>
    %1042 = arith.truncf %1040 : vector<16x32xf32> to vector<16x32xbf16>
    %cst_338 = arith.constant dense<0.000000e+00> : vector<16x128xf32>
    %1043 = tpu.matmul %1042, %1041, %cst_338 {dimension_numbers = #tpu.dot_dimension_numbers<[1], [0], [0], [1], [0, 0, 1, 1], [], []>} : vector<16x32xbf16>, vector<32x128xbf16>, vector<16x128xf32> -> vector<16x128xf32>
    %1044 = arith.addf %1019, %1043 : vector<16x128xf32>
    %1045 = vector.extract_strided_slice %987 {offsets = [0, 64], sizes = [16, 32], strides = [1, 1]} : vector<16x128xf32> to vector<16x32xf32>
    %1046 = arith.truncf %1045 : vector<16x32xf32> to vector<16x32xbf16>
    %1047 = vector.extract_strided_slice %991 {offsets = [0, 64], sizes = [16, 32], strides = [1, 1]} : vector<16x128xf32> to vector<16x32xf32>
    %1048 = arith.truncf %1047 : vector<16x32xf32> to vector<16x32xbf16>
    %cst_339 = arith.constant dense<0.000000e+00> : vector<16x16xf32>
    %1049 = tpu.matmul %1046, %1048, %cst_339 {dimension_numbers = #tpu.dot_dimension_numbers<[1], [1], [0], [0], [0, 0, 1, 0], [], []>} : vector<16x32xbf16>, vector<16x32xbf16>, vector<16x16xf32> -> vector<16x16xf32>
    %cst_340 = arith.constant -1.000000e+30 : f32
    %1050 = vector.broadcast %cst_340 : f32 to vector<16x16xf32>
    %1051 = arith.select %29, %1049, %1050 : vector<16x16xi1>, vector<16x16xf32>
    %cst_341 = arith.constant dense<0xFF800000> : vector<16xf32>
    %1052 = vector.multi_reduction <maximumf>, %1051, %cst_341 [1] : vector<16x16xf32> to vector<16xf32>
    %1053 = vector.shape_cast %1052 : vector<16xf32> to vector<16x1xf32>
    %1054 = vector.broadcast %1053 : vector<16x1xf32> to vector<16x16xf32>
    %1055 = arith.subf %1051, %1054 : vector<16x16xf32>
    %1056 = math.exp %1055 : vector<16x16xf32>
    %cst_342 = arith.constant dense<0.000000e+00> : vector<16xf32>
    %1057 = vector.multi_reduction <add>, %1056, %cst_342 [1] : vector<16x16xf32> to vector<16xf32>
    %1058 = vector.shape_cast %1057 : vector<16xf32> to vector<16x1xf32>
    %1059 = tpu.reciprocal %1058 {approx = true} : vector<16x1xf32> -> vector<16x1xf32>
    %1060 = vector.broadcast %1059 : vector<16x1xf32> to vector<16x16xf32>
    %1061 = arith.mulf %1056, %1060 : vector<16x16xf32>
    %1062 = arith.truncf %1061 : vector<16x16xf32> to vector<16x16xbf16>
    %1063 = vector.extract_strided_slice %995 {offsets = [0, 64], sizes = [16, 32], strides = [1, 1]} : vector<16x128xf32> to vector<16x32xf32>
    %1064 = arith.truncf %1063 : vector<16x32xf32> to vector<16x32xbf16>
    %cst_343 = arith.constant dense<0.000000e+00> : vector<16x32xf32>
    %1065 = tpu.matmul %1062, %1064, %cst_343 {dimension_numbers = #tpu.dot_dimension_numbers<[1], [0], [0], [1], [0, 0, 1, 1], [], []>} : vector<16x16xbf16>, vector<16x32xbf16>, vector<16x32xf32> -> vector<16x32xf32>
    %c64_344 = arith.constant 64 : index
    %c4096_345 = arith.constant 4096 : index
    %1066 = vector.load %arg2[%c64_344, %c4096_345] : memref<128x5760xbf16, #tpu.memory_space<vmem>>, vector<32x128xbf16>
    %1067 = arith.truncf %1065 : vector<16x32xf32> to vector<16x32xbf16>
    %cst_346 = arith.constant dense<0.000000e+00> : vector<16x128xf32>
    %1068 = tpu.matmul %1067, %1066, %cst_346 {dimension_numbers = #tpu.dot_dimension_numbers<[1], [0], [0], [1], [0, 0, 1, 1], [], []>} : vector<16x32xbf16>, vector<32x128xbf16>, vector<16x128xf32> -> vector<16x128xf32>
    %1069 = arith.addf %1044, %1068 : vector<16x128xf32>
    %1070 = vector.extract_strided_slice %987 {offsets = [0, 96], sizes = [16, 32], strides = [1, 1]} : vector<16x128xf32> to vector<16x32xf32>
    %1071 = arith.truncf %1070 : vector<16x32xf32> to vector<16x32xbf16>
    %1072 = vector.extract_strided_slice %991 {offsets = [0, 96], sizes = [16, 32], strides = [1, 1]} : vector<16x128xf32> to vector<16x32xf32>
    %1073 = arith.truncf %1072 : vector<16x32xf32> to vector<16x32xbf16>
    %cst_347 = arith.constant dense<0.000000e+00> : vector<16x16xf32>
    %1074 = tpu.matmul %1071, %1073, %cst_347 {dimension_numbers = #tpu.dot_dimension_numbers<[1], [1], [0], [0], [0, 0, 1, 0], [], []>} : vector<16x32xbf16>, vector<16x32xbf16>, vector<16x16xf32> -> vector<16x16xf32>
    %cst_348 = arith.constant -1.000000e+30 : f32
    %1075 = vector.broadcast %cst_348 : f32 to vector<16x16xf32>
    %1076 = arith.select %29, %1074, %1075 : vector<16x16xi1>, vector<16x16xf32>
    %cst_349 = arith.constant dense<0xFF800000> : vector<16xf32>
    %1077 = vector.multi_reduction <maximumf>, %1076, %cst_349 [1] : vector<16x16xf32> to vector<16xf32>
    %1078 = vector.shape_cast %1077 : vector<16xf32> to vector<16x1xf32>
    %1079 = vector.broadcast %1078 : vector<16x1xf32> to vector<16x16xf32>
    %1080 = arith.subf %1076, %1079 : vector<16x16xf32>
    %1081 = math.exp %1080 : vector<16x16xf32>
    %cst_350 = arith.constant dense<0.000000e+00> : vector<16xf32>
    %1082 = vector.multi_reduction <add>, %1081, %cst_350 [1] : vector<16x16xf32> to vector<16xf32>
    %1083 = vector.shape_cast %1082 : vector<16xf32> to vector<16x1xf32>
    %1084 = tpu.reciprocal %1083 {approx = true} : vector<16x1xf32> -> vector<16x1xf32>
    %1085 = vector.broadcast %1084 : vector<16x1xf32> to vector<16x16xf32>
    %1086 = arith.mulf %1081, %1085 : vector<16x16xf32>
    %1087 = arith.truncf %1086 : vector<16x16xf32> to vector<16x16xbf16>
    %1088 = vector.extract_strided_slice %995 {offsets = [0, 96], sizes = [16, 32], strides = [1, 1]} : vector<16x128xf32> to vector<16x32xf32>
    %1089 = arith.truncf %1088 : vector<16x32xf32> to vector<16x32xbf16>
    %cst_351 = arith.constant dense<0.000000e+00> : vector<16x32xf32>
    %1090 = tpu.matmul %1087, %1089, %cst_351 {dimension_numbers = #tpu.dot_dimension_numbers<[1], [0], [0], [1], [0, 0, 1, 1], [], []>} : vector<16x16xbf16>, vector<16x32xbf16>, vector<16x32xf32> -> vector<16x32xf32>
    %c96_352 = arith.constant 96 : index
    %c4096_353 = arith.constant 4096 : index
    %1091 = vector.load %arg2[%c96_352, %c4096_353] : memref<128x5760xbf16, #tpu.memory_space<vmem>>, vector<32x128xbf16>
    %1092 = arith.truncf %1090 : vector<16x32xf32> to vector<16x32xbf16>
    %cst_354 = arith.constant dense<0.000000e+00> : vector<16x128xf32>
    %1093 = tpu.matmul %1092, %1091, %cst_354 {dimension_numbers = #tpu.dot_dimension_numbers<[1], [0], [0], [1], [0, 0, 1, 1], [], []>} : vector<16x32xbf16>, vector<32x128xbf16>, vector<16x128xf32> -> vector<16x128xf32>
    %1094 = arith.addf %1069, %1093 : vector<16x128xf32>
    %c58 = arith.constant 58 : index
    %c0_355 = arith.constant 0 : index
    %1095 = vector.load %arg3[%c58, %c0_355] : memref<80x128xf32, #tpu.memory_space<vmem>>, vector<1x128xf32>
    %1096 = vector.broadcast %1095 : vector<1x128xf32> to vector<16x128xf32>
    %1097 = arith.addf %1094, %1096 : vector<16x128xf32>
    %1098 = arith.addf %980, %1097 : vector<16x128xf32>
    %cst_356 = arith.constant dense<0.000000e+00> : vector<16xf32>
    %1099 = vector.multi_reduction <add>, %1098, %cst_356 [1] : vector<16x128xf32> to vector<16xf32>
    %1100 = vector.shape_cast %1099 : vector<16xf32> to vector<16x1xf32>
    %cst_357 = arith.constant 1.280000e+02 : f32
    %1101 = vector.broadcast %cst_357 : f32 to vector<16x1xf32>
    %1102 = arith.divf %1100, %1101 : vector<16x1xf32>
    %1103 = vector.broadcast %1102 : vector<16x1xf32> to vector<16x128xf32>
    %1104 = arith.subf %1098, %1103 : vector<16x128xf32>
    %1105 = arith.mulf %1104, %1104 : vector<16x128xf32>
    %cst_358 = arith.constant dense<0.000000e+00> : vector<16xf32>
    %1106 = vector.multi_reduction <add>, %1105, %cst_358 [1] : vector<16x128xf32> to vector<16xf32>
    %1107 = vector.shape_cast %1106 : vector<16xf32> to vector<16x1xf32>
    %cst_359 = arith.constant 1.280000e+02 : f32
    %1108 = vector.broadcast %cst_359 : f32 to vector<16x1xf32>
    %1109 = arith.divf %1107, %1108 : vector<16x1xf32>
    %1110 = vector.broadcast %1102 : vector<16x1xf32> to vector<16x128xf32>
    %1111 = arith.subf %1098, %1110 : vector<16x128xf32>
    %cst_360 = arith.constant 9.99999974E-6 : f32
    %1112 = vector.broadcast %cst_360 : f32 to vector<16x1xf32>
    %1113 = arith.addf %1109, %1112 : vector<16x1xf32>
    %1114 = math.rsqrt %1113 : vector<16x1xf32>
    %1115 = vector.broadcast %1114 : vector<16x1xf32> to vector<16x128xf32>
    %1116 = arith.mulf %1111, %1115 : vector<16x128xf32>
    %c59 = arith.constant 59 : index
    %c0_361 = arith.constant 0 : index
    %1117 = vector.load %arg3[%c59, %c0_361] : memref<80x128xf32, #tpu.memory_space<vmem>>, vector<1x128xf32>
    %1118 = vector.broadcast %1117 : vector<1x128xf32> to vector<16x128xf32>
    %1119 = arith.mulf %1116, %1118 : vector<16x128xf32>
    %c60 = arith.constant 60 : index
    %c0_362 = arith.constant 0 : index
    %1120 = vector.load %arg3[%c60, %c0_362] : memref<80x128xf32, #tpu.memory_space<vmem>>, vector<1x128xf32>
    %1121 = vector.broadcast %1120 : vector<1x128xf32> to vector<16x128xf32>
    %1122 = arith.addf %1119, %1121 : vector<16x128xf32>
    %c0_363 = arith.constant 0 : index
    %c4224 = arith.constant 4224 : index
    %1123 = vector.load %arg2[%c0_363, %c4224] : memref<128x5760xbf16, #tpu.memory_space<vmem>>, vector<128x128xbf16>
    %1124 = arith.truncf %1122 : vector<16x128xf32> to vector<16x128xbf16>
    %cst_364 = arith.constant dense<0.000000e+00> : vector<16x128xf32>
    %1125 = tpu.matmul %1124, %1123, %cst_364 {dimension_numbers = #tpu.dot_dimension_numbers<[1], [0], [0], [1], [0, 0, 1, 1], [], []>} : vector<16x128xbf16>, vector<128x128xbf16>, vector<16x128xf32> -> vector<16x128xf32>
    %c61 = arith.constant 61 : index
    %c0_365 = arith.constant 0 : index
    %1126 = vector.load %arg3[%c61, %c0_365] : memref<80x128xf32, #tpu.memory_space<vmem>>, vector<1x128xf32>
    %1127 = vector.broadcast %1126 : vector<1x128xf32> to vector<16x128xf32>
    %1128 = arith.addf %1125, %1127 : vector<16x128xf32>
    %cst_366 = arith.constant 0.000000e+00 : f32
    %1129 = vector.broadcast %cst_366 : f32 to vector<16x128xf32>
    %1130 = arith.maximumf %1128, %1129 : vector<16x128xf32>
    %c0_367 = arith.constant 0 : index
    %c4352 = arith.constant 4352 : index
    %1131 = vector.load %arg2[%c0_367, %c4352] : memref<128x5760xbf16, #tpu.memory_space<vmem>>, vector<128x128xbf16>
    %1132 = arith.truncf %1130 : vector<16x128xf32> to vector<16x128xbf16>
    %cst_368 = arith.constant dense<0.000000e+00> : vector<16x128xf32>
    %1133 = tpu.matmul %1132, %1131, %cst_368 {dimension_numbers = #tpu.dot_dimension_numbers<[1], [0], [0], [1], [0, 0, 1, 1], [], []>} : vector<16x128xbf16>, vector<128x128xbf16>, vector<16x128xf32> -> vector<16x128xf32>
    %1134 = arith.addf %1122, %1133 : vector<16x128xf32>
    %c62 = arith.constant 62 : index
    %c0_369 = arith.constant 0 : index
    %1135 = vector.load %arg3[%c62, %c0_369] : memref<80x128xf32, #tpu.memory_space<vmem>>, vector<1x128xf32>
    %1136 = vector.broadcast %1135 : vector<1x128xf32> to vector<16x128xf32>
    %1137 = arith.addf %1134, %1136 : vector<16x128xf32>
    %cst_370 = arith.constant dense<0.000000e+00> : vector<16xf32>
    %1138 = vector.multi_reduction <add>, %1137, %cst_370 [1] : vector<16x128xf32> to vector<16xf32>
    %1139 = vector.shape_cast %1138 : vector<16xf32> to vector<16x1xf32>
    %cst_371 = arith.constant 1.280000e+02 : f32
    %1140 = vector.broadcast %cst_371 : f32 to vector<16x1xf32>
    %1141 = arith.divf %1139, %1140 : vector<16x1xf32>
    %1142 = vector.broadcast %1141 : vector<16x1xf32> to vector<16x128xf32>
    %1143 = arith.subf %1137, %1142 : vector<16x128xf32>
    %1144 = arith.mulf %1143, %1143 : vector<16x128xf32>
    %cst_372 = arith.constant dense<0.000000e+00> : vector<16xf32>
    %1145 = vector.multi_reduction <add>, %1144, %cst_372 [1] : vector<16x128xf32> to vector<16xf32>
    %1146 = vector.shape_cast %1145 : vector<16xf32> to vector<16x1xf32>
    %cst_373 = arith.constant 1.280000e+02 : f32
    %1147 = vector.broadcast %cst_373 : f32 to vector<16x1xf32>
    %1148 = arith.divf %1146, %1147 : vector<16x1xf32>
    %1149 = vector.broadcast %1141 : vector<16x1xf32> to vector<16x128xf32>
    %1150 = arith.subf %1137, %1149 : vector<16x128xf32>
    %cst_374 = arith.constant 9.99999974E-6 : f32
    %1151 = vector.broadcast %cst_374 : f32 to vector<16x1xf32>
    %1152 = arith.addf %1148, %1151 : vector<16x1xf32>
    %1153 = math.rsqrt %1152 : vector<16x1xf32>
    %1154 = vector.broadcast %1153 : vector<16x1xf32> to vector<16x128xf32>
    %1155 = arith.mulf %1150, %1154 : vector<16x128xf32>
    %c63 = arith.constant 63 : index
    %c0_375 = arith.constant 0 : index
    %1156 = vector.load %arg3[%c63, %c0_375] : memref<80x128xf32, #tpu.memory_space<vmem>>, vector<1x128xf32>
    %1157 = vector.broadcast %1156 : vector<1x128xf32> to vector<16x128xf32>
    %1158 = arith.mulf %1155, %1157 : vector<16x128xf32>
    %c64_376 = arith.constant 64 : index
    %c0_377 = arith.constant 0 : index
    %1159 = vector.load %arg3[%c64_376, %c0_377] : memref<80x128xf32, #tpu.memory_space<vmem>>, vector<1x128xf32>
    %1160 = vector.broadcast %1159 : vector<1x128xf32> to vector<16x128xf32>
    %1161 = arith.addf %1158, %1160 : vector<16x128xf32>
    %c0_378 = arith.constant 0 : index
    %c4992 = arith.constant 4992 : index
    %1162 = vector.load %arg2[%c0_378, %c4992] : memref<128x5760xbf16, #tpu.memory_space<vmem>>, vector<128x128xbf16>
    %1163 = arith.truncf %860 : vector<16x128xf32> to vector<16x128xbf16>
    %cst_379 = arith.constant dense<0.000000e+00> : vector<16x128xf32>
    %1164 = tpu.matmul %1163, %1162, %cst_379 {dimension_numbers = #tpu.dot_dimension_numbers<[1], [0], [0], [1], [0, 0, 1, 1], [], []>} : vector<16x128xbf16>, vector<128x128xbf16>, vector<16x128xf32> -> vector<16x128xf32>
    %c69 = arith.constant 69 : index
    %c0_380 = arith.constant 0 : index
    %1165 = vector.load %arg3[%c69, %c0_380] : memref<80x128xf32, #tpu.memory_space<vmem>>, vector<1x128xf32>
    %1166 = vector.broadcast %1165 : vector<1x128xf32> to vector<16x128xf32>
    %1167 = arith.addf %1164, %1166 : vector<16x128xf32>
    %c0_381 = arith.constant 0 : index
    %c5120 = arith.constant 5120 : index
    %1168 = vector.load %arg2[%c0_381, %c5120] : memref<128x5760xbf16, #tpu.memory_space<vmem>>, vector<128x256xbf16>
    %1169 = arith.truncf %1161 : vector<16x128xf32> to vector<16x128xbf16>
    %cst_382 = arith.constant dense<0.000000e+00> : vector<16x256xf32>
    %1170 = tpu.matmul %1169, %1168, %cst_382 {dimension_numbers = #tpu.dot_dimension_numbers<[1], [0], [0], [1], [0, 0, 1, 1], [], []>} : vector<16x128xbf16>, vector<128x256xbf16>, vector<16x256xf32> -> vector<16x256xf32>
    %1171 = vector.extract_strided_slice %1170 {offsets = [0, 0], sizes = [16, 128], strides = [1, 1]} : vector<16x256xf32> to vector<16x128xf32>
    %c70 = arith.constant 70 : index
    %c0_383 = arith.constant 0 : index
    %1172 = vector.load %arg3[%c70, %c0_383] : memref<80x128xf32, #tpu.memory_space<vmem>>, vector<1x128xf32>
    %1173 = vector.broadcast %1172 : vector<1x128xf32> to vector<16x128xf32>
    %1174 = arith.addf %1171, %1173 : vector<16x128xf32>
    %1175 = vector.extract_strided_slice %1170 {offsets = [0, 128], sizes = [16, 128], strides = [1, 1]} : vector<16x256xf32> to vector<16x128xf32>
    %c71 = arith.constant 71 : index
    %c0_384 = arith.constant 0 : index
    %1176 = vector.load %arg3[%c71, %c0_384] : memref<80x128xf32, #tpu.memory_space<vmem>>, vector<1x128xf32>
    %1177 = vector.broadcast %1176 : vector<1x128xf32> to vector<16x128xf32>
    %1178 = arith.addf %1175, %1177 : vector<16x128xf32>
    %1179 = vector.extract_strided_slice %1167 {offsets = [0, 0], sizes = [16, 32], strides = [1, 1]} : vector<16x128xf32> to vector<16x32xf32>
    %1180 = arith.truncf %1179 : vector<16x32xf32> to vector<16x32xbf16>
    %1181 = vector.extract_strided_slice %1174 {offsets = [0, 0], sizes = [16, 32], strides = [1, 1]} : vector<16x128xf32> to vector<16x32xf32>
    %1182 = arith.truncf %1181 : vector<16x32xf32> to vector<16x32xbf16>
    %cst_385 = arith.constant dense<0.000000e+00> : vector<16x16xf32>
    %1183 = tpu.matmul %1180, %1182, %cst_385 {dimension_numbers = #tpu.dot_dimension_numbers<[1], [1], [0], [0], [0, 0, 1, 0], [], []>} : vector<16x32xbf16>, vector<16x32xbf16>, vector<16x16xf32> -> vector<16x16xf32>
    %cst_386 = arith.constant -1.000000e+30 : f32
    %1184 = vector.broadcast %cst_386 : f32 to vector<16x16xf32>
    %1185 = arith.select %59, %1183, %1184 : vector<16x16xi1>, vector<16x16xf32>
    %cst_387 = arith.constant dense<0xFF800000> : vector<16xf32>
    %1186 = vector.multi_reduction <maximumf>, %1185, %cst_387 [1] : vector<16x16xf32> to vector<16xf32>
    %1187 = vector.shape_cast %1186 : vector<16xf32> to vector<16x1xf32>
    %1188 = vector.broadcast %1187 : vector<16x1xf32> to vector<16x16xf32>
    %1189 = arith.subf %1185, %1188 : vector<16x16xf32>
    %1190 = math.exp %1189 : vector<16x16xf32>
    %cst_388 = arith.constant dense<0.000000e+00> : vector<16xf32>
    %1191 = vector.multi_reduction <add>, %1190, %cst_388 [1] : vector<16x16xf32> to vector<16xf32>
    %1192 = vector.shape_cast %1191 : vector<16xf32> to vector<16x1xf32>
    %1193 = tpu.reciprocal %1192 {approx = true} : vector<16x1xf32> -> vector<16x1xf32>
    %1194 = vector.broadcast %1193 : vector<16x1xf32> to vector<16x16xf32>
    %1195 = arith.mulf %1190, %1194 : vector<16x16xf32>
    %1196 = arith.truncf %1195 : vector<16x16xf32> to vector<16x16xbf16>
    %1197 = vector.extract_strided_slice %1178 {offsets = [0, 0], sizes = [16, 32], strides = [1, 1]} : vector<16x128xf32> to vector<16x32xf32>
    %1198 = arith.truncf %1197 : vector<16x32xf32> to vector<16x32xbf16>
    %cst_389 = arith.constant dense<0.000000e+00> : vector<16x32xf32>
    %1199 = tpu.matmul %1196, %1198, %cst_389 {dimension_numbers = #tpu.dot_dimension_numbers<[1], [0], [0], [1], [0, 0, 1, 1], [], []>} : vector<16x16xbf16>, vector<16x32xbf16>, vector<16x32xf32> -> vector<16x32xf32>
    %c0_390 = arith.constant 0 : index
    %c5376 = arith.constant 5376 : index
    %1200 = vector.load %arg2[%c0_390, %c5376] : memref<128x5760xbf16, #tpu.memory_space<vmem>>, vector<32x128xbf16>
    %1201 = arith.truncf %1199 : vector<16x32xf32> to vector<16x32xbf16>
    %cst_391 = arith.constant dense<0.000000e+00> : vector<16x128xf32>
    %1202 = tpu.matmul %1201, %1200, %cst_391 {dimension_numbers = #tpu.dot_dimension_numbers<[1], [0], [0], [1], [0, 0, 1, 1], [], []>} : vector<16x32xbf16>, vector<32x128xbf16>, vector<16x128xf32> -> vector<16x128xf32>
    %1203 = vector.extract_strided_slice %1167 {offsets = [0, 32], sizes = [16, 32], strides = [1, 1]} : vector<16x128xf32> to vector<16x32xf32>
    %1204 = arith.truncf %1203 : vector<16x32xf32> to vector<16x32xbf16>
    %1205 = vector.extract_strided_slice %1174 {offsets = [0, 32], sizes = [16, 32], strides = [1, 1]} : vector<16x128xf32> to vector<16x32xf32>
    %1206 = arith.truncf %1205 : vector<16x32xf32> to vector<16x32xbf16>
    %cst_392 = arith.constant dense<0.000000e+00> : vector<16x16xf32>
    %1207 = tpu.matmul %1204, %1206, %cst_392 {dimension_numbers = #tpu.dot_dimension_numbers<[1], [1], [0], [0], [0, 0, 1, 0], [], []>} : vector<16x32xbf16>, vector<16x32xbf16>, vector<16x16xf32> -> vector<16x16xf32>
    %cst_393 = arith.constant -1.000000e+30 : f32
    %1208 = vector.broadcast %cst_393 : f32 to vector<16x16xf32>
    %1209 = arith.select %59, %1207, %1208 : vector<16x16xi1>, vector<16x16xf32>
    %cst_394 = arith.constant dense<0xFF800000> : vector<16xf32>
    %1210 = vector.multi_reduction <maximumf>, %1209, %cst_394 [1] : vector<16x16xf32> to vector<16xf32>
    %1211 = vector.shape_cast %1210 : vector<16xf32> to vector<16x1xf32>
    %1212 = vector.broadcast %1211 : vector<16x1xf32> to vector<16x16xf32>
    %1213 = arith.subf %1209, %1212 : vector<16x16xf32>
    %1214 = math.exp %1213 : vector<16x16xf32>
    %cst_395 = arith.constant dense<0.000000e+00> : vector<16xf32>
    %1215 = vector.multi_reduction <add>, %1214, %cst_395 [1] : vector<16x16xf32> to vector<16xf32>
    %1216 = vector.shape_cast %1215 : vector<16xf32> to vector<16x1xf32>
    %1217 = tpu.reciprocal %1216 {approx = true} : vector<16x1xf32> -> vector<16x1xf32>
    %1218 = vector.broadcast %1217 : vector<16x1xf32> to vector<16x16xf32>
    %1219 = arith.mulf %1214, %1218 : vector<16x16xf32>
    %1220 = arith.truncf %1219 : vector<16x16xf32> to vector<16x16xbf16>
    %1221 = vector.extract_strided_slice %1178 {offsets = [0, 32], sizes = [16, 32], strides = [1, 1]} : vector<16x128xf32> to vector<16x32xf32>
    %1222 = arith.truncf %1221 : vector<16x32xf32> to vector<16x32xbf16>
    %cst_396 = arith.constant dense<0.000000e+00> : vector<16x32xf32>
    %1223 = tpu.matmul %1220, %1222, %cst_396 {dimension_numbers = #tpu.dot_dimension_numbers<[1], [0], [0], [1], [0, 0, 1, 1], [], []>} : vector<16x16xbf16>, vector<16x32xbf16>, vector<16x32xf32> -> vector<16x32xf32>
    %c32_397 = arith.constant 32 : index
    %c5376_398 = arith.constant 5376 : index
    %1224 = vector.load %arg2[%c32_397, %c5376_398] : memref<128x5760xbf16, #tpu.memory_space<vmem>>, vector<32x128xbf16>
    %1225 = arith.truncf %1223 : vector<16x32xf32> to vector<16x32xbf16>
    %cst_399 = arith.constant dense<0.000000e+00> : vector<16x128xf32>
    %1226 = tpu.matmul %1225, %1224, %cst_399 {dimension_numbers = #tpu.dot_dimension_numbers<[1], [0], [0], [1], [0, 0, 1, 1], [], []>} : vector<16x32xbf16>, vector<32x128xbf16>, vector<16x128xf32> -> vector<16x128xf32>
    %1227 = arith.addf %1202, %1226 : vector<16x128xf32>
    %1228 = vector.extract_strided_slice %1167 {offsets = [0, 64], sizes = [16, 32], strides = [1, 1]} : vector<16x128xf32> to vector<16x32xf32>
    %1229 = arith.truncf %1228 : vector<16x32xf32> to vector<16x32xbf16>
    %1230 = vector.extract_strided_slice %1174 {offsets = [0, 64], sizes = [16, 32], strides = [1, 1]} : vector<16x128xf32> to vector<16x32xf32>
    %1231 = arith.truncf %1230 : vector<16x32xf32> to vector<16x32xbf16>
    %cst_400 = arith.constant dense<0.000000e+00> : vector<16x16xf32>
    %1232 = tpu.matmul %1229, %1231, %cst_400 {dimension_numbers = #tpu.dot_dimension_numbers<[1], [1], [0], [0], [0, 0, 1, 0], [], []>} : vector<16x32xbf16>, vector<16x32xbf16>, vector<16x16xf32> -> vector<16x16xf32>
    %cst_401 = arith.constant -1.000000e+30 : f32
    %1233 = vector.broadcast %cst_401 : f32 to vector<16x16xf32>
    %1234 = arith.select %59, %1232, %1233 : vector<16x16xi1>, vector<16x16xf32>
    %cst_402 = arith.constant dense<0xFF800000> : vector<16xf32>
    %1235 = vector.multi_reduction <maximumf>, %1234, %cst_402 [1] : vector<16x16xf32> to vector<16xf32>
    %1236 = vector.shape_cast %1235 : vector<16xf32> to vector<16x1xf32>
    %1237 = vector.broadcast %1236 : vector<16x1xf32> to vector<16x16xf32>
    %1238 = arith.subf %1234, %1237 : vector<16x16xf32>
    %1239 = math.exp %1238 : vector<16x16xf32>
    %cst_403 = arith.constant dense<0.000000e+00> : vector<16xf32>
    %1240 = vector.multi_reduction <add>, %1239, %cst_403 [1] : vector<16x16xf32> to vector<16xf32>
    %1241 = vector.shape_cast %1240 : vector<16xf32> to vector<16x1xf32>
    %1242 = tpu.reciprocal %1241 {approx = true} : vector<16x1xf32> -> vector<16x1xf32>
    %1243 = vector.broadcast %1242 : vector<16x1xf32> to vector<16x16xf32>
    %1244 = arith.mulf %1239, %1243 : vector<16x16xf32>
    %1245 = arith.truncf %1244 : vector<16x16xf32> to vector<16x16xbf16>
    %1246 = vector.extract_strided_slice %1178 {offsets = [0, 64], sizes = [16, 32], strides = [1, 1]} : vector<16x128xf32> to vector<16x32xf32>
    %1247 = arith.truncf %1246 : vector<16x32xf32> to vector<16x32xbf16>
    %cst_404 = arith.constant dense<0.000000e+00> : vector<16x32xf32>
    %1248 = tpu.matmul %1245, %1247, %cst_404 {dimension_numbers = #tpu.dot_dimension_numbers<[1], [0], [0], [1], [0, 0, 1, 1], [], []>} : vector<16x16xbf16>, vector<16x32xbf16>, vector<16x32xf32> -> vector<16x32xf32>
    %c64_405 = arith.constant 64 : index
    %c5376_406 = arith.constant 5376 : index
    %1249 = vector.load %arg2[%c64_405, %c5376_406] : memref<128x5760xbf16, #tpu.memory_space<vmem>>, vector<32x128xbf16>
    %1250 = arith.truncf %1248 : vector<16x32xf32> to vector<16x32xbf16>
    %cst_407 = arith.constant dense<0.000000e+00> : vector<16x128xf32>
    %1251 = tpu.matmul %1250, %1249, %cst_407 {dimension_numbers = #tpu.dot_dimension_numbers<[1], [0], [0], [1], [0, 0, 1, 1], [], []>} : vector<16x32xbf16>, vector<32x128xbf16>, vector<16x128xf32> -> vector<16x128xf32>
    %1252 = arith.addf %1227, %1251 : vector<16x128xf32>
    %1253 = vector.extract_strided_slice %1167 {offsets = [0, 96], sizes = [16, 32], strides = [1, 1]} : vector<16x128xf32> to vector<16x32xf32>
    %1254 = arith.truncf %1253 : vector<16x32xf32> to vector<16x32xbf16>
    %1255 = vector.extract_strided_slice %1174 {offsets = [0, 96], sizes = [16, 32], strides = [1, 1]} : vector<16x128xf32> to vector<16x32xf32>
    %1256 = arith.truncf %1255 : vector<16x32xf32> to vector<16x32xbf16>
    %cst_408 = arith.constant dense<0.000000e+00> : vector<16x16xf32>
    %1257 = tpu.matmul %1254, %1256, %cst_408 {dimension_numbers = #tpu.dot_dimension_numbers<[1], [1], [0], [0], [0, 0, 1, 0], [], []>} : vector<16x32xbf16>, vector<16x32xbf16>, vector<16x16xf32> -> vector<16x16xf32>
    %cst_409 = arith.constant -1.000000e+30 : f32
    %1258 = vector.broadcast %cst_409 : f32 to vector<16x16xf32>
    %1259 = arith.select %59, %1257, %1258 : vector<16x16xi1>, vector<16x16xf32>
    %cst_410 = arith.constant dense<0xFF800000> : vector<16xf32>
    %1260 = vector.multi_reduction <maximumf>, %1259, %cst_410 [1] : vector<16x16xf32> to vector<16xf32>
    %1261 = vector.shape_cast %1260 : vector<16xf32> to vector<16x1xf32>
    %1262 = vector.broadcast %1261 : vector<16x1xf32> to vector<16x16xf32>
    %1263 = arith.subf %1259, %1262 : vector<16x16xf32>
    %1264 = math.exp %1263 : vector<16x16xf32>
    %cst_411 = arith.constant dense<0.000000e+00> : vector<16xf32>
    %1265 = vector.multi_reduction <add>, %1264, %cst_411 [1] : vector<16x16xf32> to vector<16xf32>
    %1266 = vector.shape_cast %1265 : vector<16xf32> to vector<16x1xf32>
    %1267 = tpu.reciprocal %1266 {approx = true} : vector<16x1xf32> -> vector<16x1xf32>
    %1268 = vector.broadcast %1267 : vector<16x1xf32> to vector<16x16xf32>
    %1269 = arith.mulf %1264, %1268 : vector<16x16xf32>
    %1270 = arith.truncf %1269 : vector<16x16xf32> to vector<16x16xbf16>
    %1271 = vector.extract_strided_slice %1178 {offsets = [0, 96], sizes = [16, 32], strides = [1, 1]} : vector<16x128xf32> to vector<16x32xf32>
    %1272 = arith.truncf %1271 : vector<16x32xf32> to vector<16x32xbf16>
    %cst_412 = arith.constant dense<0.000000e+00> : vector<16x32xf32>
    %1273 = tpu.matmul %1270, %1272, %cst_412 {dimension_numbers = #tpu.dot_dimension_numbers<[1], [0], [0], [1], [0, 0, 1, 1], [], []>} : vector<16x16xbf16>, vector<16x32xbf16>, vector<16x32xf32> -> vector<16x32xf32>
    %c96_413 = arith.constant 96 : index
    %c5376_414 = arith.constant 5376 : index
    %1274 = vector.load %arg2[%c96_413, %c5376_414] : memref<128x5760xbf16, #tpu.memory_space<vmem>>, vector<32x128xbf16>
    %1275 = arith.truncf %1273 : vector<16x32xf32> to vector<16x32xbf16>
    %cst_415 = arith.constant dense<0.000000e+00> : vector<16x128xf32>
    %1276 = tpu.matmul %1275, %1274, %cst_415 {dimension_numbers = #tpu.dot_dimension_numbers<[1], [0], [0], [1], [0, 0, 1, 1], [], []>} : vector<16x32xbf16>, vector<32x128xbf16>, vector<16x128xf32> -> vector<16x128xf32>
    %1277 = arith.addf %1252, %1276 : vector<16x128xf32>
    %c72 = arith.constant 72 : index
    %c0_416 = arith.constant 0 : index
    %1278 = vector.load %arg3[%c72, %c0_416] : memref<80x128xf32, #tpu.memory_space<vmem>>, vector<1x128xf32>
    %1279 = vector.broadcast %1278 : vector<1x128xf32> to vector<16x128xf32>
    %1280 = arith.addf %1277, %1279 : vector<16x128xf32>
    %1281 = arith.addf %860, %1280 : vector<16x128xf32>
    %c0_417 = arith.constant 0 : index
    %c5504 = arith.constant 5504 : index
    %1282 = vector.load %arg2[%c0_417, %c5504] : memref<128x5760xbf16, #tpu.memory_space<vmem>>, vector<128x128xbf16>
    %1283 = arith.truncf %1161 : vector<16x128xf32> to vector<16x128xbf16>
    %cst_418 = arith.constant dense<0.000000e+00> : vector<16x128xf32>
    %1284 = tpu.matmul %1283, %1282, %cst_418 {dimension_numbers = #tpu.dot_dimension_numbers<[1], [0], [0], [1], [0, 0, 1, 1], [], []>} : vector<16x128xbf16>, vector<128x128xbf16>, vector<16x128xf32> -> vector<16x128xf32>
    %c73 = arith.constant 73 : index
    %c0_419 = arith.constant 0 : index
    %1285 = vector.load %arg3[%c73, %c0_419] : memref<80x128xf32, #tpu.memory_space<vmem>>, vector<1x128xf32>
    %1286 = vector.broadcast %1285 : vector<1x128xf32> to vector<16x128xf32>
    %1287 = arith.addf %1284, %1286 : vector<16x128xf32>
    %c0_420 = arith.constant 0 : index
    %c5632 = arith.constant 5632 : index
    %1288 = vector.load %arg2[%c0_420, %c5632] : memref<128x5760xbf16, #tpu.memory_space<vmem>>, vector<128x128xbf16>
    %1289 = arith.truncf %1281 : vector<16x128xf32> to vector<16x128xbf16>
    %cst_421 = arith.constant dense<0.000000e+00> : vector<16x128xf32>
    %1290 = tpu.matmul %1289, %1288, %cst_421 {dimension_numbers = #tpu.dot_dimension_numbers<[1], [0], [0], [1], [0, 0, 1, 1], [], []>} : vector<16x128xbf16>, vector<128x128xbf16>, vector<16x128xf32> -> vector<16x128xf32>
    %c74 = arith.constant 74 : index
    %c0_422 = arith.constant 0 : index
    %1291 = vector.load %arg3[%c74, %c0_422] : memref<80x128xf32, #tpu.memory_space<vmem>>, vector<1x128xf32>
    %1292 = vector.broadcast %1291 : vector<1x128xf32> to vector<16x128xf32>
    %1293 = arith.addf %1290, %1292 : vector<16x128xf32>
    %1294 = vector.extract_strided_slice %1287 {offsets = [0, 0], sizes = [16, 32], strides = [1, 1]} : vector<16x128xf32> to vector<16x32xf32>
    %1295 = arith.truncf %1294 : vector<16x32xf32> to vector<16x32xbf16>
    %1296 = vector.extract_strided_slice %1293 {offsets = [0, 0], sizes = [16, 32], strides = [1, 1]} : vector<16x128xf32> to vector<16x32xf32>
    %1297 = arith.truncf %1296 : vector<16x32xf32> to vector<16x32xbf16>
    %cst_423 = arith.constant dense<0.000000e+00> : vector<16x16xf32>
    %1298 = tpu.matmul %1295, %1297, %cst_423 {dimension_numbers = #tpu.dot_dimension_numbers<[1], [1], [0], [0], [0, 0, 1, 0], [], []>} : vector<16x32xbf16>, vector<16x32xbf16>, vector<16x16xf32> -> vector<16x16xf32>
    %cst_424 = arith.constant -1.000000e+30 : f32
    %1299 = vector.broadcast %cst_424 : f32 to vector<16x16xf32>
    %1300 = arith.select %44, %1298, %1299 : vector<16x16xi1>, vector<16x16xf32>
    %cst_425 = arith.constant dense<0xFF800000> : vector<16xf32>
    %1301 = vector.multi_reduction <maximumf>, %1300, %cst_425 [1] : vector<16x16xf32> to vector<16xf32>
    %1302 = vector.shape_cast %1301 : vector<16xf32> to vector<16x1xf32>
    %1303 = vector.broadcast %1302 : vector<16x1xf32> to vector<16x16xf32>
    %1304 = arith.subf %1300, %1303 : vector<16x16xf32>
    %1305 = math.exp %1304 : vector<16x16xf32>
    %cst_426 = arith.constant dense<0.000000e+00> : vector<16xf32>
    %1306 = vector.multi_reduction <add>, %1305, %cst_426 [1] : vector<16x16xf32> to vector<16xf32>
    %1307 = vector.shape_cast %1306 : vector<16xf32> to vector<16x1xf32>
    %1308 = vector.broadcast %1307 : vector<16x1xf32> to vector<16x16xf32>
    %1309 = arith.divf %1305, %1308 : vector<16x16xf32>
    %1310 = vector.extract_strided_slice %1287 {offsets = [0, 32], sizes = [16, 32], strides = [1, 1]} : vector<16x128xf32> to vector<16x32xf32>
    %1311 = arith.truncf %1310 : vector<16x32xf32> to vector<16x32xbf16>
    %1312 = vector.extract_strided_slice %1293 {offsets = [0, 32], sizes = [16, 32], strides = [1, 1]} : vector<16x128xf32> to vector<16x32xf32>
    %1313 = arith.truncf %1312 : vector<16x32xf32> to vector<16x32xbf16>
    %cst_427 = arith.constant dense<0.000000e+00> : vector<16x16xf32>
    %1314 = tpu.matmul %1311, %1313, %cst_427 {dimension_numbers = #tpu.dot_dimension_numbers<[1], [1], [0], [0], [0, 0, 1, 0], [], []>} : vector<16x32xbf16>, vector<16x32xbf16>, vector<16x16xf32> -> vector<16x16xf32>
    %cst_428 = arith.constant -1.000000e+30 : f32
    %1315 = vector.broadcast %cst_428 : f32 to vector<16x16xf32>
    %1316 = arith.select %44, %1314, %1315 : vector<16x16xi1>, vector<16x16xf32>
    %cst_429 = arith.constant dense<0xFF800000> : vector<16xf32>
    %1317 = vector.multi_reduction <maximumf>, %1316, %cst_429 [1] : vector<16x16xf32> to vector<16xf32>
    %1318 = vector.shape_cast %1317 : vector<16xf32> to vector<16x1xf32>
    %1319 = vector.broadcast %1318 : vector<16x1xf32> to vector<16x16xf32>
    %1320 = arith.subf %1316, %1319 : vector<16x16xf32>
    %1321 = math.exp %1320 : vector<16x16xf32>
    %cst_430 = arith.constant dense<0.000000e+00> : vector<16xf32>
    %1322 = vector.multi_reduction <add>, %1321, %cst_430 [1] : vector<16x16xf32> to vector<16xf32>
    %1323 = vector.shape_cast %1322 : vector<16xf32> to vector<16x1xf32>
    %1324 = vector.broadcast %1323 : vector<16x1xf32> to vector<16x16xf32>
    %1325 = arith.divf %1321, %1324 : vector<16x16xf32>
    %1326 = arith.addf %1309, %1325 : vector<16x16xf32>
    %1327 = vector.extract_strided_slice %1287 {offsets = [0, 64], sizes = [16, 32], strides = [1, 1]} : vector<16x128xf32> to vector<16x32xf32>
    %1328 = arith.truncf %1327 : vector<16x32xf32> to vector<16x32xbf16>
    %1329 = vector.extract_strided_slice %1293 {offsets = [0, 64], sizes = [16, 32], strides = [1, 1]} : vector<16x128xf32> to vector<16x32xf32>
    %1330 = arith.truncf %1329 : vector<16x32xf32> to vector<16x32xbf16>
    %cst_431 = arith.constant dense<0.000000e+00> : vector<16x16xf32>
    %1331 = tpu.matmul %1328, %1330, %cst_431 {dimension_numbers = #tpu.dot_dimension_numbers<[1], [1], [0], [0], [0, 0, 1, 0], [], []>} : vector<16x32xbf16>, vector<16x32xbf16>, vector<16x16xf32> -> vector<16x16xf32>
    %cst_432 = arith.constant -1.000000e+30 : f32
    %1332 = vector.broadcast %cst_432 : f32 to vector<16x16xf32>
    %1333 = arith.select %44, %1331, %1332 : vector<16x16xi1>, vector<16x16xf32>
    %cst_433 = arith.constant dense<0xFF800000> : vector<16xf32>
    %1334 = vector.multi_reduction <maximumf>, %1333, %cst_433 [1] : vector<16x16xf32> to vector<16xf32>
    %1335 = vector.shape_cast %1334 : vector<16xf32> to vector<16x1xf32>
    %1336 = vector.broadcast %1335 : vector<16x1xf32> to vector<16x16xf32>
    %1337 = arith.subf %1333, %1336 : vector<16x16xf32>
    %1338 = math.exp %1337 : vector<16x16xf32>
    %cst_434 = arith.constant dense<0.000000e+00> : vector<16xf32>
    %1339 = vector.multi_reduction <add>, %1338, %cst_434 [1] : vector<16x16xf32> to vector<16xf32>
    %1340 = vector.shape_cast %1339 : vector<16xf32> to vector<16x1xf32>
    %1341 = vector.broadcast %1340 : vector<16x1xf32> to vector<16x16xf32>
    %1342 = arith.divf %1338, %1341 : vector<16x16xf32>
    %1343 = arith.addf %1326, %1342 : vector<16x16xf32>
    %1344 = vector.extract_strided_slice %1287 {offsets = [0, 96], sizes = [16, 32], strides = [1, 1]} : vector<16x128xf32> to vector<16x32xf32>
    %1345 = arith.truncf %1344 : vector<16x32xf32> to vector<16x32xbf16>
    %1346 = vector.extract_strided_slice %1293 {offsets = [0, 96], sizes = [16, 32], strides = [1, 1]} : vector<16x128xf32> to vector<16x32xf32>
    %1347 = arith.truncf %1346 : vector<16x32xf32> to vector<16x32xbf16>
    %cst_435 = arith.constant dense<0.000000e+00> : vector<16x16xf32>
    %1348 = tpu.matmul %1345, %1347, %cst_435 {dimension_numbers = #tpu.dot_dimension_numbers<[1], [1], [0], [0], [0, 0, 1, 0], [], []>} : vector<16x32xbf16>, vector<16x32xbf16>, vector<16x16xf32> -> vector<16x16xf32>
    %cst_436 = arith.constant -1.000000e+30 : f32
    %1349 = vector.broadcast %cst_436 : f32 to vector<16x16xf32>
    %1350 = arith.select %44, %1348, %1349 : vector<16x16xi1>, vector<16x16xf32>
    %cst_437 = arith.constant dense<0xFF800000> : vector<16xf32>
    %1351 = vector.multi_reduction <maximumf>, %1350, %cst_437 [1] : vector<16x16xf32> to vector<16xf32>
    %1352 = vector.shape_cast %1351 : vector<16xf32> to vector<16x1xf32>
    %1353 = vector.broadcast %1352 : vector<16x1xf32> to vector<16x16xf32>
    %1354 = arith.subf %1350, %1353 : vector<16x16xf32>
    %1355 = math.exp %1354 : vector<16x16xf32>
    %cst_438 = arith.constant dense<0.000000e+00> : vector<16xf32>
    %1356 = vector.multi_reduction <add>, %1355, %cst_438 [1] : vector<16x16xf32> to vector<16xf32>
    %1357 = vector.shape_cast %1356 : vector<16xf32> to vector<16x1xf32>
    %1358 = vector.broadcast %1357 : vector<16x1xf32> to vector<16x16xf32>
    %1359 = arith.divf %1355, %1358 : vector<16x16xf32>
    %1360 = arith.addf %1343, %1359 : vector<16x16xf32>
    %cst_439 = arith.constant dense<0.000000e+00> : vector<16xf32>
    %1361 = vector.multi_reduction <add>, %1360, %cst_439 [0] : vector<16x16xf32> to vector<16xf32>
    %1362 = vector.shape_cast %1361 : vector<16xf32> to vector<1x16xf32>
    %cst_440 = arith.constant 3.125000e-02 : f32
    %1363 = vector.broadcast %cst_440 : f32 to vector<1x16xf32>
    %1364 = arith.mulf %1362, %1363 : vector<1x16xf32>
    %c0_441 = arith.constant 0 : index
    %c0_442 = arith.constant 0 : index
    %1365 = vector.load %arg4[%c0_441, %c0_442] : memref<1x16xf32, #tpu.memory_space<vmem>>, vector<1x16xf32>
    tpu.vector_store %arg4[%c0_441, %c0_442], %1364 {strides = array<i32>} : memref<1x16xf32, #tpu.memory_space<vmem>>, vector<1x16xf32>,
    return
  }
}

</mosaic_0001>

<bundles_post_ra>
// kernel: forward.1
= control target key start
LH: loop header
LB: loop body
LE: loop exit
PB: predicated region body
PF: predicated region fallthrough
CT: control target
= control target key end

     0   :  { %9 = vsyncpa [#allocation3], 0  ;;  %s14643_s0 = inlined_call_operand.hbm [shape: f32[16,256], index: 0, kind: input, shape index: {}]   ;;  %s14644_s1 = inlined_call_operand.hbm [shape: f32[16,128], index: 1, kind: input, shape index: {}]   ;;  %s14645_s2 = inlined_call_operand.hbm [shape: bf16[128,5760], index: 2, kind: input, shape index: {}]   ;;  %s14646_s3 = inlined_call_operand.hbm [shape: f32[80,128], index: 3, kind: input, shape index: {}]   ;;  %s14647_s4 = inlined_call_operand.vmem [shape: f32[1,16], index: 4, kind: output, shape index: {}]  }
   0x1   :  { %10 = vsyncpa [#allocation5], 0 }
   0x2   :  { %11 = vsyncpa [#allocation8], 0  ;;  %s13165_s15 = smov [#allocation4]   ;;  %s13071_s19 = scalar_lea.hbm %s14644_s1, 256 }
   0x3   :  { %s29_s16 = sshll.u32 %s13165_s15, 4  ;;  %p13072_p0 = scmp.ne.s32.totalorder %s14644_s1, %s13071_s19  ;;  %s30_s16 = int_to_ptr.vmem [resolvable:$true] %s29_s16 }
   0x4   :  { %p13075_p1 = scmp.lt.u32.totalorder %s13071_s19, %s14644_s1 }
   0x6   :  { %p13077_p2 = pnand %p13075_p1, %p13072_p0 }
   0x8   :  { %13080 = shalt.err (!%p13077_p2)
}
   0x9   :  { %s13081_s24 = scalar_lea.vmem %s30_s16, 256  ;;  %p13086_p4 = scmp.lt.s32.totalorder %s30_s16, %s30_s16 }
   0xa   :  { %p13082_p3 = scmp.ne.s32.totalorder %s30_s16, %s13081_s24  ;;  %p13087_p5 = scmp.lt.s32.totalorder %s13081_s24, %s13081_s24 }
   0xc   :  { %p13088_p6 = por %p13087_p5, %p13086_p4 }
   0xe   :  { %p13089_p7 = pnand %p13088_p6, %p13082_p3 }
  0x10   :  { %13092 = shalt.err (!%p13089_p7)
}
  0x11   :  { %s13166_s25 = smov 128   ;;  %s13167_s26 = smov 8  }
  0x12   :  { %35 = dma.hbm_to_vmem [thread:$0]  %s14644_s1, 256, %s30_s16, [#allocation5], %s13166_s25, %s13166_s25, %s13167_s26  }
  0x13   :  { %s13168_s29 = smov [#allocation2]   ;;  %s13093_s7 = scalar_lea.hbm %s14643_s0, 512 }
  0x14   :  { %s17_s30 = sshll.u32 %s13168_s29, 4  ;;  %p13094_p8 = scmp.ne.s32.totalorder %s14643_s0, %s13093_s7  ;;  %s18_s30 = int_to_ptr.vmem [resolvable:$true] %s17_s30 }
  0x15   :  { %p13097_p9 = scmp.lt.u32.totalorder %s13093_s7, %s14643_s0 }
  0x17   :  { %p13099_p10 = pnand %p13097_p9, %p13094_p8 }
  0x19   :  { %13102 = shalt.err (!%p13099_p10)
}
  0x1a   :  { %s13103_s12 = scalar_lea.vmem %s18_s30, 512  ;;  %p13108_p12 = scmp.lt.s32.totalorder %s18_s30, %s18_s30 }
  0x1b   :  { %p13104_p11 = scmp.ne.s32.totalorder %s18_s30, %s13103_s12  ;;  %p13109_p13 = scmp.lt.s32.totalorder %s13103_s12, %s13103_s12 }
  0x1d   :  { %p13110_p0 = por %p13109_p13, %p13108_p12 }
  0x1f   :  { %p13111_p1 = pnand %p13110_p0, %p13104_p11 }
  0x21   :  { %13114 = shalt.err (!%p13111_p1)
}
  0x22   :  { %s13169_s1 = smov 256   ;;  %s13170_s13 = smov 16  }
  0x23   :  { %23 = dma.hbm_to_vmem [thread:$0]  %s14643_s0, 512, %s18_s30, [#allocation3], %s13169_s1, %s13169_s1, %s13170_s13  }
  0x24   :  { %s13171_s16 = smov [#allocation6]   ;;  %s13115_s20 = scalar_lea.hbm %s14645_s2, 46080 }
  0x25   :  { %s41_s17 = sshll.u32 %s13171_s16, 4  ;;  %p13116_p2 = scmp.ne.s32.totalorder %s14645_s2, %s13115_s20  ;;  %s42_s17 = int_to_ptr.vmem [resolvable:$true] %s41_s17 }
  0x26   :  { %p13119_p3 = scmp.lt.u32.totalorder %s13115_s20, %s14645_s2 }
  0x28   :  { %p13121_p4 = pnand %p13119_p3, %p13116_p2 }
  0x2a   :  { %13124 = shalt.err (!%p13121_p4)
}
  0x2b   :  { %s13125_s27 = scalar_lea.vmem %s42_s17, 46080  ;;  %p13130_p6 = scmp.lt.s32.totalorder %s42_s17, %s42_s17 }
  0x2c   :  { %p13126_p5 = scmp.ne.s32.totalorder %s42_s17, %s13125_s27  ;;  %p13131_p7 = scmp.lt.s32.totalorder %s13125_s27, %s13125_s27 }
  0x2e   :  { %p13132_p8 = por %p13131_p7, %p13130_p6 }
  0x30   :  { %p13133_p9 = pnand %p13132_p8, %p13126_p5 }
  0x32   :  { %13136 = shalt.err (!%p13133_p9)
}
  0x33   :  { %s13172_s0 = smov 2880   ;;  %s13173_s28 = smov 180  }
  0x34   :  { %47 = dma.hbm_to_vmem [thread:$0]  %s14645_s2, 46080, %s42_s17, [#allocation5], %s13172_s0, %s13172_s0, %s13173_s28  }
  0x35   :  { %s13174_s5 = smov [#allocation7]   ;;  %s13137_s9 = scalar_lea.hbm %s14646_s3, 1280 }
  0x36   :  { %s53_s6 = sshll.u32 %s13174_s5, 4  ;;  %p13138_p10 = scmp.ne.s32.totalorder %s14646_s3, %s13137_s9  ;;  %s54_s6 = int_to_ptr.vmem [resolvable:$true] %s53_s6 }
  0x37   :  { %p13141_p11 = scmp.lt.u32.totalorder %s13137_s9, %s14646_s3 }
  0x39   :  { %p13143_p12 = pnand %p13141_p11, %p13138_p10 }
  0x3b   :  { %13146 = shalt.err (!%p13143_p12)
}
  0x3c   :  { %s13147_s13 = scalar_lea.vmem %s54_s6, 1280  ;;  %p13152_p0 = scmp.lt.s32.totalorder %s54_s6, %s54_s6 }
  0x3d   :  { %p13148_p13 = scmp.ne.s32.totalorder %s54_s6, %s13147_s13  ;;  %p13153_p1 = scmp.lt.s32.totalorder %s13147_s13, %s13147_s13 }
  0x3f   :  { %p13154_p2 = por %p13153_p1, %p13152_p0 }
  0x41   :  { %p13155_p3 = pnand %p13154_p2, %p13148_p13 }
  0x43   :  { %13158 = shalt.err (!%p13155_p3)
}
  0x44   :  { %59 = dma.hbm_to_vmem [thread:$0]  %s14646_s3, 1280, %s54_s6, [#allocation8], %s13166_s25, %s13166_s25, %s13167_s26  }
  0x45   :  { %13159 = dma.done.wait [#allocation3], 512  }
  0x46   :  { %13160 = vsyncadd [#allocation3], 4294966784 }
  0x47   :  { %13161 = dma.done.wait [#allocation5], 46336  }
  0x48   :  { %13162 = vsyncadd [#allocation5], 4294920960 }
  0x49   :  { %13163 = dma.done.wait [#allocation8], 1280  }
  0x4a   :  { %13164 = vsyncadd [#allocation8], 4294966016  ;;  %v13175_v0 = vmov 0.0   ;;  %vm13176_vm0 = vmmov 0   ;;  %v12327_v1 = vld [vmem:[#allocation6 + $0x8] ss:$180 sps:$4 sm:$0xff]  }
  0x4b   :  { %11261 = vmatprep.subr.bf16.mxu1 %v13175_v0  ;;  %11277 = vmatprep.mubr.msk.bf16.mxu1 %vm13176_vm0, %v13175_v0  ;;  %v12328_v2 = vld [vmem:[#allocation6 + $0x170] ss:$180 sps:$4 sm:$0xff]   ;;  %v12329_v3 = vld [vmem:[#allocation6 + $0x2d8] ss:$180 sps:$4 sm:$0xff]   ;;  %v12335_v4 = vld [vmem:[#allocation6] ss:$180 sps:$4 sm:$0xff]  }
  0x4c   :  { %11221 = vmatprep.subr.bf16.mxu0 %v13175_v0  ;;  %11237 = vmatprep.mubr.msk.bf16.mxu0 %vm13176_vm0, %v13175_v0  ;;  %v12330_v5 = vld [vmem:[#allocation6 + $0x440] ss:$180 sps:$4 sm:$0xff]   ;;  %v12336_v6 = vld [vmem:[#allocation6 + $0x168] ss:$180 sps:$4 sm:$0xff]   ;;  %v12337_v8 = vld [vmem:[#allocation6 + $0x2d0] ss:$180 sps:$4 sm:$0xff]  }
  0x4d   :  { %11262 = vmatpush3.bf16.msra.mxu1 %v12327_v1  ;;  %11222 = vmatpush3.bf16.msra.mxu0 %v12335_v4  ;;  %v12331_v7 = vld [vmem:[#allocation6 + $0x5a8] ss:$180 sps:$4 sm:$0xff]   ;;  %v12332_v9 = vld [vmem:[#allocation6 + $0x710] ss:$180 sps:$4 sm:$0xff]   ;;  %v12338_v10 = vld [vmem:[#allocation6 + $0x438] ss:$180 sps:$4 sm:$0xff]  }
  0x4e   :  { %11263 = vmatprep.subr.bf16.mxu1 %v13175_v0  ;;  %11223 = vmatprep.subr.bf16.mxu0 %v13175_v0  ;;  %v12333_v11 = vld [vmem:[#allocation6 + $0x878] ss:$180 sps:$4 sm:$0xff]   ;;  %v12339_v12 = vld [vmem:[#allocation6 + $0x5a0] ss:$180 sps:$4 sm:$0xff]   ;;  %v12340_v16 = vld [vmem:[#allocation6 + $0x708] ss:$180 sps:$4 sm:$0xff]  }
  0x4f   :  { %v12334_v13 = vld [vmem:[#allocation6 + $0x9e0] ss:$180 sps:$4 sm:$0xff]   ;;  %v315_v15 = vld [vmem:[#allocation4 + $0x8] sm:$0xff]  ;;  %v12353_v17 = vld [vmem:[#allocation6 + $0x10] ss:$180 sps:$4 sm:$0xff]   ;;  %v13177_v58 = vmov 0  }
  0x50   :  { %v314_v14 = vld [vmem:[#allocation4] sm:$0xff]  ;;  %v12351_v19 = vld [vmem:[#allocation6 + $0xc] ss:$180 sps:$4 sm:$0xff]   ;;  %v12343_v29 = vld [vmem:[#allocation6 + $0x4] ss:$180 sps:$4 sm:$0xff]   ;;  %vm695_vm1 = vcmask 261120  }
  0x51   :  { %11264 = vmatpush3.bf16.msra.mxu1 %v12328_v2  ;;  %11224 = vmatpush3.bf16.msra.mxu0 %v12336_v6  ;;  %v332_v18 = vpack.c.bf16 %v315_v15, %v314_v14  ;;  %v12341_v20 = vld [vmem:[#allocation6 + $0x870] ss:$180 sps:$4 sm:$0xff]   ;;  %v12357_v21 = vld [vmem:[#allocation6 + $0x178] ss:$180 sps:$4 sm:$0xff]   ;;  %v12355_v25 = vld [vmem:[#allocation6 + $0x174] ss:$180 sps:$4 sm:$0xff]  }
  0x52   :  { %11265 = vmatprep.subr.bf16.mxu1 %v13175_v0  ;;  %11225 = vmatprep.subr.bf16.mxu0 %v13175_v0  ;;  %v12342_v22 = vld [vmem:[#allocation6 + $0x9d8] ss:$180 sps:$4 sm:$0xff]   ;;  %v94_v23 = vld [vmem:[#allocation2] sm:$0xff]  ;;  %v95_v24 = vld [vmem:[#allocation2 + $0x10] sm:$0xff]  ;;  %vm745_vm3 = vcmask 130048   ;;  %s13178_s3 = smov 96  }
  0x53   :  { %v12361_v26 = vld [vmem:[#allocation6 + $0x2e0] ss:$180 sps:$4 sm:$0xff]   ;;  %v112_v27 = vpack.c.bf16 %v95_v24, %v94_v23  ;;  %v12359_v28 = vld [vmem:[#allocation6 + $0x2dc] ss:$180 sps:$4 sm:$0xff]   ;;  %v12363_v32 = vld [vmem:[#allocation6 + $0x444] ss:$180 sps:$4 sm:$0xff]  }
  0x54   :  { %v12365_v30 = vld [vmem:[#allocation6 + $0x448] ss:$180 sps:$4 sm:$0xff]   ;;  %v12344_v31 = vld [vmem:[#allocation6 + $0x16c] ss:$180 sps:$4 sm:$0xff]   ;;  %v12369_v33 = vld [vmem:[#allocation6 + $0x5b0] ss:$180 sps:$4 sm:$0xff]  }
  0x55   :  { %11266 = vmatpush3.bf16.msra.mxu1 %v12329_v3  ;;  %11226 = vmatpush3.bf16.msra.mxu0 %v12337_v8  ;;  %v12367_v34 = vld [vmem:[#allocation6 + $0x5ac] ss:$180 sps:$4 sm:$0xff]   ;;  %v12345_v35 = vld [vmem:[#allocation6 + $0x2d4] ss:$180 sps:$4 sm:$0xff]   ;;  %v12346_v38 = vld [vmem:[#allocation6 + $0x43c] ss:$180 sps:$4 sm:$0xff]  }
  0x56   :  { %11267 = vmatprep.subr.bf16.mxu1 %v13175_v0  ;;  %11227 = vmatprep.subr.bf16.mxu0 %v13175_v0  ;;  %v12373_v36 = vld [vmem:[#allocation6 + $0x718] ss:$180 sps:$4 sm:$0xff]   ;;  %v12371_v37 = vld [vmem:[#allocation6 + $0x714] ss:$180 sps:$4 sm:$0xff]   ;;  %v12375_v40 = vld [vmem:[#allocation6 + $0x87c] ss:$180 sps:$4 sm:$0xff]  }
  0x57   :  { %v12377_v39 = vld [vmem:[#allocation6 + $0x880] ss:$180 sps:$4 sm:$0xff]   ;;  %v12347_v41 = vld [vmem:[#allocation6 + $0x5a4] ss:$180 sps:$4 sm:$0xff]   ;;  %v12350_v44 = vld [vmem:[#allocation6 + $0x9dc] ss:$180 sps:$4 sm:$0xff]  }
  0x58   :  { %v12348_v42 = vld [vmem:[#allocation6 + $0x70c] ss:$180 sps:$4 sm:$0xff]   ;;  %v12349_v43 = vld [vmem:[#allocation6 + $0x874] ss:$180 sps:$4 sm:$0xff]   ;;  %v204_v45 = vld [vmem:[#allocation2 + $0x8] sm:$0xff]  ;;  %s13179_s25 = smov 64  }
  0x59   :  { %11268 = vmatpush3.bf16.msra.mxu1 %v12330_v5  ;;  %11228 = vmatpush3.bf16.msra.mxu0 %v12338_v10  ;;  %v205_v46 = vld [vmem:[#allocation2 + $0x18] sm:$0xff]  ;;  %v12358_v49 = vld [vmem:[#allocation6 + $0x17c] ss:$180 sps:$4 sm:$0xff]   ;;  %v12362_v50 = vld [vmem:[#allocation6 + $0x2e4] ss:$180 sps:$4 sm:$0xff]   ;;  %s13180_s26 = smov 32  }
  0x5a   :  { %11269 = vmatprep.subr.bf16.mxu1 %v13175_v0  ;;  %11229 = vmatprep.subr.bf16.mxu0 %v13175_v0  ;;  %v12354_v47 = vld [vmem:[#allocation6 + $0x14] ss:$180 sps:$4 sm:$0xff]   ;;  %v222_v48 = vpack.c.bf16 %v205_v46, %v204_v45  ;;  %v12366_v51 = vld [vmem:[#allocation6 + $0x44c] ss:$180 sps:$4 sm:$0xff]   ;;  %v12374_v53 = vld [vmem:[#allocation6 + $0x71c] ss:$180 sps:$4 sm:$0xff]  }
  0x5b   :  { %v12370_v52 = vld [vmem:[#allocation6 + $0x5b4] ss:$180 sps:$4 sm:$0xff]   ;;  %v12378_v54 = vld [vmem:[#allocation6 + $0x884] ss:$180 sps:$4 sm:$0xff]   ;;  %v12382_v57 = vld [vmem:[#allocation6 + $0x9ec] ss:$180 sps:$4 sm:$0xff]  }
  0x5c   :  { %v12381_v55 = vld [vmem:[#allocation6 + $0x9e8] ss:$180 sps:$4 sm:$0xff]   ;;  %v12379_v56 = vld [vmem:[#allocation6 + $0x9e4] ss:$180 sps:$4 sm:$0xff]   ;;  %v10297_v59 = vld [vmem:[#allocation7 + $0x10] ss:$0 sm:$0xff] }
  0x5d   :  { %11270 = vmatpush3.bf16.msra.mxu1 %v12331_v7  ;;  %11230 = vmatpush3.bf16.msra.mxu0 %v12339_v12  ;;  %vm10272_vm5 = vcmask 122880  }
  0x5e   :  { %11271 = vmatprep.subr.bf16.mxu1 %v13175_v0  ;;  %11231 = vmatprep.subr.bf16.mxu0 %v13175_v0 }
  0x61   :  { %11272 = vmatpush3.bf16.msra.mxu1 %v12332_v9  ;;  %11232 = vmatpush3.bf16.msra.mxu0 %v12340_v16  ;;  %v10330_v9 = vld [vmem:[#allocation7 + $0x11] ss:$0 sm:$0xff] }
  0x62   :  { %11273 = vmatprep.subr.bf16.mxu1 %v13175_v0  ;;  %11233 = vmatprep.subr.bf16.mxu0 %v13175_v0 }
  0x65   :  { %11274 = vmatpush3.bf16.msra.mxu1 %v12333_v11  ;;  %11234 = vmatpush3.bf16.msra.mxu0 %v12341_v20  ;;  %v10332_v11 = vld [vmem:[#allocation7 + $0x13] ss:$0 sm:$0xff] }
  0x66   :  { %11275 = vmatprep.subr.bf16.mxu1 %v13175_v0  ;;  %11235 = vmatprep.subr.bf16.mxu0 %v13175_v0 }
  0x69   :  { %11276 = vmatpush3.bf16.msra.mxu1 %v12334_v13  ;;  %11236 = vmatpush3.bf16.msra.mxu0 %v12342_v22  ;;  %v10331_v13 = vld [vmem:[#allocation7 + $0x12] ss:$0 sm:$0xff] }
  0x6a   :  { %588 = vmatprep.subr.bf16.mxu1 %v12353_v17  ;;  %11241 = vmatprep.subr.bf16.mxu0 %v13175_v0 }
  0x6c   :  { %11278 = vmatmul.mubr.bf16.vlgmr.msra.gmra.mrb[0].mxu1 %v332_v18  ;;  %11238 = vmatmul.mubr.bf16.vlgmr.msra.gmra.mrb[0].mxu0 %v112_v27 }
  0x6d   :  { %589 = vmatpush1.bf16.msra.mxu1 %v12351_v19  ;;  %11242 = vmatpush3.bf16.msra.mxu0 %v12343_v29  ;;  %v73_v29 = vlaneseq }
  0x6e   :  { %590 = vmatprep.subr.bf16.mxu1 %v12357_v21  ;;  %11257 = vmatprep.mubr.msk.bf16.mxu0 %vm13176_vm0, %v13175_v0 }
  0x6f   :  { %11243 = vmatprep.subr.bf16.mxu0 %v13175_v0  ;;  %620 = vmatprep.mubr.bf16.mxu1 %v13177_v58 }
  0x71   :  { %591 = vmatpush1.bf16.msra.mxu1 %v12355_v25  ;;  %11244 = vmatpush3.bf16.msra.mxu0 %v12344_v31  ;;  %v79_v31 = vand.u32 127, %v73_v29 }
  0x72   :  { %592 = vmatprep.subr.bf16.mxu1 %v12361_v26  ;;  %11245 = vmatprep.subr.bf16.mxu0 %v13175_v0 }
  0x75   :  { %593 = vmatpush1.bf16.msra.mxu1 %v12359_v28  ;;  %11246 = vmatpush3.bf16.msra.mxu0 %v12345_v35 }
  0x76   :  { %594 = vmatprep.subr.bf16.mxu1 %v12365_v30  ;;  %11247 = vmatprep.subr.bf16.mxu0 %v13175_v0  ;;  %v74_v30 = vshrl.u32 %v73_v29, 7 }
  0x79   :  { %595 = vmatpush1.bf16.msra.mxu1 %v12363_v32  ;;  %11248 = vmatpush3.bf16.msra.mxu0 %v12346_v38  ;;  %v75_v32 = vadd.s32 8, %v74_v30 }
  0x7a   :  { %596 = vmatprep.subr.bf16.mxu1 %v12369_v33  ;;  %11249 = vmatprep.subr.bf16.mxu0 %v13175_v0  ;;  %v76_v33 = vcvt.s32.f32 %v74_v30 }
  0x7b   :  { %v77_v35 = vcvt.s32.f32 %v75_v32 }
  0x7d   :  { %597 = vmatpush1.bf16.msra.mxu1 %v12367_v34  ;;  %11250 = vmatpush3.bf16.msra.mxu0 %v12347_v41  ;;  %v80_v34 = vcvt.s32.f32 %v79_v31  ;;  %v82_v38 = vadd.f32 0.5, %v77_v35 }
  0x7e   :  { %598 = vmatprep.subr.bf16.mxu1 %v12373_v36  ;;  %11251 = vmatprep.subr.bf16.mxu0 %v13175_v0  ;;  %v81_v36 = vadd.f32 0.5, %v76_v33 }
  0x7f   :  { %v84_v41 = vmul.f32 0.125, %v82_v38 }
  0x81   :  { %599 = vmatpush1.bf16.msra.mxu1 %v12371_v37  ;;  %11252 = vmatpush3.bf16.msra.mxu0 %v12348_v42  ;;  %v87_v37 = vadd.f32 0.5, %v80_v34 }
  0x82   :  { %600 = vmatprep.subr.bf16.mxu1 %v12377_v39  ;;  %11253 = vmatprep.subr.bf16.mxu0 %v13175_v0  ;;  %v83_v39 = vmul.f32 0.125, %v81_v36 }
  0x84   :  { %v85_v42 = vfloor.f32 %v83_v39 }
  0x85   :  { %601 = vmatpush1.bf16.msra.mxu1 %v12375_v40  ;;  %11254 = vmatpush3.bf16.msra.mxu0 %v12349_v43  ;;  %v88_v40 = vmul.f32 0.125, %v87_v37 }
  0x86   :  { %11255 = vmatprep.subr.bf16.mxu0 %v13175_v0  ;;  %602 = vmatprep.subr.bf16.mxu1 %v12381_v55 }
  0x87   :  { %v89_v43 = vfloor.f32 %v88_v40 }
  0x89   :  { %11256 = vmatpush3.bf16.msra.mxu0 %v12350_v44  ;;  %603 = vmatpush1.bf16.msra.mxu1 %v12379_v56  ;;  %v86_v44 = vfloor.f32 %v84_v41  ;;  %vm13332_vm2 = vcmp.eq.f32.partialorder %v85_v42, %v89_v43 }
  0x8a   :  { %11281 = vmatprep.subr.bf16.mxu0 %v13175_v0  ;;  %11301 = vmatprep.subr.bf16.mxu1 %v13175_v0 }
  0x8b   :  { %vm13336_vm4 = vcmp.eq.f32.partialorder %v86_v44, %v89_v43  ;;  %v12385_v43 = vld [vmem:[#allocation6 + $0x2e8] ss:$180 sps:$4 sm:$0xff]   ;;  %v12386_v44 = vld [vmem:[#allocation6 + $0x450] ss:$180 sps:$4 sm:$0xff]  }
  0x8c   :  { %11258 = vmatmul.mubr.bf16.vlgmr.msra.gmra.mrb[0].mxu0 %v222_v48 }
  0x8d   :  { %11282 = vmatpush3.bf16.msra.mxu0 %v12354_v47  ;;  %11297 = vmatprep.mubr.msk.bf16.mxu0 %vm13176_vm0, %v13175_v0 }
  0x8e   :  { %11283 = vmatprep.subr.bf16.mxu0 %v13175_v0 }
  0x91   :  { %11284 = vmatpush3.bf16.msra.mxu0 %v12358_v49 }
  0x92   :  { %11285 = vmatprep.subr.bf16.mxu0 %v13175_v0 }
  0x95   :  { %11286 = vmatpush3.bf16.msra.mxu0 %v12362_v50 }
  0x96   :  { %11287 = vmatprep.subr.bf16.mxu0 %v13175_v0 }
  0x99   :  { %11288 = vmatpush3.bf16.msra.mxu0 %v12366_v51 }
  0x9a   :  { %11289 = vmatprep.subr.bf16.mxu0 %v13175_v0 }
  0x9d   :  { %11290 = vmatpush3.bf16.msra.mxu0 %v12370_v52 }
  0x9e   :  { %11291 = vmatprep.subr.bf16.mxu0 %v13175_v0 }
  0xa1   :  { %11292 = vmatpush3.bf16.msra.mxu0 %v12374_v53 }
  0xa2   :  { %11293 = vmatprep.subr.bf16.mxu0 %v13175_v0 }
  0xa5   :  { %11294 = vmatpush3.bf16.msra.mxu0 %v12378_v54 }
  0xa6   :  { %11295 = vmatprep.subr.bf16.mxu0 %v13175_v0 }
  0xa9   :  { %11296 = vmatpush3.bf16.msra.mxu0 %v12382_v57 }
  0xaa   :  { %11325 = vmatprep.subr.bf16.mxu0 %v13175_v0 }
 0x13f   :  { %v420_v60 = vpop.f32.mrb[0].mxu1 }
 0x140   :  { %v11279_v61 = vpop.f32.mrb[1].mxu1  ;;  %v13303_v63 = vadd.f32 %v10297_v59, %v420_v60 }
 0x141   :  { %v423_v62 = vpop.f32.mrb[2].mxu1 }
 0x142   :  { %v13305_v1 = vadd.f32 %v10297_v59, %v423_v62  ;;  %v11280_v2 = vpop.f32.mrb[3].mxu1 }
 0x144   :  { %v459_v3 = vpack.c.bf16 %v13305_v1, %v13303_v63 }
 0x146   :  { %621 = vmatmul.mubr.bf16.vlgmr.msra.gmra.mrb[4].mxu1 %v459_v3  ;;  %11298 = vmatmul.mubr.bf16.vlgmr.msra.gmra.mrb[4].mxu0 %v459_v3 }
 0x147   :  { %11303 = vmatprep.mubr.msk.bf16.mxu1 %vm13176_vm0, %v13175_v0  ;;  %11329 = vmatprep.mubr.msk.bf16.mxu0 %vm13176_vm0, %v13175_v0 }
 0x148   :  { %11326 = vmatpush3.bf16.msra.mxu0 %v12385_v43 }
 0x149   :  { %11327 = vmatprep.subr.bf16.mxu0 %v13175_v0 }
 0x14c   :  { %11328 = vmatpush3.bf16.msra.mxu0 %v12386_v44 }
 0x14d   :  { %11341 = vmatprep.subr.bf16.mxu0 %v13175_v0 }
 0x15f   :  { %v13313_v4 = vpop.f32.mrb[0].mxu0 }
 0x160   :  { %v11259_v5 = vpop.f32.mrb[1].mxu0 }
 0x161   :  { %v13315_v6 = vpop.f32.mrb[2].mxu0 }
 0x162   :  { %v11260_v7 = vpop.f32.mrb[3].mxu0 }
 0x219   :  { %v622_v8 = vpop.f32.mrb[4].mxu1  ;;  %v665_v10 = vpop.f32.mrb[4].mxu0 }
 0x21a   :  { %v624_v12 = vpop.f32.mrb[5].mxu1  ;;  %v11299_v14 = vpop.f32.mrb[5].mxu0  ;;  %v677_v17 = vadd.f32 %v10330_v9, %v622_v8  ;;  %v691_v18 = vadd.f32 %v10332_v11, %v665_v10 }
 0x21b   :  { %v626_v15 = vpop.f32.mrb[6].mxu1  ;;  %v668_v16 = vpop.f32.mrb[6].mxu0  ;;  %v684_v23 = vadd.f32 %v10331_v13, %v624_v12 }
 0x21c   :  { %v678_v19 = vadd.f32 %v10330_v9, %v626_v15  ;;  %v692_v20 = vadd.f32 %v10332_v11, %v668_v16  ;;  %v628_v21 = vpop.f32.mrb[7].mxu1  ;;  %v11300_v22 = vpop.f32.mrb[7].mxu0 }
 0x21d   :  { %v685_v24 = vadd.f32 %v10331_v13, %v628_v21 }
 0x21e   :  { %v13317_v25 = vpack.c.bf16 %v678_v19, %v677_v17  ;;  %v13319_v26 = vpack.c.bf16 %v692_v20, %v691_v18 }
 0x21f   :  { %v13321_v27 = vpack.c.bf16 %v685_v24, %v684_v23 }
 0x221   :  { %v700_v28 = vsel %vm695_vm1, %v13321_v27, 0 }
 0x222   :  { %11302 = vmatpush3.bf16.xpose.msra.mxu1 %v700_v28 }
 0x223   :  { %11307 = vmatprep.subr.bf16.mxu1 %v13175_v0 }
 0x229   :  { %11304 = vmatmul.mubr.msk.bf16.vlgmr.msra.gmra.mrb[8].mxu1 %vm695_vm1, %v13317_v25 }
 0x22a   :  { %11308 = vmatpush3.bf16.msra.mxu1 %v13319_v26  ;;  %11309 = vmatprep.mubr.msk.bf16.mxu1 %vm13176_vm0, %v13175_v0 }
 0x22b   :  { %11313 = vmatprep.subr.bf16.mxu1 %v13175_v0 }
 0x2fc   :  { %v736_v46 = vpop.f32.mrb[8].mxu1 }
 0x2fd   :  { %v743_v48 = vsel %vm13332_vm2, %v736_v46, -1e+30  ;;  %v11305_v49 = vpop.f32.mrb[9].mxu1 }
 0x2fe   :  { %v739_v50 = vpop.f32.mrb[10].mxu1  ;;  %v746_v51 = vsel %vm745_vm3, %v743_v48, -inf }
 0x2ff   :  { %v744_v52 = vsel %vm13336_vm4, %v739_v50, -1e+30  ;;  %747 = vmax.xlane.f32.xlu0 %v746_v51  ;;  %v11306_v53 = vpop.f32.mrb[11].mxu1 }
 0x300   :  { %v749_v54 = vsel %vm745_vm3, %v744_v52, -inf }
 0x303   :  { %750 = vmax.xlane.f32.xlu0 %v749_v54  ;;  %v12383_v54 = vld [vmem:[#allocation6 + $0x18] ss:$180 sps:$4 sm:$0xff]  }
 0x319   :  { %823 = vrot.lane.b32.xlu0 %v13321_v27, %s13178_s3 }
 0x38c   :  { %v748_v55 = vpop.xlane.xlu0 %747 }
 0x38d   :  { %v752_v56 = vsub.f32 %v743_v48, %v748_v55 }
 0x38f   :  { %v754_v57 = vmul.f32 1.442695, %v752_v56  ;;  %v12384_v56 = vld [vmem:[#allocation6 + $0x180] ss:$180 sps:$4 sm:$0xff]  }
 0x390   :  { %v751_v59 = vpop.xlane.xlu0 %750 }
 0x391   :  { %12751 = vpow2.f32 %v754_v57  ;;  %v753_v60 = vsub.f32 %v744_v52, %v751_v59 }
 0x393   :  { %v756_v61 = vmul.f32 1.442695, %v753_v60 }
 0x394   :  { %v824_v13 = vpop.permute.xlu0 %823 }
 0x395   :  { %12753 = vpow2.f32 %v756_v61  ;;  %v829_v15 = vsel %vm695_vm1, %v824_v13, 0 }
 0x39b   :  { %v12752_v62 = vpop.eup %12751 }
 0x39c   :  { %v758_v2 = vsel %vm745_vm3, %v12752_v62, 0.0 }
 0x39d   :  { %759 = vadd.xlane.f32.xlu1 %v758_v2 }
 0x39f   :  { %v12754_v3 = vpop.eup %12753 }
 0x3a0   :  { %v761_v5 = vsel %vm745_vm3, %v12754_v3, 0.0 }
 0x3a1   :  { %762 = vadd.xlane.f32.xlu1 %v761_v5 }
 0x3b2   :  { %820 = vrot.lane.b32.xlu1 %v13317_v25, %s13178_s3 }
 0x42a   :  { %v760_v7 = vpop.xlane.xlu1 %759 }
 0x42b   :  { %12755 = vrcp.f32 %v760_v7 }
 0x42e   :  { %v763_v8 = vpop.xlane.xlu1 %762 }
 0x42f   :  { %12757 = vrcp.f32 %v763_v8 }
 0x432   :  { %v821_v16 = vpop.permute.xlu1 %820 }
 0x435   :  { %v12756_v9 = vpop.eup %12755 }
 0x436   :  { %v766_v11 = vmul.f32 %v12756_v9, %v12752_v62 }
 0x439   :  { %v12758_v10 = vpop.eup %12757 }
 0x43a   :  { %v767_v12 = vmul.f32 %v12758_v10, %v12754_v3 }
 0x43c   :  { %v768_v14 = vpack.c.bf16 %v767_v12, %v766_v11 }
 0x43e   :  { %11310 = vmatmul.mubr.msk.bf16.vlgmr.msra.gmra.mrb[12].mxu1 %vm745_vm3, %v768_v14 }
 0x43f   :  { %11314 = vmatpush3.bf16.xpose.msra.mxu1 %v829_v15  ;;  %11315 = vmatprep.mubr.msk.bf16.mxu1 %vm13176_vm0, %v13175_v0 }
 0x440   :  { %11319 = vmatprep.subr.bf16.mxu1 %v13175_v0 }
 0x446   :  { %11316 = vmatmul.mubr.msk.bf16.vlgmr.msra.gmra.mrb[16].mxu1 %vm695_vm1, %v821_v16 }
 0x447   :  { %11321 = vmatprep.mubr.msk.bf16.mxu1 %vm13176_vm0, %v13175_v0 }
 0x511   :  { %v807_v17 = vpop.f32.mrb[12].mxu1 }
 0x512   :  { %v11311_v18 = vpop.f32.mrb[13].mxu1 }
 0x513   :  { %v810_v19 = vpop.f32.mrb[14].mxu1 }
 0x514   :  { %v818_v20 = vpack.c.bf16 %v810_v19, %v807_v17  ;;  %v11312_v21 = vpop.f32.mrb[15].mxu1 }
 0x519   :  { %v865_v22 = vpop.f32.mrb[16].mxu1 }
 0x51a   :  { %v872_v23 = vsel %vm13332_vm2, %v865_v22, -1e+30  ;;  %v11317_v24 = vpop.f32.mrb[17].mxu1 }
 0x51b   :  { %v868_v28 = vpop.f32.mrb[18].mxu1  ;;  %v874_v29 = vsel %vm745_vm3, %v872_v23, -inf }
 0x51c   :  { %v873_v30 = vsel %vm13336_vm4, %v868_v28, -1e+30  ;;  %875 = vmax.xlane.f32.xlu1 %v874_v29  ;;  %v11318_v31 = vpop.f32.mrb[19].mxu1 }
 0x51d   :  { %v877_v32 = vsel %vm745_vm3, %v873_v30, -inf }
 0x51e   :  { %878 = vmax.xlane.f32.xlu0 %v877_v32 }
 0x5a9   :  { %v876_v33 = vpop.xlane.xlu1 %875 }
 0x5aa   :  { %v880_v34 = vsub.f32 %v872_v23, %v876_v33 }
 0x5ab   :  { %v879_v35 = vpop.xlane.xlu0 %878 }
 0x5ac   :  { %v882_v36 = vmul.f32 1.442695, %v880_v34  ;;  %v881_v37 = vsub.f32 %v873_v30, %v879_v35 }
 0x5ae   :  { %12759 = vpow2.f32 %v882_v36  ;;  %v884_v38 = vmul.f32 1.442695, %v881_v37 }
 0x5b0   :  { %12761 = vpow2.f32 %v884_v38 }
 0x5b8   :  { %v12760_v39 = vpop.eup %12759 }
 0x5b9   :  { %v886_v40 = vsel %vm745_vm3, %v12760_v39, 0.0 }
 0x5ba   :  { %v12762_v41 = vpop.eup %12761  ;;  %887 = vadd.xlane.f32.xlu0 %v886_v40 }
 0x5bb   :  { %v889_v42 = vsel %vm745_vm3, %v12762_v41, 0.0 }
 0x5bc   :  { %890 = vadd.xlane.f32.xlu1 %v889_v42 }
 0x5cd   :  { %1064 = vrot.lane.b32.xlu1 %v13321_v27, %s13179_s25 }
 0x5d0   :  { %898 = vrot.lane.b32.xlu0 %v13319_v26, %s13178_s3 }
 0x5d1   :  { %1062 = vrot.lane.b32.xlu1 %v13317_v25, %s13179_s25 }
 0x647   :  { %v888_v46 = vpop.xlane.xlu0 %887 }
 0x648   :  { %12763 = vrcp.f32 %v888_v46 }
 0x649   :  { %v891_v48 = vpop.xlane.xlu1 %890 }
 0x64a   :  { %12765 = vrcp.f32 %v891_v48 }
 0x64b   :  { %v899_v49 = vpop.permute.xlu0 %898 }
 0x64c   :  { %11320 = vmatpush3.bf16.msra.mxu1 %v899_v49 }
 0x64d   :  { %11333 = vmatprep.subr.bf16.mxu1 %v13175_v0  ;;  %v1065_v60 = vpop.permute.xlu1 %1064 }
 0x64e   :  { %v1070_v3 = vsel %vm695_vm1, %v1065_v60, 0 }
 0x651   :  { %v1063_v10 = vpop.permute.xlu1 %1062 }
 0x652   :  { %v12764_v50 = vpop.eup %12763 }
 0x653   :  { %v894_v52 = vmul.f32 %v12764_v50, %v12760_v39  ;;  %v12388_v50 = vld [vmem:[#allocation6 + $0x720] ss:$180 sps:$4 sm:$0xff]  }
 0x654   :  { %v12766_v51 = vpop.eup %12765 }
 0x655   :  { %v895_v53 = vmul.f32 %v12766_v51, %v12762_v41 }
 0x657   :  { %v896_v55 = vpack.c.bf16 %v895_v53, %v894_v52 }
 0x659   :  { %11322 = vmatmul.mubr.msk.bf16.vlgmr.msra.gmra.mrb[20].mxu1 %vm745_vm3, %v896_v55 }
 0x65a   :  { %11334 = vmatpush3.bf16.msra.mxu1 %v12383_v54  ;;  %11337 = vmatprep.mubr.msk.bf16.mxu1 %vm13176_vm0, %v13175_v0 }
 0x65b   :  { %11335 = vmatprep.subr.bf16.mxu1 %v13175_v0 }
 0x65e   :  { %11336 = vmatpush3.bf16.msra.mxu1 %v12384_v56 }
 0x65f   :  { %11347 = vmatprep.subr.bf16.mxu1 %v13175_v0 }
 0x661   :  { %11338 = vmatmul.mubr.msk.bf16.vlgmr.msra.gmra.mrb[24].mxu1 %vm695_vm1, %v818_v20 }
 0x662   :  { %11349 = vmatprep.mubr.msk.bf16.mxu1 %vm13176_vm0, %v13175_v0 }
 0x72c   :  { %v938_v57 = vpop.f32.mrb[20].mxu1 }
 0x72d   :  { %v11323_v59 = vpop.f32.mrb[21].mxu1 }
 0x72e   :  { %v941_v61 = vpop.f32.mrb[22].mxu1 }
 0x72f   :  { %v949_v62 = vpack.c.bf16 %v941_v61, %v938_v57  ;;  %v11324_v2 = vpop.f32.mrb[23].mxu1 }
 0x731   :  { %11330 = vmatmul.mubr.msk.bf16.vlgmr.msra.gmra.mrb[8].mxu0 %vm695_vm1, %v949_v62 }
 0x732   :  { %11342 = vmatpush3.bf16.xpose.msra.mxu0 %v1070_v3  ;;  %11343 = vmatprep.mubr.msk.bf16.mxu0 %vm13176_vm0, %v13175_v0 }
 0x733   :  { %11353 = vmatprep.subr.bf16.mxu0 %v13175_v0 }
 0x734   :  { %v1055_v5 = vpop.f32.mrb[24].mxu1 }
 0x735   :  { %v11339_v7 = vpop.f32.mrb[25].mxu1 }
 0x736   :  { %v1058_v8 = vpop.f32.mrb[26].mxu1 }
 0x737   :  { %v11340_v9 = vpop.f32.mrb[27].mxu1 }
 0x739   :  { %11344 = vmatmul.mubr.msk.bf16.vlgmr.msra.gmra.mrb[12].mxu0 %vm695_vm1, %v1063_v10 }
 0x73a   :  { %11357 = vmatprep.mubr.msk.bf16.mxu0 %vm13176_vm0, %v13175_v0 }
 0x804   :  { %v999_v11 = vpop.f32.mrb[8].mxu0 }
 0x805   :  { %v13393_v12 = vadd.f32 %v1055_v5, %v999_v11  ;;  %v11331_v13 = vpop.f32.mrb[9].mxu0 }
 0x806   :  { %v1002_v14 = vpop.f32.mrb[10].mxu0 }
 0x807   :  { %v13395_v15 = vadd.f32 %v1058_v8, %v1002_v14  ;;  %v11332_v16 = vpop.f32.mrb[11].mxu0 }
 0x80c   :  { %v1106_v17 = vpop.f32.mrb[12].mxu0 }
 0x80d   :  { %v1113_v18 = vsel %vm13332_vm2, %v1106_v17, -1e+30  ;;  %v11345_v19 = vpop.f32.mrb[13].mxu0 }
 0x80e   :  { %v1109_v20 = vpop.f32.mrb[14].mxu0  ;;  %v1115_v21 = vsel %vm745_vm3, %v1113_v18, -inf }
 0x80f   :  { %v1114_v22 = vsel %vm13336_vm4, %v1109_v20, -1e+30  ;;  %1116 = vmax.xlane.f32.xlu1 %v1115_v21  ;;  %v11346_v23 = vpop.f32.mrb[15].mxu0 }
 0x810   :  { %v1118_v24 = vsel %vm745_vm3, %v1114_v22, -inf }
 0x811   :  { %1119 = vmax.xlane.f32.xlu0 %v1118_v24 }
 0x820   :  { %1138 = vrot.lane.b32.xlu1 %v13319_v26, %s13179_s25 }
 0x824   :  { %1248 = vrot.lane.b32.xlu1 %v13317_v25, %s13180_s26  ;;  %v12387_v25 = vld [vmem:[#allocation6 + $0x5b8] ss:$180 sps:$4 sm:$0xff]  }
 0x825   :  { %11354 = vmatpush3.bf16.msra.mxu0 %v12387_v25 }
 0x826   :  { %11355 = vmatprep.subr.bf16.mxu0 %v13175_v0 }
 0x829   :  { %11356 = vmatpush3.bf16.msra.mxu0 %v12388_v50  ;;  %v12391_v50 = vld [vmem:[#allocation6 + $0x1c] ss:$180 sps:$4 sm:$0xff]  }
 0x82a   :  { %11367 = vmatprep.subr.bf16.mxu0 %v13175_v0 }
 0x89c   :  { %v1117_v28 = vpop.xlane.xlu1 %1116 }
 0x89d   :  { %v1121_v29 = vsub.f32 %v1113_v18, %v1117_v28  ;;  %v12389_v18 = vld [vmem:[#allocation6 + $0x888] ss:$180 sps:$4 sm:$0xff]  }
 0x89e   :  { %v1120_v30 = vpop.xlane.xlu0 %1119 }
 0x89f   :  { %v1123_v31 = vmul.f32 1.442695, %v1121_v29  ;;  %v1122_v32 = vsub.f32 %v1114_v22, %v1120_v30 }
 0x8a0   :  { %v1139_v33 = vpop.permute.xlu1 %1138 }
 0x8a1   :  { %12767 = vpow2.f32 %v1123_v31  ;;  %v1125_v34 = vmul.f32 1.442695, %v1122_v32  ;;  %11348 = vmatpush3.bf16.msra.mxu1 %v1139_v33 }
 0x8a2   :  { %11361 = vmatprep.subr.bf16.mxu1 %v13175_v0 }
 0x8a3   :  { %12769 = vpow2.f32 %v1125_v34 }
 0x8ab   :  { %v12768_v35 = vpop.eup %12767 }
 0x8ac   :  { %v1127_v36 = vsel %vm745_vm3, %v12768_v35, 0.0 }
 0x8ad   :  { %v12770_v37 = vpop.eup %12769  ;;  %1128 = vadd.xlane.f32.xlu0 %v1127_v36 }
 0x8ae   :  { %v1130_v38 = vsel %vm745_vm3, %v12770_v37, 0.0 }
 0x8b1   :  { %1131 = vadd.xlane.f32.xlu0 %v1130_v38 }
 0x8c7   :  { %1250 = vrot.lane.b32.xlu0 %v13321_v27, %s13180_s26  ;;  %v1249_v27 = vpop.permute.xlu1 %1248 }
 0x93a   :  { %v1129_v39 = vpop.xlane.xlu0 %1128 }
 0x93b   :  { %12771 = vrcp.f32 %v1129_v39  ;;  %v10353_v39 = vld [vmem:[#allocation7 + $0x14] ss:$0 sm:$0xff] }
 0x93e   :  { %v1132_v40 = vpop.xlane.xlu0 %1131 }
 0x93f   :  { %12773 = vrcp.f32 %v1132_v40 }
 0x942   :  { %v1251_v46 = vpop.permute.xlu0 %1250 }
 0x943   :  { %v1256_v49 = vsel %vm695_vm1, %v1251_v46, 0 }
 0x945   :  { %v12772_v41 = vpop.eup %12771 }
 0x946   :  { %v1135_v43 = vmul.f32 %v12772_v41, %v12768_v35 }
 0x949   :  { %v12774_v42 = vpop.eup %12773 }
 0x94a   :  { %v1136_v44 = vmul.f32 %v12774_v42, %v12770_v37 }
 0x94c   :  { %v1137_v48 = vpack.c.bf16 %v1136_v44, %v1135_v43 }
 0x94e   :  { %11350 = vmatmul.mubr.msk.bf16.vlgmr.msra.gmra.mrb[28].mxu1 %vm745_vm3, %v1137_v48 }
 0x94f   :  { %11362 = vmatpush3.bf16.xpose.msra.mxu1 %v1256_v49  ;;  %11363 = vmatprep.mubr.msk.bf16.mxu1 %vm13176_vm0, %v13175_v0 }
 0x950   :  { %11373 = vmatprep.subr.bf16.mxu1 %v13175_v0 }
 0x956   :  { %11364 = vmatmul.mubr.msk.bf16.vlgmr.msra.gmra.mrb[32].mxu1 %vm695_vm1, %v1249_v27 }
 0x957   :  { %11377 = vmatprep.mubr.msk.bf16.mxu1 %vm13176_vm0, %v13175_v0  ;;  %11374 = vmatpush3.bf16.msra.mxu1 %v12389_v18 }
 0x958   :  { %11375 = vmatprep.subr.bf16.mxu1 %v13175_v0 }
 0xa21   :  { %v1178_v51 = vpop.f32.mrb[28].mxu1 }
 0xa22   :  { %v11351_v52 = vpop.f32.mrb[29].mxu1 }
 0xa23   :  { %v1181_v53 = vpop.f32.mrb[30].mxu1 }
 0xa24   :  { %v1189_v54 = vpack.c.bf16 %v1181_v53, %v1178_v51  ;;  %v11352_v55 = vpop.f32.mrb[31].mxu1  ;;  %v12392_v51 = vld [vmem:[#allocation6 + $0x184] ss:$180 sps:$4 sm:$0xff]  }
 0xa26   :  { %11358 = vmatmul.mubr.msk.bf16.vlgmr.msra.gmra.mrb[16].mxu0 %vm695_vm1, %v1189_v54 }
 0xa27   :  { %11369 = vmatprep.mubr.msk.bf16.mxu0 %vm13176_vm0, %v13175_v0 }
 0xa29   :  { %v1292_v56 = vpop.f32.mrb[32].mxu1 }
 0xa2a   :  { %v1299_v57 = vsel %vm13332_vm2, %v1292_v56, -1e+30  ;;  %v11365_v59 = vpop.f32.mrb[33].mxu1 }
 0xa2b   :  { %v1295_v60 = vpop.f32.mrb[34].mxu1  ;;  %v1301_v61 = vsel %vm745_vm3, %v1299_v57, -inf }
 0xa2c   :  { %v1300_v62 = vsel %vm13336_vm4, %v1295_v60, -1e+30  ;;  %1302 = vmax.xlane.f32.xlu1 %v1301_v61  ;;  %v11366_v2 = vpop.f32.mrb[35].mxu1  ;;  %v12394_v60 = vld [vmem:[#allocation6 + $0x454] ss:$180 sps:$4 sm:$0xff]  }
 0xa2d   :  { %v1304_v3 = vsel %vm745_vm3, %v1300_v62, -inf  ;;  %v12395_v61 = vld [vmem:[#allocation6 + $0x5bc] ss:$180 sps:$4 sm:$0xff]   ;;  %v12397_v2 = vld [vmem:[#allocation6 + $0x88c] ss:$180 sps:$4 sm:$0xff]  }
 0xa2e   :  { %1305 = vmax.xlane.f32.xlu0 %v1304_v3  ;;  %v12398_v3 = vld [vmem:[#allocation6 + $0x9f4] ss:$180 sps:$4 sm:$0xff]  }
 0xab9   :  { %v1303_v5 = vpop.xlane.xlu1 %1302 }
 0xaba   :  { %v1307_v7 = vsub.f32 %v1299_v57, %v1303_v5  ;;  %v12407_v5 = vld [vmem:[#allocation6 + $0x20] ss:$180 sps:$4 sm:$0xff]  }
 0xabb   :  { %v1306_v8 = vpop.xlane.xlu0 %1305 }
 0xabc   :  { %v1309_v9 = vmul.f32 1.442695, %v1307_v7  ;;  %v1308_v10 = vsub.f32 %v1300_v62, %v1306_v8  ;;  %v12396_v62 = vld [vmem:[#allocation6 + $0x724] ss:$180 sps:$4 sm:$0xff]   ;;  %v12408_v7 = vld [vmem:[#allocation6 + $0x188] ss:$180 sps:$4 sm:$0xff]  }
 0xabd   :  { %v12409_v8 = vld [vmem:[#allocation6 + $0x2f0] ss:$180 sps:$4 sm:$0xff]  }
 0xabe   :  { %12775 = vpow2.f32 %v1309_v9  ;;  %v1311_v11 = vmul.f32 1.442695, %v1308_v10  ;;  %v12410_v9 = vld [vmem:[#allocation6 + $0x458] ss:$180 sps:$4 sm:$0xff]   ;;  %v12411_v10 = vld [vmem:[#allocation6 + $0x5c0] ss:$180 sps:$4 sm:$0xff]  }
 0xac0   :  { %12777 = vpow2.f32 %v1311_v11  ;;  %v12412_v11 = vld [vmem:[#allocation6 + $0x728] ss:$180 sps:$4 sm:$0xff]  }
 0xac8   :  { %v12776_v13 = vpop.eup %12775 }
 0xac9   :  { %v1313_v14 = vsel %vm745_vm3, %v12776_v13, 0.0 }
 0xaca   :  { %v12778_v16 = vpop.eup %12777  ;;  %1314 = vadd.xlane.f32.xlu0 %v1313_v14 }
 0xacb   :  { %v1316_v17 = vsel %vm745_vm3, %v12778_v16, 0.0 }
 0xacc   :  { %1317 = vadd.xlane.f32.xlu1 %v1316_v17 }
 0xae0   :  { %1324 = vrot.lane.b32.xlu0 %v13319_v26, %s13180_s26 }
 0xaf9   :  { %v1239_v19 = vpop.f32.mrb[16].mxu0 }
 0xafa   :  { %v1246_v20 = vadd.f32 %v1239_v19, %v13393_v12  ;;  %v11359_v21 = vpop.f32.mrb[17].mxu0  ;;  %v12390_v12 = vld [vmem:[#allocation6 + $0x9f0] ss:$180 sps:$4 sm:$0xff]  }
 0xafb   :  { %v1242_v22 = vpop.f32.mrb[18].mxu0  ;;  %11376 = vmatpush3.bf16.msra.mxu1 %v12390_v12  ;;  %v12401_v12 = vld [vmem:[#allocation6 + $0x30c] ss:$180 sps:$4 sm:$0xff]  }
 0xafc   :  { %v1247_v23 = vadd.f32 %v1242_v22, %v13395_v15  ;;  %v11360_v24 = vpop.f32.mrb[19].mxu0  ;;  %11401 = vmatprep.subr.bf16.mxu1 %v13175_v0  ;;  %v10354_v22 = vld [vmem:[#allocation7 + $0x15] ss:$0 sm:$0xff] }
 0xb57   :  { %v1315_v28 = vpop.xlane.xlu0 %1314 }
 0xb58   :  { %12779 = vrcp.f32 %v1315_v28 }
 0xb59   :  { %v1318_v29 = vpop.xlane.xlu1 %1317 }
 0xb5a   :  { %12781 = vrcp.f32 %v1318_v29  ;;  %v10355_v29 = vld [vmem:[#allocation7 + $0x16] ss:$0 sm:$0xff] }
 0xb5b   :  { %v1325_v30 = vpop.permute.xlu0 %1324 }
 0xb5c   :  { %11368 = vmatpush3.bf16.msra.mxu0 %v1325_v30 }
 0xb5d   :  { %11381 = vmatprep.subr.bf16.mxu0 %v13175_v0 }
 0xb62   :  { %v12780_v26 = vpop.eup %12779 }
 0xb63   :  { %v1321_v32 = vmul.f32 %v12780_v26, %v12776_v13 }
 0xb64   :  { %v12782_v31 = vpop.eup %12781 }
 0xb65   :  { %v1322_v33 = vmul.f32 %v12782_v31, %v12778_v16 }
 0xb67   :  { %v1323_v34 = vpack.c.bf16 %v1322_v33, %v1321_v32  ;;  %v12399_v32 = vld [vmem:[#allocation6 + $0x3c] ss:$180 sps:$4 sm:$0xff]  }
 0xb69   :  { %11370 = vmatmul.mubr.msk.bf16.vlgmr.msra.gmra.mrb[20].mxu0 %vm745_vm3, %v1323_v34  ;;  %v12400_v34 = vld [vmem:[#allocation6 + $0x1a4] ss:$180 sps:$4 sm:$0xff]  }
 0xb6a   :  { %11397 = vmatprep.mubr.msk.bf16.mxu0 %vm13176_vm0, %v13175_v0  ;;  %11382 = vmatpush3.bf16.msra.mxu0 %v12391_v50 }
 0xb6b   :  { %11383 = vmatprep.subr.bf16.mxu0 %v13175_v0 }
 0xb6e   :  { %11384 = vmatpush3.bf16.msra.mxu0 %v12392_v51 }
 0xb6f   :  { %11385 = vmatprep.subr.bf16.mxu0 %v13175_v0 }
 0xc3c   :  { %v1364_v15 = vpop.f32.mrb[20].mxu0 }
 0xc3d   :  { %v11371_v35 = vpop.f32.mrb[21].mxu0 }
 0xc3e   :  { %v1367_v36 = vpop.f32.mrb[22].mxu0  ;;  %v12403_v35 = vld [vmem:[#allocation6 + $0x5dc] ss:$180 sps:$4 sm:$0xff]  }
 0xc3f   :  { %v1375_v37 = vpack.c.bf16 %v1367_v36, %v1364_v15  ;;  %v11372_v38 = vpop.f32.mrb[23].mxu0  ;;  %v12402_v15 = vld [vmem:[#allocation6 + $0x474] ss:$180 sps:$4 sm:$0xff]   ;;  %v12404_v36 = vld [vmem:[#allocation6 + $0x744] ss:$180 sps:$4 sm:$0xff]  }
 0xc40   :  { %v92_v38 = vld [vmem:[#allocation7] sm:$0xff] }
 0xc41   :  { %11378 = vmatmul.mubr.msk.bf16.vlgmr.msra.gmra.mrb[36].mxu1 %vm695_vm1, %v1375_v37  ;;  %v12405_v37 = vld [vmem:[#allocation6 + $0x8ac] ss:$180 sps:$4 sm:$0xff]  }
 0xc42   :  { %11417 = vmatprep.mubr.msk.bf16.mxu1 %vm13176_vm0, %v13175_v0  ;;  %11402 = vmatpush3.bf16.msra.mxu1 %v12407_v5 }
 0xc43   :  { %11403 = vmatprep.subr.bf16.mxu1 %v13175_v0 }
 0xc46   :  { %11404 = vmatpush3.bf16.msra.mxu1 %v12408_v7 }
 0xc47   :  { %11405 = vmatprep.subr.bf16.mxu1 %v13175_v0 }
 0xc4a   :  { %11406 = vmatpush3.bf16.msra.mxu1 %v12409_v8 }
 0xc4b   :  { %11407 = vmatprep.subr.bf16.mxu1 %v13175_v0 }
 0xc4e   :  { %11408 = vmatpush3.bf16.msra.mxu1 %v12410_v9 }
 0xc4f   :  { %11409 = vmatprep.subr.bf16.mxu1 %v13175_v0 }
 0xc52   :  { %11410 = vmatpush3.bf16.msra.mxu1 %v12411_v10 }
 0xc53   :  { %11411 = vmatprep.subr.bf16.mxu1 %v13175_v0 }
 0xc56   :  { %11412 = vmatpush3.bf16.msra.mxu1 %v12412_v11  ;;  %v12415_v11 = vld [vmem:[#allocation6 + $0x40] ss:$180 sps:$4 sm:$0xff]  }
 0xc57   :  { %11413 = vmatprep.subr.bf16.mxu1 %v13175_v0 }
 0xd14   :  { %v1425_v25 = vpop.f32.mrb[36].mxu1 }
 0xd15   :  { %v1432_v40 = vadd.f32 %v1425_v25, %v1246_v20  ;;  %v11379_v41 = vpop.f32.mrb[37].mxu1  ;;  %v93_v25 = vld [vmem:[#allocation7 + $0x8] sm:$0xff] }
 0xd16   :  { %v1428_v42 = vpop.f32.mrb[38].mxu1  ;;  %v13480_v41 = vadd.f32 %v13315_v6, %v93_v25  ;;  %v10356_v6 = vld [vmem:[#allocation7 + $0x17] ss:$0 sm:$0xff] }
 0xd17   :  { %v1439_v43 = vadd.f32 %v10353_v39, %v1432_v40  ;;  %v1433_v44 = vadd.f32 %v1428_v42, %v1247_v23  ;;  %v11380_v46 = vpop.f32.mrb[39].mxu1  ;;  %v13477_v40 = vadd.f32 %v13313_v4, %v92_v38  ;;  %v12414_v4 = vld [vmem:[#allocation6 + $0x9f8] ss:$180 sps:$4 sm:$0xff]  }
 0xd19   :  { %v1440_v48 = vadd.f32 %v10353_v39, %v1433_v44  ;;  %v1441_v49 = vadd.f32 %v1439_v43, %v13303_v63  ;;  %v12406_v39 = vld [vmem:[#allocation6 + $0xa14] ss:$180 sps:$4 sm:$0xff]   ;;  %v1760_v42 = vpack.c.bf16 %v13480_v41, %v13477_v40  ;;  %v12413_v43 = vld [vmem:[#allocation6 + $0x890] ss:$180 sps:$4 sm:$0xff]  }
 0xd1a   :  { %11414 = vmatpush3.bf16.msra.mxu1 %v12413_v43 }
 0xd1b   :  { %1443 = vadd.xlane.f32.xlu1 %v1441_v49  ;;  %v1442_v27 = vadd.f32 %v1440_v48, %v13305_v1  ;;  %v12393_v1 = vld [vmem:[#allocation6 + $0x2ec] ss:$180 sps:$4 sm:$0xff]   ;;  %11415 = vmatprep.subr.bf16.mxu1 %v13175_v0 }
 0xd1c   :  { %11386 = vmatpush3.bf16.msra.mxu0 %v12393_v1 }
 0xd1d   :  { %11387 = vmatprep.subr.bf16.mxu0 %v13175_v0 }
 0xd1e   :  { %11416 = vmatpush3.bf16.msra.mxu1 %v12414_v4 }
 0xd1f   :  { %1445 = vadd.xlane.f32.xlu1 %v1442_v27 }
 0xd20   :  { %11388 = vmatpush3.bf16.msra.mxu0 %v12394_v60 }
 0xd21   :  { %11389 = vmatprep.subr.bf16.mxu0 %v13175_v0 }
 0xd24   :  { %11390 = vmatpush3.bf16.msra.mxu0 %v12395_v61 }
 0xd25   :  { %11391 = vmatprep.subr.bf16.mxu0 %v13175_v0 }
 0xd28   :  { %11392 = vmatpush3.bf16.msra.mxu0 %v12396_v62  ;;  %v10373_v62 = vld [vmem:[#allocation7 + $0x18] ss:$0 sm:$0xff] }
 0xd29   :  { %11393 = vmatprep.subr.bf16.mxu0 %v13175_v0 }
 0xd2c   :  { %11394 = vmatpush3.bf16.msra.mxu0 %v12397_v2 }
 0xd2d   :  { %11395 = vmatprep.subr.bf16.mxu0 %v13175_v0 }
 0xd30   :  { %11396 = vmatpush3.bf16.msra.mxu0 %v12398_v3 }
 0xd31   :  { %11421 = vmatprep.subr.bf16.mxu0 %v13175_v0 }
 0xda8   :  { %v1444_v52 = vpop.xlane.xlu1 %1443 }
 0xda9   :  { %v1448_v53 = vmul.f32 0.0078125, %v1444_v52 }
 0xdab   :  { %v1450_v54 = vsub.f32 %v1441_v49, %v1448_v53 }
 0xdac   :  { %v1446_v55 = vpop.xlane.xlu1 %1445 }
 0xdad   :  { %v1449_v56 = vmul.f32 0.0078125, %v1446_v55  ;;  %v1452_v57 = vmul.f32 %v1450_v54, %v1450_v54 }
 0xdaf   :  { %1454 = vadd.xlane.f32.xlu1 %v1452_v57  ;;  %v1451_v63 = vsub.f32 %v1442_v27, %v1449_v56 }
 0xdb1   :  { %v1453_v59 = vmul.f32 %v1451_v63, %v1451_v63 }
 0xdb3   :  { %1456 = vadd.xlane.f32.xlu1 %v1453_v59 }
 0xe3c   :  { %v1455_v13 = vpop.xlane.xlu1 %1454 }
 0xe3d   :  { %v1458_v14 = vmul.f32 0.0078125, %v1455_v13  ;;  %v12417_v13 = vld [vmem:[#allocation6 + $0x44] ss:$180 sps:$4 sm:$0xff]  }
 0xe3e   :  { %1952 = vmatprep.subr.bf16.mxu1 %v12417_v13 }
 0xe3f   :  { %v1460_v16 = vadd.f32 1e-05, %v1458_v14  ;;  %v12420_v14 = vld [vmem:[#allocation6 + $0x1ac] ss:$180 sps:$4 sm:$0xff]  }
 0xe40   :  { %v1457_v17 = vpop.xlane.xlu1 %1456 }
 0xe41   :  { %12783 = vrsqrt.f32 %v1460_v16  ;;  %v1459_v18 = vmul.f32 0.0078125, %v1457_v17  ;;  %v12418_v16 = vld [vmem:[#allocation6 + $0x1a8] ss:$180 sps:$4 sm:$0xff]  }
 0xe43   :  { %v1461_v19 = vadd.f32 1e-05, %v1459_v18 }
 0xe45   :  { %12785 = vrsqrt.f32 %v1461_v19 }
 0xe4b   :  { %v12784_v20 = vpop.eup %12783 }
 0xe4c   :  { %v1464_v21 = vmul.f32 %v12784_v20, %v1450_v54  ;;  %v10376_v54 = vld [vmem:[#allocation7 + $0x25] ss:$0 sm:$0xff] }
 0xe4e   :  { %v1471_v28 = vmul.f32 %v10354_v22, %v1464_v21 }
 0xe4f   :  { %v12786_v23 = vpop.eup %12785 }
 0xe50   :  { %v1465_v24 = vmul.f32 %v12786_v23, %v1451_v63  ;;  %v13462_v26 = vadd.f32 %v10355_v29, %v1471_v28  ;;  %v12423_v28 = vld [vmem:[#allocation6 + $0x314] ss:$180 sps:$4 sm:$0xff]  }
 0xe52   :  { %v1472_v30 = vmul.f32 %v10354_v22, %v1465_v24 }
 0xe54   :  { %v13464_v31 = vadd.f32 %v10355_v29, %v1472_v30  ;;  %v12421_v29 = vld [vmem:[#allocation6 + $0x310] ss:$180 sps:$4 sm:$0xff]  }
 0xe55   :  { %v12426_v30 = vld [vmem:[#allocation6 + $0x47c] ss:$180 sps:$4 sm:$0xff]  }
 0xe56   :  { %v1496_v33 = vpack.c.bf16 %v13464_v31, %v13462_v26 }
 0xe58   :  { %11398 = vmatmul.mubr.bf16.vlgmr.msra.gmra.mrb[24].mxu0 %v1496_v33  ;;  %v12432_v33 = vld [vmem:[#allocation6 + $0x74c] ss:$180 sps:$4 sm:$0xff]  }
 0xe59   :  { %11422 = vmatpush3.bf16.msra.mxu0 %v12399_v32  ;;  %11437 = vmatprep.mubr.msk.bf16.mxu0 %vm13176_vm0, %v13175_v0  ;;  %v12427_v32 = vld [vmem:[#allocation6 + $0x5e0] ss:$180 sps:$4 sm:$0xff]  }
 0xe5a   :  { %11423 = vmatprep.subr.bf16.mxu0 %v13175_v0 }
 0xe5d   :  { %11424 = vmatpush3.bf16.msra.mxu0 %v12400_v34  ;;  %v12430_v34 = vld [vmem:[#allocation6 + $0x748] ss:$180 sps:$4 sm:$0xff]  }
 0xe5e   :  { %11425 = vmatprep.subr.bf16.mxu0 %v13175_v0 }
 0xe61   :  { %11426 = vmatpush3.bf16.msra.mxu0 %v12401_v12  ;;  %v12435_v12 = vld [vmem:[#allocation6 + $0x8b4] ss:$180 sps:$4 sm:$0xff]  }
 0xe62   :  { %11427 = vmatprep.subr.bf16.mxu0 %v13175_v0 }
 0xe65   :  { %11428 = vmatpush3.bf16.msra.mxu0 %v12402_v15  ;;  %v12433_v15 = vld [vmem:[#allocation6 + $0x8b0] ss:$180 sps:$4 sm:$0xff]  }
 0xe66   :  { %11429 = vmatprep.subr.bf16.mxu0 %v13175_v0 }
 0xe69   :  { %11430 = vmatpush3.bf16.msra.mxu0 %v12403_v35  ;;  %v12438_v35 = vld [vmem:[#allocation6 + $0xa1c] ss:$180 sps:$4 sm:$0xff]  }
 0xe6a   :  { %11431 = vmatprep.subr.bf16.mxu0 %v13175_v0 }
 0xe6d   :  { %11432 = vmatpush3.bf16.msra.mxu0 %v12404_v36  ;;  %v12436_v36 = vld [vmem:[#allocation6 + $0xa18] ss:$180 sps:$4 sm:$0xff]  }
 0xe6e   :  { %11433 = vmatprep.subr.bf16.mxu0 %v13175_v0 }
 0xe71   :  { %11434 = vmatpush3.bf16.msra.mxu0 %v12405_v37 }
 0xe72   :  { %11435 = vmatprep.subr.bf16.mxu0 %v13175_v0 }
 0xe75   :  { %11436 = vmatpush3.bf16.msra.mxu0 %v12406_v39 }
 0xe76   :  { %11441 = vmatprep.subr.bf16.mxu0 %v13175_v0 }
 0xe78   :  { %11438 = vmatmul.mubr.bf16.vlgmr.msra.gmra.mrb[28].mxu0 %v1760_v42 }
 0xe79   :  { %11443 = vmatprep.mubr.msk.bf16.mxu0 %vm13176_vm0, %v13175_v0 }
 0xf2b   :  { %v1584_v44 = vpop.f32.mrb[24].mxu0 }
 0xf2c   :  { %v1585_v46 = vadd.f32 %v10356_v6, %v1584_v44  ;;  %v11399_v48 = vpop.f32.mrb[25].mxu0  ;;  %v10374_v44 = vld [vmem:[#allocation7 + $0x19] ss:$0 sm:$0xff] }
 0xf2d   :  { %v1587_v49 = vpop.f32.mrb[26].mxu0 }
 0xf2e   :  { %v1588_v27 = vadd.f32 %v10356_v6, %v1587_v49  ;;  %v11400_v50 = vpop.f32.mrb[27].mxu0  ;;  %v1591_v51 = vmax.f32 %v1585_v46, 0.0 }
 0xf30   :  { %v1592_v52 = vmax.f32 %v1588_v27, 0.0  ;;  %v10375_v27 = vld [vmem:[#allocation7 + $0x1a] ss:$0 sm:$0xff] }
 0xf32   :  { %v1609_v53 = vpack.c.bf16 %v1592_v52, %v1591_v51 }
 0xf34   :  { %11418 = vmatmul.mubr.bf16.vlgmr.msra.gmra.mrb[40].mxu1 %v1609_v53 }
 0xf35   :  { %1984 = vmatprep.mubr.bf16.mxu1 %v13177_v58  ;;  %1953 = vmatpush1.bf16.msra.mxu1 %v12415_v11 }
 0xf36   :  { %1954 = vmatprep.subr.bf16.mxu1 %v12420_v14 }
 0xf39   :  { %1955 = vmatpush1.bf16.msra.mxu1 %v12418_v16 }
 0xf3a   :  { %1956 = vmatprep.subr.bf16.mxu1 %v12423_v28 }
 0xf3d   :  { %1957 = vmatpush1.bf16.msra.mxu1 %v12421_v29 }
 0xf3e   :  { %1958 = vmatprep.subr.bf16.mxu1 %v12426_v30 }
 0xf4b   :  { %v1848_v55 = vpop.f32.mrb[28].mxu0 }
 0xf4c   :  { %v11439_v56 = vpop.f32.mrb[29].mxu0  ;;  %v1849_v63 = vadd.f32 %v10376_v54, %v1848_v55  ;;  %v10401_v55 = vld [vmem:[#allocation7 + $0x26] ss:$0 sm:$0xff] }
 0xf4d   :  { %v1851_v57 = vpop.f32.mrb[30].mxu0 }
 0xf4e   :  { %v1852_v59 = vadd.f32 %v10376_v54, %v1851_v57  ;;  %v11440_v1 = vpop.f32.mrb[31].mxu0  ;;  %v10402_v57 = vld [vmem:[#allocation7 + $0x27] ss:$0 sm:$0xff] }
 0xf50   :  { %v13490_v60 = vpack.c.bf16 %v1852_v59, %v1849_v63 }
0x1007   :  { %v1692_v61 = vpop.f32.mrb[40].mxu1 }
0x1008   :  { %v1699_v2 = vadd.f32 %v1692_v61, %v13462_v26  ;;  %v11419_v3 = vpop.f32.mrb[41].mxu1  ;;  %v12424_v26 = vld [vmem:[#allocation6 + $0x478] ss:$180 sps:$4 sm:$0xff]  }
0x1009   :  { %v1695_v5 = vpop.f32.mrb[42].mxu1  ;;  %1959 = vmatpush1.bf16.msra.mxu1 %v12424_v26 }
0x100a   :  { %v1700_v7 = vadd.f32 %v1695_v5, %v13464_v31  ;;  %v11420_v8 = vpop.f32.mrb[43].mxu1  ;;  %v1706_v9 = vadd.f32 %v10373_v62, %v1699_v2  ;;  %v12429_v31 = vld [vmem:[#allocation6 + $0x5e4] ss:$180 sps:$4 sm:$0xff]  }
0x100b   :  { %1960 = vmatprep.subr.bf16.mxu1 %v12429_v31 }
0x100c   :  { %1708 = vadd.xlane.f32.xlu1 %v1706_v9  ;;  %v1707_v10 = vadd.f32 %v10373_v62, %v1700_v7 }
0x100d   :  { %1961 = vmatpush1.bf16.msra.mxu1 %v12427_v32 }
0x100e   :  { %1962 = vmatprep.subr.bf16.mxu1 %v12432_v33 }
0x1010   :  { %1710 = vadd.xlane.f32.xlu1 %v1707_v10 }
0x1011   :  { %1963 = vmatpush1.bf16.msra.mxu1 %v12430_v34 }
0x1012   :  { %1964 = vmatprep.subr.bf16.mxu1 %v12435_v12 }
0x1015   :  { %1965 = vmatpush1.bf16.msra.mxu1 %v12433_v15 }
0x1016   :  { %1966 = vmatprep.subr.bf16.mxu1 %v12438_v35 }
0x1019   :  { %1967 = vmatpush1.bf16.msra.mxu1 %v12436_v36 }
0x101a   :  { %11447 = vmatprep.subr.bf16.mxu1 %v13175_v0 }
0x1099   :  { %v1709_v17 = vpop.xlane.xlu1 %1708 }
0x109a   :  { %v1712_v18 = vmul.f32 0.0078125, %v1709_v17 }
0x109c   :  { %v1714_v19 = vsub.f32 %v1706_v9, %v1712_v18 }
0x109d   :  { %v1711_v20 = vpop.xlane.xlu1 %1710 }
0x109e   :  { %v1713_v21 = vmul.f32 0.0078125, %v1711_v20  ;;  %v1716_v22 = vmul.f32 %v1714_v19, %v1714_v19 }
0x10a0   :  { %1718 = vadd.xlane.f32.xlu0 %v1716_v22  ;;  %v1715_v23 = vsub.f32 %v1707_v10, %v1713_v21 }
0x10a2   :  { %v1717_v24 = vmul.f32 %v1715_v23, %v1715_v23 }
0x10a4   :  { %1720 = vadd.xlane.f32.xlu1 %v1717_v24 }
0x112d   :  { %v1719_v37 = vpop.xlane.xlu0 %1718 }
0x112e   :  { %v1722_v38 = vmul.f32 0.0078125, %v1719_v37 }
0x1130   :  { %v1724_v25 = vadd.f32 1e-05, %v1722_v38 }
0x1131   :  { %v1721_v39 = vpop.xlane.xlu1 %1720 }
0x1132   :  { %12787 = vrsqrt.f32 %v1724_v25  ;;  %v1723_v42 = vmul.f32 0.0078125, %v1721_v39 }
0x1134   :  { %v1725_v43 = vadd.f32 1e-05, %v1723_v42 }
0x1136   :  { %12789 = vrsqrt.f32 %v1725_v43 }
0x113c   :  { %v12788_v4 = vpop.eup %12787 }
0x113d   :  { %v1728_v6 = vmul.f32 %v12788_v4, %v1714_v19 }
0x113f   :  { %v1735_v49 = vmul.f32 %v10374_v44, %v1728_v6 }
0x1140   :  { %v12790_v46 = vpop.eup %12789 }
0x1141   :  { %v1729_v48 = vmul.f32 %v12790_v46, %v1715_v23  ;;  %v13495_v51 = vadd.f32 %v10375_v27, %v1735_v49 }
0x1143   :  { %v1736_v50 = vmul.f32 %v10374_v44, %v1729_v48 }
0x1145   :  { %v13497_v52 = vadd.f32 %v10375_v27, %v1736_v50 }
0x1147   :  { %v13501_v53 = vpack.c.bf16 %v13497_v52, %v13495_v51 }
0x1149   :  { %1985 = vmatmul.mubr.bf16.vlgmr.msra.gmra.mrb[44].mxu1 %v13501_v53 }
0x114a   :  { %11449 = vmatprep.mubr.msk.bf16.mxu1 %vm13176_vm0, %v13175_v0 }
0x121c   :  { %v1986_v54 = vpop.f32.mrb[44].mxu1 }
0x121d   :  { %v1988_v56 = vpop.f32.mrb[45].mxu1  ;;  %v2000_v59 = vadd.f32 %v10401_v55, %v1986_v54 }
0x121e   :  { %v1990_v63 = vpop.f32.mrb[46].mxu1  ;;  %v2007_v62 = vadd.f32 %v10402_v57, %v1988_v56 }
0x121f   :  { %v2001_v1 = vadd.f32 %v10401_v55, %v1990_v63  ;;  %v1992_v61 = vpop.f32.mrb[47].mxu1 }
0x1220   :  { %v2008_v2 = vadd.f32 %v10402_v57, %v1992_v61 }
0x1221   :  { %v13506_v3 = vpack.c.bf16 %v2001_v1, %v2000_v59  ;;  %v12441_v59 = vld [vmem:[#allocation6 + $0x318] ss:$180 sps:$4 sm:$0xff]   ;;  %v12442_v1 = vld [vmem:[#allocation6 + $0x480] ss:$180 sps:$4 sm:$0xff]  }
0x1222   :  { %v13508_v5 = vpack.c.bf16 %v2008_v2, %v2007_v62 }
0x1223   :  { %2137 = vrot.lane.b32.xlu1 %v13506_v3, %s13178_s3  ;;  %v2015_v7 = vsel %vm695_vm1, %v13506_v3, 0 }
0x1224   :  { %11442 = vmatpush3.bf16.xpose.msra.mxu0 %v2015_v7  ;;  %11448 = vmatpush3.bf16.msra.mxu1 %v13508_v5 }
0x1225   :  { %11453 = vmatprep.subr.bf16.mxu0 %v13175_v0  ;;  %11459 = vmatprep.subr.bf16.mxu1 %v13175_v0 }
0x1227   :  { %2134 = vrot.lane.b32.xlu1 %v13490_v60, %s13178_s3 }
0x122b   :  { %11444 = vmatmul.mubr.msk.bf16.vlgmr.msra.gmra.mrb[32].mxu0 %vm695_vm1, %v13490_v60 }
0x122c   :  { %11455 = vmatprep.mubr.msk.bf16.mxu0 %vm13176_vm0, %v13175_v0 }
0x1295   :  { %v2138_v8 = vpop.permute.xlu1 %2137 }
0x1296   :  { %v2143_v9 = vsel %vm695_vm1, %v2138_v8, 0 }
0x1297   :  { %11454 = vmatpush3.bf16.xpose.msra.mxu0 %v2143_v9 }
0x1298   :  { %11465 = vmatprep.subr.bf16.mxu0 %v13175_v0 }
0x1299   :  { %v2135_v10 = vpop.permute.xlu1 %2134 }
0x129e   :  { %11456 = vmatmul.mubr.msk.bf16.vlgmr.msra.gmra.mrb[36].mxu0 %vm695_vm1, %v2135_v10 }
0x129f   :  { %11469 = vmatprep.mubr.msk.bf16.mxu0 %vm13176_vm0, %v13175_v0  ;;  %11466 = vmatpush3.bf16.msra.mxu0 %v12441_v59 }
0x12a0   :  { %11467 = vmatprep.subr.bf16.mxu0 %v13175_v0 }
0x12a3   :  { %11468 = vmatpush3.bf16.msra.mxu0 %v12442_v1 }
0x12a4   :  { %11481 = vmatprep.subr.bf16.mxu0 %v13175_v0 }
0x12fe   :  { %v2051_v11 = vpop.f32.mrb[32].mxu0 }
0x12ff   :  { %v2058_v13 = vsel %vm13332_vm2, %v2051_v11, -1e+30  ;;  %v11445_v14 = vpop.f32.mrb[33].mxu0  ;;  %v12439_v11 = vld [vmem:[#allocation6 + $0x48] ss:$180 sps:$4 sm:$0xff]  }
0x1300   :  { %v2054_v16 = vpop.f32.mrb[34].mxu0  ;;  %v2060_v17 = vsel %vm745_vm3, %v2058_v13, -inf  ;;  %v12440_v14 = vld [vmem:[#allocation6 + $0x1b0] ss:$180 sps:$4 sm:$0xff]  }
0x1301   :  { %v2059_v18 = vsel %vm13336_vm4, %v2054_v16, -1e+30  ;;  %2061 = vmax.xlane.f32.xlu1 %v2060_v17  ;;  %v11446_v19 = vpop.f32.mrb[35].mxu0 }
0x1302   :  { %v2063_v20 = vsel %vm745_vm3, %v2059_v18, -inf }
0x1303   :  { %2064 = vmax.xlane.f32.xlu0 %v2063_v20 }
0x1312   :  { %2378 = vrot.lane.b32.xlu1 %v13506_v3, %s13179_s25 }
0x1316   :  { %2376 = vrot.lane.b32.xlu1 %v13490_v60, %s13179_s25 }
0x1371   :  { %v2179_v21 = vpop.f32.mrb[36].mxu0 }
0x1372   :  { %v2186_v22 = vsel %vm13332_vm2, %v2179_v21, -1e+30  ;;  %v11457_v23 = vpop.f32.mrb[37].mxu0 }
0x1373   :  { %v2182_v24 = vpop.f32.mrb[38].mxu0  ;;  %v2188_v28 = vsel %vm745_vm3, %v2186_v22, -inf }
0x1374   :  { %v2187_v29 = vsel %vm13336_vm4, %v2182_v24, -1e+30  ;;  %2189 = vmax.xlane.f32.xlu0 %v2188_v28  ;;  %v11458_v30 = vpop.f32.mrb[39].mxu0 }
0x1375   :  { %v2191_v26 = vsel %vm745_vm3, %v2187_v29, -inf }
0x1378   :  { %2192 = vmax.xlane.f32.xlu0 %v2191_v26 }
0x138e   :  { %v2062_v31 = vpop.xlane.xlu1 %2061 }
0x138f   :  { %v2066_v32 = vsub.f32 %v2058_v13, %v2062_v31 }
0x1390   :  { %v2065_v33 = vpop.xlane.xlu0 %2064 }
0x1391   :  { %v2068_v34 = vmul.f32 1.442695, %v2066_v32  ;;  %v2067_v12 = vsub.f32 %v2059_v18, %v2065_v33 }
0x1392   :  { %v2379_v23 = vpop.permute.xlu1 %2378 }
0x1393   :  { %12791 = vpow2.f32 %v2068_v34  ;;  %v2070_v15 = vmul.f32 1.442695, %v2067_v12  ;;  %v2384_v30 = vsel %vm695_vm1, %v2379_v23, 0 }
0x1395   :  { %12793 = vpow2.f32 %v2070_v15 }
0x1396   :  { %v2377_v26 = vpop.permute.xlu1 %2376 }
0x139d   :  { %v12792_v35 = vpop.eup %12791 }
0x139e   :  { %v2072_v36 = vsel %vm745_vm3, %v12792_v35, 0.0 }
0x139f   :  { %v12794_v37 = vpop.eup %12793  ;;  %2073 = vadd.xlane.f32.xlu0 %v2072_v36 }
0x13a0   :  { %v2075_v38 = vsel %vm745_vm3, %v12794_v37, 0.0 }
0x13a3   :  { %2076 = vadd.xlane.f32.xlu0 %v2075_v38 }
0x1401   :  { %v2190_v25 = vpop.xlane.xlu0 %2189 }
0x1402   :  { %v2194_v39 = vsub.f32 %v2186_v22, %v2190_v25 }
0x1404   :  { %v2196_v42 = vmul.f32 1.442695, %v2194_v39 }
0x1405   :  { %v2193_v43 = vpop.xlane.xlu0 %2192 }
0x1406   :  { %12795 = vpow2.f32 %v2196_v42  ;;  %v2195_v4 = vsub.f32 %v2187_v29, %v2193_v43 }
0x1408   :  { %v2198_v6 = vmul.f32 1.442695, %v2195_v4 }
0x140a   :  { %12797 = vpow2.f32 %v2198_v6 }
0x1410   :  { %v12796_v44 = vpop.eup %12795 }
0x1411   :  { %v2200_v46 = vsel %vm745_vm3, %v12796_v44, 0.0 }
0x1412   :  { %2201 = vadd.xlane.f32.xlu0 %v2200_v46 }
0x1414   :  { %v12798_v48 = vpop.eup %12797 }
0x1415   :  { %v2203_v49 = vsel %vm745_vm3, %v12798_v48, 0.0 }
0x1416   :  { %2204 = vadd.xlane.f32.xlu0 %v2203_v49 }
0x142c   :  { %2212 = vrot.lane.b32.xlu0 %v13508_v5, %s13178_s3  ;;  %v2074_v27 = vpop.xlane.xlu0 %2073 }
0x142d   :  { %12799 = vrcp.f32 %v2074_v27 }
0x1430   :  { %v2077_v50 = vpop.xlane.xlu0 %2076 }
0x1431   :  { %12801 = vrcp.f32 %v2077_v50 }
0x1437   :  { %v12800_v54 = vpop.eup %12799 }
0x1438   :  { %v2080_v56 = vmul.f32 %v12800_v54, %v12792_v35 }
0x143b   :  { %v12802_v55 = vpop.eup %12801 }
0x143c   :  { %v2081_v57 = vmul.f32 %v12802_v55, %v12794_v37 }
0x143e   :  { %v2082_v63 = vpack.c.bf16 %v2081_v57, %v2080_v56 }
0x1440   :  { %11450 = vmatmul.mubr.msk.bf16.vlgmr.msra.gmra.mrb[48].mxu1 %vm745_vm3, %v2082_v63 }
0x1441   :  { %11461 = vmatprep.mubr.msk.bf16.mxu1 %vm13176_vm0, %v13175_v0 }
0x149f   :  { %v2202_v61 = vpop.xlane.xlu0 %2201 }
0x14a0   :  { %12803 = vrcp.f32 %v2202_v61 }
0x14a3   :  { %v2205_v62 = vpop.xlane.xlu0 %2204 }
0x14a4   :  { %12805 = vrcp.f32 %v2205_v62 }
0x14a7   :  { %v2213_v2 = vpop.permute.xlu0 %2212 }
0x14a8   :  { %11460 = vmatpush3.bf16.msra.mxu1 %v2213_v2 }
0x14a9   :  { %11473 = vmatprep.subr.bf16.mxu1 %v13175_v0 }
0x14aa   :  { %v12804_v7 = vpop.eup %12803 }
0x14ab   :  { %v2208_v9 = vmul.f32 %v12804_v7, %v12796_v44 }
0x14ae   :  { %v12806_v8 = vpop.eup %12805 }
0x14af   :  { %v2209_v10 = vmul.f32 %v12806_v8, %v12798_v48 }
0x14b1   :  { %v2210_v13 = vpack.c.bf16 %v2209_v10, %v2208_v9 }
0x14b3   :  { %11462 = vmatmul.mubr.msk.bf16.vlgmr.msra.gmra.mrb[52].mxu1 %vm745_vm3, %v2210_v13 }
0x14b4   :  { %11474 = vmatpush3.bf16.msra.mxu1 %v12439_v11  ;;  %11477 = vmatprep.mubr.msk.bf16.mxu1 %vm13176_vm0, %v13175_v0 }
0x14b5   :  { %11475 = vmatprep.subr.bf16.mxu1 %v13175_v0 }
0x14b8   :  { %11476 = vmatpush3.bf16.msra.mxu1 %v12440_v14  ;;  %v12444_v14 = vld [vmem:[#allocation6 + $0x750] ss:$180 sps:$4 sm:$0xff]  }
0x14b9   :  { %11487 = vmatprep.subr.bf16.mxu1 %v13175_v0 }
0x1513   :  { %v2121_v16 = vpop.f32.mrb[48].mxu1 }
0x1514   :  { %v11451_v17 = vpop.f32.mrb[49].mxu1 }
0x1515   :  { %v2124_v18 = vpop.f32.mrb[50].mxu1 }
0x1516   :  { %v2132_v19 = vpack.c.bf16 %v2124_v18, %v2121_v16  ;;  %v11452_v20 = vpop.f32.mrb[51].mxu1 }
0x1518   :  { %11478 = vmatmul.mubr.msk.bf16.vlgmr.msra.gmra.mrb[56].mxu1 %vm695_vm1, %v2132_v19 }
0x1519   :  { %11489 = vmatprep.mubr.msk.bf16.mxu1 %vm13176_vm0, %v13175_v0 }
0x1586   :  { %v2252_v21 = vpop.f32.mrb[52].mxu1 }
0x1587   :  { %v11463_v22 = vpop.f32.mrb[53].mxu1 }
0x1588   :  { %v2255_v24 = vpop.f32.mrb[54].mxu1 }
0x1589   :  { %v2263_v28 = vpack.c.bf16 %v2255_v24, %v2252_v21  ;;  %v11464_v29 = vpop.f32.mrb[55].mxu1 }
0x158b   :  { %11470 = vmatmul.mubr.msk.bf16.vlgmr.msra.gmra.mrb[40].mxu0 %vm695_vm1, %v2263_v28 }
0x158c   :  { %11482 = vmatpush3.bf16.xpose.msra.mxu0 %v2384_v30  ;;  %11483 = vmatprep.mubr.msk.bf16.mxu0 %vm13176_vm0, %v13175_v0 }
0x158d   :  { %11493 = vmatprep.subr.bf16.mxu0 %v13175_v0 }
0x1593   :  { %11484 = vmatmul.mubr.msk.bf16.vlgmr.msra.gmra.mrb[44].mxu0 %vm695_vm1, %v2377_v26 }
0x1594   :  { %11497 = vmatprep.mubr.msk.bf16.mxu0 %vm13176_vm0, %v13175_v0 }
0x15eb   :  { %v2369_v31 = vpop.f32.mrb[56].mxu1 }
0x15ec   :  { %v11479_v32 = vpop.f32.mrb[57].mxu1 }
0x15ed   :  { %v2372_v33 = vpop.f32.mrb[58].mxu1 }
0x15ee   :  { %v11480_v34 = vpop.f32.mrb[59].mxu1 }
0x165e   :  { %v2313_v12 = vpop.f32.mrb[40].mxu0 }
0x165f   :  { %v13572_v15 = vadd.f32 %v2369_v31, %v2313_v12  ;;  %v11471_v35 = vpop.f32.mrb[41].mxu0 }
0x1660   :  { %v2316_v36 = vpop.f32.mrb[42].mxu0 }
0x1661   :  { %v13574_v37 = vadd.f32 %v2372_v33, %v2316_v36  ;;  %v11472_v38 = vpop.f32.mrb[43].mxu0 }
0x1666   :  { %v2420_v25 = vpop.f32.mrb[44].mxu0 }
0x1667   :  { %v2427_v39 = vsel %vm13332_vm2, %v2420_v25, -1e+30  ;;  %v11485_v42 = vpop.f32.mrb[45].mxu0 }
0x1668   :  { %v2423_v43 = vpop.f32.mrb[46].mxu0  ;;  %v2429_v4 = vsel %vm745_vm3, %v2427_v39, -inf }
0x1669   :  { %v2428_v6 = vsel %vm13336_vm4, %v2423_v43, -1e+30  ;;  %2430 = vmax.xlane.f32.xlu0 %v2429_v4  ;;  %v11486_v44 = vpop.f32.mrb[47].mxu0  ;;  %v12445_v43 = vld [vmem:[#allocation6 + $0x8b8] ss:$180 sps:$4 sm:$0xff]  }
0x166a   :  { %v2432_v46 = vsel %vm745_vm3, %v2428_v6, -inf }
0x166b   :  { %2433 = vmax.xlane.f32.xlu1 %v2432_v46 }
0x167c   :  { %2564 = vrot.lane.b32.xlu1 %v13506_v3, %s13180_s26 }
0x1680   :  { %2562 = vrot.lane.b32.xlu1 %v13490_v60, %s13180_s26  ;;  %v12443_v60 = vld [vmem:[#allocation6 + $0x5e8] ss:$180 sps:$4 sm:$0xff]  }
0x1681   :  { %11494 = vmatpush3.bf16.msra.mxu0 %v12443_v60  ;;  %v12451_v60 = vld [vmem:[#allocation6 + $0x18c] ss:$180 sps:$4 sm:$0xff]  }
0x1682   :  { %11495 = vmatprep.subr.bf16.mxu0 %v13175_v0 }
0x1685   :  { %11496 = vmatpush3.bf16.msra.mxu0 %v12444_v14  ;;  %v12450_v14 = vld [vmem:[#allocation6 + $0x2c] ss:$180 sps:$4 sm:$0xff]  }
0x1686   :  { %11507 = vmatprep.subr.bf16.mxu0 %v13175_v0 }
0x16f6   :  { %v2431_v48 = vpop.xlane.xlu0 %2430 }
0x16f7   :  { %v2435_v49 = vsub.f32 %v2427_v39, %v2431_v48 }
0x16f8   :  { %v2434_v27 = vpop.xlane.xlu1 %2433 }
0x16f9   :  { %v2437_v50 = vmul.f32 1.442695, %v2435_v49  ;;  %v2436_v54 = vsub.f32 %v2428_v6, %v2434_v27 }
0x16fb   :  { %12807 = vpow2.f32 %v2437_v50  ;;  %v2439_v55 = vmul.f32 1.442695, %v2436_v54 }
0x16fc   :  { %v2565_v9 = vpop.permute.xlu1 %2564 }
0x16fd   :  { %12809 = vpow2.f32 %v2439_v55  ;;  %v2570_v11 = vsel %vm695_vm1, %v2565_v9, 0  ;;  %v12467_v9 = vld [vmem:[#allocation6 + $0x72c] ss:$180 sps:$4 sm:$0xff]  }
0x1700   :  { %v2563_v13 = vpop.permute.xlu1 %2562 }
0x1705   :  { %v12808_v56 = vpop.eup %12807 }
0x1706   :  { %v2441_v57 = vsel %vm745_vm3, %v12808_v56, 0.0 }
0x1707   :  { %v12810_v63 = vpop.eup %12809  ;;  %2442 = vadd.xlane.f32.xlu0 %v2441_v57 }
0x1708   :  { %v2444_v59 = vsel %vm745_vm3, %v12810_v63, 0.0 }
0x170b   :  { %2445 = vadd.xlane.f32.xlu0 %v2444_v59  ;;  %v12453_v59 = vld [vmem:[#allocation6 + $0x190] ss:$180 sps:$4 sm:$0xff]  }
0x1721   :  { %2452 = vrot.lane.b32.xlu0 %v13508_v5, %s13179_s25 }
0x1794   :  { %v2443_v3 = vpop.xlane.xlu0 %2442 }
0x1795   :  { %12811 = vrcp.f32 %v2443_v3  ;;  %v12457_v3 = vld [vmem:[#allocation6 + $0x2f8] ss:$180 sps:$4 sm:$0xff]  }
0x1798   :  { %v2446_v1 = vpop.xlane.xlu0 %2445 }
0x1799   :  { %12813 = vrcp.f32 %v2446_v1  ;;  %v12455_v1 = vld [vmem:[#allocation6 + $0x2f4] ss:$180 sps:$4 sm:$0xff]  }
0x179c   :  { %v2453_v61 = vpop.permute.xlu0 %2452 }
0x179d   :  { %11488 = vmatpush3.bf16.msra.mxu1 %v2453_v61  ;;  %v12461_v61 = vld [vmem:[#allocation6 + $0x460] ss:$180 sps:$4 sm:$0xff]  }
0x179e   :  { %11501 = vmatprep.subr.bf16.mxu1 %v13175_v0 }
0x179f   :  { %v12812_v62 = vpop.eup %12811 }
0x17a0   :  { %v2449_v7 = vmul.f32 %v12812_v62, %v12808_v56  ;;  %v12459_v62 = vld [vmem:[#allocation6 + $0x45c] ss:$180 sps:$4 sm:$0xff]  }
0x17a3   :  { %v12814_v2 = vpop.eup %12813 }
0x17a4   :  { %v2450_v8 = vmul.f32 %v12814_v2, %v12810_v63  ;;  %v12449_v63 = vld [vmem:[#allocation6 + $0x28] ss:$180 sps:$4 sm:$0xff]  }
0x17a5   :  { %v12465_v2 = vld [vmem:[#allocation6 + $0x5c8] ss:$180 sps:$4 sm:$0xff]  }
0x17a6   :  { %v2451_v10 = vpack.c.bf16 %v2450_v8, %v2449_v7  ;;  %v12463_v7 = vld [vmem:[#allocation6 + $0x5c4] ss:$180 sps:$4 sm:$0xff]  }
0x17a7   :  { %v12469_v8 = vld [vmem:[#allocation6 + $0x730] ss:$180 sps:$4 sm:$0xff]  }
0x17a8   :  { %11490 = vmatmul.mubr.msk.bf16.vlgmr.msra.gmra.mrb[60].mxu1 %vm745_vm3, %v2451_v10 }
0x17a9   :  { %11502 = vmatpush3.bf16.xpose.msra.mxu1 %v2570_v11  ;;  %11503 = vmatprep.mubr.msk.bf16.mxu1 %vm13176_vm0, %v13175_v0 }
0x17aa   :  { %11513 = vmatprep.subr.bf16.mxu1 %v13175_v0 }
0x17b0   :  { %11504 = vmatmul.mubr.msk.bf16.vlgmr.msra.gmra.mrb[64].mxu1 %vm695_vm1, %v2563_v13 }
0x17b1   :  { %11517 = vmatprep.mubr.msk.bf16.mxu1 %vm13176_vm0, %v13175_v0  ;;  %11514 = vmatpush3.bf16.msra.mxu1 %v12445_v43 }
0x17b2   :  { %11515 = vmatprep.subr.bf16.mxu1 %v13175_v0 }
0x187b   :  { %v2492_v16 = vpop.f32.mrb[60].mxu1 }
0x187c   :  { %v11491_v17 = vpop.f32.mrb[61].mxu1 }
0x187d   :  { %v2495_v18 = vpop.f32.mrb[62].mxu1 }
0x187e   :  { %v2503_v19 = vpack.c.bf16 %v2495_v18, %v2492_v16  ;;  %v11492_v20 = vpop.f32.mrb[63].mxu1  ;;  %v12454_v18 = vld [vmem:[#allocation6 + $0x194] ss:$180 sps:$4 sm:$0xff]  }
0x187f   :  { %v12462_v20 = vld [vmem:[#allocation6 + $0x464] ss:$180 sps:$4 sm:$0xff]  }
0x1880   :  { %11498 = vmatmul.mubr.msk.bf16.vlgmr.msra.gmra.mrb[48].mxu0 %vm695_vm1, %v2503_v19  ;;  %v12458_v19 = vld [vmem:[#allocation6 + $0x2fc] ss:$180 sps:$4 sm:$0xff]  }
0x1881   :  { %11509 = vmatprep.mubr.msk.bf16.mxu0 %vm13176_vm0, %v13175_v0 }
0x1883   :  { %v2606_v21 = vpop.f32.mrb[64].mxu1 }
0x1884   :  { %v2613_v22 = vsel %vm13332_vm2, %v2606_v21, -1e+30  ;;  %v11505_v23 = vpop.f32.mrb[65].mxu1  ;;  %v12466_v21 = vld [vmem:[#allocation6 + $0x5cc] ss:$180 sps:$4 sm:$0xff]  }
0x1885   :  { %v2609_v24 = vpop.f32.mrb[66].mxu1  ;;  %v2615_v28 = vsel %vm745_vm3, %v2613_v22, -inf  ;;  %v12473_v23 = vld [vmem:[#allocation6 + $0x898] ss:$180 sps:$4 sm:$0xff]  }
0x1886   :  { %v2614_v29 = vsel %vm13336_vm4, %v2609_v24, -1e+30  ;;  %2616 = vmax.xlane.f32.xlu1 %v2615_v28  ;;  %v11506_v30 = vpop.f32.mrb[67].mxu1  ;;  %v12471_v24 = vld [vmem:[#allocation6 + $0x894] ss:$180 sps:$4 sm:$0xff]  }
0x1887   :  { %v2618_v26 = vsel %vm745_vm3, %v2614_v29, -inf  ;;  %v12474_v28 = vld [vmem:[#allocation6 + $0x89c] ss:$180 sps:$4 sm:$0xff]  }
0x1888   :  { %2619 = vmax.xlane.f32.xlu0 %v2618_v26  ;;  %v12475_v30 = vld [vmem:[#allocation6 + $0x9fc] ss:$180 sps:$4 sm:$0xff]   ;;  %v12478_v26 = vld [vmem:[#allocation6 + $0xa04] ss:$180 sps:$4 sm:$0xff]  }
0x1897   :  { %2638 = vrot.lane.b32.xlu1 %v13508_v5, %s13180_s26 }
0x1913   :  { %v2617_v31 = vpop.xlane.xlu1 %2616 }
0x1914   :  { %v2621_v32 = vsub.f32 %v2613_v22, %v2617_v31  ;;  %v12470_v22 = vld [vmem:[#allocation6 + $0x734] ss:$180 sps:$4 sm:$0xff]  }
0x1915   :  { %v2620_v33 = vpop.xlane.xlu0 %2619 }
0x1916   :  { %v2623_v34 = vmul.f32 1.442695, %v2621_v32  ;;  %v2622_v12 = vsub.f32 %v2614_v29, %v2620_v33  ;;  %v12477_v29 = vld [vmem:[#allocation6 + $0xa00] ss:$180 sps:$4 sm:$0xff]   ;;  %v10423_v32 = vld [vmem:[#allocation7 + $0x28] ss:$0 sm:$0xff] }
0x1917   :  { %v2639_v35 = vpop.permute.xlu1 %2638 }
0x1918   :  { %12815 = vpow2.f32 %v2623_v34  ;;  %v2625_v36 = vmul.f32 1.442695, %v2622_v12  ;;  %11508 = vmatpush3.bf16.msra.mxu0 %v2639_v35 }
0x1919   :  { %2918 = vmatprep.subr.bf16.mxu0 %v12449_v63 }
0x191a   :  { %12817 = vpow2.f32 %v2625_v36 }
0x1922   :  { %v12816_v38 = vpop.eup %12815 }
0x1923   :  { %v2627_v25 = vsel %vm745_vm3, %v12816_v38, 0.0 }
0x1924   :  { %v12818_v39 = vpop.eup %12817  ;;  %2628 = vadd.xlane.f32.xlu0 %v2627_v25 }
0x1925   :  { %v2630_v42 = vsel %vm745_vm3, %v12818_v39, 0.0 }
0x1928   :  { %2631 = vadd.xlane.f32.xlu0 %v2630_v42 }
0x1953   :  { %v2553_v5 = vpop.f32.mrb[48].mxu0 }
0x1954   :  { %v13616_v4 = vadd.f32 %v2553_v5, %v13572_v15  ;;  %v11499_v6 = vpop.f32.mrb[49].mxu0  ;;  %v12446_v15 = vld [vmem:[#allocation6 + $0xa20] ss:$180 sps:$4 sm:$0xff]  }
0x1955   :  { %v2556_v44 = vpop.f32.mrb[50].mxu0  ;;  %11516 = vmatpush3.bf16.msra.mxu1 %v12446_v15 }
0x1956   :  { %v13619_v46 = vadd.f32 %v2556_v44, %v13574_v37  ;;  %v11500_v48 = vpop.f32.mrb[51].mxu0  ;;  %11521 = vmatprep.subr.bf16.mxu1 %v13175_v0  ;;  %v12447_v37 = vld [vmem:[#allocation6 + $0x24] ss:$180 sps:$4 sm:$0xff]   ;;  %v10450_v44 = vld [vmem:[#allocation7 + $0x1d] ss:$0 sm:$0xff] }
0x19b1   :  { %v2629_v49 = vpop.xlane.xlu0 %2628 }
0x19b2   :  { %12819 = vrcp.f32 %v2629_v49 }
0x19b5   :  { %v2632_v27 = vpop.xlane.xlu0 %2631 }
0x19b6   :  { %12821 = vrcp.f32 %v2632_v27 }
0x19bc   :  { %v12820_v50 = vpop.eup %12819 }
0x19bd   :  { %v2635_v55 = vmul.f32 %v12820_v50, %v12816_v38 }
0x19c0   :  { %v12822_v54 = vpop.eup %12821 }
0x19c1   :  { %v2636_v56 = vmul.f32 %v12822_v54, %v12818_v39 }
0x19c3   :  { %v2637_v57 = vpack.c.bf16 %v2636_v56, %v2635_v55 }
0x19c5   :  { %11510 = vmatmul.mubr.msk.bf16.vlgmr.msra.gmra.mrb[52].mxu0 %vm745_vm3, %v2637_v57 }
0x19c6   :  { %2950 = vmatprep.mubr.bf16.mxu0 %v13177_v58  ;;  %2919 = vmatpush1.bf16.msra.mxu0 %v12447_v37 }
0x19c7   :  { %2920 = vmatprep.subr.bf16.mxu0 %v12453_v59 }
0x19ca   :  { %2921 = vmatpush1.bf16.msra.mxu0 %v12451_v60 }
0x19cb   :  { %2922 = vmatprep.subr.bf16.mxu0 %v12457_v3 }
0x19ce   :  { %2923 = vmatpush1.bf16.msra.mxu0 %v12455_v1 }
0x19cf   :  { %2924 = vmatprep.subr.bf16.mxu0 %v12461_v61 }
0x19d2   :  { %2925 = vmatpush1.bf16.msra.mxu0 %v12459_v62 }
0x19d3   :  { %2926 = vmatprep.subr.bf16.mxu0 %v12465_v2 }
0x19d6   :  { %2927 = vmatpush1.bf16.msra.mxu0 %v12463_v7 }
0x19d7   :  { %2928 = vmatprep.subr.bf16.mxu0 %v12469_v8 }
0x19da   :  { %2929 = vmatpush1.bf16.msra.mxu0 %v12467_v9 }
0x19db   :  { %2930 = vmatprep.subr.bf16.mxu0 %v12473_v23 }
0x19de   :  { %2931 = vmatpush1.bf16.msra.mxu0 %v12471_v24 }
0x19df   :  { %2932 = vmatprep.subr.bf16.mxu0 %v12477_v29 }
0x19e2   :  { %2933 = vmatpush1.bf16.msra.mxu0 %v12475_v30 }
0x19e3   :  { %11541 = vmatprep.subr.bf16.mxu0 %v13175_v0 }
0x1a98   :  { %v2678_v10 = vpop.f32.mrb[52].mxu0 }
0x1a99   :  { %v11511_v11 = vpop.f32.mrb[53].mxu0 }
0x1a9a   :  { %v2681_v13 = vpop.f32.mrb[54].mxu0 }
0x1a9b   :  { %v2689_v16 = vpack.c.bf16 %v2681_v13, %v2678_v10  ;;  %v11512_v17 = vpop.f32.mrb[55].mxu0 }
0x1a9d   :  { %11518 = vmatmul.mubr.msk.bf16.vlgmr.msra.gmra.mrb[68].mxu1 %vm695_vm1, %v2689_v16 }
0x1a9e   :  { %11522 = vmatpush3.bf16.msra.mxu1 %v12450_v14  ;;  %11537 = vmatprep.mubr.msk.bf16.mxu1 %vm13176_vm0, %v13175_v0 }
0x1a9f   :  { %11523 = vmatprep.subr.bf16.mxu1 %v13175_v0 }
0x1aa2   :  { %11524 = vmatpush3.bf16.msra.mxu1 %v12454_v18 }
0x1aa3   :  { %11525 = vmatprep.subr.bf16.mxu1 %v13175_v0 }
0x1aa6   :  { %11526 = vmatpush3.bf16.msra.mxu1 %v12458_v19 }
0x1aa7   :  { %11527 = vmatprep.subr.bf16.mxu1 %v13175_v0 }
0x1aaa   :  { %11528 = vmatpush3.bf16.msra.mxu1 %v12462_v20 }
0x1aab   :  { %11529 = vmatprep.subr.bf16.mxu1 %v13175_v0 }
0x1aae   :  { %11530 = vmatpush3.bf16.msra.mxu1 %v12466_v21 }
0x1aaf   :  { %11531 = vmatprep.subr.bf16.mxu1 %v13175_v0 }
0x1ab2   :  { %11532 = vmatpush3.bf16.msra.mxu1 %v12470_v22 }
0x1ab3   :  { %11533 = vmatprep.subr.bf16.mxu1 %v13175_v0 }
0x1ab6   :  { %11534 = vmatpush3.bf16.msra.mxu1 %v12474_v28 }
0x1ab7   :  { %11535 = vmatprep.subr.bf16.mxu1 %v13175_v0 }
0x1aba   :  { %11536 = vmatpush3.bf16.msra.mxu1 %v12478_v26 }
0x1abb   :  { %11547 = vmatprep.subr.bf16.mxu1 %v13175_v0 }
0x1b70   :  { %v2739_v31 = vpop.f32.mrb[68].mxu1 }
0x1b71   :  { %v2746_v33 = vadd.f32 %v2739_v31, %v13616_v4  ;;  %v11519_v34 = vpop.f32.mrb[69].mxu1  ;;  %v10448_v4 = vld [vmem:[#allocation7 + $0x1b] ss:$0 sm:$0xff] }
0x1b72   :  { %v2742_v12 = vpop.f32.mrb[70].mxu1 }
0x1b73   :  { %v2753_v35 = vadd.f32 %v10423_v32, %v2746_v33  ;;  %v2747_v36 = vadd.f32 %v2742_v12, %v13619_v46  ;;  %v11520_v38 = vpop.f32.mrb[71].mxu1  ;;  %v10449_v46 = vld [vmem:[#allocation7 + $0x1c] ss:$0 sm:$0xff] }
0x1b75   :  { %v2754_v25 = vadd.f32 %v10423_v32, %v2747_v36  ;;  %v13639_v39 = vadd.f32 %v13477_v40, %v2753_v35 }
0x1b77   :  { %v13642_v42 = vadd.f32 %v13480_v41, %v2754_v25 }
0x1b79   :  { %v2789_v43 = vpack.c.bf16 %v13642_v42, %v13639_v39 }
0x1b7b   :  { %2951 = vmatmul.mubr.bf16.vlgmr.msra.gmra.mrb[56].mxu0 %v2789_v43  ;;  %11538 = vmatmul.mubr.bf16.vlgmr.msra.gmra.mrb[72].mxu1 %v2789_v43 }
0x1b7c   :  { %11543 = vmatprep.mubr.msk.bf16.mxu0 %vm13176_vm0, %v13175_v0  ;;  %11549 = vmatprep.mubr.msk.bf16.mxu1 %vm13176_vm0, %v13175_v0 }
0x1c4e   :  { %v2952_v5 = vpop.f32.mrb[56].mxu0  ;;  %v2995_v6 = vpop.f32.mrb[72].mxu1 }
0x1c4f   :  { %v2954_v40 = vpop.f32.mrb[57].mxu0  ;;  %v11539_v48 = vpop.f32.mrb[73].mxu1  ;;  %v3007_v27 = vadd.f32 %v10448_v4, %v2952_v5  ;;  %v3021_v50 = vadd.f32 %v10450_v44, %v2995_v6 }
0x1c50   :  { %v2956_v41 = vpop.f32.mrb[58].mxu0  ;;  %v2998_v49 = vpop.f32.mrb[74].mxu1  ;;  %v3014_v15 = vadd.f32 %v10449_v46, %v2954_v40 }
0x1c51   :  { %v3008_v54 = vadd.f32 %v10448_v4, %v2956_v41  ;;  %v3022_v55 = vadd.f32 %v10450_v44, %v2998_v49  ;;  %v2958_v56 = vpop.f32.mrb[59].mxu0  ;;  %v11540_v57 = vpop.f32.mrb[75].mxu1 }
0x1c52   :  { %v3015_v37 = vadd.f32 %v10449_v46, %v2958_v56  ;;  %v12482_v56 = vld [vmem:[#allocation6 + $0x468] ss:$180 sps:$4 sm:$0xff]  }
0x1c53   :  { %v13650_v63 = vpack.c.bf16 %v3008_v54, %v3007_v27  ;;  %v13652_v59 = vpack.c.bf16 %v3022_v55, %v3021_v50  ;;  %v12481_v55 = vld [vmem:[#allocation6 + $0x300] ss:$180 sps:$4 sm:$0xff]  }
0x1c54   :  { %v13654_v60 = vpack.c.bf16 %v3015_v37, %v3014_v15 }
0x1c55   :  { %11548 = vmatpush3.bf16.msra.mxu1 %v13652_v59  ;;  %3148 = vrot.lane.b32.xlu1 %v13650_v63, %s13178_s3 }
0x1c56   :  { %3151 = vrot.lane.b32.xlu0 %v13654_v60, %s13178_s3  ;;  %v3029_v3 = vsel %vm695_vm1, %v13654_v60, 0  ;;  %11559 = vmatprep.subr.bf16.mxu1 %v13175_v0 }
0x1c57   :  { %11542 = vmatpush3.bf16.xpose.msra.mxu0 %v3029_v3 }
0x1c58   :  { %11553 = vmatprep.subr.bf16.mxu0 %v13175_v0 }
0x1c5e   :  { %11544 = vmatmul.mubr.msk.bf16.vlgmr.msra.gmra.mrb[60].mxu0 %vm695_vm1, %v13650_v63 }
0x1c5f   :  { %11555 = vmatprep.mubr.msk.bf16.mxu0 %vm13176_vm0, %v13175_v0 }
0x1cc7   :  { %v3149_v62 = vpop.permute.xlu1 %3148 }
0x1cc8   :  { %v3152_v1 = vpop.permute.xlu0 %3151 }
0x1cc9   :  { %v3157_v61 = vsel %vm695_vm1, %v3152_v1, 0 }
0x1cca   :  { %11554 = vmatpush3.bf16.xpose.msra.mxu0 %v3157_v61 }
0x1ccb   :  { %11565 = vmatprep.subr.bf16.mxu0 %v13175_v0 }
0x1cd1   :  { %11556 = vmatmul.mubr.msk.bf16.vlgmr.msra.gmra.mrb[64].mxu0 %vm695_vm1, %v3149_v62 }
0x1cd2   :  { %11569 = vmatprep.mubr.msk.bf16.mxu0 %vm13176_vm0, %v13175_v0  ;;  %11566 = vmatpush3.bf16.msra.mxu0 %v12481_v55 }
0x1cd3   :  { %11567 = vmatprep.subr.bf16.mxu0 %v13175_v0 }
0x1cd6   :  { %11568 = vmatpush3.bf16.msra.mxu0 %v12482_v56 }
0x1cd7   :  { %11581 = vmatprep.subr.bf16.mxu0 %v13175_v0 }
0x1d31   :  { %v3065_v2 = vpop.f32.mrb[60].mxu0 }
0x1d32   :  { %v3072_v7 = vsel %vm13332_vm2, %v3065_v2, -1e+30  ;;  %v11545_v8 = vpop.f32.mrb[61].mxu0  ;;  %v12479_v2 = vld [vmem:[#allocation6 + $0x30] ss:$180 sps:$4 sm:$0xff]  }
0x1d33   :  { %v3068_v9 = vpop.f32.mrb[62].mxu0  ;;  %v3074_v10 = vsel %vm745_vm3, %v3072_v7, -inf  ;;  %v12480_v8 = vld [vmem:[#allocation6 + $0x198] ss:$180 sps:$4 sm:$0xff]  }
0x1d34   :  { %v3073_v11 = vsel %vm13336_vm4, %v3068_v9, -1e+30  ;;  %3075 = vmax.xlane.f32.xlu1 %v3074_v10  ;;  %v11546_v13 = vpop.f32.mrb[63].mxu0 }
0x1d35   :  { %v3077_v14 = vsel %vm745_vm3, %v3073_v11, -inf }
0x1d36   :  { %3078 = vmax.xlane.f32.xlu0 %v3077_v14 }
0x1da4   :  { %v3193_v16 = vpop.f32.mrb[64].mxu0 }
0x1da5   :  { %v3200_v17 = vsel %vm13332_vm2, %v3193_v16, -1e+30  ;;  %v11557_v18 = vpop.f32.mrb[65].mxu0 }
0x1da6   :  { %v3196_v19 = vpop.f32.mrb[66].mxu0  ;;  %v3202_v20 = vsel %vm745_vm3, %v3200_v17, -inf }
0x1da7   :  { %v3201_v21 = vsel %vm13336_vm4, %v3196_v19, -1e+30  ;;  %3203 = vmax.xlane.f32.xlu0 %v3202_v20  ;;  %v11558_v22 = vpop.f32.mrb[67].mxu0 }
0x1da8   :  { %v3205_v23 = vsel %vm745_vm3, %v3201_v21, -inf }
0x1da9   :  { %3206 = vmax.xlane.f32.xlu1 %v3205_v23 }
0x1dc1   :  { %v3076_v24 = vpop.xlane.xlu1 %3075 }
0x1dc2   :  { %v3080_v28 = vsub.f32 %v3072_v7, %v3076_v24 }
0x1dc3   :  { %v3079_v29 = vpop.xlane.xlu0 %3078 }
0x1dc4   :  { %v3082_v30 = vmul.f32 1.442695, %v3080_v28  ;;  %v3081_v26 = vsub.f32 %v3073_v11, %v3079_v29 }
0x1dc6   :  { %12823 = vpow2.f32 %v3082_v30  ;;  %v3084_v31 = vmul.f32 1.442695, %v3081_v26 }
0x1dc8   :  { %12825 = vpow2.f32 %v3084_v31 }
0x1dd0   :  { %v12824_v32 = vpop.eup %12823 }
0x1dd1   :  { %v3086_v33 = vsel %vm745_vm3, %v12824_v32, 0.0 }
0x1dd2   :  { %v12826_v34 = vpop.eup %12825  ;;  %3087 = vadd.xlane.f32.xlu0 %v3086_v33 }
0x1dd3   :  { %v3089_v12 = vsel %vm745_vm3, %v12826_v34, 0.0 }
0x1dd4   :  { %3090 = vadd.xlane.f32.xlu1 %v3089_v12 }
0x1e34   :  { %v3204_v35 = vpop.xlane.xlu0 %3203 }
0x1e35   :  { %v3208_v36 = vsub.f32 %v3200_v17, %v3204_v35 }
0x1e36   :  { %v3207_v38 = vpop.xlane.xlu1 %3206 }
0x1e37   :  { %v3210_v25 = vmul.f32 1.442695, %v3208_v36  ;;  %v3209_v43 = vsub.f32 %v3201_v21, %v3207_v38 }
0x1e39   :  { %12827 = vpow2.f32 %v3210_v25  ;;  %v3212_v5 = vmul.f32 1.442695, %v3209_v43 }
0x1e3b   :  { %12829 = vpow2.f32 %v3212_v5 }
0x1e43   :  { %v12828_v4 = vpop.eup %12827 }
0x1e44   :  { %v3214_v6 = vsel %vm745_vm3, %v12828_v4, 0.0 }
0x1e45   :  { %v12830_v44 = vpop.eup %12829  ;;  %3215 = vadd.xlane.f32.xlu0 %v3214_v6 }
0x1e46   :  { %v3217_v40 = vsel %vm745_vm3, %v12830_v44, 0.0 }
0x1e47   :  { %3218 = vadd.xlane.f32.xlu1 %v3217_v40 }
0x1e58   :  { %3392 = vrot.lane.b32.xlu1 %v13654_v60, %s13179_s25 }
0x1e5b   :  { %3226 = vrot.lane.b32.xlu0 %v13652_v59, %s13178_s3 }
0x1e5c   :  { %3390 = vrot.lane.b32.xlu1 %v13650_v63, %s13179_s25 }
0x1e5f   :  { %v3088_v46 = vpop.xlane.xlu0 %3087 }
0x1e60   :  { %12831 = vrcp.f32 %v3088_v46 }
0x1e61   :  { %v3091_v48 = vpop.xlane.xlu1 %3090 }
0x1e62   :  { %12833 = vrcp.f32 %v3091_v48 }
0x1e6a   :  { %v12832_v41 = vpop.eup %12831 }
0x1e6b   :  { %v3094_v27 = vmul.f32 %v12832_v41, %v12824_v32 }
0x1e6c   :  { %v12834_v49 = vpop.eup %12833 }
0x1e6d   :  { %v3095_v50 = vmul.f32 %v12834_v49, %v12826_v34 }
0x1e6f   :  { %v3096_v54 = vpack.c.bf16 %v3095_v50, %v3094_v27 }
0x1e71   :  { %11550 = vmatmul.mubr.msk.bf16.vlgmr.msra.gmra.mrb[76].mxu1 %vm745_vm3, %v3096_v54 }
0x1e72   :  { %11561 = vmatprep.mubr.msk.bf16.mxu1 %vm13176_vm0, %v13175_v0 }
0x1ed2   :  { %v3216_v57 = vpop.xlane.xlu0 %3215 }
0x1ed3   :  { %12835 = vrcp.f32 %v3216_v57 }
0x1ed4   :  { %v3219_v15 = vpop.xlane.xlu1 %3218 }
0x1ed5   :  { %12837 = vrcp.f32 %v3219_v15 }
0x1ed6   :  { %v3227_v37 = vpop.permute.xlu0 %3226 }
0x1ed7   :  { %11560 = vmatpush3.bf16.msra.mxu1 %v3227_v37 }
0x1ed8   :  { %11573 = vmatprep.subr.bf16.mxu1 %v13175_v0  ;;  %v3393_v18 = vpop.permute.xlu1 %3392 }
0x1ed9   :  { %v3398_v22 = vsel %vm695_vm1, %v3393_v18, 0 }
0x1edc   :  { %v3391_v23 = vpop.permute.xlu1 %3390 }
0x1edd   :  { %v12836_v3 = vpop.eup %12835 }
0x1ede   :  { %v3222_v61 = vmul.f32 %v12836_v3, %v12828_v4 }
0x1edf   :  { %v12838_v1 = vpop.eup %12837 }
0x1ee0   :  { %v3223_v62 = vmul.f32 %v12838_v1, %v12830_v44 }
0x1ee2   :  { %v3224_v7 = vpack.c.bf16 %v3223_v62, %v3222_v61 }
0x1ee4   :  { %11562 = vmatmul.mubr.msk.bf16.vlgmr.msra.gmra.mrb[80].mxu1 %vm745_vm3, %v3224_v7 }
0x1ee5   :  { %11574 = vmatpush3.bf16.msra.mxu1 %v12479_v2  ;;  %11577 = vmatprep.mubr.msk.bf16.mxu1 %vm13176_vm0, %v13175_v0 }
0x1ee6   :  { %11575 = vmatprep.subr.bf16.mxu1 %v13175_v0 }
0x1ee9   :  { %11576 = vmatpush3.bf16.msra.mxu1 %v12480_v8  ;;  %v12484_v8 = vld [vmem:[#allocation6 + $0x738] ss:$180 sps:$4 sm:$0xff]  }
0x1eea   :  { %11587 = vmatprep.subr.bf16.mxu1 %v13175_v0 }
0x1f44   :  { %v3135_v9 = vpop.f32.mrb[76].mxu1 }
0x1f45   :  { %v11551_v10 = vpop.f32.mrb[77].mxu1 }
0x1f46   :  { %v3138_v11 = vpop.f32.mrb[78].mxu1 }
0x1f47   :  { %v3146_v13 = vpack.c.bf16 %v3138_v11, %v3135_v9  ;;  %v11552_v14 = vpop.f32.mrb[79].mxu1 }
0x1f49   :  { %11578 = vmatmul.mubr.msk.bf16.vlgmr.msra.gmra.mrb[84].mxu1 %vm695_vm1, %v3146_v13 }
0x1f4a   :  { %11589 = vmatprep.mubr.msk.bf16.mxu1 %vm13176_vm0, %v13175_v0 }
0x1fb7   :  { %v3266_v16 = vpop.f32.mrb[80].mxu1 }
0x1fb8   :  { %v11563_v17 = vpop.f32.mrb[81].mxu1 }
0x1fb9   :  { %v3269_v19 = vpop.f32.mrb[82].mxu1 }
0x1fba   :  { %v3277_v20 = vpack.c.bf16 %v3269_v19, %v3266_v16  ;;  %v11564_v21 = vpop.f32.mrb[83].mxu1 }
0x1fbc   :  { %11570 = vmatmul.mubr.msk.bf16.vlgmr.msra.gmra.mrb[68].mxu0 %vm695_vm1, %v3277_v20 }
0x1fbd   :  { %11582 = vmatpush3.bf16.xpose.msra.mxu0 %v3398_v22  ;;  %11583 = vmatprep.mubr.msk.bf16.mxu0 %vm13176_vm0, %v13175_v0 }
0x1fbe   :  { %11593 = vmatprep.subr.bf16.mxu0 %v13175_v0 }
0x1fc4   :  { %11584 = vmatmul.mubr.msk.bf16.vlgmr.msra.gmra.mrb[72].mxu0 %vm695_vm1, %v3391_v23 }
0x1fc5   :  { %11597 = vmatprep.mubr.msk.bf16.mxu0 %vm13176_vm0, %v13175_v0 }
0x201c   :  { %v3383_v24 = vpop.f32.mrb[84].mxu1 }
0x201d   :  { %v11579_v28 = vpop.f32.mrb[85].mxu1 }
0x201e   :  { %v3386_v29 = vpop.f32.mrb[86].mxu1 }
0x201f   :  { %v11580_v30 = vpop.f32.mrb[87].mxu1 }
0x208f   :  { %v3327_v26 = vpop.f32.mrb[68].mxu0 }
0x2090   :  { %v13718_v31 = vadd.f32 %v3383_v24, %v3327_v26  ;;  %v11571_v32 = vpop.f32.mrb[69].mxu0 }
0x2091   :  { %v3330_v33 = vpop.f32.mrb[70].mxu0 }
0x2092   :  { %v13720_v34 = vadd.f32 %v3386_v29, %v3330_v33  ;;  %v11572_v12 = vpop.f32.mrb[71].mxu0 }
0x2097   :  { %v3434_v35 = vpop.f32.mrb[72].mxu0 }
0x2098   :  { %v3441_v36 = vsel %vm13332_vm2, %v3434_v35, -1e+30  ;;  %v11585_v38 = vpop.f32.mrb[73].mxu0 }
0x2099   :  { %v3437_v25 = vpop.f32.mrb[74].mxu0  ;;  %v3443_v43 = vsel %vm745_vm3, %v3441_v36, -inf  ;;  %v12485_v38 = vld [vmem:[#allocation6 + $0x8a0] ss:$180 sps:$4 sm:$0xff]  }
0x209a   :  { %v3442_v5 = vsel %vm13336_vm4, %v3437_v25, -1e+30  ;;  %3444 = vmax.xlane.f32.xlu1 %v3443_v43  ;;  %v11586_v4 = vpop.f32.mrb[75].mxu0 }
0x209b   :  { %v3446_v6 = vsel %vm745_vm3, %v3442_v5, -inf }
0x209c   :  { %3447 = vmax.xlane.f32.xlu0 %v3446_v6 }
0x20ab   :  { %3466 = vrot.lane.b32.xlu1 %v13652_v59, %s13179_s25 }
0x20af   :  { %3576 = vrot.lane.b32.xlu1 %v13650_v63, %s13180_s26  ;;  %v12483_v63 = vld [vmem:[#allocation6 + $0x5d0] ss:$180 sps:$4 sm:$0xff]  }
0x20b0   :  { %11594 = vmatpush3.bf16.msra.mxu0 %v12483_v63 }
0x20b1   :  { %11595 = vmatprep.subr.bf16.mxu0 %v13175_v0 }
0x20b4   :  { %11596 = vmatpush3.bf16.msra.mxu0 %v12484_v8 }
0x20b5   :  { %11607 = vmatprep.subr.bf16.mxu0 %v13175_v0 }
0x2127   :  { %v3445_v44 = vpop.xlane.xlu1 %3444 }
0x2128   :  { %v3449_v40 = vsub.f32 %v3441_v36, %v3445_v44 }
0x2129   :  { %v3448_v46 = vpop.xlane.xlu0 %3447 }
0x212a   :  { %v3451_v48 = vmul.f32 1.442695, %v3449_v40  ;;  %v3450_v41 = vsub.f32 %v3442_v5, %v3448_v46 }
0x212b   :  { %v3467_v49 = vpop.permute.xlu1 %3466 }
0x212c   :  { %12839 = vpow2.f32 %v3451_v48  ;;  %v3453_v27 = vmul.f32 1.442695, %v3450_v41  ;;  %11588 = vmatpush3.bf16.msra.mxu1 %v3467_v49 }
0x212d   :  { %11601 = vmatprep.subr.bf16.mxu1 %v13175_v0 }
0x212e   :  { %12841 = vpow2.f32 %v3453_v27 }
0x2136   :  { %v12840_v50 = vpop.eup %12839 }
0x2137   :  { %v3455_v54 = vsel %vm745_vm3, %v12840_v50, 0.0 }
0x2138   :  { %v12842_v55 = vpop.eup %12841  ;;  %3456 = vadd.xlane.f32.xlu0 %v3455_v54 }
0x2139   :  { %v3458_v56 = vsel %vm745_vm3, %v12842_v55, 0.0 }
0x213c   :  { %3459 = vadd.xlane.f32.xlu0 %v3458_v56 }
0x2152   :  { %3578 = vrot.lane.b32.xlu0 %v13654_v60, %s13180_s26  ;;  %v3577_v60 = vpop.permute.xlu1 %3576 }
0x21c5   :  { %v3457_v57 = vpop.xlane.xlu0 %3456 }
0x21c6   :  { %12843 = vrcp.f32 %v3457_v57 }
0x21c9   :  { %v3460_v15 = vpop.xlane.xlu0 %3459 }
0x21ca   :  { %12845 = vrcp.f32 %v3460_v15  ;;  %v10471_v15 = vld [vmem:[#allocation7 + $0x1e] ss:$0 sm:$0xff] }
0x21cd   :  { %v3579_v62 = vpop.permute.xlu0 %3578 }
0x21ce   :  { %v3584_v7 = vsel %vm695_vm1, %v3579_v62, 0 }
0x21d0   :  { %v12844_v37 = vpop.eup %12843 }
0x21d1   :  { %v3463_v1 = vmul.f32 %v12844_v37, %v12840_v50 }
0x21d4   :  { %v12846_v3 = vpop.eup %12845 }
0x21d5   :  { %v3464_v61 = vmul.f32 %v12846_v3, %v12842_v55 }
0x21d7   :  { %v3465_v2 = vpack.c.bf16 %v3464_v61, %v3463_v1 }
0x21d9   :  { %11590 = vmatmul.mubr.msk.bf16.vlgmr.msra.gmra.mrb[88].mxu1 %vm745_vm3, %v3465_v2 }
0x21da   :  { %11602 = vmatpush3.bf16.xpose.msra.mxu1 %v3584_v7  ;;  %11603 = vmatprep.mubr.msk.bf16.mxu1 %vm13176_vm0, %v13175_v0 }
0x21db   :  { %11613 = vmatprep.subr.bf16.mxu1 %v13175_v0 }
0x21e1   :  { %11604 = vmatmul.mubr.msk.bf16.vlgmr.msra.gmra.mrb[92].mxu1 %vm695_vm1, %v3577_v60 }
0x21e2   :  { %11617 = vmatprep.mubr.msk.bf16.mxu1 %vm13176_vm0, %v13175_v0  ;;  %11614 = vmatpush3.bf16.msra.mxu1 %v12485_v38 }
0x21e3   :  { %11615 = vmatprep.subr.bf16.mxu1 %v13175_v0 }
0x22ac   :  { %v3506_v9 = vpop.f32.mrb[88].mxu1 }
0x22ad   :  { %v11591_v10 = vpop.f32.mrb[89].mxu1 }
0x22ae   :  { %v3509_v11 = vpop.f32.mrb[90].mxu1  ;;  %v12488_v10 = vld [vmem:[#allocation6 + $0x19c] ss:$180 sps:$4 sm:$0xff]  }
0x22af   :  { %v3517_v13 = vpack.c.bf16 %v3509_v11, %v3506_v9  ;;  %v11592_v14 = vpop.f32.mrb[91].mxu1  ;;  %v12487_v9 = vld [vmem:[#allocation6 + $0x34] ss:$180 sps:$4 sm:$0xff]  }
0x22b1   :  { %11598 = vmatmul.mubr.msk.bf16.vlgmr.msra.gmra.mrb[76].mxu0 %vm695_vm1, %v3517_v13 }
0x22b2   :  { %11609 = vmatprep.mubr.msk.bf16.mxu0 %vm13176_vm0, %v13175_v0 }
0x22b4   :  { %v3620_v16 = vpop.f32.mrb[92].mxu1 }
0x22b5   :  { %v3627_v17 = vsel %vm13332_vm2, %v3620_v16, -1e+30  ;;  %v11605_v18 = vpop.f32.mrb[93].mxu1 }
0x22b6   :  { %v3623_v19 = vpop.f32.mrb[94].mxu1  ;;  %v3629_v20 = vsel %vm745_vm3, %v3627_v17, -inf }
0x22b7   :  { %v3628_v21 = vsel %vm13336_vm4, %v3623_v19, -1e+30  ;;  %3630 = vmax.xlane.f32.xlu1 %v3629_v20  ;;  %v11606_v22 = vpop.f32.mrb[95].mxu1  ;;  %v12490_v20 = vld [vmem:[#allocation6 + $0x46c] ss:$180 sps:$4 sm:$0xff]  }
0x22b8   :  { %v3632_v23 = vsel %vm745_vm3, %v3628_v21, -inf  ;;  %v12492_v22 = vld [vmem:[#allocation6 + $0x73c] ss:$180 sps:$4 sm:$0xff]  }
0x22b9   :  { %3633 = vmax.xlane.f32.xlu0 %v3632_v23  ;;  %v12493_v23 = vld [vmem:[#allocation6 + $0x8a4] ss:$180 sps:$4 sm:$0xff]  }
0x2344   :  { %v3631_v24 = vpop.xlane.xlu1 %3630 }
0x2345   :  { %v3635_v28 = vsub.f32 %v3627_v17, %v3631_v24  ;;  %v12494_v24 = vld [vmem:[#allocation6 + $0xa0c] ss:$180 sps:$4 sm:$0xff]  }
0x2346   :  { %v3634_v29 = vpop.xlane.xlu0 %3633 }
0x2347   :  { %v3637_v30 = vmul.f32 1.442695, %v3635_v28  ;;  %v3636_v26 = vsub.f32 %v3628_v21, %v3634_v29  ;;  %v12491_v21 = vld [vmem:[#allocation6 + $0x5d4] ss:$180 sps:$4 sm:$0xff]   ;;  %v12503_v28 = vld [vmem:[#allocation6 + $0x38] ss:$180 sps:$4 sm:$0xff]  }
0x2348   :  { %v12504_v29 = vld [vmem:[#allocation6 + $0x1a0] ss:$180 sps:$4 sm:$0xff]  }
0x2349   :  { %12847 = vpow2.f32 %v3637_v30  ;;  %v3639_v32 = vmul.f32 1.442695, %v3636_v26  ;;  %v12505_v30 = vld [vmem:[#allocation6 + $0x308] ss:$180 sps:$4 sm:$0xff]   ;;  %v12506_v26 = vld [vmem:[#allocation6 + $0x470] ss:$180 sps:$4 sm:$0xff]  }
0x234b   :  { %12849 = vpow2.f32 %v3639_v32  ;;  %v12507_v32 = vld [vmem:[#allocation6 + $0x5d8] ss:$180 sps:$4 sm:$0xff]  }
0x2353   :  { %v12848_v33 = vpop.eup %12847 }
0x2354   :  { %v3641_v12 = vsel %vm745_vm3, %v12848_v33, 0.0 }
0x2355   :  { %v12850_v35 = vpop.eup %12849  ;;  %3642 = vadd.xlane.f32.xlu0 %v3641_v12 }
0x2356   :  { %v3644_v36 = vsel %vm745_vm3, %v12850_v35, 0.0 }
0x2357   :  { %3645 = vadd.xlane.f32.xlu1 %v3644_v36 }
0x236b   :  { %3652 = vrot.lane.b32.xlu0 %v13652_v59, %s13180_s26 }
0x2384   :  { %v3567_v25 = vpop.f32.mrb[76].mxu0 }
0x2385   :  { %v3574_v43 = vadd.f32 %v3567_v25, %v13718_v31  ;;  %v11599_v5 = vpop.f32.mrb[77].mxu0  ;;  %v12486_v31 = vld [vmem:[#allocation6 + $0xa08] ss:$180 sps:$4 sm:$0xff]  }
0x2386   :  { %v3570_v4 = vpop.f32.mrb[78].mxu0  ;;  %11616 = vmatpush3.bf16.msra.mxu1 %v12486_v31  ;;  %v12496_v31 = vld [vmem:[#allocation6 + $0x1b4] ss:$180 sps:$4 sm:$0xff]  }
0x2387   :  { %v3575_v6 = vadd.f32 %v3570_v4, %v13720_v34  ;;  %v11600_v44 = vpop.f32.mrb[79].mxu0  ;;  %11641 = vmatprep.subr.bf16.mxu1 %v13175_v0 }
0x23e2   :  { %v3643_v40 = vpop.xlane.xlu0 %3642 }
0x23e3   :  { %12851 = vrcp.f32 %v3643_v40 }
0x23e4   :  { %v3646_v46 = vpop.xlane.xlu1 %3645 }
0x23e5   :  { %12853 = vrcp.f32 %v3646_v46 }
0x23e6   :  { %v3653_v48 = vpop.permute.xlu0 %3652 }
0x23e7   :  { %11608 = vmatpush3.bf16.msra.mxu0 %v3653_v48  ;;  %v10473_v48 = vld [vmem:[#allocation7 + $0x20] ss:$0 sm:$0xff] }
0x23e8   :  { %11621 = vmatprep.subr.bf16.mxu0 %v13175_v0 }
0x23ed   :  { %v12852_v59 = vpop.eup %12851 }
0x23ee   :  { %v3649_v49 = vmul.f32 %v12852_v59, %v12848_v33  ;;  %v12508_v33 = vld [vmem:[#allocation6 + $0x740] ss:$180 sps:$4 sm:$0xff]  }
0x23ef   :  { %v12854_v41 = vpop.eup %12853 }
0x23f0   :  { %v3650_v27 = vmul.f32 %v12854_v41, %v12850_v35 }
0x23f2   :  { %v3651_v50 = vpack.c.bf16 %v3650_v27, %v3649_v49  ;;  %v12495_v27 = vld [vmem:[#allocation6 + $0x4c] ss:$180 sps:$4 sm:$0xff]  }
0x23f4   :  { %11610 = vmatmul.mubr.msk.bf16.vlgmr.msra.gmra.mrb[80].mxu0 %vm745_vm3, %v3651_v50 }
0x23f5   :  { %11637 = vmatprep.mubr.msk.bf16.mxu0 %vm13176_vm0, %v13175_v0  ;;  %11622 = vmatpush3.bf16.msra.mxu0 %v12487_v9 }
0x23f6   :  { %11623 = vmatprep.subr.bf16.mxu0 %v13175_v0 }
0x23f9   :  { %11624 = vmatpush3.bf16.msra.mxu0 %v12488_v10 }
0x23fa   :  { %11625 = vmatprep.subr.bf16.mxu0 %v13175_v0 }
0x24c7   :  { %v3692_v34 = vpop.f32.mrb[80].mxu0 }
0x24c8   :  { %v11611_v54 = vpop.f32.mrb[81].mxu0 }
0x24c9   :  { %v3695_v55 = vpop.f32.mrb[82].mxu0  ;;  %v12498_v54 = vld [vmem:[#allocation6 + $0x484] ss:$180 sps:$4 sm:$0xff]  }
0x24ca   :  { %v3703_v56 = vpack.c.bf16 %v3695_v55, %v3692_v34  ;;  %v11612_v63 = vpop.f32.mrb[83].mxu0  ;;  %v12497_v34 = vld [vmem:[#allocation6 + $0x31c] ss:$180 sps:$4 sm:$0xff]   ;;  %v12499_v55 = vld [vmem:[#allocation6 + $0x5ec] ss:$180 sps:$4 sm:$0xff]  }
0x24cb   :  { %v12501_v63 = vld [vmem:[#allocation6 + $0x8bc] ss:$180 sps:$4 sm:$0xff]  }
0x24cc   :  { %11618 = vmatmul.mubr.msk.bf16.vlgmr.msra.gmra.mrb[96].mxu1 %vm695_vm1, %v3703_v56  ;;  %v12500_v56 = vld [vmem:[#allocation6 + $0x754] ss:$180 sps:$4 sm:$0xff]  }
0x24cd   :  { %11657 = vmatprep.mubr.msk.bf16.mxu1 %vm13176_vm0, %v13175_v0  ;;  %11642 = vmatpush3.bf16.msra.mxu1 %v12503_v28 }
0x24ce   :  { %11643 = vmatprep.subr.bf16.mxu1 %v13175_v0 }
0x24d1   :  { %11644 = vmatpush3.bf16.msra.mxu1 %v12504_v29 }
0x24d2   :  { %11645 = vmatprep.subr.bf16.mxu1 %v13175_v0 }
0x24d5   :  { %11646 = vmatpush3.bf16.msra.mxu1 %v12505_v30  ;;  %v12511_v30 = vld [vmem:[#allocation6 + $0x50] ss:$180 sps:$4 sm:$0xff]  }
0x24d6   :  { %11647 = vmatprep.subr.bf16.mxu1 %v13175_v0 }
0x24d9   :  { %11648 = vmatpush3.bf16.msra.mxu1 %v12506_v26  ;;  %v12513_v26 = vld [vmem:[#allocation6 + $0x54] ss:$180 sps:$4 sm:$0xff]  }
0x24da   :  { %11649 = vmatprep.subr.bf16.mxu1 %v13175_v0 }
0x24dd   :  { %11650 = vmatpush3.bf16.msra.mxu1 %v12507_v32  ;;  %v12516_v32 = vld [vmem:[#allocation6 + $0x1bc] ss:$180 sps:$4 sm:$0xff]  }
0x24de   :  { %11651 = vmatprep.subr.bf16.mxu1 %v13175_v0 }
0x24e1   :  { %11652 = vmatpush3.bf16.msra.mxu1 %v12508_v33  ;;  %v12514_v33 = vld [vmem:[#allocation6 + $0x1b8] ss:$180 sps:$4 sm:$0xff]  }
0x24e2   :  { %11653 = vmatprep.subr.bf16.mxu1 %v13175_v0 }
0x259f   :  { %v3753_v57 = vpop.f32.mrb[96].mxu1 }
0x25a0   :  { %v3760_v37 = vadd.f32 %v3753_v57, %v3574_v43  ;;  %v11619_v3 = vpop.f32.mrb[97].mxu1  ;;  %v12502_v57 = vld [vmem:[#allocation6 + $0xa24] ss:$180 sps:$4 sm:$0xff]  }
0x25a1   :  { %v3756_v1 = vpop.f32.mrb[98].mxu1  ;;  %v10474_v3 = vld [vmem:[#allocation7 + $0x21] ss:$0 sm:$0xff] }
0x25a2   :  { %v3767_v61 = vadd.f32 %v10471_v15, %v3760_v37  ;;  %v3761_v62 = vadd.f32 %v3756_v1, %v3575_v6  ;;  %v11620_v2 = vpop.f32.mrb[99].mxu1  ;;  %v10472_v6 = vld [vmem:[#allocation7 + $0x1f] ss:$0 sm:$0xff]  ;;  %v12510_v37 = vld [vmem:[#allocation6 + $0xa10] ss:$180 sps:$4 sm:$0xff]  }
0x25a4   :  { %v3768_v7 = vadd.f32 %v10471_v15, %v3761_v62  ;;  %v3769_v60 = vadd.f32 %v3767_v61, %v13639_v39  ;;  %v12509_v15 = vld [vmem:[#allocation6 + $0x8a8] ss:$180 sps:$4 sm:$0xff]  }
0x25a5   :  { %11654 = vmatpush3.bf16.msra.mxu1 %v12509_v15 }
0x25a6   :  { %3771 = vadd.xlane.f32.xlu1 %v3769_v60  ;;  %v3770_v8 = vadd.f32 %v3768_v7, %v13642_v42  ;;  %v12489_v42 = vld [vmem:[#allocation6 + $0x304] ss:$180 sps:$4 sm:$0xff]   ;;  %11655 = vmatprep.subr.bf16.mxu1 %v13175_v0 }
0x25a7   :  { %11626 = vmatpush3.bf16.msra.mxu0 %v12489_v42  ;;  %v10491_v42 = vld [vmem:[#allocation7 + $0x22] ss:$0 sm:$0xff] }
0x25a8   :  { %11627 = vmatprep.subr.bf16.mxu0 %v13175_v0 }
0x25a9   :  { %11656 = vmatpush3.bf16.msra.mxu1 %v12510_v37 }
0x25aa   :  { %3773 = vadd.xlane.f32.xlu1 %v3770_v8  ;;  %4278 = vmatprep.subr.bf16.mxu1 %v12513_v26 }
0x25ab   :  { %11628 = vmatpush3.bf16.msra.mxu0 %v12490_v20 }
0x25ac   :  { %11629 = vmatprep.subr.bf16.mxu0 %v13175_v0 }
0x25af   :  { %11630 = vmatpush3.bf16.msra.mxu0 %v12491_v21 }
0x25b0   :  { %11631 = vmatprep.subr.bf16.mxu0 %v13175_v0 }
0x25b3   :  { %11632 = vmatpush3.bf16.msra.mxu0 %v12492_v22 }
0x25b4   :  { %11633 = vmatprep.subr.bf16.mxu0 %v13175_v0 }
0x25b7   :  { %11634 = vmatpush3.bf16.msra.mxu0 %v12493_v23 }
0x25b8   :  { %11635 = vmatprep.subr.bf16.mxu0 %v13175_v0 }
0x25bb   :  { %11636 = vmatpush3.bf16.msra.mxu0 %v12494_v24 }
0x25bc   :  { %11661 = vmatprep.subr.bf16.mxu0 %v13175_v0 }
0x2633   :  { %v3772_v11 = vpop.xlane.xlu1 %3771 }
0x2634   :  { %v3775_v13 = vmul.f32 0.0078125, %v3772_v11 }
0x2636   :  { %v3777_v14 = vsub.f32 %v3769_v60, %v3775_v13 }
0x2637   :  { %v3774_v16 = vpop.xlane.xlu1 %3773 }
0x2638   :  { %v3776_v17 = vmul.f32 0.0078125, %v3774_v16  ;;  %v3779_v18 = vmul.f32 %v3777_v14, %v3777_v14 }
0x263a   :  { %3781 = vadd.xlane.f32.xlu1 %v3779_v18  ;;  %v3778_v39 = vsub.f32 %v3770_v8, %v3776_v17 }
0x263c   :  { %v3780_v19 = vmul.f32 %v3778_v39, %v3778_v39 }
0x263e   :  { %3783 = vadd.xlane.f32.xlu1 %v3780_v19 }
0x26c7   :  { %v3782_v12 = vpop.xlane.xlu1 %3781 }
0x26c8   :  { %v3785_v35 = vmul.f32 0.0078125, %v3782_v12 }
0x26ca   :  { %v3787_v36 = vadd.f32 1e-05, %v3785_v35 }
0x26cb   :  { %v3784_v38 = vpop.xlane.xlu1 %3783 }
0x26cc   :  { %12855 = vrsqrt.f32 %v3787_v36  ;;  %v3786_v25 = vmul.f32 0.0078125, %v3784_v38 }
0x26ce   :  { %v3788_v43 = vadd.f32 1e-05, %v3786_v25 }
0x26d0   :  { %12857 = vrsqrt.f32 %v3788_v43 }
0x26d6   :  { %v12856_v5 = vpop.eup %12855 }
0x26d7   :  { %v3791_v4 = vmul.f32 %v12856_v5, %v3777_v14 }
0x26d9   :  { %v3798_v46 = vmul.f32 %v10472_v6, %v3791_v4 }
0x26da   :  { %v12858_v44 = vpop.eup %12857 }
0x26db   :  { %v3792_v40 = vmul.f32 %v12858_v44, %v3778_v39  ;;  %v3805_v41 = vadd.f32 %v10473_v48, %v3798_v46  ;;  %v12517_v44 = vld [vmem:[#allocation6 + $0x320] ss:$180 sps:$4 sm:$0xff]   ;;  %v12520_v46 = vld [vmem:[#allocation6 + $0x488] ss:$180 sps:$4 sm:$0xff]  }
0x26dd   :  { %v3799_v59 = vmul.f32 %v10472_v6, %v3792_v40  ;;  %v12519_v6 = vld [vmem:[#allocation6 + $0x324] ss:$180 sps:$4 sm:$0xff]   ;;  %v12522_v40 = vld [vmem:[#allocation6 + $0x48c] ss:$180 sps:$4 sm:$0xff]  }
0x26df   :  { %v3806_v49 = vadd.f32 %v10473_v48, %v3799_v59  ;;  %v12525_v48 = vld [vmem:[#allocation6 + $0x5f4] ss:$180 sps:$4 sm:$0xff]   ;;  %v12523_v59 = vld [vmem:[#allocation6 + $0x5f0] ss:$180 sps:$4 sm:$0xff]  }
0x26e1   :  { %v3823_v50 = vpack.c.bf16 %v3806_v49, %v3805_v41 }
0x26e3   :  { %11638 = vmatmul.mubr.bf16.vlgmr.msra.gmra.mrb[84].mxu0 %v3823_v50  ;;  %v12529_v50 = vld [vmem:[#allocation6 + $0x8c0] ss:$180 sps:$4 sm:$0xff]  }
0x26e4   :  { %11662 = vmatpush3.bf16.msra.mxu0 %v12495_v27  ;;  %11677 = vmatprep.mubr.msk.bf16.mxu0 %vm13176_vm0, %v13175_v0  ;;  %v12531_v27 = vld [vmem:[#allocation6 + $0x8c4] ss:$180 sps:$4 sm:$0xff]  }
0x26e5   :  { %11663 = vmatprep.subr.bf16.mxu0 %v13175_v0 }
0x26e8   :  { %11664 = vmatpush3.bf16.msra.mxu0 %v12496_v31  ;;  %v12534_v31 = vld [vmem:[#allocation6 + $0xa2c] ss:$180 sps:$4 sm:$0xff]  }
0x26e9   :  { %11665 = vmatprep.subr.bf16.mxu0 %v13175_v0 }
0x26ec   :  { %11666 = vmatpush3.bf16.msra.mxu0 %v12497_v34  ;;  %v12532_v34 = vld [vmem:[#allocation6 + $0xa28] ss:$180 sps:$4 sm:$0xff]  }
0x26ed   :  { %11667 = vmatprep.subr.bf16.mxu0 %v13175_v0 }
0x26f0   :  { %11668 = vmatpush3.bf16.msra.mxu0 %v12498_v54 }
0x26f1   :  { %11669 = vmatprep.subr.bf16.mxu0 %v13175_v0 }
0x26f4   :  { %11670 = vmatpush3.bf16.msra.mxu0 %v12499_v55 }
0x26f5   :  { %11671 = vmatprep.subr.bf16.mxu0 %v13175_v0 }
0x26f8   :  { %11672 = vmatpush3.bf16.msra.mxu0 %v12500_v56 }
0x26f9   :  { %11673 = vmatprep.subr.bf16.mxu0 %v13175_v0 }
0x26fc   :  { %11674 = vmatpush3.bf16.msra.mxu0 %v12501_v63 }
0x26fd   :  { %11675 = vmatprep.subr.bf16.mxu0 %v13175_v0 }
0x2700   :  { %11676 = vmatpush3.bf16.msra.mxu0 %v12502_v57 }
0x2701   :  { %11681 = vmatprep.subr.bf16.mxu0 %v13175_v0 }
0x2703   :  { %11678 = vmatmul.mubr.bf16.vlgmr.msra.gmra.mrb[88].mxu0 %v13501_v53  ;;  %v10494_v53 = vld [vmem:[#allocation7 + $0x29] ss:$0 sm:$0xff] }
0x2704   :  { %11683 = vmatprep.mubr.msk.bf16.mxu0 %vm13176_vm0, %v13175_v0 }
0x27b6   :  { %v3911_v1 = vpop.f32.mrb[84].mxu0 }
0x27b7   :  { %v3912_v61 = vadd.f32 %v10474_v3, %v3911_v1  ;;  %v11639_v62 = vpop.f32.mrb[85].mxu0  ;;  %v10492_v1 = vld [vmem:[#allocation7 + $0x23] ss:$0 sm:$0xff] }
0x27b8   :  { %v3914_v2 = vpop.f32.mrb[86].mxu0 }
0x27b9   :  { %v3915_v7 = vadd.f32 %v10474_v3, %v3914_v2  ;;  %v11640_v60 = vpop.f32.mrb[87].mxu0  ;;  %v3918_v8 = vmax.f32 %v3912_v61, 0.0 }
0x27bb   :  { %v3919_v9 = vmax.f32 %v3915_v7, 0.0  ;;  %v10493_v7 = vld [vmem:[#allocation7 + $0x24] ss:$0 sm:$0xff] }
0x27bd   :  { %v3936_v10 = vpack.c.bf16 %v3919_v9, %v3918_v8 }
0x27bf   :  { %11658 = vmatmul.mubr.bf16.vlgmr.msra.gmra.mrb[100].mxu1 %v3936_v10 }
0x27c0   :  { %4310 = vmatprep.mubr.bf16.mxu1 %v13177_v58  ;;  %4279 = vmatpush1.bf16.msra.mxu1 %v12511_v30 }
0x27c1   :  { %4280 = vmatprep.subr.bf16.mxu1 %v12516_v32 }
0x27c4   :  { %4281 = vmatpush1.bf16.msra.mxu1 %v12514_v33 }
0x27c5   :  { %4282 = vmatprep.subr.bf16.mxu1 %v12519_v6 }
0x27c8   :  { %4283 = vmatpush1.bf16.msra.mxu1 %v12517_v44 }
0x27c9   :  { %4284 = vmatprep.subr.bf16.mxu1 %v12522_v40 }
0x27cc   :  { %4285 = vmatpush1.bf16.msra.mxu1 %v12520_v46 }
0x27cd   :  { %4286 = vmatprep.subr.bf16.mxu1 %v12525_v48 }
0x27d0   :  { %4287 = vmatpush1.bf16.msra.mxu1 %v12523_v59 }
0x27d6   :  { %v4174_v11 = vpop.f32.mrb[88].mxu0 }
0x27d7   :  { %v11679_v13 = vpop.f32.mrb[89].mxu0  ;;  %v4175_v16 = vadd.f32 %v10494_v53, %v4174_v11  ;;  %v10519_v11 = vld [vmem:[#allocation7 + $0x2a] ss:$0 sm:$0xff] }
0x27d8   :  { %v4177_v14 = vpop.f32.mrb[90].mxu0 }
0x27d9   :  { %v4178_v17 = vadd.f32 %v10494_v53, %v4177_v14  ;;  %v11680_v18 = vpop.f32.mrb[91].mxu0  ;;  %v10520_v14 = vld [vmem:[#allocation7 + $0x2b] ss:$0 sm:$0xff] }
0x27db   :  { %v13802_v39 = vpack.c.bf16 %v4178_v17, %v4175_v16 }
0x2892   :  { %v4019_v19 = vpop.f32.mrb[100].mxu1 }
0x2893   :  { %v4026_v20 = vadd.f32 %v4019_v19, %v3805_v41  ;;  %v11659_v21 = vpop.f32.mrb[101].mxu1  ;;  %v12528_v41 = vld [vmem:[#allocation6 + $0x75c] ss:$180 sps:$4 sm:$0xff]  }
0x2894   :  { %v4022_v22 = vpop.f32.mrb[102].mxu1  ;;  %4288 = vmatprep.subr.bf16.mxu1 %v12528_v41 }
0x2895   :  { %v4027_v23 = vadd.f32 %v4022_v22, %v3806_v49  ;;  %v11660_v24 = vpop.f32.mrb[103].mxu1  ;;  %v4033_v28 = vadd.f32 %v10491_v42, %v4026_v20  ;;  %v12526_v49 = vld [vmem:[#allocation6 + $0x758] ss:$180 sps:$4 sm:$0xff]  }
0x2896   :  { %4289 = vmatpush1.bf16.msra.mxu1 %v12526_v49 }
0x2897   :  { %4035 = vadd.xlane.f32.xlu1 %v4033_v28  ;;  %v4034_v29 = vadd.f32 %v10491_v42, %v4027_v23  ;;  %4290 = vmatprep.subr.bf16.mxu1 %v12531_v27 }
0x289a   :  { %4291 = vmatpush1.bf16.msra.mxu1 %v12529_v50 }
0x289b   :  { %4037 = vadd.xlane.f32.xlu1 %v4034_v29  ;;  %4292 = vmatprep.subr.bf16.mxu1 %v12534_v31 }
0x289e   :  { %4293 = vmatpush1.bf16.msra.mxu1 %v12532_v34 }
0x289f   :  { %11687 = vmatprep.subr.bf16.mxu1 %v13175_v0 }
0x2924   :  { %v4036_v12 = vpop.xlane.xlu1 %4035 }
0x2925   :  { %v4039_v35 = vmul.f32 0.0078125, %v4036_v12 }
0x2927   :  { %v4041_v36 = vsub.f32 %v4033_v28, %v4039_v35 }
0x2928   :  { %v4038_v38 = vpop.xlane.xlu1 %4037 }
0x2929   :  { %v4040_v25 = vmul.f32 0.0078125, %v4038_v38  ;;  %v4043_v43 = vmul.f32 %v4041_v36, %v4041_v36 }
0x292b   :  { %4045 = vadd.xlane.f32.xlu0 %v4043_v43  ;;  %v4042_v5 = vsub.f32 %v4034_v29, %v4040_v25 }
0x292d   :  { %v4044_v4 = vmul.f32 %v4042_v5, %v4042_v5 }
0x292f   :  { %4047 = vadd.xlane.f32.xlu1 %v4044_v4 }
0x29b8   :  { %v4046_v54 = vpop.xlane.xlu0 %4045 }
0x29b9   :  { %v4049_v55 = vmul.f32 0.0078125, %v4046_v54 }
0x29bb   :  { %v4051_v56 = vadd.f32 1e-05, %v4049_v55 }
0x29bc   :  { %v4048_v63 = vpop.xlane.xlu1 %4047 }
0x29bd   :  { %12859 = vrsqrt.f32 %v4051_v56  ;;  %v4050_v57 = vmul.f32 0.0078125, %v4048_v63 }
0x29bf   :  { %v4052_v15 = vadd.f32 1e-05, %v4050_v57 }
0x29c1   :  { %12861 = vrsqrt.f32 %v4052_v15 }
0x29c7   :  { %v12860_v37 = vpop.eup %12859 }
0x29c8   :  { %v4055_v3 = vmul.f32 %v12860_v37, %v4041_v36 }
0x29ca   :  { %v4062_v2 = vmul.f32 %v10492_v1, %v4055_v3 }
0x29cb   :  { %v12862_v61 = vpop.eup %12861 }
0x29cc   :  { %v4056_v62 = vmul.f32 %v12862_v61, %v4042_v5  ;;  %v13805_v8 = vadd.f32 %v10493_v7, %v4062_v2 }
0x29ce   :  { %v4063_v60 = vmul.f32 %v10492_v1, %v4056_v62 }
0x29d0   :  { %v13807_v9 = vadd.f32 %v10493_v7, %v4063_v60 }
0x29d2   :  { %v13811_v10 = vpack.c.bf16 %v13807_v9, %v13805_v8 }
0x29d4   :  { %4311 = vmatmul.mubr.bf16.vlgmr.msra.gmra.mrb[104].mxu1 %v13811_v10 }
0x29d5   :  { %11689 = vmatprep.mubr.msk.bf16.mxu1 %vm13176_vm0, %v13175_v0 }
0x2aa7   :  { %v4312_v53 = vpop.f32.mrb[104].mxu1 }
0x2aa8   :  { %v4314_v13 = vpop.f32.mrb[105].mxu1  ;;  %v4326_v17 = vadd.f32 %v10519_v11, %v4312_v53 }
0x2aa9   :  { %v4316_v16 = vpop.f32.mrb[106].mxu1  ;;  %v4333_v42 = vadd.f32 %v10520_v14, %v4314_v13 }
0x2aaa   :  { %v4327_v18 = vadd.f32 %v10519_v11, %v4316_v16  ;;  %v4318_v19 = vpop.f32.mrb[107].mxu1 }
0x2aab   :  { %v4334_v20 = vadd.f32 %v10520_v14, %v4318_v19 }
0x2aac   :  { %v13816_v21 = vpack.c.bf16 %v4327_v18, %v4326_v17  ;;  %v12537_v17 = vld [vmem:[#allocation6 + $0x328] ss:$180 sps:$4 sm:$0xff]   ;;  %v12538_v18 = vld [vmem:[#allocation6 + $0x490] ss:$180 sps:$4 sm:$0xff]  }
0x2aad   :  { %v13818_v22 = vpack.c.bf16 %v4334_v20, %v4333_v42 }
0x2aae   :  { %4463 = vrot.lane.b32.xlu1 %v13816_v21, %s13178_s3  ;;  %v4341_v23 = vsel %vm695_vm1, %v13816_v21, 0 }
0x2aaf   :  { %11682 = vmatpush3.bf16.xpose.msra.mxu0 %v4341_v23  ;;  %11688 = vmatpush3.bf16.msra.mxu1 %v13818_v22 }
0x2ab0   :  { %11693 = vmatprep.subr.bf16.mxu0 %v13175_v0  ;;  %11699 = vmatprep.subr.bf16.mxu1 %v13175_v0 }
0x2ab2   :  { %4460 = vrot.lane.b32.xlu1 %v13802_v39, %s13178_s3 }
0x2ab6   :  { %11684 = vmatmul.mubr.msk.bf16.vlgmr.msra.gmra.mrb[92].mxu0 %vm695_vm1, %v13802_v39 }
0x2ab7   :  { %11695 = vmatprep.mubr.msk.bf16.mxu0 %vm13176_vm0, %v13175_v0 }
0x2b20   :  { %v4464_v24 = vpop.permute.xlu1 %4463 }
0x2b21   :  { %v4469_v28 = vsel %vm695_vm1, %v4464_v24, 0 }
0x2b22   :  { %11694 = vmatpush3.bf16.xpose.msra.mxu0 %v4469_v28 }
0x2b23   :  { %11705 = vmatprep.subr.bf16.mxu0 %v13175_v0 }
0x2b24   :  { %v4461_v29 = vpop.permute.xlu1 %4460 }
0x2b29   :  { %11696 = vmatmul.mubr.msk.bf16.vlgmr.msra.gmra.mrb[96].mxu0 %vm695_vm1, %v4461_v29 }
0x2b2a   :  { %11709 = vmatprep.mubr.msk.bf16.mxu0 %vm13176_vm0, %v13175_v0  ;;  %11706 = vmatpush3.bf16.msra.mxu0 %v12537_v17 }
0x2b2b   :  { %11707 = vmatprep.subr.bf16.mxu0 %v13175_v0 }
0x2b2e   :  { %11708 = vmatpush3.bf16.msra.mxu0 %v12538_v18 }
0x2b2f   :  { %11721 = vmatprep.subr.bf16.mxu0 %v13175_v0 }
0x2b89   :  { %v4377_v30 = vpop.f32.mrb[92].mxu0 }
0x2b8a   :  { %v4384_v26 = vsel %vm13332_vm2, %v4377_v30, -1e+30  ;;  %v11685_v32 = vpop.f32.mrb[93].mxu0  ;;  %v12535_v30 = vld [vmem:[#allocation6 + $0x58] ss:$180 sps:$4 sm:$0xff]  }
0x2b8b   :  { %v4386_v33 = vsel %vm745_vm3, %v4384_v26, -inf  ;;  %v4380_v12 = vpop.f32.mrb[94].mxu0  ;;  %v12536_v32 = vld [vmem:[#allocation6 + $0x1c0] ss:$180 sps:$4 sm:$0xff]  }
0x2b8c   :  { %v4385_v35 = vsel %vm13336_vm4, %v4380_v12, -1e+30  ;;  %4387 = vmax.xlane.f32.xlu1 %v4386_v33  ;;  %v11686_v36 = vpop.f32.mrb[95].mxu0 }
0x2b8d   :  { %v4389_v38 = vsel %vm745_vm3, %v4385_v35, -inf }
0x2b8e   :  { %4390 = vmax.xlane.f32.xlu0 %v4389_v38 }
0x2b9d   :  { %4704 = vrot.lane.b32.xlu1 %v13816_v21, %s13179_s25 }
0x2ba1   :  { %4702 = vrot.lane.b32.xlu1 %v13802_v39, %s13179_s25 }
0x2bfc   :  { %v4505_v25 = vpop.f32.mrb[96].mxu0 }
0x2bfd   :  { %v4512_v43 = vsel %vm13332_vm2, %v4505_v25, -1e+30  ;;  %v11697_v5 = vpop.f32.mrb[97].mxu0 }
0x2bfe   :  { %v4508_v4 = vpop.f32.mrb[98].mxu0  ;;  %v4514_v6 = vsel %vm745_vm3, %v4512_v43, -inf }
0x2bff   :  { %v4513_v44 = vsel %vm13336_vm4, %v4508_v4, -1e+30  ;;  %4515 = vmax.xlane.f32.xlu0 %v4514_v6  ;;  %v11698_v40 = vpop.f32.mrb[99].mxu0 }
0x2c00   :  { %v4517_v46 = vsel %vm745_vm3, %v4513_v44, -inf }
0x2c03   :  { %4518 = vmax.xlane.f32.xlu0 %v4517_v46 }
0x2c19   :  { %v4388_v48 = vpop.xlane.xlu1 %4387 }
0x2c1a   :  { %v4392_v59 = vsub.f32 %v4384_v26, %v4388_v48 }
0x2c1b   :  { %v4391_v41 = vpop.xlane.xlu0 %4390 }
0x2c1c   :  { %v4394_v49 = vmul.f32 1.442695, %v4392_v59  ;;  %v4393_v27 = vsub.f32 %v4385_v35, %v4391_v41 }
0x2c1d   :  { %v4705_v5 = vpop.permute.xlu1 %4704 }
0x2c1e   :  { %12863 = vpow2.f32 %v4394_v49  ;;  %v4396_v50 = vmul.f32 1.442695, %v4393_v27  ;;  %v4710_v40 = vsel %vm695_vm1, %v4705_v5, 0 }
0x2c20   :  { %12865 = vpow2.f32 %v4396_v50 }
0x2c21   :  { %v4703_v46 = vpop.permute.xlu1 %4702 }
0x2c28   :  { %v12864_v31 = vpop.eup %12863 }
0x2c29   :  { %v4398_v34 = vsel %vm745_vm3, %v12864_v31, 0.0 }
0x2c2a   :  { %v12866_v54 = vpop.eup %12865  ;;  %4399 = vadd.xlane.f32.xlu0 %v4398_v34 }
0x2c2b   :  { %v4401_v55 = vsel %vm745_vm3, %v12866_v54, 0.0 }
0x2c2e   :  { %4402 = vadd.xlane.f32.xlu0 %v4401_v55 }
0x2c8c   :  { %v4516_v56 = vpop.xlane.xlu0 %4515 }
0x2c8d   :  { %v4520_v63 = vsub.f32 %v4512_v43, %v4516_v56 }
0x2c8f   :  { %v4522_v57 = vmul.f32 1.442695, %v4520_v63 }
0x2c90   :  { %v4519_v15 = vpop.xlane.xlu0 %4518 }
0x2c91   :  { %12867 = vpow2.f32 %v4522_v57  ;;  %v4521_v37 = vsub.f32 %v4513_v44, %v4519_v15 }
0x2c93   :  { %v4524_v3 = vmul.f32 1.442695, %v4521_v37 }
0x2c95   :  { %12869 = vpow2.f32 %v4524_v3 }
0x2c9b   :  { %v12868_v1 = vpop.eup %12867 }
0x2c9c   :  { %v4526_v61 = vsel %vm745_vm3, %v12868_v1, 0.0 }
0x2c9d   :  { %4527 = vadd.xlane.f32.xlu0 %v4526_v61 }
0x2c9f   :  { %v12870_v62 = vpop.eup %12869 }
0x2ca0   :  { %v4529_v2 = vsel %vm745_vm3, %v12870_v62, 0.0 }
0x2ca1   :  { %4530 = vadd.xlane.f32.xlu0 %v4529_v2 }
0x2cb7   :  { %4538 = vrot.lane.b32.xlu0 %v13818_v22, %s13178_s3  ;;  %v4400_v7 = vpop.xlane.xlu0 %4399 }
0x2cb8   :  { %12871 = vrcp.f32 %v4400_v7 }
0x2cbb   :  { %v4403_v60 = vpop.xlane.xlu0 %4402 }
0x2cbc   :  { %12873 = vrcp.f32 %v4403_v60 }
0x2cc2   :  { %v12872_v53 = vpop.eup %12871 }
0x2cc3   :  { %v4406_v13 = vmul.f32 %v12872_v53, %v12864_v31 }
0x2cc6   :  { %v12874_v11 = vpop.eup %12873 }
0x2cc7   :  { %v4407_v14 = vmul.f32 %v12874_v11, %v12866_v54 }
0x2cc9   :  { %v4408_v16 = vpack.c.bf16 %v4407_v14, %v4406_v13 }
0x2ccb   :  { %11690 = vmatmul.mubr.msk.bf16.vlgmr.msra.gmra.mrb[108].mxu1 %vm745_vm3, %v4408_v16 }
0x2ccc   :  { %11701 = vmatprep.mubr.msk.bf16.mxu1 %vm13176_vm0, %v13175_v0 }
0x2d2a   :  { %v4528_v19 = vpop.xlane.xlu0 %4527 }
0x2d2b   :  { %12875 = vrcp.f32 %v4528_v19 }
0x2d2e   :  { %v4531_v42 = vpop.xlane.xlu0 %4530 }
0x2d2f   :  { %12877 = vrcp.f32 %v4531_v42 }
0x2d32   :  { %v4539_v20 = vpop.permute.xlu0 %4538 }
0x2d33   :  { %11700 = vmatpush3.bf16.msra.mxu1 %v4539_v20 }
0x2d34   :  { %11713 = vmatprep.subr.bf16.mxu1 %v13175_v0 }
0x2d35   :  { %v12876_v23 = vpop.eup %12875 }
0x2d36   :  { %v4534_v28 = vmul.f32 %v12876_v23, %v12868_v1 }
0x2d39   :  { %v12878_v24 = vpop.eup %12877 }
0x2d3a   :  { %v4535_v29 = vmul.f32 %v12878_v24, %v12870_v62 }
0x2d3c   :  { %v4536_v26 = vpack.c.bf16 %v4535_v29, %v4534_v28 }
0x2d3e   :  { %11702 = vmatmul.mubr.msk.bf16.vlgmr.msra.gmra.mrb[112].mxu1 %vm745_vm3, %v4536_v26 }
0x2d3f   :  { %11714 = vmatpush3.bf16.msra.mxu1 %v12535_v30  ;;  %11717 = vmatprep.mubr.msk.bf16.mxu1 %vm13176_vm0, %v13175_v0 }
0x2d40   :  { %11715 = vmatprep.subr.bf16.mxu1 %v13175_v0 }
0x2d43   :  { %11716 = vmatpush3.bf16.msra.mxu1 %v12536_v32  ;;  %v12540_v32 = vld [vmem:[#allocation6 + $0x760] ss:$180 sps:$4 sm:$0xff]  }
0x2d44   :  { %11727 = vmatprep.subr.bf16.mxu1 %v13175_v0 }
0x2d9e   :  { %v4447_v33 = vpop.f32.mrb[108].mxu1 }
0x2d9f   :  { %v11691_v12 = vpop.f32.mrb[109].mxu1 }
0x2da0   :  { %v4450_v35 = vpop.f32.mrb[110].mxu1 }
0x2da1   :  { %v4458_v36 = vpack.c.bf16 %v4450_v35, %v4447_v33  ;;  %v11692_v38 = vpop.f32.mrb[111].mxu1 }
0x2da3   :  { %11718 = vmatmul.mubr.msk.bf16.vlgmr.msra.gmra.mrb[116].mxu1 %vm695_vm1, %v4458_v36 }
0x2da4   :  { %11729 = vmatprep.mubr.msk.bf16.mxu1 %vm13176_vm0, %v13175_v0 }
0x2e11   :  { %v4578_v25 = vpop.f32.mrb[112].mxu1 }
0x2e12   :  { %v11703_v43 = vpop.f32.mrb[113].mxu1 }
0x2e13   :  { %v4581_v4 = vpop.f32.mrb[114].mxu1 }
0x2e14   :  { %v4589_v6 = vpack.c.bf16 %v4581_v4, %v4578_v25  ;;  %v11704_v44 = vpop.f32.mrb[115].mxu1 }
0x2e16   :  { %11710 = vmatmul.mubr.msk.bf16.vlgmr.msra.gmra.mrb[100].mxu0 %vm695_vm1, %v4589_v6 }
0x2e17   :  { %11722 = vmatpush3.bf16.xpose.msra.mxu0 %v4710_v40  ;;  %11723 = vmatprep.mubr.msk.bf16.mxu0 %vm13176_vm0, %v13175_v0 }
0x2e18   :  { %11733 = vmatprep.subr.bf16.mxu0 %v13175_v0 }
0x2e1e   :  { %11724 = vmatmul.mubr.msk.bf16.vlgmr.msra.gmra.mrb[104].mxu0 %vm695_vm1, %v4703_v46 }
0x2e1f   :  { %11737 = vmatprep.mubr.msk.bf16.mxu0 %vm13176_vm0, %v13175_v0 }
0x2e76   :  { %v4695_v48 = vpop.f32.mrb[116].mxu1 }
0x2e77   :  { %v11719_v59 = vpop.f32.mrb[117].mxu1 }
0x2e78   :  { %v4698_v41 = vpop.f32.mrb[118].mxu1 }
0x2e79   :  { %v11720_v49 = vpop.f32.mrb[119].mxu1 }
0x2ee9   :  { %v4639_v27 = vpop.f32.mrb[100].mxu0 }
0x2eea   :  { %v13882_v50 = vadd.f32 %v4695_v48, %v4639_v27  ;;  %v11711_v31 = vpop.f32.mrb[101].mxu0 }
0x2eeb   :  { %v4642_v34 = vpop.f32.mrb[102].mxu0 }
0x2eec   :  { %v13884_v54 = vadd.f32 %v4698_v41, %v4642_v34  ;;  %v11712_v55 = vpop.f32.mrb[103].mxu0 }
0x2ef1   :  { %v4746_v56 = vpop.f32.mrb[104].mxu0 }
0x2ef2   :  { %v4753_v63 = vsel %vm13332_vm2, %v4746_v56, -1e+30  ;;  %v11725_v57 = vpop.f32.mrb[105].mxu0 }
0x2ef3   :  { %v4755_v15 = vsel %vm745_vm3, %v4753_v63, -inf  ;;  %v4749_v37 = vpop.f32.mrb[106].mxu0 }
0x2ef4   :  { %v4754_v3 = vsel %vm13336_vm4, %v4749_v37, -1e+30  ;;  %4756 = vmax.xlane.f32.xlu0 %v4755_v15  ;;  %v11726_v1 = vpop.f32.mrb[107].mxu0  ;;  %v12541_v15 = vld [vmem:[#allocation6 + $0x8c8] ss:$180 sps:$4 sm:$0xff]  }
0x2ef5   :  { %v4758_v61 = vsel %vm745_vm3, %v4754_v3, -inf }
0x2ef6   :  { %4759 = vmax.xlane.f32.xlu1 %v4758_v61 }
0x2f07   :  { %4890 = vrot.lane.b32.xlu1 %v13816_v21, %s13180_s26 }
0x2f0b   :  { %4888 = vrot.lane.b32.xlu1 %v13802_v39, %s13180_s26  ;;  %v12539_v39 = vld [vmem:[#allocation6 + $0x5f8] ss:$180 sps:$4 sm:$0xff]  }
0x2f0c   :  { %11734 = vmatpush3.bf16.msra.mxu0 %v12539_v39  ;;  %v12547_v39 = vld [vmem:[#allocation6 + $0x1c4] ss:$180 sps:$4 sm:$0xff]  }
0x2f0d   :  { %11735 = vmatprep.subr.bf16.mxu0 %v13175_v0 }
0x2f10   :  { %11736 = vmatpush3.bf16.msra.mxu0 %v12540_v32  ;;  %v12546_v32 = vld [vmem:[#allocation6 + $0x64] ss:$180 sps:$4 sm:$0xff]  }
0x2f11   :  { %11747 = vmatprep.subr.bf16.mxu0 %v13175_v0 }
0x2f81   :  { %v4757_v62 = vpop.xlane.xlu0 %4756 }
0x2f82   :  { %v4761_v2 = vsub.f32 %v4753_v63, %v4757_v62 }
0x2f83   :  { %v4760_v7 = vpop.xlane.xlu1 %4759 }
0x2f84   :  { %v4763_v60 = vmul.f32 1.442695, %v4761_v2  ;;  %v4762_v53 = vsub.f32 %v4754_v3, %v4760_v7 }
0x2f86   :  { %12879 = vpow2.f32 %v4763_v60  ;;  %v4765_v11 = vmul.f32 1.442695, %v4762_v53 }
0x2f87   :  { %v4891_v28 = vpop.permute.xlu1 %4890 }
0x2f88   :  { %12881 = vpow2.f32 %v4765_v11  ;;  %v4896_v30 = vsel %vm695_vm1, %v4891_v28, 0  ;;  %v12563_v28 = vld [vmem:[#allocation6 + $0x764] ss:$180 sps:$4 sm:$0xff]  }
0x2f8b   :  { %v4889_v26 = vpop.permute.xlu1 %4888 }
0x2f90   :  { %v12880_v13 = vpop.eup %12879 }
0x2f91   :  { %v4767_v14 = vsel %vm745_vm3, %v12880_v13, 0.0 }
0x2f92   :  { %v12882_v16 = vpop.eup %12881  ;;  %4768 = vadd.xlane.f32.xlu0 %v4767_v14 }
0x2f93   :  { %v4770_v17 = vsel %vm745_vm3, %v12882_v16, 0.0 }
0x2f96   :  { %4771 = vadd.xlane.f32.xlu0 %v4770_v17  ;;  %v12549_v17 = vld [vmem:[#allocation6 + $0x1c8] ss:$180 sps:$4 sm:$0xff]  }
0x2fac   :  { %4778 = vrot.lane.b32.xlu0 %v13818_v22, %s13179_s25 }
0x301f   :  { %v4769_v21 = vpop.xlane.xlu0 %4768 }
0x3020   :  { %12883 = vrcp.f32 %v4769_v21  ;;  %v12553_v21 = vld [vmem:[#allocation6 + $0x330] ss:$180 sps:$4 sm:$0xff]  }
0x3023   :  { %v4772_v18 = vpop.xlane.xlu0 %4771 }
0x3024   :  { %12885 = vrcp.f32 %v4772_v18  ;;  %v12551_v18 = vld [vmem:[#allocation6 + $0x32c] ss:$180 sps:$4 sm:$0xff]  }
0x3027   :  { %v4779_v19 = vpop.permute.xlu0 %4778 }
0x3028   :  { %11728 = vmatpush3.bf16.msra.mxu1 %v4779_v19  ;;  %v12557_v19 = vld [vmem:[#allocation6 + $0x498] ss:$180 sps:$4 sm:$0xff]  }
0x3029   :  { %11741 = vmatprep.subr.bf16.mxu1 %v13175_v0 }
0x302a   :  { %v12884_v42 = vpop.eup %12883 }
0x302b   :  { %v4775_v23 = vmul.f32 %v12884_v42, %v12880_v13  ;;  %v12555_v42 = vld [vmem:[#allocation6 + $0x494] ss:$180 sps:$4 sm:$0xff]  }
0x302e   :  { %v12886_v20 = vpop.eup %12885 }
0x302f   :  { %v4776_v24 = vmul.f32 %v12886_v20, %v12882_v16  ;;  %v12545_v16 = vld [vmem:[#allocation6 + $0x60] ss:$180 sps:$4 sm:$0xff]  }
0x3030   :  { %v12561_v20 = vld [vmem:[#allocation6 + $0x600] ss:$180 sps:$4 sm:$0xff]  }
0x3031   :  { %v4777_v29 = vpack.c.bf16 %v4776_v24, %v4775_v23  ;;  %v12559_v23 = vld [vmem:[#allocation6 + $0x5fc] ss:$180 sps:$4 sm:$0xff]  }
0x3032   :  { %v12565_v24 = vld [vmem:[#allocation6 + $0x768] ss:$180 sps:$4 sm:$0xff]  }
0x3033   :  { %11730 = vmatmul.mubr.msk.bf16.vlgmr.msra.gmra.mrb[120].mxu1 %vm745_vm3, %v4777_v29 }
0x3034   :  { %11742 = vmatpush3.bf16.xpose.msra.mxu1 %v4896_v30  ;;  %11743 = vmatprep.mubr.msk.bf16.mxu1 %vm13176_vm0, %v13175_v0 }
0x3035   :  { %11753 = vmatprep.subr.bf16.mxu1 %v13175_v0 }
0x303b   :  { %11744 = vmatmul.mubr.msk.bf16.vlgmr.msra.gmra.mrb[124].mxu1 %vm695_vm1, %v4889_v26 }
0x303c   :  { %11757 = vmatprep.mubr.msk.bf16.mxu1 %vm13176_vm0, %v13175_v0  ;;  %11754 = vmatpush3.bf16.msra.mxu1 %v12541_v15 }
0x303d   :  { %11755 = vmatprep.subr.bf16.mxu1 %v13175_v0 }
0x3106   :  { %v4818_v33 = vpop.f32.mrb[120].mxu1 }
0x3107   :  { %v11731_v12 = vpop.f32.mrb[121].mxu1 }
0x3108   :  { %v4821_v35 = vpop.f32.mrb[122].mxu1 }
0x3109   :  { %v4829_v36 = vpack.c.bf16 %v4821_v35, %v4818_v33  ;;  %v11732_v38 = vpop.f32.mrb[123].mxu1  ;;  %v12550_v35 = vld [vmem:[#allocation6 + $0x1cc] ss:$180 sps:$4 sm:$0xff]  }
0x310a   :  { %v12558_v38 = vld [vmem:[#allocation6 + $0x49c] ss:$180 sps:$4 sm:$0xff]  }
0x310b   :  { %11738 = vmatmul.mubr.msk.bf16.vlgmr.msra.gmra.mrb[108].mxu0 %vm695_vm1, %v4829_v36  ;;  %v12554_v36 = vld [vmem:[#allocation6 + $0x334] ss:$180 sps:$4 sm:$0xff]  }
0x310c   :  { %11749 = vmatprep.mubr.msk.bf16.mxu0 %vm13176_vm0, %v13175_v0 }
0x310e   :  { %v4932_v25 = vpop.f32.mrb[124].mxu1 }
0x310f   :  { %v4939_v43 = vsel %vm13332_vm2, %v4932_v25, -1e+30  ;;  %v11745_v5 = vpop.f32.mrb[125].mxu1  ;;  %v12562_v25 = vld [vmem:[#allocation6 + $0x604] ss:$180 sps:$4 sm:$0xff]  }
0x3110   :  { %v4941_v4 = vsel %vm745_vm3, %v4939_v43, -inf  ;;  %v4935_v6 = vpop.f32.mrb[126].mxu1  ;;  %v12569_v5 = vld [vmem:[#allocation6 + $0x8d0] ss:$180 sps:$4 sm:$0xff]  }
0x3111   :  { %v4940_v44 = vsel %vm13336_vm4, %v4935_v6, -1e+30  ;;  %4942 = vmax.xlane.f32.xlu1 %v4941_v4  ;;  %v11746_v40 = vpop.f32.mrb[127].mxu1  ;;  %v12567_v4 = vld [vmem:[#allocation6 + $0x8cc] ss:$180 sps:$4 sm:$0xff]  }
0x3112   :  { %v4944_v46 = vsel %vm745_vm3, %v4940_v44, -inf  ;;  %v12570_v6 = vld [vmem:[#allocation6 + $0x8d4] ss:$180 sps:$4 sm:$0xff]  }
0x3113   :  { %4945 = vmax.xlane.f32.xlu0 %v4944_v46  ;;  %v12571_v40 = vld [vmem:[#allocation6 + $0xa34] ss:$180 sps:$4 sm:$0xff]   ;;  %v12574_v46 = vld [vmem:[#allocation6 + $0xa3c] ss:$180 sps:$4 sm:$0xff]  }
0x3122   :  { %4964 = vrot.lane.b32.xlu1 %v13818_v22, %s13180_s26 }
0x319e   :  { %v4943_v48 = vpop.xlane.xlu1 %4942 }
0x319f   :  { %v4947_v59 = vsub.f32 %v4939_v43, %v4943_v48  ;;  %v12566_v43 = vld [vmem:[#allocation6 + $0x76c] ss:$180 sps:$4 sm:$0xff]  }
0x31a0   :  { %v4946_v41 = vpop.xlane.xlu0 %4945 }
0x31a1   :  { %v4949_v49 = vmul.f32 1.442695, %v4947_v59  ;;  %v4948_v27 = vsub.f32 %v4940_v44, %v4946_v41  ;;  %v12573_v44 = vld [vmem:[#allocation6 + $0xa38] ss:$180 sps:$4 sm:$0xff]  }
0x31a2   :  { %v4965_v31 = vpop.permute.xlu1 %4964  ;;  %v10541_v59 = vld [vmem:[#allocation7 + $0x2c] ss:$0 sm:$0xff] }
0x31a3   :  { %12887 = vpow2.f32 %v4949_v49  ;;  %v4951_v34 = vmul.f32 1.442695, %v4948_v27  ;;  %11748 = vmatpush3.bf16.msra.mxu0 %v4965_v31 }
0x31a4   :  { %5244 = vmatprep.subr.bf16.mxu0 %v12545_v16 }
0x31a5   :  { %12889 = vpow2.f32 %v4951_v34 }
0x31ad   :  { %v12888_v55 = vpop.eup %12887 }
0x31ae   :  { %v4953_v56 = vsel %vm745_vm3, %v12888_v55, 0.0 }
0x31af   :  { %v12890_v63 = vpop.eup %12889  ;;  %4954 = vadd.xlane.f32.xlu0 %v4953_v56 }
0x31b0   :  { %v4956_v57 = vsel %vm745_vm3, %v12890_v63, 0.0 }
0x31b3   :  { %4957 = vadd.xlane.f32.xlu0 %v4956_v57 }
0x31de   :  { %v4879_v22 = vpop.f32.mrb[108].mxu0 }
0x31df   :  { %v13926_v37 = vadd.f32 %v4879_v22, %v13882_v50  ;;  %v11739_v3 = vpop.f32.mrb[109].mxu0  ;;  %v12542_v50 = vld [vmem:[#allocation6 + $0xa30] ss:$180 sps:$4 sm:$0xff]  }
0x31e0   :  { %v4882_v1 = vpop.f32.mrb[110].mxu0  ;;  %11756 = vmatpush3.bf16.msra.mxu1 %v12542_v50 }
0x31e1   :  { %v13929_v61 = vadd.f32 %v4882_v1, %v13884_v54  ;;  %v11740_v62 = vpop.f32.mrb[111].mxu0  ;;  %11761 = vmatprep.subr.bf16.mxu1 %v13175_v0  ;;  %v12543_v54 = vld [vmem:[#allocation6 + $0x5c] ss:$180 sps:$4 sm:$0xff]   ;;  %v10568_v1 = vld [vmem:[#allocation7 + $0x2f] ss:$0 sm:$0xff] }
0x323c   :  { %v4955_v2 = vpop.xlane.xlu0 %4954 }
0x323d   :  { %12891 = vrcp.f32 %v4955_v2 }
0x3240   :  { %v4958_v7 = vpop.xlane.xlu0 %4957 }
0x3241   :  { %12893 = vrcp.f32 %v4958_v7 }
0x3247   :  { %v12892_v60 = vpop.eup %12891 }
0x3248   :  { %v4961_v11 = vmul.f32 %v12892_v60, %v12888_v55 }
0x324b   :  { %v12894_v53 = vpop.eup %12893 }
0x324c   :  { %v4962_v13 = vmul.f32 %v12894_v53, %v12890_v63 }
0x324e   :  { %v4963_v14 = vpack.c.bf16 %v4962_v13, %v4961_v11 }
0x3250   :  { %11750 = vmatmul.mubr.msk.bf16.vlgmr.msra.gmra.mrb[112].mxu0 %vm745_vm3, %v4963_v14 }
0x3251   :  { %5276 = vmatprep.mubr.bf16.mxu0 %v13177_v58  ;;  %5245 = vmatpush1.bf16.msra.mxu0 %v12543_v54 }
0x3252   :  { %5246 = vmatprep.subr.bf16.mxu0 %v12549_v17 }
0x3255   :  { %5247 = vmatpush1.bf16.msra.mxu0 %v12547_v39 }
0x3256   :  { %5248 = vmatprep.subr.bf16.mxu0 %v12553_v21 }
0x3259   :  { %5249 = vmatpush1.bf16.msra.mxu0 %v12551_v18 }
0x325a   :  { %5250 = vmatprep.subr.bf16.mxu0 %v12557_v19 }
0x325d   :  { %5251 = vmatpush1.bf16.msra.mxu0 %v12555_v42 }
0x325e   :  { %5252 = vmatprep.subr.bf16.mxu0 %v12561_v20 }
0x3261   :  { %5253 = vmatpush1.bf16.msra.mxu0 %v12559_v23 }
0x3262   :  { %5254 = vmatprep.subr.bf16.mxu0 %v12565_v24 }
0x3265   :  { %5255 = vmatpush1.bf16.msra.mxu0 %v12563_v28 }
0x3266   :  { %5256 = vmatprep.subr.bf16.mxu0 %v12569_v5 }
0x3269   :  { %5257 = vmatpush1.bf16.msra.mxu0 %v12567_v4 }
0x326a   :  { %5258 = vmatprep.subr.bf16.mxu0 %v12573_v44 }
0x326d   :  { %5259 = vmatpush1.bf16.msra.mxu0 %v12571_v40 }
0x326e   :  { %11781 = vmatprep.subr.bf16.mxu0 %v13175_v0 }
0x3323   :  { %v5004_v29 = vpop.f32.mrb[112].mxu0 }
0x3324   :  { %v11751_v30 = vpop.f32.mrb[113].mxu0 }
0x3325   :  { %v5007_v26 = vpop.f32.mrb[114].mxu0 }
0x3326   :  { %v5015_v33 = vpack.c.bf16 %v5007_v26, %v5004_v29  ;;  %v11752_v12 = vpop.f32.mrb[115].mxu0 }
0x3328   :  { %11758 = vmatmul.mubr.msk.bf16.vlgmr.msra.gmra.mrb[128].mxu1 %vm695_vm1, %v5015_v33 }
0x3329   :  { %11762 = vmatpush3.bf16.msra.mxu1 %v12546_v32  ;;  %11777 = vmatprep.mubr.msk.bf16.mxu1 %vm13176_vm0, %v13175_v0 }
0x332a   :  { %11763 = vmatprep.subr.bf16.mxu1 %v13175_v0 }
0x332d   :  { %11764 = vmatpush3.bf16.msra.mxu1 %v12550_v35 }
0x332e   :  { %11765 = vmatprep.subr.bf16.mxu1 %v13175_v0 }
0x3331   :  { %11766 = vmatpush3.bf16.msra.mxu1 %v12554_v36 }
0x3332   :  { %11767 = vmatprep.subr.bf16.mxu1 %v13175_v0 }
0x3335   :  { %11768 = vmatpush3.bf16.msra.mxu1 %v12558_v38 }
0x3336   :  { %11769 = vmatprep.subr.bf16.mxu1 %v13175_v0 }
0x3339   :  { %11770 = vmatpush3.bf16.msra.mxu1 %v12562_v25 }
0x333a   :  { %11771 = vmatprep.subr.bf16.mxu1 %v13175_v0 }
0x333d   :  { %11772 = vmatpush3.bf16.msra.mxu1 %v12566_v43 }
0x333e   :  { %11773 = vmatprep.subr.bf16.mxu1 %v13175_v0 }
0x3341   :  { %11774 = vmatpush3.bf16.msra.mxu1 %v12570_v6 }
0x3342   :  { %11775 = vmatprep.subr.bf16.mxu1 %v13175_v0 }
0x3345   :  { %11776 = vmatpush3.bf16.msra.mxu1 %v12574_v46 }
0x3346   :  { %11787 = vmatprep.subr.bf16.mxu1 %v13175_v0 }
0x33fb   :  { %v5065_v48 = vpop.f32.mrb[128].mxu1 }
0x33fc   :  { %v5072_v41 = vadd.f32 %v5065_v48, %v13926_v37  ;;  %v11759_v49 = vpop.f32.mrb[129].mxu1  ;;  %v10566_v37 = vld [vmem:[#allocation7 + $0x2d] ss:$0 sm:$0xff] }
0x33fd   :  { %v5068_v27 = vpop.f32.mrb[130].mxu1 }
0x33fe   :  { %v5079_v31 = vadd.f32 %v10541_v59, %v5072_v41  ;;  %v5073_v34 = vadd.f32 %v5068_v27, %v13929_v61  ;;  %v11760_v55 = vpop.f32.mrb[131].mxu1  ;;  %v10567_v61 = vld [vmem:[#allocation7 + $0x2e] ss:$0 sm:$0xff] }
0x3400   :  { %v5080_v56 = vadd.f32 %v10541_v59, %v5073_v34  ;;  %v13949_v63 = vadd.f32 %v5079_v31, %v13495_v51 }
0x3402   :  { %v13952_v57 = vadd.f32 %v5080_v56, %v13497_v52 }
0x3404   :  { %v5115_v15 = vpack.c.bf16 %v13952_v57, %v13949_v63 }
0x3406   :  { %5277 = vmatmul.mubr.bf16.vlgmr.msra.gmra.mrb[116].mxu0 %v5115_v15  ;;  %11778 = vmatmul.mubr.bf16.vlgmr.msra.gmra.mrb[132].mxu1 %v5115_v15 }
0x3407   :  { %11783 = vmatprep.mubr.msk.bf16.mxu0 %vm13176_vm0, %v13175_v0  ;;  %11789 = vmatprep.mubr.msk.bf16.mxu1 %vm13176_vm0, %v13175_v0 }
0x34d9   :  { %v5278_v22 = vpop.f32.mrb[116].mxu0  ;;  %v5321_v3 = vpop.f32.mrb[132].mxu1 }
0x34da   :  { %v5280_v51 = vpop.f32.mrb[117].mxu0  ;;  %v11779_v62 = vpop.f32.mrb[133].mxu1  ;;  %v5333_v7 = vadd.f32 %v10566_v37, %v5278_v22  ;;  %v5347_v60 = vadd.f32 %v10568_v1, %v5321_v3 }
0x34db   :  { %v5282_v52 = vpop.f32.mrb[118].mxu0  ;;  %v5324_v2 = vpop.f32.mrb[134].mxu1  ;;  %v5340_v50 = vadd.f32 %v10567_v61, %v5280_v51 }
0x34dc   :  { %v5334_v53 = vadd.f32 %v10566_v37, %v5282_v52  ;;  %v5348_v11 = vadd.f32 %v10568_v1, %v5324_v2  ;;  %v5284_v13 = vpop.f32.mrb[119].mxu0  ;;  %v11780_v14 = vpop.f32.mrb[135].mxu1 }
0x34dd   :  { %v5341_v54 = vadd.f32 %v10567_v61, %v5284_v13  ;;  %v12578_v13 = vld [vmem:[#allocation6 + $0x4a0] ss:$180 sps:$4 sm:$0xff]  }
0x34de   :  { %v13960_v16 = vpack.c.bf16 %v5334_v53, %v5333_v7  ;;  %v13962_v17 = vpack.c.bf16 %v5348_v11, %v5347_v60  ;;  %v12577_v11 = vld [vmem:[#allocation6 + $0x338] ss:$180 sps:$4 sm:$0xff]  }
0x34df   :  { %v13964_v39 = vpack.c.bf16 %v5341_v54, %v5340_v50 }
0x34e0   :  { %11788 = vmatpush3.bf16.msra.mxu1 %v13962_v17  ;;  %5474 = vrot.lane.b32.xlu1 %v13960_v16, %s13178_s3 }
0x34e1   :  { %5477 = vrot.lane.b32.xlu0 %v13964_v39, %s13178_s3  ;;  %v5355_v21 = vsel %vm695_vm1, %v13964_v39, 0  ;;  %11799 = vmatprep.subr.bf16.mxu1 %v13175_v0 }
0x34e2   :  { %11782 = vmatpush3.bf16.xpose.msra.mxu0 %v5355_v21 }
0x34e3   :  { %11793 = vmatprep.subr.bf16.mxu0 %v13175_v0 }
0x34e9   :  { %11784 = vmatmul.mubr.msk.bf16.vlgmr.msra.gmra.mrb[120].mxu0 %vm695_vm1, %v13960_v16 }
0x34ea   :  { %11795 = vmatprep.mubr.msk.bf16.mxu0 %vm13176_vm0, %v13175_v0 }
0x3552   :  { %v5475_v42 = vpop.permute.xlu1 %5474 }
0x3553   :  { %v5478_v18 = vpop.permute.xlu0 %5477 }
0x3554   :  { %v5483_v19 = vsel %vm695_vm1, %v5478_v18, 0 }
0x3555   :  { %11794 = vmatpush3.bf16.xpose.msra.mxu0 %v5483_v19 }
0x3556   :  { %11805 = vmatprep.subr.bf16.mxu0 %v13175_v0 }
0x355c   :  { %11796 = vmatmul.mubr.msk.bf16.vlgmr.msra.gmra.mrb[124].mxu0 %vm695_vm1, %v5475_v42 }
0x355d   :  { %11809 = vmatprep.mubr.msk.bf16.mxu0 %vm13176_vm0, %v13175_v0  ;;  %11806 = vmatpush3.bf16.msra.mxu0 %v12577_v11 }
0x355e   :  { %11807 = vmatprep.subr.bf16.mxu0 %v13175_v0 }
0x3561   :  { %11808 = vmatpush3.bf16.msra.mxu0 %v12578_v13 }
0x3562   :  { %11821 = vmatprep.subr.bf16.mxu0 %v13175_v0 }
0x35bc   :  { %v5391_v20 = vpop.f32.mrb[120].mxu0 }
0x35bd   :  { %v5398_v23 = vsel %vm13332_vm2, %v5391_v20, -1e+30  ;;  %v11785_v24 = vpop.f32.mrb[121].mxu0  ;;  %v12575_v20 = vld [vmem:[#allocation6 + $0x68] ss:$180 sps:$4 sm:$0xff]  }
0x35be   :  { %v5400_v28 = vsel %vm745_vm3, %v5398_v23, -inf  ;;  %v5394_v29 = vpop.f32.mrb[122].mxu0  ;;  %v12576_v24 = vld [vmem:[#allocation6 + $0x1d0] ss:$180 sps:$4 sm:$0xff]  }
0x35bf   :  { %v5399_v30 = vsel %vm13336_vm4, %v5394_v29, -1e+30  ;;  %5401 = vmax.xlane.f32.xlu1 %v5400_v28  ;;  %v11786_v26 = vpop.f32.mrb[123].mxu0 }
0x35c0   :  { %v5403_v32 = vsel %vm745_vm3, %v5399_v30, -inf }
0x35c1   :  { %5404 = vmax.xlane.f32.xlu0 %v5403_v32 }
0x362f   :  { %v5519_v33 = vpop.f32.mrb[124].mxu0 }
0x3630   :  { %v5526_v12 = vsel %vm13332_vm2, %v5519_v33, -1e+30  ;;  %v11797_v35 = vpop.f32.mrb[125].mxu0 }
0x3631   :  { %v5528_v36 = vsel %vm745_vm3, %v5526_v12, -inf  ;;  %v5522_v38 = vpop.f32.mrb[126].mxu0 }
0x3632   :  { %v5527_v25 = vsel %vm13336_vm4, %v5522_v38, -1e+30  ;;  %5529 = vmax.xlane.f32.xlu0 %v5528_v36  ;;  %v11798_v43 = vpop.f32.mrb[127].mxu0 }
0x3633   :  { %v5531_v5 = vsel %vm745_vm3, %v5527_v25, -inf }
0x3634   :  { %5532 = vmax.xlane.f32.xlu1 %v5531_v5 }
0x364c   :  { %v5402_v4 = vpop.xlane.xlu1 %5401 }
0x364d   :  { %v5406_v6 = vsub.f32 %v5398_v23, %v5402_v4 }
0x364e   :  { %v5405_v44 = vpop.xlane.xlu0 %5404 }
0x364f   :  { %v5408_v40 = vmul.f32 1.442695, %v5406_v6  ;;  %v5407_v46 = vsub.f32 %v5399_v30, %v5405_v44 }
0x3651   :  { %12895 = vpow2.f32 %v5408_v40  ;;  %v5410_v48 = vmul.f32 1.442695, %v5407_v46 }
0x3653   :  { %12897 = vpow2.f32 %v5410_v48 }
0x365b   :  { %v12896_v59 = vpop.eup %12895 }
0x365c   :  { %v5412_v41 = vsel %vm745_vm3, %v12896_v59, 0.0 }
0x365d   :  { %v12898_v49 = vpop.eup %12897  ;;  %5413 = vadd.xlane.f32.xlu0 %v5412_v41 }
0x365e   :  { %v5415_v27 = vsel %vm745_vm3, %v12898_v49, 0.0 }
0x365f   :  { %5416 = vadd.xlane.f32.xlu1 %v5415_v27 }
0x36bf   :  { %v5530_v31 = vpop.xlane.xlu0 %5529 }
0x36c0   :  { %v5534_v34 = vsub.f32 %v5526_v12, %v5530_v31 }
0x36c1   :  { %v5533_v55 = vpop.xlane.xlu1 %5532 }
0x36c2   :  { %v5536_v56 = vmul.f32 1.442695, %v5534_v34  ;;  %v5535_v15 = vsub.f32 %v5527_v25, %v5533_v55 }
0x36c4   :  { %12899 = vpow2.f32 %v5536_v56  ;;  %v5538_v22 = vmul.f32 1.442695, %v5535_v15 }
0x36c6   :  { %12901 = vpow2.f32 %v5538_v22 }
0x36ce   :  { %v12900_v37 = vpop.eup %12899 }
0x36cf   :  { %v5540_v3 = vsel %vm745_vm3, %v12900_v37, 0.0 }
0x36d0   :  { %v12902_v1 = vpop.eup %12901  ;;  %5541 = vadd.xlane.f32.xlu0 %v5540_v3 }
0x36d1   :  { %v5543_v51 = vsel %vm745_vm3, %v12902_v1, 0.0 }
0x36d2   :  { %5544 = vadd.xlane.f32.xlu1 %v5543_v51 }
0x36e3   :  { %5718 = vrot.lane.b32.xlu1 %v13964_v39, %s13179_s25 }
0x36e6   :  { %5552 = vrot.lane.b32.xlu0 %v13962_v17, %s13178_s3 }
0x36e7   :  { %5716 = vrot.lane.b32.xlu1 %v13960_v16, %s13179_s25 }
0x36ea   :  { %v5414_v61 = vpop.xlane.xlu0 %5413 }
0x36eb   :  { %12903 = vrcp.f32 %v5414_v61 }
0x36ec   :  { %v5417_v62 = vpop.xlane.xlu1 %5416 }
0x36ed   :  { %12905 = vrcp.f32 %v5417_v62 }
0x36f5   :  { %v12904_v52 = vpop.eup %12903 }
0x36f6   :  { %v5420_v7 = vmul.f32 %v12904_v52, %v12896_v59 }
0x36f7   :  { %v12906_v2 = vpop.eup %12905 }
0x36f8   :  { %v5421_v60 = vmul.f32 %v12906_v2, %v12898_v49 }
0x36fa   :  { %v5422_v53 = vpack.c.bf16 %v5421_v60, %v5420_v7 }
0x36fc   :  { %11790 = vmatmul.mubr.msk.bf16.vlgmr.msra.gmra.mrb[136].mxu1 %vm745_vm3, %v5422_v53 }
0x36fd   :  { %11801 = vmatprep.mubr.msk.bf16.mxu1 %vm13176_vm0, %v13175_v0 }
0x375d   :  { %v5542_v14 = vpop.xlane.xlu0 %5541 }
0x375e   :  { %12907 = vrcp.f32 %v5542_v14 }
0x375f   :  { %v5545_v50 = vpop.xlane.xlu1 %5544 }
0x3760   :  { %12909 = vrcp.f32 %v5545_v50 }
0x3761   :  { %v5553_v54 = vpop.permute.xlu0 %5552 }
0x3762   :  { %11800 = vmatpush3.bf16.msra.mxu1 %v5553_v54 }
0x3763   :  { %11813 = vmatprep.subr.bf16.mxu1 %v13175_v0  ;;  %v5719_v35 = vpop.permute.xlu1 %5718 }
0x3764   :  { %v5724_v43 = vsel %vm695_vm1, %v5719_v35, 0 }
0x3767   :  { %v5717_v5 = vpop.permute.xlu1 %5716 }
0x3768   :  { %v12908_v21 = vpop.eup %12907 }
0x3769   :  { %v5548_v19 = vmul.f32 %v12908_v21, %v12900_v37 }
0x376a   :  { %v12910_v18 = vpop.eup %12909 }
0x376b   :  { %v5549_v42 = vmul.f32 %v12910_v18, %v12902_v1 }
0x376d   :  { %v5550_v23 = vpack.c.bf16 %v5549_v42, %v5548_v19 }
0x376f   :  { %11802 = vmatmul.mubr.msk.bf16.vlgmr.msra.gmra.mrb[140].mxu1 %vm745_vm3, %v5550_v23 }
0x3770   :  { %11814 = vmatpush3.bf16.msra.mxu1 %v12575_v20  ;;  %11817 = vmatprep.mubr.msk.bf16.mxu1 %vm13176_vm0, %v13175_v0 }
0x3771   :  { %11815 = vmatprep.subr.bf16.mxu1 %v13175_v0 }
0x3774   :  { %11816 = vmatpush3.bf16.msra.mxu1 %v12576_v24  ;;  %v12580_v24 = vld [vmem:[#allocation6 + $0x770] ss:$180 sps:$4 sm:$0xff]  }
0x3775   :  { %11827 = vmatprep.subr.bf16.mxu1 %v13175_v0 }
0x37cf   :  { %v5461_v28 = vpop.f32.mrb[136].mxu1 }
0x37d0   :  { %v11791_v29 = vpop.f32.mrb[137].mxu1 }
0x37d1   :  { %v5464_v30 = vpop.f32.mrb[138].mxu1 }
0x37d2   :  { %v5472_v26 = vpack.c.bf16 %v5464_v30, %v5461_v28  ;;  %v11792_v32 = vpop.f32.mrb[139].mxu1 }
0x37d4   :  { %11818 = vmatmul.mubr.msk.bf16.vlgmr.msra.gmra.mrb[144].mxu1 %vm695_vm1, %v5472_v26 }
0x37d5   :  { %11829 = vmatprep.mubr.msk.bf16.mxu1 %vm13176_vm0, %v13175_v0 }
0x3842   :  { %v5592_v33 = vpop.f32.mrb[140].mxu1 }
0x3843   :  { %v11803_v12 = vpop.f32.mrb[141].mxu1 }
0x3844   :  { %v5595_v36 = vpop.f32.mrb[142].mxu1 }
0x3845   :  { %v5603_v38 = vpack.c.bf16 %v5595_v36, %v5592_v33  ;;  %v11804_v25 = vpop.f32.mrb[143].mxu1 }
0x3847   :  { %11810 = vmatmul.mubr.msk.bf16.vlgmr.msra.gmra.mrb[128].mxu0 %vm695_vm1, %v5603_v38 }
0x3848   :  { %11822 = vmatpush3.bf16.xpose.msra.mxu0 %v5724_v43  ;;  %11823 = vmatprep.mubr.msk.bf16.mxu0 %vm13176_vm0, %v13175_v0 }
0x3849   :  { %11833 = vmatprep.subr.bf16.mxu0 %v13175_v0 }
0x384f   :  { %11824 = vmatmul.mubr.msk.bf16.vlgmr.msra.gmra.mrb[132].mxu0 %vm695_vm1, %v5717_v5 }
0x3850   :  { %11837 = vmatprep.mubr.msk.bf16.mxu0 %vm13176_vm0, %v13175_v0 }
0x38a7   :  { %v5709_v4 = vpop.f32.mrb[144].mxu1 }
0x38a8   :  { %v11819_v6 = vpop.f32.mrb[145].mxu1 }
0x38a9   :  { %v5712_v44 = vpop.f32.mrb[146].mxu1 }
0x38aa   :  { %v11820_v40 = vpop.f32.mrb[147].mxu1 }
0x391a   :  { %v5653_v46 = vpop.f32.mrb[128].mxu0 }
0x391b   :  { %v14028_v48 = vadd.f32 %v5709_v4, %v5653_v46  ;;  %v11811_v59 = vpop.f32.mrb[129].mxu0 }
0x391c   :  { %v5656_v41 = vpop.f32.mrb[130].mxu0 }
0x391d   :  { %v14030_v49 = vadd.f32 %v5712_v44, %v5656_v41  ;;  %v11812_v27 = vpop.f32.mrb[131].mxu0 }
0x3922   :  { %v5760_v31 = vpop.f32.mrb[132].mxu0 }
0x3923   :  { %v5767_v34 = vsel %vm13332_vm2, %v5760_v31, -1e+30  ;;  %v11825_v55 = vpop.f32.mrb[133].mxu0 }
0x3924   :  { %v5769_v56 = vsel %vm745_vm3, %v5767_v34, -inf  ;;  %v5763_v15 = vpop.f32.mrb[134].mxu0  ;;  %v12581_v55 = vld [vmem:[#allocation6 + $0x8d8] ss:$180 sps:$4 sm:$0xff]  }
0x3925   :  { %v5768_v22 = vsel %vm13336_vm4, %v5763_v15, -1e+30  ;;  %5770 = vmax.xlane.f32.xlu1 %v5769_v56  ;;  %v11826_v37 = vpop.f32.mrb[135].mxu0 }
0x3926   :  { %v5772_v3 = vsel %vm745_vm3, %v5768_v22, -inf }
0x3927   :  { %5773 = vmax.xlane.f32.xlu0 %v5772_v3 }
0x3936   :  { %5792 = vrot.lane.b32.xlu1 %v13962_v17, %s13179_s25 }
0x393a   :  { %5902 = vrot.lane.b32.xlu1 %v13960_v16, %s13180_s26  ;;  %v12579_v16 = vld [vmem:[#allocation6 + $0x608] ss:$180 sps:$4 sm:$0xff]  }
0x393b   :  { %11834 = vmatpush3.bf16.msra.mxu0 %v12579_v16 }
0x393c   :  { %11835 = vmatprep.subr.bf16.mxu0 %v13175_v0 }
0x393f   :  { %11836 = vmatpush3.bf16.msra.mxu0 %v12580_v24 }
0x3940   :  { %11847 = vmatprep.subr.bf16.mxu0 %v13175_v0 }
0x39b2   :  { %v5771_v1 = vpop.xlane.xlu1 %5770 }
0x39b3   :  { %v5775_v51 = vsub.f32 %v5767_v34, %v5771_v1 }
0x39b4   :  { %v5774_v61 = vpop.xlane.xlu0 %5773 }
0x39b5   :  { %v5777_v62 = vmul.f32 1.442695, %v5775_v51  ;;  %v5776_v52 = vsub.f32 %v5768_v22, %v5774_v61 }
0x39b6   :  { %v5793_v2 = vpop.permute.xlu1 %5792 }
0x39b7   :  { %12911 = vpow2.f32 %v5777_v62  ;;  %v5779_v7 = vmul.f32 1.442695, %v5776_v52  ;;  %11828 = vmatpush3.bf16.msra.mxu1 %v5793_v2 }
0x39b8   :  { %11841 = vmatprep.subr.bf16.mxu1 %v13175_v0 }
0x39b9   :  { %12913 = vpow2.f32 %v5779_v7 }
0x39c1   :  { %v12912_v60 = vpop.eup %12911 }
0x39c2   :  { %v5781_v53 = vsel %vm745_vm3, %v12912_v60, 0.0 }
0x39c3   :  { %v12914_v11 = vpop.eup %12913  ;;  %5782 = vadd.xlane.f32.xlu0 %v5781_v53 }
0x39c4   :  { %v5784_v13 = vsel %vm745_vm3, %v12914_v11, 0.0 }
0x39c7   :  { %5785 = vadd.xlane.f32.xlu0 %v5784_v13 }
0x39dd   :  { %5904 = vrot.lane.b32.xlu0 %v13964_v39, %s13180_s26  ;;  %v5903_v39 = vpop.permute.xlu1 %5902 }
0x3a50   :  { %v5783_v14 = vpop.xlane.xlu0 %5782 }
0x3a51   :  { %12915 = vrcp.f32 %v5783_v14 }
0x3a54   :  { %v5786_v50 = vpop.xlane.xlu0 %5785 }
0x3a55   :  { %12917 = vrcp.f32 %v5786_v50  ;;  %v10589_v50 = vld [vmem:[#allocation7 + $0x30] ss:$0 sm:$0xff] }
0x3a58   :  { %v5905_v42 = vpop.permute.xlu0 %5904 }
0x3a59   :  { %v5910_v23 = vsel %vm695_vm1, %v5905_v42, 0 }
0x3a5b   :  { %v12916_v54 = vpop.eup %12915 }
0x3a5c   :  { %v5789_v18 = vmul.f32 %v12916_v54, %v12912_v60 }
0x3a5f   :  { %v12918_v21 = vpop.eup %12917 }
0x3a60   :  { %v5790_v19 = vmul.f32 %v12918_v21, %v12914_v11 }
0x3a62   :  { %v5791_v20 = vpack.c.bf16 %v5790_v19, %v5789_v18 }
0x3a64   :  { %11830 = vmatmul.mubr.msk.bf16.vlgmr.msra.gmra.mrb[148].mxu1 %vm745_vm3, %v5791_v20 }
0x3a65   :  { %11842 = vmatpush3.bf16.xpose.msra.mxu1 %v5910_v23  ;;  %11843 = vmatprep.mubr.msk.bf16.mxu1 %vm13176_vm0, %v13175_v0 }
0x3a66   :  { %11853 = vmatprep.subr.bf16.mxu1 %v13175_v0 }
0x3a6c   :  { %11844 = vmatmul.mubr.msk.bf16.vlgmr.msra.gmra.mrb[152].mxu1 %vm695_vm1, %v5903_v39 }
0x3a6d   :  { %11857 = vmatprep.mubr.msk.bf16.mxu1 %vm13176_vm0, %v13175_v0  ;;  %11854 = vmatpush3.bf16.msra.mxu1 %v12581_v55 }
0x3a6e   :  { %11855 = vmatprep.subr.bf16.mxu1 %v13175_v0 }
0x3b37   :  { %v5832_v28 = vpop.f32.mrb[148].mxu1 }
0x3b38   :  { %v11831_v29 = vpop.f32.mrb[149].mxu1 }
0x3b39   :  { %v5835_v30 = vpop.f32.mrb[150].mxu1  ;;  %v12584_v29 = vld [vmem:[#allocation6 + $0x1d4] ss:$180 sps:$4 sm:$0xff]  }
0x3b3a   :  { %v5843_v26 = vpack.c.bf16 %v5835_v30, %v5832_v28  ;;  %v11832_v32 = vpop.f32.mrb[151].mxu1  ;;  %v12583_v28 = vld [vmem:[#allocation6 + $0x6c] ss:$180 sps:$4 sm:$0xff]  }
0x3b3c   :  { %11838 = vmatmul.mubr.msk.bf16.vlgmr.msra.gmra.mrb[136].mxu0 %vm695_vm1, %v5843_v26 }
0x3b3d   :  { %11849 = vmatprep.mubr.msk.bf16.mxu0 %vm13176_vm0, %v13175_v0 }
0x3b3f   :  { %v5946_v33 = vpop.f32.mrb[152].mxu1 }
0x3b40   :  { %v5953_v12 = vsel %vm13332_vm2, %v5946_v33, -1e+30  ;;  %v11845_v35 = vpop.f32.mrb[153].mxu1 }
0x3b41   :  { %v5955_v36 = vsel %vm745_vm3, %v5953_v12, -inf  ;;  %v5949_v38 = vpop.f32.mrb[154].mxu1 }
0x3b42   :  { %v5954_v25 = vsel %vm13336_vm4, %v5949_v38, -1e+30  ;;  %5956 = vmax.xlane.f32.xlu1 %v5955_v36  ;;  %v11846_v43 = vpop.f32.mrb[155].mxu1  ;;  %v12586_v38 = vld [vmem:[#allocation6 + $0x4a4] ss:$180 sps:$4 sm:$0xff]  }
0x3b43   :  { %v5958_v5 = vsel %vm745_vm3, %v5954_v25, -inf  ;;  %v12588_v43 = vld [vmem:[#allocation6 + $0x774] ss:$180 sps:$4 sm:$0xff]  }
0x3b44   :  { %5959 = vmax.xlane.f32.xlu0 %v5958_v5  ;;  %v12589_v5 = vld [vmem:[#allocation6 + $0x8dc] ss:$180 sps:$4 sm:$0xff]  }
0x3bcf   :  { %v5957_v4 = vpop.xlane.xlu1 %5956 }
0x3bd0   :  { %v5961_v6 = vsub.f32 %v5953_v12, %v5957_v4  ;;  %v12590_v4 = vld [vmem:[#allocation6 + $0xa44] ss:$180 sps:$4 sm:$0xff]  }
0x3bd1   :  { %v5960_v44 = vpop.xlane.xlu0 %5959 }
0x3bd2   :  { %v5963_v40 = vmul.f32 1.442695, %v5961_v6  ;;  %v5962_v46 = vsub.f32 %v5954_v25, %v5960_v44  ;;  %v12587_v25 = vld [vmem:[#allocation6 + $0x60c] ss:$180 sps:$4 sm:$0xff]   ;;  %v12599_v6 = vld [vmem:[#allocation6 + $0x70] ss:$180 sps:$4 sm:$0xff]  }
0x3bd3   :  { %v12600_v44 = vld [vmem:[#allocation6 + $0x1d8] ss:$180 sps:$4 sm:$0xff]  }
0x3bd4   :  { %12919 = vpow2.f32 %v5963_v40  ;;  %v5965_v59 = vmul.f32 1.442695, %v5962_v46  ;;  %v12601_v40 = vld [vmem:[#allocation6 + $0x340] ss:$180 sps:$4 sm:$0xff]   ;;  %v12602_v46 = vld [vmem:[#allocation6 + $0x4a8] ss:$180 sps:$4 sm:$0xff]  }
0x3bd6   :  { %12921 = vpow2.f32 %v5965_v59  ;;  %v12603_v59 = vld [vmem:[#allocation6 + $0x610] ss:$180 sps:$4 sm:$0xff]  }
0x3bde   :  { %v12920_v41 = vpop.eup %12919 }
0x3bdf   :  { %v5967_v27 = vsel %vm745_vm3, %v12920_v41, 0.0 }
0x3be0   :  { %v12922_v31 = vpop.eup %12921  ;;  %5968 = vadd.xlane.f32.xlu0 %v5967_v27 }
0x3be1   :  { %v5970_v34 = vsel %vm745_vm3, %v12922_v31, 0.0 }
0x3be2   :  { %5971 = vadd.xlane.f32.xlu1 %v5970_v34 }
0x3bf6   :  { %5978 = vrot.lane.b32.xlu0 %v13962_v17, %s13180_s26 }
0x3c0f   :  { %v5893_v56 = vpop.f32.mrb[136].mxu0 }
0x3c10   :  { %v5900_v15 = vadd.f32 %v5893_v56, %v14028_v48  ;;  %v11839_v22 = vpop.f32.mrb[137].mxu0  ;;  %v12582_v48 = vld [vmem:[#allocation6 + $0xa40] ss:$180 sps:$4 sm:$0xff]  }
0x3c11   :  { %v5896_v37 = vpop.f32.mrb[138].mxu0  ;;  %11856 = vmatpush3.bf16.msra.mxu1 %v12582_v48  ;;  %v12592_v48 = vld [vmem:[#allocation6 + $0x1f4] ss:$180 sps:$4 sm:$0xff]  }
0x3c12   :  { %v5901_v3 = vadd.f32 %v5896_v37, %v14030_v49  ;;  %v11840_v1 = vpop.f32.mrb[139].mxu0  ;;  %11881 = vmatprep.subr.bf16.mxu1 %v13175_v0 }
0x3c6d   :  { %v5969_v51 = vpop.xlane.xlu0 %5968 }
0x3c6e   :  { %12923 = vrcp.f32 %v5969_v51 }
0x3c6f   :  { %v5972_v61 = vpop.xlane.xlu1 %5971 }
0x3c70   :  { %12925 = vrcp.f32 %v5972_v61 }
0x3c71   :  { %v5979_v62 = vpop.permute.xlu0 %5978 }
0x3c72   :  { %11848 = vmatpush3.bf16.msra.mxu0 %v5979_v62  ;;  %v10591_v62 = vld [vmem:[#allocation7 + $0x32] ss:$0 sm:$0xff] }
0x3c73   :  { %11861 = vmatprep.subr.bf16.mxu0 %v13175_v0 }
0x3c78   :  { %v12924_v17 = vpop.eup %12923 }
0x3c79   :  { %v5975_v2 = vmul.f32 %v12924_v17, %v12920_v41  ;;  %v12604_v41 = vld [vmem:[#allocation6 + $0x778] ss:$180 sps:$4 sm:$0xff]  }
0x3c7a   :  { %v12926_v52 = vpop.eup %12925 }
0x3c7b   :  { %v5976_v7 = vmul.f32 %v12926_v52, %v12922_v31 }
0x3c7d   :  { %v5977_v60 = vpack.c.bf16 %v5976_v7, %v5975_v2  ;;  %v12591_v7 = vld [vmem:[#allocation6 + $0x8c] ss:$180 sps:$4 sm:$0xff]  }
0x3c7f   :  { %11850 = vmatmul.mubr.msk.bf16.vlgmr.msra.gmra.mrb[140].mxu0 %vm745_vm3, %v5977_v60 }
0x3c80   :  { %11877 = vmatprep.mubr.msk.bf16.mxu0 %vm13176_vm0, %v13175_v0  ;;  %11862 = vmatpush3.bf16.msra.mxu0 %v12583_v28 }
0x3c81   :  { %11863 = vmatprep.subr.bf16.mxu0 %v13175_v0 }
0x3c84   :  { %11864 = vmatpush3.bf16.msra.mxu0 %v12584_v29 }
0x3c85   :  { %11865 = vmatprep.subr.bf16.mxu0 %v13175_v0 }
0x3d52   :  { %v6018_v49 = vpop.f32.mrb[140].mxu0 }
0x3d53   :  { %v11851_v53 = vpop.f32.mrb[141].mxu0 }
0x3d54   :  { %v6021_v11 = vpop.f32.mrb[142].mxu0  ;;  %v12594_v53 = vld [vmem:[#allocation6 + $0x4c4] ss:$180 sps:$4 sm:$0xff]  }
0x3d55   :  { %v6029_v13 = vpack.c.bf16 %v6021_v11, %v6018_v49  ;;  %v11852_v16 = vpop.f32.mrb[143].mxu0  ;;  %v12593_v49 = vld [vmem:[#allocation6 + $0x35c] ss:$180 sps:$4 sm:$0xff]   ;;  %v12595_v11 = vld [vmem:[#allocation6 + $0x62c] ss:$180 sps:$4 sm:$0xff]  }
0x3d56   :  { %v12597_v16 = vld [vmem:[#allocation6 + $0x8fc] ss:$180 sps:$4 sm:$0xff]  }
0x3d57   :  { %11858 = vmatmul.mubr.msk.bf16.vlgmr.msra.gmra.mrb[156].mxu1 %vm695_vm1, %v6029_v13  ;;  %v12596_v13 = vld [vmem:[#allocation6 + $0x794] ss:$180 sps:$4 sm:$0xff]  }
0x3d58   :  { %11897 = vmatprep.mubr.msk.bf16.mxu1 %vm13176_vm0, %v13175_v0  ;;  %11882 = vmatpush3.bf16.msra.mxu1 %v12599_v6 }
0x3d59   :  { %11883 = vmatprep.subr.bf16.mxu1 %v13175_v0 }
0x3d5c   :  { %11884 = vmatpush3.bf16.msra.mxu1 %v12600_v44 }
0x3d5d   :  { %11885 = vmatprep.subr.bf16.mxu1 %v13175_v0 }
0x3d60   :  { %11886 = vmatpush3.bf16.msra.mxu1 %v12601_v40  ;;  %v12607_v40 = vld [vmem:[#allocation6 + $0x90] ss:$180 sps:$4 sm:$0xff]  }
0x3d61   :  { %11887 = vmatprep.subr.bf16.mxu1 %v13175_v0 }
0x3d64   :  { %11888 = vmatpush3.bf16.msra.mxu1 %v12602_v46  ;;  %v12609_v46 = vld [vmem:[#allocation6 + $0x94] ss:$180 sps:$4 sm:$0xff]  }
0x3d65   :  { %11889 = vmatprep.subr.bf16.mxu1 %v13175_v0 }
0x3d68   :  { %11890 = vmatpush3.bf16.msra.mxu1 %v12603_v59  ;;  %v12612_v59 = vld [vmem:[#allocation6 + $0x1fc] ss:$180 sps:$4 sm:$0xff]  }
0x3d69   :  { %11891 = vmatprep.subr.bf16.mxu1 %v13175_v0 }
0x3d6c   :  { %11892 = vmatpush3.bf16.msra.mxu1 %v12604_v41  ;;  %v12610_v41 = vld [vmem:[#allocation6 + $0x1f8] ss:$180 sps:$4 sm:$0xff]  }
0x3d6d   :  { %11893 = vmatprep.subr.bf16.mxu1 %v13175_v0 }
0x3e2a   :  { %v6079_v14 = vpop.f32.mrb[156].mxu1 }
0x3e2b   :  { %v6086_v54 = vadd.f32 %v6079_v14, %v5900_v15  ;;  %v11859_v21 = vpop.f32.mrb[157].mxu1  ;;  %v12598_v14 = vld [vmem:[#allocation6 + $0xa64] ss:$180 sps:$4 sm:$0xff]  }
0x3e2c   :  { %v6082_v18 = vpop.f32.mrb[158].mxu1  ;;  %v10592_v21 = vld [vmem:[#allocation7 + $0x33] ss:$0 sm:$0xff] }
0x3e2d   :  { %v6093_v19 = vadd.f32 %v10589_v50, %v6086_v54  ;;  %v6087_v42 = vadd.f32 %v6082_v18, %v5901_v3  ;;  %v11860_v20 = vpop.f32.mrb[159].mxu1  ;;  %v10590_v3 = vld [vmem:[#allocation7 + $0x31] ss:$0 sm:$0xff]  ;;  %v12606_v54 = vld [vmem:[#allocation6 + $0xa48] ss:$180 sps:$4 sm:$0xff]  }
0x3e2f   :  { %v6094_v23 = vadd.f32 %v10589_v50, %v6087_v42  ;;  %v6095_v39 = vadd.f32 %v6093_v19, %v13949_v63  ;;  %v12605_v50 = vld [vmem:[#allocation6 + $0x8e0] ss:$180 sps:$4 sm:$0xff]  }
0x3e30   :  { %11894 = vmatpush3.bf16.msra.mxu1 %v12605_v50 }
0x3e31   :  { %6097 = vadd.xlane.f32.xlu1 %v6095_v39  ;;  %v6096_v24 = vadd.f32 %v6094_v23, %v13952_v57  ;;  %v12585_v57 = vld [vmem:[#allocation6 + $0x33c] ss:$180 sps:$4 sm:$0xff]   ;;  %11895 = vmatprep.subr.bf16.mxu1 %v13175_v0 }
0x3e32   :  { %11866 = vmatpush3.bf16.msra.mxu0 %v12585_v57  ;;  %v10609_v57 = vld [vmem:[#allocation7 + $0x34] ss:$0 sm:$0xff] }
0x3e33   :  { %11867 = vmatprep.subr.bf16.mxu0 %v13175_v0 }
0x3e34   :  { %11896 = vmatpush3.bf16.msra.mxu1 %v12606_v54 }
0x3e35   :  { %6099 = vadd.xlane.f32.xlu1 %v6096_v24  ;;  %6604 = vmatprep.subr.bf16.mxu1 %v12609_v46 }
0x3e36   :  { %11868 = vmatpush3.bf16.msra.mxu0 %v12586_v38 }
0x3e37   :  { %11869 = vmatprep.subr.bf16.mxu0 %v13175_v0 }
0x3e3a   :  { %11870 = vmatpush3.bf16.msra.mxu0 %v12587_v25 }
0x3e3b   :  { %11871 = vmatprep.subr.bf16.mxu0 %v13175_v0 }
0x3e3e   :  { %11872 = vmatpush3.bf16.msra.mxu0 %v12588_v43 }
0x3e3f   :  { %11873 = vmatprep.subr.bf16.mxu0 %v13175_v0 }
0x3e42   :  { %11874 = vmatpush3.bf16.msra.mxu0 %v12589_v5 }
0x3e43   :  { %11875 = vmatprep.subr.bf16.mxu0 %v13175_v0 }
0x3e46   :  { %11876 = vmatpush3.bf16.msra.mxu0 %v12590_v4 }
0x3e47   :  { %11901 = vmatprep.subr.bf16.mxu0 %v13175_v0 }
0x3ebe   :  { %v6098_v30 = vpop.xlane.xlu1 %6097 }
0x3ebf   :  { %v6101_v26 = vmul.f32 0.0078125, %v6098_v30 }
0x3ec1   :  { %v6103_v32 = vsub.f32 %v6095_v39, %v6101_v26 }
0x3ec2   :  { %v6100_v33 = vpop.xlane.xlu1 %6099 }
0x3ec3   :  { %v6102_v12 = vmul.f32 0.0078125, %v6100_v33  ;;  %v6105_v35 = vmul.f32 %v6103_v32, %v6103_v32 }
0x3ec5   :  { %v6104_v36 = vsub.f32 %v6096_v24, %v6102_v12  ;;  %6107 = vadd.xlane.f32.xlu1 %v6105_v35 }
0x3ec7   :  { %v6106_v63 = vmul.f32 %v6104_v36, %v6104_v36 }
0x3ec9   :  { %6109 = vadd.xlane.f32.xlu1 %v6106_v63 }
0x3f52   :  { %v6108_v27 = vpop.xlane.xlu1 %6107 }
0x3f53   :  { %v6111_v31 = vmul.f32 0.0078125, %v6108_v27 }
0x3f55   :  { %v6113_v34 = vadd.f32 1e-05, %v6111_v31 }
0x3f56   :  { %v6110_v55 = vpop.xlane.xlu1 %6109 }
0x3f57   :  { %12927 = vrsqrt.f32 %v6113_v34  ;;  %v6112_v56 = vmul.f32 0.0078125, %v6110_v55 }
0x3f59   :  { %v6114_v15 = vadd.f32 1e-05, %v6112_v56 }
0x3f5b   :  { %12929 = vrsqrt.f32 %v6114_v15 }
0x3f61   :  { %v12928_v22 = vpop.eup %12927 }
0x3f62   :  { %v6117_v37 = vmul.f32 %v12928_v22, %v6103_v32 }
0x3f64   :  { %v6124_v61 = vmul.f32 %v10590_v3, %v6117_v37 }
0x3f65   :  { %v12930_v1 = vpop.eup %12929 }
0x3f66   :  { %v6118_v51 = vmul.f32 %v12930_v1, %v6104_v36  ;;  %v6131_v52 = vadd.f32 %v10591_v62, %v6124_v61  ;;  %v12613_v1 = vld [vmem:[#allocation6 + $0x360] ss:$180 sps:$4 sm:$0xff]   ;;  %v12616_v61 = vld [vmem:[#allocation6 + $0x4c8] ss:$180 sps:$4 sm:$0xff]  }
0x3f68   :  { %v6125_v17 = vmul.f32 %v10590_v3, %v6118_v51  ;;  %v12615_v3 = vld [vmem:[#allocation6 + $0x364] ss:$180 sps:$4 sm:$0xff]   ;;  %v12618_v51 = vld [vmem:[#allocation6 + $0x4cc] ss:$180 sps:$4 sm:$0xff]  }
0x3f6a   :  { %v6132_v2 = vadd.f32 %v10591_v62, %v6125_v17  ;;  %v12621_v62 = vld [vmem:[#allocation6 + $0x634] ss:$180 sps:$4 sm:$0xff]   ;;  %v12619_v17 = vld [vmem:[#allocation6 + $0x630] ss:$180 sps:$4 sm:$0xff]  }
0x3f6c   :  { %v6149_v60 = vpack.c.bf16 %v6132_v2, %v6131_v52 }
0x3f6e   :  { %11878 = vmatmul.mubr.bf16.vlgmr.msra.gmra.mrb[144].mxu0 %v6149_v60  ;;  %v12625_v60 = vld [vmem:[#allocation6 + $0x900] ss:$180 sps:$4 sm:$0xff]  }
0x3f6f   :  { %11902 = vmatpush3.bf16.msra.mxu0 %v12591_v7  ;;  %11917 = vmatprep.mubr.msk.bf16.mxu0 %vm13176_vm0, %v13175_v0  ;;  %v12627_v7 = vld [vmem:[#allocation6 + $0x904] ss:$180 sps:$4 sm:$0xff]  }
0x3f70   :  { %11903 = vmatprep.subr.bf16.mxu0 %v13175_v0 }
0x3f73   :  { %11904 = vmatpush3.bf16.msra.mxu0 %v12592_v48  ;;  %v12630_v48 = vld [vmem:[#allocation6 + $0xa6c] ss:$180 sps:$4 sm:$0xff]  }
0x3f74   :  { %11905 = vmatprep.subr.bf16.mxu0 %v13175_v0 }
0x3f77   :  { %11906 = vmatpush3.bf16.msra.mxu0 %v12593_v49  ;;  %v12628_v49 = vld [vmem:[#allocation6 + $0xa68] ss:$180 sps:$4 sm:$0xff]  }
0x3f78   :  { %11907 = vmatprep.subr.bf16.mxu0 %v13175_v0 }
0x3f7b   :  { %11908 = vmatpush3.bf16.msra.mxu0 %v12594_v53 }
0x3f7c   :  { %11909 = vmatprep.subr.bf16.mxu0 %v13175_v0 }
0x3f7f   :  { %11910 = vmatpush3.bf16.msra.mxu0 %v12595_v11 }
0x3f80   :  { %11911 = vmatprep.subr.bf16.mxu0 %v13175_v0 }
0x3f83   :  { %11912 = vmatpush3.bf16.msra.mxu0 %v12596_v13 }
0x3f84   :  { %11913 = vmatprep.subr.bf16.mxu0 %v13175_v0 }
0x3f87   :  { %11914 = vmatpush3.bf16.msra.mxu0 %v12597_v16 }
0x3f88   :  { %11915 = vmatprep.subr.bf16.mxu0 %v13175_v0 }
0x3f8b   :  { %11916 = vmatpush3.bf16.msra.mxu0 %v12598_v14 }
0x3f8c   :  { %11921 = vmatprep.subr.bf16.mxu0 %v13175_v0 }
0x3f8e   :  { %11918 = vmatmul.mubr.bf16.vlgmr.msra.gmra.mrb[148].mxu0 %v13811_v10  ;;  %v10612_v10 = vld [vmem:[#allocation7 + $0x41] ss:$0 sm:$0xff] }
0x3f8f   :  { %11923 = vmatprep.mubr.msk.bf16.mxu0 %vm13176_vm0, %v13175_v0 }
0x4041   :  { %v6237_v18 = vpop.f32.mrb[144].mxu0 }
0x4042   :  { %v6238_v19 = vadd.f32 %v10592_v21, %v6237_v18  ;;  %v11879_v42 = vpop.f32.mrb[145].mxu0  ;;  %v10610_v18 = vld [vmem:[#allocation7 + $0x35] ss:$0 sm:$0xff] }
0x4043   :  { %v6240_v20 = vpop.f32.mrb[146].mxu0 }
0x4044   :  { %v6241_v23 = vadd.f32 %v10592_v21, %v6240_v20  ;;  %v11880_v39 = vpop.f32.mrb[147].mxu0  ;;  %v6244_v24 = vmax.f32 %v6238_v19, 0.0 }
0x4046   :  { %v6245_v28 = vmax.f32 %v6241_v23, 0.0  ;;  %v10611_v23 = vld [vmem:[#allocation7 + $0x36] ss:$0 sm:$0xff] }
0x4048   :  { %v6262_v29 = vpack.c.bf16 %v6245_v28, %v6244_v24 }
0x404a   :  { %11898 = vmatmul.mubr.bf16.vlgmr.msra.gmra.mrb[160].mxu1 %v6262_v29 }
0x404b   :  { %6636 = vmatprep.mubr.bf16.mxu1 %v13177_v58  ;;  %6605 = vmatpush1.bf16.msra.mxu1 %v12607_v40 }
0x404c   :  { %6606 = vmatprep.subr.bf16.mxu1 %v12612_v59 }
0x404f   :  { %6607 = vmatpush1.bf16.msra.mxu1 %v12610_v41 }
0x4050   :  { %6608 = vmatprep.subr.bf16.mxu1 %v12615_v3 }
0x4053   :  { %6609 = vmatpush1.bf16.msra.mxu1 %v12613_v1 }
0x4054   :  { %6610 = vmatprep.subr.bf16.mxu1 %v12618_v51 }
0x4057   :  { %6611 = vmatpush1.bf16.msra.mxu1 %v12616_v61 }
0x4058   :  { %6612 = vmatprep.subr.bf16.mxu1 %v12621_v62 }
0x405b   :  { %6613 = vmatpush1.bf16.msra.mxu1 %v12619_v17 }
0x4061   :  { %v6500_v30 = vpop.f32.mrb[148].mxu0 }
0x4062   :  { %v11919_v26 = vpop.f32.mrb[149].mxu0  ;;  %v6501_v33 = vadd.f32 %v10612_v10, %v6500_v30  ;;  %v10637_v30 = vld [vmem:[#allocation7 + $0x42] ss:$0 sm:$0xff] }
0x4063   :  { %v6503_v32 = vpop.f32.mrb[150].mxu0 }
0x4064   :  { %v6504_v12 = vadd.f32 %v10612_v10, %v6503_v32  ;;  %v11920_v35 = vpop.f32.mrb[151].mxu0  ;;  %v10638_v32 = vld [vmem:[#allocation7 + $0x43] ss:$0 sm:$0xff] }
0x4066   :  { %v14112_v36 = vpack.c.bf16 %v6504_v12, %v6501_v33 }
0x411d   :  { %v6345_v63 = vpop.f32.mrb[160].mxu1 }
0x411e   :  { %v6352_v38 = vadd.f32 %v6345_v63, %v6131_v52  ;;  %v11899_v25 = vpop.f32.mrb[161].mxu1  ;;  %v12624_v52 = vld [vmem:[#allocation6 + $0x79c] ss:$180 sps:$4 sm:$0xff]  }
0x411f   :  { %v6348_v43 = vpop.f32.mrb[162].mxu1  ;;  %6614 = vmatprep.subr.bf16.mxu1 %v12624_v52 }
0x4120   :  { %v6359_v5 = vadd.f32 %v10609_v57, %v6352_v38  ;;  %v6353_v4 = vadd.f32 %v6348_v43, %v6132_v2  ;;  %v11900_v6 = vpop.f32.mrb[163].mxu1  ;;  %v12622_v2 = vld [vmem:[#allocation6 + $0x798] ss:$180 sps:$4 sm:$0xff]  }
0x4121   :  { %6615 = vmatpush1.bf16.msra.mxu1 %v12622_v2 }
0x4122   :  { %6361 = vadd.xlane.f32.xlu1 %v6359_v5  ;;  %v6360_v44 = vadd.f32 %v10609_v57, %v6353_v4  ;;  %6616 = vmatprep.subr.bf16.mxu1 %v12627_v7 }
0x4125   :  { %6617 = vmatpush1.bf16.msra.mxu1 %v12625_v60 }
0x4126   :  { %6363 = vadd.xlane.f32.xlu1 %v6360_v44  ;;  %6618 = vmatprep.subr.bf16.mxu1 %v12630_v48 }
0x4129   :  { %6619 = vmatpush1.bf16.msra.mxu1 %v12628_v49 }
0x412a   :  { %11927 = vmatprep.subr.bf16.mxu1 %v13175_v0 }
0x41af   :  { %v6362_v27 = vpop.xlane.xlu1 %6361 }
0x41b0   :  { %v6365_v31 = vmul.f32 0.0078125, %v6362_v27 }
0x41b2   :  { %v6367_v34 = vsub.f32 %v6359_v5, %v6365_v31 }
0x41b3   :  { %v6364_v55 = vpop.xlane.xlu1 %6363 }
0x41b4   :  { %v6366_v56 = vmul.f32 0.0078125, %v6364_v55  ;;  %v6369_v15 = vmul.f32 %v6367_v34, %v6367_v34 }
0x41b6   :  { %v6368_v22 = vsub.f32 %v6360_v44, %v6366_v56  ;;  %6371 = vadd.xlane.f32.xlu0 %v6369_v15 }
0x41b8   :  { %v6370_v37 = vmul.f32 %v6368_v22, %v6368_v22 }
0x41ba   :  { %6373 = vadd.xlane.f32.xlu1 %v6370_v37 }
0x4243   :  { %v6372_v53 = vpop.xlane.xlu0 %6371 }
0x4244   :  { %v6375_v11 = vmul.f32 0.0078125, %v6372_v53 }
0x4246   :  { %v6377_v13 = vadd.f32 1e-05, %v6375_v11 }
0x4247   :  { %v6374_v16 = vpop.xlane.xlu1 %6373 }
0x4248   :  { %12931 = vrsqrt.f32 %v6377_v13  ;;  %v6376_v14 = vmul.f32 0.0078125, %v6374_v16 }
0x424a   :  { %v6378_v50 = vadd.f32 1e-05, %v6376_v14 }
0x424c   :  { %12933 = vrsqrt.f32 %v6378_v50 }
0x4252   :  { %v12932_v54 = vpop.eup %12931 }
0x4253   :  { %v6381_v21 = vmul.f32 %v12932_v54, %v6367_v34 }
0x4255   :  { %v6388_v20 = vmul.f32 %v10610_v18, %v6381_v21 }
0x4256   :  { %v12934_v19 = vpop.eup %12933 }
0x4257   :  { %v6382_v42 = vmul.f32 %v12934_v19, %v6368_v22  ;;  %v14115_v24 = vadd.f32 %v10611_v23, %v6388_v20 }
0x4259   :  { %v6389_v39 = vmul.f32 %v10610_v18, %v6382_v42 }
0x425b   :  { %v14117_v28 = vadd.f32 %v10611_v23, %v6389_v39 }
0x425d   :  { %v14121_v29 = vpack.c.bf16 %v14117_v28, %v14115_v24 }
0x425f   :  { %6637 = vmatmul.mubr.bf16.vlgmr.msra.gmra.mrb[164].mxu1 %v14121_v29 }
0x4260   :  { %11929 = vmatprep.mubr.msk.bf16.mxu1 %vm13176_vm0, %v13175_v0 }
0x4332   :  { %v6638_v10 = vpop.f32.mrb[164].mxu1 }
0x4333   :  { %v6640_v26 = vpop.f32.mrb[165].mxu1  ;;  %v6652_v12 = vadd.f32 %v10637_v30, %v6638_v10 }
0x4334   :  { %v6642_v33 = vpop.f32.mrb[166].mxu1  ;;  %v6659_v57 = vadd.f32 %v10638_v32, %v6640_v26 }
0x4335   :  { %v6653_v35 = vadd.f32 %v10637_v30, %v6642_v33  ;;  %v6644_v63 = vpop.f32.mrb[167].mxu1 }
0x4336   :  { %v6660_v38 = vadd.f32 %v10638_v32, %v6644_v63 }
0x4337   :  { %v14126_v25 = vpack.c.bf16 %v6653_v35, %v6652_v12  ;;  %v12633_v12 = vld [vmem:[#allocation6 + $0x368] ss:$180 sps:$4 sm:$0xff]   ;;  %v12634_v35 = vld [vmem:[#allocation6 + $0x4d0] ss:$180 sps:$4 sm:$0xff]  }
0x4338   :  { %v14128_v43 = vpack.c.bf16 %v6660_v38, %v6659_v57 }
0x4339   :  { %6789 = vrot.lane.b32.xlu1 %v14126_v25, %s13178_s3  ;;  %v6667_v5 = vsel %vm695_vm1, %v14126_v25, 0 }
0x433a   :  { %11922 = vmatpush3.bf16.xpose.msra.mxu0 %v6667_v5  ;;  %11928 = vmatpush3.bf16.msra.mxu1 %v14128_v43 }
0x433b   :  { %11933 = vmatprep.subr.bf16.mxu0 %v13175_v0  ;;  %11939 = vmatprep.subr.bf16.mxu1 %v13175_v0 }
0x433d   :  { %6786 = vrot.lane.b32.xlu1 %v14112_v36, %s13178_s3 }
0x4341   :  { %11924 = vmatmul.mubr.msk.bf16.vlgmr.msra.gmra.mrb[152].mxu0 %vm695_vm1, %v14112_v36 }
0x4342   :  { %11935 = vmatprep.mubr.msk.bf16.mxu0 %vm13176_vm0, %v13175_v0 }
0x43ab   :  { %v6790_v4 = vpop.permute.xlu1 %6789 }
0x43ac   :  { %v6795_v6 = vsel %vm695_vm1, %v6790_v4, 0 }
0x43ad   :  { %11934 = vmatpush3.bf16.xpose.msra.mxu0 %v6795_v6 }
0x43ae   :  { %11945 = vmatprep.subr.bf16.mxu0 %v13175_v0 }
0x43af   :  { %v6787_v44 = vpop.permute.xlu1 %6786 }
0x43b4   :  { %11936 = vmatmul.mubr.msk.bf16.vlgmr.msra.gmra.mrb[156].mxu0 %vm695_vm1, %v6787_v44 }
0x43b5   :  { %11949 = vmatprep.mubr.msk.bf16.mxu0 %vm13176_vm0, %v13175_v0  ;;  %11946 = vmatpush3.bf16.msra.mxu0 %v12633_v12 }
0x43b6   :  { %11947 = vmatprep.subr.bf16.mxu0 %v13175_v0 }
0x43b9   :  { %11948 = vmatpush3.bf16.msra.mxu0 %v12634_v35 }
0x43ba   :  { %11961 = vmatprep.subr.bf16.mxu0 %v13175_v0 }
0x4414   :  { %v6703_v40 = vpop.f32.mrb[152].mxu0 }
0x4415   :  { %v6710_v46 = vsel %vm13332_vm2, %v6703_v40, -1e+30  ;;  %v11925_v59 = vpop.f32.mrb[153].mxu0  ;;  %v12631_v40 = vld [vmem:[#allocation6 + $0x98] ss:$180 sps:$4 sm:$0xff]  }
0x4416   :  { %v6712_v41 = vsel %vm745_vm3, %v6710_v46, -inf  ;;  %v6706_v27 = vpop.f32.mrb[154].mxu0  ;;  %v12632_v59 = vld [vmem:[#allocation6 + $0x200] ss:$180 sps:$4 sm:$0xff]  }
0x4417   :  { %v6711_v31 = vsel %vm13336_vm4, %v6706_v27, -1e+30  ;;  %6713 = vmax.xlane.f32.xlu1 %v6712_v41  ;;  %v11926_v34 = vpop.f32.mrb[155].mxu0 }
0x4418   :  { %v6715_v55 = vsel %vm745_vm3, %v6711_v31, -inf }
0x4419   :  { %6716 = vmax.xlane.f32.xlu0 %v6715_v55 }
0x4428   :  { %7030 = vrot.lane.b32.xlu1 %v14126_v25, %s13179_s25 }
0x442c   :  { %7028 = vrot.lane.b32.xlu1 %v14112_v36, %s13179_s25 }
0x4487   :  { %v6831_v56 = vpop.f32.mrb[156].mxu0 }
0x4488   :  { %v6838_v15 = vsel %vm13332_vm2, %v6831_v56, -1e+30  ;;  %v11937_v22 = vpop.f32.mrb[157].mxu0 }
0x4489   :  { %v6840_v37 = vsel %vm745_vm3, %v6838_v15, -inf  ;;  %v6834_v3 = vpop.f32.mrb[158].mxu0 }
0x448a   :  { %v6839_v1 = vsel %vm13336_vm4, %v6834_v3, -1e+30  ;;  %6841 = vmax.xlane.f32.xlu0 %v6840_v37  ;;  %v11938_v51 = vpop.f32.mrb[159].mxu0 }
0x448b   :  { %v6843_v61 = vsel %vm745_vm3, %v6839_v1, -inf }
0x448e   :  { %6844 = vmax.xlane.f32.xlu0 %v6843_v61 }
0x44a4   :  { %v6714_v62 = vpop.xlane.xlu1 %6713 }
0x44a5   :  { %v6718_v17 = vsub.f32 %v6710_v46, %v6714_v62 }
0x44a6   :  { %v6717_v52 = vpop.xlane.xlu0 %6716 }
0x44a7   :  { %v6720_v2 = vmul.f32 1.442695, %v6718_v17  ;;  %v6719_v7 = vsub.f32 %v6711_v31, %v6717_v52 }
0x44a8   :  { %v7031_v22 = vpop.permute.xlu1 %7030 }
0x44a9   :  { %12935 = vpow2.f32 %v6720_v2  ;;  %v6722_v60 = vmul.f32 1.442695, %v6719_v7  ;;  %v7036_v51 = vsel %vm695_vm1, %v7031_v22, 0 }
0x44ab   :  { %12937 = vpow2.f32 %v6722_v60 }
0x44ac   :  { %v7029_v61 = vpop.permute.xlu1 %7028 }
0x44b3   :  { %v12936_v48 = vpop.eup %12935 }
0x44b4   :  { %v6724_v49 = vsel %vm745_vm3, %v12936_v48, 0.0 }
0x44b5   :  { %v12938_v53 = vpop.eup %12937  ;;  %6725 = vadd.xlane.f32.xlu0 %v6724_v49 }
0x44b6   :  { %v6727_v11 = vsel %vm745_vm3, %v12938_v53, 0.0 }
0x44b9   :  { %6728 = vadd.xlane.f32.xlu0 %v6727_v11 }
0x4517   :  { %v6842_v13 = vpop.xlane.xlu0 %6841 }
0x4518   :  { %v6846_v16 = vsub.f32 %v6838_v15, %v6842_v13 }
0x451a   :  { %v6848_v14 = vmul.f32 1.442695, %v6846_v16 }
0x451b   :  { %v6845_v50 = vpop.xlane.xlu0 %6844 }
0x451c   :  { %12939 = vpow2.f32 %v6848_v14  ;;  %v6847_v54 = vsub.f32 %v6839_v1, %v6845_v50 }
0x451e   :  { %v6850_v21 = vmul.f32 1.442695, %v6847_v54 }
0x4520   :  { %12941 = vpow2.f32 %v6850_v21 }
0x4526   :  { %v12940_v18 = vpop.eup %12939 }
0x4527   :  { %v6852_v19 = vsel %vm745_vm3, %v12940_v18, 0.0 }
0x4528   :  { %6853 = vadd.xlane.f32.xlu0 %v6852_v19 }
0x452a   :  { %v12942_v42 = vpop.eup %12941 }
0x452b   :  { %v6855_v20 = vsel %vm745_vm3, %v12942_v42, 0.0 }
0x452c   :  { %6856 = vadd.xlane.f32.xlu0 %v6855_v20 }
0x4542   :  { %6864 = vrot.lane.b32.xlu0 %v14128_v43, %s13178_s3  ;;  %v6726_v23 = vpop.xlane.xlu0 %6725 }
0x4543   :  { %12943 = vrcp.f32 %v6726_v23 }
0x4546   :  { %v6729_v39 = vpop.xlane.xlu0 %6728 }
0x4547   :  { %12945 = vrcp.f32 %v6729_v39 }
0x454d   :  { %v12944_v10 = vpop.eup %12943 }
0x454e   :  { %v6732_v26 = vmul.f32 %v12944_v10, %v12936_v48 }
0x4551   :  { %v12946_v30 = vpop.eup %12945 }
0x4552   :  { %v6733_v32 = vmul.f32 %v12946_v30, %v12938_v53 }
0x4554   :  { %v6734_v33 = vpack.c.bf16 %v6733_v32, %v6732_v26 }
0x4556   :  { %11930 = vmatmul.mubr.msk.bf16.vlgmr.msra.gmra.mrb[168].mxu1 %vm745_vm3, %v6734_v33 }
0x4557   :  { %11941 = vmatprep.mubr.msk.bf16.mxu1 %vm13176_vm0, %v13175_v0 }
0x45b5   :  { %v6854_v63 = vpop.xlane.xlu0 %6853 }
0x45b6   :  { %12947 = vrcp.f32 %v6854_v63 }
0x45b9   :  { %v6857_v57 = vpop.xlane.xlu0 %6856 }
0x45ba   :  { %12949 = vrcp.f32 %v6857_v57 }
0x45bd   :  { %v6865_v38 = vpop.permute.xlu0 %6864 }
0x45be   :  { %11940 = vmatpush3.bf16.msra.mxu1 %v6865_v38 }
0x45bf   :  { %11953 = vmatprep.subr.bf16.mxu1 %v13175_v0 }
0x45c0   :  { %v12948_v5 = vpop.eup %12947 }
0x45c1   :  { %v6860_v6 = vmul.f32 %v12948_v5, %v12940_v18 }
0x45c4   :  { %v12950_v4 = vpop.eup %12949 }
0x45c5   :  { %v6861_v44 = vmul.f32 %v12950_v4, %v12942_v42 }
0x45c7   :  { %v6862_v46 = vpack.c.bf16 %v6861_v44, %v6860_v6 }
0x45c9   :  { %11942 = vmatmul.mubr.msk.bf16.vlgmr.msra.gmra.mrb[172].mxu1 %vm745_vm3, %v6862_v46 }
0x45ca   :  { %11954 = vmatpush3.bf16.msra.mxu1 %v12631_v40  ;;  %11957 = vmatprep.mubr.msk.bf16.mxu1 %vm13176_vm0, %v13175_v0 }
0x45cb   :  { %11955 = vmatprep.subr.bf16.mxu1 %v13175_v0 }
0x45ce   :  { %11956 = vmatpush3.bf16.msra.mxu1 %v12632_v59  ;;  %v12636_v59 = vld [vmem:[#allocation6 + $0x7a0] ss:$180 sps:$4 sm:$0xff]  }
0x45cf   :  { %11967 = vmatprep.subr.bf16.mxu1 %v13175_v0 }
0x4629   :  { %v6773_v41 = vpop.f32.mrb[168].mxu1 }
0x462a   :  { %v11931_v27 = vpop.f32.mrb[169].mxu1 }
0x462b   :  { %v6776_v31 = vpop.f32.mrb[170].mxu1 }
0x462c   :  { %v6784_v34 = vpack.c.bf16 %v6776_v31, %v6773_v41  ;;  %v11932_v55 = vpop.f32.mrb[171].mxu1 }
0x462e   :  { %11958 = vmatmul.mubr.msk.bf16.vlgmr.msra.gmra.mrb[176].mxu1 %vm695_vm1, %v6784_v34 }
0x462f   :  { %11969 = vmatprep.mubr.msk.bf16.mxu1 %vm13176_vm0, %v13175_v0 }
0x469c   :  { %v6904_v56 = vpop.f32.mrb[172].mxu1 }
0x469d   :  { %v11943_v15 = vpop.f32.mrb[173].mxu1 }
0x469e   :  { %v6907_v37 = vpop.f32.mrb[174].mxu1 }
0x469f   :  { %v6915_v3 = vpack.c.bf16 %v6907_v37, %v6904_v56  ;;  %v11944_v1 = vpop.f32.mrb[175].mxu1 }
0x46a1   :  { %11950 = vmatmul.mubr.msk.bf16.vlgmr.msra.gmra.mrb[160].mxu0 %vm695_vm1, %v6915_v3 }
0x46a2   :  { %11962 = vmatpush3.bf16.xpose.msra.mxu0 %v7036_v51  ;;  %11963 = vmatprep.mubr.msk.bf16.mxu0 %vm13176_vm0, %v13175_v0 }
0x46a3   :  { %11973 = vmatprep.subr.bf16.mxu0 %v13175_v0 }
0x46a9   :  { %11964 = vmatmul.mubr.msk.bf16.vlgmr.msra.gmra.mrb[164].mxu0 %vm695_vm1, %v7029_v61 }
0x46aa   :  { %11977 = vmatprep.mubr.msk.bf16.mxu0 %vm13176_vm0, %v13175_v0 }
0x4701   :  { %v7021_v62 = vpop.f32.mrb[176].mxu1 }
0x4702   :  { %v11959_v17 = vpop.f32.mrb[177].mxu1 }
0x4703   :  { %v7024_v52 = vpop.f32.mrb[178].mxu1 }
0x4704   :  { %v11960_v2 = vpop.f32.mrb[179].mxu1 }
0x4774   :  { %v6965_v7 = vpop.f32.mrb[160].mxu0 }
0x4775   :  { %v14192_v60 = vadd.f32 %v7021_v62, %v6965_v7  ;;  %v11951_v48 = vpop.f32.mrb[161].mxu0 }
0x4776   :  { %v6968_v49 = vpop.f32.mrb[162].mxu0 }
0x4777   :  { %v14194_v53 = vadd.f32 %v7024_v52, %v6968_v49  ;;  %v11952_v11 = vpop.f32.mrb[163].mxu0 }
0x477c   :  { %v7072_v13 = vpop.f32.mrb[164].mxu0 }
0x477d   :  { %v7079_v16 = vsel %vm13332_vm2, %v7072_v13, -1e+30  ;;  %v11965_v14 = vpop.f32.mrb[165].mxu0 }
0x477e   :  { %v7081_v50 = vsel %vm745_vm3, %v7079_v16, -inf  ;;  %v7075_v54 = vpop.f32.mrb[166].mxu0 }
0x477f   :  { %v7080_v21 = vsel %vm13336_vm4, %v7075_v54, -1e+30  ;;  %7082 = vmax.xlane.f32.xlu0 %v7081_v50  ;;  %v11966_v18 = vpop.f32.mrb[167].mxu0  ;;  %v12637_v50 = vld [vmem:[#allocation6 + $0x908] ss:$180 sps:$4 sm:$0xff]  }
0x4780   :  { %v7084_v19 = vsel %vm745_vm3, %v7080_v21, -inf }
0x4781   :  { %7085 = vmax.xlane.f32.xlu1 %v7084_v19 }
0x4792   :  { %7216 = vrot.lane.b32.xlu1 %v14126_v25, %s13180_s26 }
0x4796   :  { %7214 = vrot.lane.b32.xlu1 %v14112_v36, %s13180_s26  ;;  %v12635_v36 = vld [vmem:[#allocation6 + $0x638] ss:$180 sps:$4 sm:$0xff]  }
0x4797   :  { %11974 = vmatpush3.bf16.msra.mxu0 %v12635_v36  ;;  %v12643_v36 = vld [vmem:[#allocation6 + $0x1dc] ss:$180 sps:$4 sm:$0xff]  }
0x4798   :  { %11975 = vmatprep.subr.bf16.mxu0 %v13175_v0 }
0x479b   :  { %11976 = vmatpush3.bf16.msra.mxu0 %v12636_v59  ;;  %v12642_v59 = vld [vmem:[#allocation6 + $0x7c] ss:$180 sps:$4 sm:$0xff]  }
0x479c   :  { %11987 = vmatprep.subr.bf16.mxu0 %v13175_v0 }
0x480c   :  { %v7083_v42 = vpop.xlane.xlu0 %7082 }
0x480d   :  { %v7087_v20 = vsub.f32 %v7079_v16, %v7083_v42 }
0x480e   :  { %v7086_v23 = vpop.xlane.xlu1 %7085 }
0x480f   :  { %v7089_v39 = vmul.f32 1.442695, %v7087_v20  ;;  %v7088_v10 = vsub.f32 %v7080_v21, %v7086_v23 }
0x4811   :  { %12951 = vpow2.f32 %v7089_v39  ;;  %v7091_v30 = vmul.f32 1.442695, %v7088_v10 }
0x4812   :  { %v7217_v6 = vpop.permute.xlu1 %7216 }
0x4813   :  { %12953 = vpow2.f32 %v7091_v30  ;;  %v7222_v40 = vsel %vm695_vm1, %v7217_v6, 0  ;;  %v12659_v6 = vld [vmem:[#allocation6 + $0x77c] ss:$180 sps:$4 sm:$0xff]  }
0x4816   :  { %v7215_v46 = vpop.permute.xlu1 %7214 }
0x481b   :  { %v12952_v26 = vpop.eup %12951 }
0x481c   :  { %v7093_v32 = vsel %vm745_vm3, %v12952_v26, 0.0 }
0x481d   :  { %v12954_v33 = vpop.eup %12953  ;;  %7094 = vadd.xlane.f32.xlu0 %v7093_v32 }
0x481e   :  { %v7096_v12 = vsel %vm745_vm3, %v12954_v33, 0.0 }
0x4821   :  { %7097 = vadd.xlane.f32.xlu0 %v7096_v12  ;;  %v12645_v12 = vld [vmem:[#allocation6 + $0x1e0] ss:$180 sps:$4 sm:$0xff]  }
0x4837   :  { %7104 = vrot.lane.b32.xlu0 %v14128_v43, %s13179_s25 }
0x48aa   :  { %v7095_v25 = vpop.xlane.xlu0 %7094 }
0x48ab   :  { %12955 = vrcp.f32 %v7095_v25  ;;  %v12649_v25 = vld [vmem:[#allocation6 + $0x348] ss:$180 sps:$4 sm:$0xff]  }
0x48ae   :  { %v7098_v35 = vpop.xlane.xlu0 %7097 }
0x48af   :  { %12957 = vrcp.f32 %v7098_v35  ;;  %v12647_v35 = vld [vmem:[#allocation6 + $0x344] ss:$180 sps:$4 sm:$0xff]  }
0x48b2   :  { %v7105_v63 = vpop.permute.xlu0 %7104 }
0x48b3   :  { %11968 = vmatpush3.bf16.msra.mxu1 %v7105_v63  ;;  %v12653_v63 = vld [vmem:[#allocation6 + $0x4b0] ss:$180 sps:$4 sm:$0xff]  }
0x48b4   :  { %11981 = vmatprep.subr.bf16.mxu1 %v13175_v0 }
0x48b5   :  { %v12956_v57 = vpop.eup %12955 }
0x48b6   :  { %v7101_v5 = vmul.f32 %v12956_v57, %v12952_v26  ;;  %v12651_v57 = vld [vmem:[#allocation6 + $0x4ac] ss:$180 sps:$4 sm:$0xff]  }
0x48b9   :  { %v12958_v38 = vpop.eup %12957 }
0x48ba   :  { %v7102_v4 = vmul.f32 %v12958_v38, %v12954_v33  ;;  %v12641_v33 = vld [vmem:[#allocation6 + $0x78] ss:$180 sps:$4 sm:$0xff]  }
0x48bb   :  { %v12657_v38 = vld [vmem:[#allocation6 + $0x618] ss:$180 sps:$4 sm:$0xff]  }
0x48bc   :  { %v7103_v44 = vpack.c.bf16 %v7102_v4, %v7101_v5  ;;  %v12655_v5 = vld [vmem:[#allocation6 + $0x614] ss:$180 sps:$4 sm:$0xff]  }
0x48bd   :  { %v12661_v4 = vld [vmem:[#allocation6 + $0x780] ss:$180 sps:$4 sm:$0xff]  }
0x48be   :  { %11970 = vmatmul.mubr.msk.bf16.vlgmr.msra.gmra.mrb[180].mxu1 %vm745_vm3, %v7103_v44 }
0x48bf   :  { %11982 = vmatpush3.bf16.xpose.msra.mxu1 %v7222_v40  ;;  %11983 = vmatprep.mubr.msk.bf16.mxu1 %vm13176_vm0, %v13175_v0 }
0x48c0   :  { %11993 = vmatprep.subr.bf16.mxu1 %v13175_v0 }
0x48c6   :  { %11984 = vmatmul.mubr.msk.bf16.vlgmr.msra.gmra.mrb[184].mxu1 %vm695_vm1, %v7215_v46 }
0x48c7   :  { %11997 = vmatprep.mubr.msk.bf16.mxu1 %vm13176_vm0, %v13175_v0  ;;  %11994 = vmatpush3.bf16.msra.mxu1 %v12637_v50 }
0x48c8   :  { %11995 = vmatprep.subr.bf16.mxu1 %v13175_v0 }
0x4991   :  { %v7144_v41 = vpop.f32.mrb[180].mxu1 }
0x4992   :  { %v11971_v27 = vpop.f32.mrb[181].mxu1 }
0x4993   :  { %v7147_v31 = vpop.f32.mrb[182].mxu1 }
0x4994   :  { %v7155_v34 = vpack.c.bf16 %v7147_v31, %v7144_v41  ;;  %v11972_v55 = vpop.f32.mrb[183].mxu1  ;;  %v12646_v31 = vld [vmem:[#allocation6 + $0x1e4] ss:$180 sps:$4 sm:$0xff]  }
0x4995   :  { %v12654_v55 = vld [vmem:[#allocation6 + $0x4b4] ss:$180 sps:$4 sm:$0xff]  }
0x4996   :  { %11978 = vmatmul.mubr.msk.bf16.vlgmr.msra.gmra.mrb[168].mxu0 %vm695_vm1, %v7155_v34  ;;  %v12650_v34 = vld [vmem:[#allocation6 + $0x34c] ss:$180 sps:$4 sm:$0xff]  }
0x4997   :  { %11989 = vmatprep.mubr.msk.bf16.mxu0 %vm13176_vm0, %v13175_v0 }
0x4999   :  { %v7258_v56 = vpop.f32.mrb[184].mxu1 }
0x499a   :  { %v7265_v15 = vsel %vm13332_vm2, %v7258_v56, -1e+30  ;;  %v11985_v22 = vpop.f32.mrb[185].mxu1  ;;  %v12658_v56 = vld [vmem:[#allocation6 + $0x61c] ss:$180 sps:$4 sm:$0xff]  }
0x499b   :  { %v7267_v37 = vsel %vm745_vm3, %v7265_v15, -inf  ;;  %v7261_v3 = vpop.f32.mrb[186].mxu1  ;;  %v12665_v22 = vld [vmem:[#allocation6 + $0x8e8] ss:$180 sps:$4 sm:$0xff]  }
0x499c   :  { %v7266_v1 = vsel %vm13336_vm4, %v7261_v3, -1e+30  ;;  %7268 = vmax.xlane.f32.xlu1 %v7267_v37  ;;  %v11986_v51 = vpop.f32.mrb[187].mxu1  ;;  %v12663_v37 = vld [vmem:[#allocation6 + $0x8e4] ss:$180 sps:$4 sm:$0xff]  }
0x499d   :  { %v7270_v61 = vsel %vm745_vm3, %v7266_v1, -inf  ;;  %v12666_v3 = vld [vmem:[#allocation6 + $0x8ec] ss:$180 sps:$4 sm:$0xff]  }
0x499e   :  { %7271 = vmax.xlane.f32.xlu0 %v7270_v61  ;;  %v12667_v51 = vld [vmem:[#allocation6 + $0xa4c] ss:$180 sps:$4 sm:$0xff]   ;;  %v12670_v61 = vld [vmem:[#allocation6 + $0xa54] ss:$180 sps:$4 sm:$0xff]  }
0x49ad   :  { %7290 = vrot.lane.b32.xlu1 %v14128_v43, %s13180_s26 }
0x4a29   :  { %v7269_v62 = vpop.xlane.xlu1 %7268 }
0x4a2a   :  { %v7273_v17 = vsub.f32 %v7265_v15, %v7269_v62  ;;  %v12662_v15 = vld [vmem:[#allocation6 + $0x784] ss:$180 sps:$4 sm:$0xff]  }
0x4a2b   :  { %v7272_v52 = vpop.xlane.xlu0 %7271 }
0x4a2c   :  { %v7275_v2 = vmul.f32 1.442695, %v7273_v17  ;;  %v7274_v7 = vsub.f32 %v7266_v1, %v7272_v52  ;;  %v12669_v1 = vld [vmem:[#allocation6 + $0xa50] ss:$180 sps:$4 sm:$0xff]  }
0x4a2d   :  { %v7291_v48 = vpop.permute.xlu1 %7290  ;;  %v10659_v17 = vld [vmem:[#allocation7 + $0x44] ss:$0 sm:$0xff] }
0x4a2e   :  { %12959 = vpow2.f32 %v7275_v2  ;;  %v7277_v49 = vmul.f32 1.442695, %v7274_v7  ;;  %11988 = vmatpush3.bf16.msra.mxu0 %v7291_v48 }
0x4a2f   :  { %7570 = vmatprep.subr.bf16.mxu0 %v12641_v33 }
0x4a30   :  { %12961 = vpow2.f32 %v7277_v49 }
0x4a38   :  { %v12960_v11 = vpop.eup %12959 }
0x4a39   :  { %v7279_v13 = vsel %vm745_vm3, %v12960_v11, 0.0 }
0x4a3a   :  { %v12962_v16 = vpop.eup %12961  ;;  %7280 = vadd.xlane.f32.xlu0 %v7279_v13 }
0x4a3b   :  { %v7282_v14 = vsel %vm745_vm3, %v12962_v16, 0.0 }
0x4a3e   :  { %7283 = vadd.xlane.f32.xlu0 %v7282_v14 }
0x4a69   :  { %v7205_v43 = vpop.f32.mrb[168].mxu0 }
0x4a6a   :  { %v14236_v54 = vadd.f32 %v7205_v43, %v14192_v60  ;;  %v11979_v21 = vpop.f32.mrb[169].mxu0  ;;  %v12638_v60 = vld [vmem:[#allocation6 + $0xa70] ss:$180 sps:$4 sm:$0xff]  }
0x4a6b   :  { %v7208_v18 = vpop.f32.mrb[170].mxu0  ;;  %11996 = vmatpush3.bf16.msra.mxu1 %v12638_v60 }
0x4a6c   :  { %v14239_v19 = vadd.f32 %v7208_v18, %v14194_v53  ;;  %v11980_v42 = vpop.f32.mrb[171].mxu0  ;;  %12001 = vmatprep.subr.bf16.mxu1 %v13175_v0  ;;  %v12639_v53 = vld [vmem:[#allocation6 + $0x74] ss:$180 sps:$4 sm:$0xff]   ;;  %v10686_v18 = vld [vmem:[#allocation7 + $0x39] ss:$0 sm:$0xff] }
0x4ac7   :  { %v7281_v20 = vpop.xlane.xlu0 %7280 }
0x4ac8   :  { %12963 = vrcp.f32 %v7281_v20 }
0x4acb   :  { %v7284_v23 = vpop.xlane.xlu0 %7283 }
0x4acc   :  { %12965 = vrcp.f32 %v7284_v23 }
0x4ad2   :  { %v12964_v39 = vpop.eup %12963 }
0x4ad3   :  { %v7287_v30 = vmul.f32 %v12964_v39, %v12960_v11 }
0x4ad6   :  { %v12966_v10 = vpop.eup %12965 }
0x4ad7   :  { %v7288_v26 = vmul.f32 %v12966_v10, %v12962_v16 }
0x4ad9   :  { %v7289_v32 = vpack.c.bf16 %v7288_v26, %v7287_v30 }
0x4adb   :  { %11990 = vmatmul.mubr.msk.bf16.vlgmr.msra.gmra.mrb[172].mxu0 %vm745_vm3, %v7289_v32 }
0x4adc   :  { %7602 = vmatprep.mubr.bf16.mxu0 %v13177_v58  ;;  %7571 = vmatpush1.bf16.msra.mxu0 %v12639_v53 }
0x4add   :  { %7572 = vmatprep.subr.bf16.mxu0 %v12645_v12 }
0x4ae0   :  { %7573 = vmatpush1.bf16.msra.mxu0 %v12643_v36 }
0x4ae1   :  { %7574 = vmatprep.subr.bf16.mxu0 %v12649_v25 }
0x4ae4   :  { %7575 = vmatpush1.bf16.msra.mxu0 %v12647_v35 }
0x4ae5   :  { %7576 = vmatprep.subr.bf16.mxu0 %v12653_v63 }
0x4ae8   :  { %7577 = vmatpush1.bf16.msra.mxu0 %v12651_v57 }
0x4ae9   :  { %7578 = vmatprep.subr.bf16.mxu0 %v12657_v38 }
0x4aec   :  { %7579 = vmatpush1.bf16.msra.mxu0 %v12655_v5 }
0x4aed   :  { %7580 = vmatprep.subr.bf16.mxu0 %v12661_v4 }
0x4af0   :  { %7581 = vmatpush1.bf16.msra.mxu0 %v12659_v6 }
0x4af1   :  { %7582 = vmatprep.subr.bf16.mxu0 %v12665_v22 }
0x4af4   :  { %7583 = vmatpush1.bf16.msra.mxu0 %v12663_v37 }
0x4af5   :  { %7584 = vmatprep.subr.bf16.mxu0 %v12669_v1 }
0x4af8   :  { %7585 = vmatpush1.bf16.msra.mxu0 %v12667_v51 }
0x4af9   :  { %12021 = vmatprep.subr.bf16.mxu0 %v13175_v0 }
0x4bae   :  { %v7330_v44 = vpop.f32.mrb[172].mxu0 }
0x4baf   :  { %v11991_v40 = vpop.f32.mrb[173].mxu0 }
0x4bb0   :  { %v7333_v46 = vpop.f32.mrb[174].mxu0 }
0x4bb1   :  { %v7341_v41 = vpack.c.bf16 %v7333_v46, %v7330_v44  ;;  %v11992_v27 = vpop.f32.mrb[175].mxu0 }
0x4bb3   :  { %11998 = vmatmul.mubr.msk.bf16.vlgmr.msra.gmra.mrb[188].mxu1 %vm695_vm1, %v7341_v41 }
0x4bb4   :  { %12002 = vmatpush3.bf16.msra.mxu1 %v12642_v59  ;;  %12017 = vmatprep.mubr.msk.bf16.mxu1 %vm13176_vm0, %v13175_v0 }
0x4bb5   :  { %12003 = vmatprep.subr.bf16.mxu1 %v13175_v0 }
0x4bb8   :  { %12004 = vmatpush3.bf16.msra.mxu1 %v12646_v31 }
0x4bb9   :  { %12005 = vmatprep.subr.bf16.mxu1 %v13175_v0 }
0x4bbc   :  { %12006 = vmatpush3.bf16.msra.mxu1 %v12650_v34 }
0x4bbd   :  { %12007 = vmatprep.subr.bf16.mxu1 %v13175_v0 }
0x4bc0   :  { %12008 = vmatpush3.bf16.msra.mxu1 %v12654_v55 }
0x4bc1   :  { %12009 = vmatprep.subr.bf16.mxu1 %v13175_v0 }
0x4bc4   :  { %12010 = vmatpush3.bf16.msra.mxu1 %v12658_v56 }
0x4bc5   :  { %12011 = vmatprep.subr.bf16.mxu1 %v13175_v0 }
0x4bc8   :  { %12012 = vmatpush3.bf16.msra.mxu1 %v12662_v15 }
0x4bc9   :  { %12013 = vmatprep.subr.bf16.mxu1 %v13175_v0 }
0x4bcc   :  { %12014 = vmatpush3.bf16.msra.mxu1 %v12666_v3 }
0x4bcd   :  { %12015 = vmatprep.subr.bf16.mxu1 %v13175_v0 }
0x4bd0   :  { %12016 = vmatpush3.bf16.msra.mxu1 %v12670_v61 }
0x4bd1   :  { %12027 = vmatprep.subr.bf16.mxu1 %v13175_v0 }
0x4c86   :  { %v7391_v62 = vpop.f32.mrb[188].mxu1 }
0x4c87   :  { %v7398_v52 = vadd.f32 %v7391_v62, %v14236_v54  ;;  %v11999_v2 = vpop.f32.mrb[189].mxu1  ;;  %v10684_v54 = vld [vmem:[#allocation7 + $0x37] ss:$0 sm:$0xff] }
0x4c88   :  { %v7394_v7 = vpop.f32.mrb[190].mxu1 }
0x4c89   :  { %v7405_v48 = vadd.f32 %v10659_v17, %v7398_v52  ;;  %v7399_v49 = vadd.f32 %v7394_v7, %v14239_v19  ;;  %v12000_v11 = vpop.f32.mrb[191].mxu1  ;;  %v10685_v19 = vld [vmem:[#allocation7 + $0x38] ss:$0 sm:$0xff] }
0x4c8b   :  { %v7406_v13 = vadd.f32 %v10659_v17, %v7399_v49  ;;  %v14259_v16 = vadd.f32 %v7405_v48, %v13805_v8 }
0x4c8d   :  { %v14262_v14 = vadd.f32 %v7406_v13, %v13807_v9 }
0x4c8f   :  { %v7441_v50 = vpack.c.bf16 %v14262_v14, %v14259_v16 }
0x4c91   :  { %7603 = vmatmul.mubr.bf16.vlgmr.msra.gmra.mrb[176].mxu0 %v7441_v50  ;;  %12018 = vmatmul.mubr.bf16.vlgmr.msra.gmra.mrb[192].mxu1 %v7441_v50 }
0x4c92   :  { %12023 = vmatprep.mubr.msk.bf16.mxu0 %vm13176_vm0, %v13175_v0  ;;  %12029 = vmatprep.mubr.msk.bf16.mxu1 %vm13176_vm0, %v13175_v0 }
0x4d64   :  { %v7604_v43 = vpop.f32.mrb[176].mxu0  ;;  %v7647_v21 = vpop.f32.mrb[192].mxu1 }
0x4d65   :  { %v7606_v8 = vpop.f32.mrb[177].mxu0  ;;  %v12019_v42 = vpop.f32.mrb[193].mxu1  ;;  %v7659_v23 = vadd.f32 %v10684_v54, %v7604_v43  ;;  %v7673_v39 = vadd.f32 %v10686_v18, %v7647_v21 }
0x4d66   :  { %v7608_v9 = vpop.f32.mrb[178].mxu0  ;;  %v7650_v20 = vpop.f32.mrb[194].mxu1  ;;  %v7666_v60 = vadd.f32 %v10685_v19, %v7606_v8 }
0x4d67   :  { %v7660_v10 = vadd.f32 %v10684_v54, %v7608_v9  ;;  %v7674_v30 = vadd.f32 %v10686_v18, %v7650_v20  ;;  %v7610_v26 = vpop.f32.mrb[179].mxu0  ;;  %v12020_v32 = vpop.f32.mrb[195].mxu1 }
0x4d68   :  { %v7667_v53 = vadd.f32 %v10685_v19, %v7610_v26  ;;  %v12674_v26 = vld [vmem:[#allocation6 + $0x4b8] ss:$180 sps:$4 sm:$0xff]  }
0x4d69   :  { %v14270_v33 = vpack.c.bf16 %v7660_v10, %v7659_v23  ;;  %v14272_v12 = vpack.c.bf16 %v7674_v30, %v7673_v39  ;;  %v12673_v30 = vld [vmem:[#allocation6 + $0x350] ss:$180 sps:$4 sm:$0xff]  }
0x4d6a   :  { %v14274_v36 = vpack.c.bf16 %v7667_v53, %v7666_v60 }
0x4d6b   :  { %12028 = vmatpush3.bf16.msra.mxu1 %v14272_v12  ;;  %7800 = vrot.lane.b32.xlu1 %v14270_v33, %s13178_s3 }
0x4d6c   :  { %7803 = vrot.lane.b32.xlu0 %v14274_v36, %s13178_s3  ;;  %v7681_v25 = vsel %vm695_vm1, %v14274_v36, 0  ;;  %12039 = vmatprep.subr.bf16.mxu1 %v13175_v0 }
0x4d6d   :  { %12022 = vmatpush3.bf16.xpose.msra.mxu0 %v7681_v25 }
0x4d6e   :  { %12033 = vmatprep.subr.bf16.mxu0 %v13175_v0 }
0x4d74   :  { %12024 = vmatmul.mubr.msk.bf16.vlgmr.msra.gmra.mrb[180].mxu0 %vm695_vm1, %v14270_v33 }
0x4d75   :  { %12035 = vmatprep.mubr.msk.bf16.mxu0 %vm13176_vm0, %v13175_v0 }
0x4ddd   :  { %v7801_v57 = vpop.permute.xlu1 %7800 }
0x4dde   :  { %v7804_v35 = vpop.permute.xlu0 %7803 }
0x4ddf   :  { %v7809_v63 = vsel %vm695_vm1, %v7804_v35, 0 }
0x4de0   :  { %12034 = vmatpush3.bf16.xpose.msra.mxu0 %v7809_v63 }
0x4de1   :  { %12045 = vmatprep.subr.bf16.mxu0 %v13175_v0 }
0x4de7   :  { %12036 = vmatmul.mubr.msk.bf16.vlgmr.msra.gmra.mrb[184].mxu0 %vm695_vm1, %v7801_v57 }
0x4de8   :  { %12049 = vmatprep.mubr.msk.bf16.mxu0 %vm13176_vm0, %v13175_v0  ;;  %12046 = vmatpush3.bf16.msra.mxu0 %v12673_v30 }
0x4de9   :  { %12047 = vmatprep.subr.bf16.mxu0 %v13175_v0 }
0x4dec   :  { %12048 = vmatpush3.bf16.msra.mxu0 %v12674_v26 }
0x4ded   :  { %12061 = vmatprep.subr.bf16.mxu0 %v13175_v0 }
0x4e47   :  { %v7717_v38 = vpop.f32.mrb[180].mxu0 }
0x4e48   :  { %v7724_v5 = vsel %vm13332_vm2, %v7717_v38, -1e+30  ;;  %v12025_v4 = vpop.f32.mrb[181].mxu0  ;;  %v12671_v38 = vld [vmem:[#allocation6 + $0x80] ss:$180 sps:$4 sm:$0xff]  }
0x4e49   :  { %v7726_v6 = vsel %vm745_vm3, %v7724_v5, -inf  ;;  %v7720_v44 = vpop.f32.mrb[182].mxu0  ;;  %v12672_v4 = vld [vmem:[#allocation6 + $0x1e8] ss:$180 sps:$4 sm:$0xff]  }
0x4e4a   :  { %v7725_v40 = vsel %vm13336_vm4, %v7720_v44, -1e+30  ;;  %7727 = vmax.xlane.f32.xlu1 %v7726_v6  ;;  %v12026_v46 = vpop.f32.mrb[183].mxu0 }
0x4e4b   :  { %v7729_v59 = vsel %vm745_vm3, %v7725_v40, -inf }
0x4e4c   :  { %7730 = vmax.xlane.f32.xlu0 %v7729_v59 }
0x4eba   :  { %v7845_v41 = vpop.f32.mrb[184].mxu0 }
0x4ebb   :  { %v7852_v27 = vsel %vm13332_vm2, %v7845_v41, -1e+30  ;;  %v12037_v31 = vpop.f32.mrb[185].mxu0 }
0x4ebc   :  { %v7854_v34 = vsel %vm745_vm3, %v7852_v27, -inf  ;;  %v7848_v55 = vpop.f32.mrb[186].mxu0 }
0x4ebd   :  { %v7853_v56 = vsel %vm13336_vm4, %v7848_v55, -1e+30  ;;  %7855 = vmax.xlane.f32.xlu0 %v7854_v34  ;;  %v12038_v15 = vpop.f32.mrb[187].mxu0 }
0x4ebe   :  { %v7857_v22 = vsel %vm745_vm3, %v7853_v56, -inf }
0x4ebf   :  { %7858 = vmax.xlane.f32.xlu1 %v7857_v22 }
0x4ed7   :  { %v7728_v37 = vpop.xlane.xlu1 %7727 }
0x4ed8   :  { %v7732_v3 = vsub.f32 %v7724_v5, %v7728_v37 }
0x4ed9   :  { %v7731_v1 = vpop.xlane.xlu0 %7730 }
0x4eda   :  { %v7734_v51 = vmul.f32 1.442695, %v7732_v3  ;;  %v7733_v61 = vsub.f32 %v7725_v40, %v7731_v1 }
0x4edc   :  { %12967 = vpow2.f32 %v7734_v51  ;;  %v7736_v62 = vmul.f32 1.442695, %v7733_v61 }
0x4ede   :  { %12969 = vpow2.f32 %v7736_v62 }
0x4ee6   :  { %v12968_v17 = vpop.eup %12967 }
0x4ee7   :  { %v7738_v52 = vsel %vm745_vm3, %v12968_v17, 0.0 }
0x4ee8   :  { %v12970_v2 = vpop.eup %12969  ;;  %7739 = vadd.xlane.f32.xlu0 %v7738_v52 }
0x4ee9   :  { %v7741_v7 = vsel %vm745_vm3, %v12970_v2, 0.0 }
0x4eea   :  { %7742 = vadd.xlane.f32.xlu1 %v7741_v7 }
0x4f4a   :  { %v7856_v48 = vpop.xlane.xlu0 %7855 }
0x4f4b   :  { %v7860_v49 = vsub.f32 %v7852_v27, %v7856_v48 }
0x4f4c   :  { %v7859_v11 = vpop.xlane.xlu1 %7858 }
0x4f4d   :  { %v7862_v13 = vmul.f32 1.442695, %v7860_v49  ;;  %v7861_v50 = vsub.f32 %v7853_v56, %v7859_v11 }
0x4f4f   :  { %12971 = vpow2.f32 %v7862_v13  ;;  %v7864_v43 = vmul.f32 1.442695, %v7861_v50 }
0x4f51   :  { %12973 = vpow2.f32 %v7864_v43 }
0x4f59   :  { %v12972_v54 = vpop.eup %12971 }
0x4f5a   :  { %v7866_v21 = vsel %vm745_vm3, %v12972_v54, 0.0 }
0x4f5b   :  { %v12974_v18 = vpop.eup %12973  ;;  %7867 = vadd.xlane.f32.xlu0 %v7866_v21 }
0x4f5c   :  { %v7869_v8 = vsel %vm745_vm3, %v12974_v18, 0.0 }
0x4f5d   :  { %7870 = vadd.xlane.f32.xlu1 %v7869_v8 }
0x4f6e   :  { %8044 = vrot.lane.b32.xlu1 %v14274_v36, %s13179_s25 }
0x4f71   :  { %7878 = vrot.lane.b32.xlu0 %v14272_v12, %s13178_s3 }
0x4f72   :  { %8042 = vrot.lane.b32.xlu1 %v14270_v33, %s13179_s25 }
0x4f75   :  { %v7740_v19 = vpop.xlane.xlu0 %7739 }
0x4f76   :  { %12975 = vrcp.f32 %v7740_v19 }
0x4f77   :  { %v7743_v42 = vpop.xlane.xlu1 %7742 }
0x4f78   :  { %12977 = vrcp.f32 %v7743_v42 }
0x4f80   :  { %v12976_v9 = vpop.eup %12975 }
0x4f81   :  { %v7746_v23 = vmul.f32 %v12976_v9, %v12968_v17 }
0x4f82   :  { %v12978_v20 = vpop.eup %12977 }
0x4f83   :  { %v7747_v39 = vmul.f32 %v12978_v20, %v12970_v2 }
0x4f85   :  { %v7748_v10 = vpack.c.bf16 %v7747_v39, %v7746_v23 }
0x4f87   :  { %12030 = vmatmul.mubr.msk.bf16.vlgmr.msra.gmra.mrb[196].mxu1 %vm745_vm3, %v7748_v10 }
0x4f88   :  { %12041 = vmatprep.mubr.msk.bf16.mxu1 %vm13176_vm0, %v13175_v0 }
0x4fe8   :  { %v7868_v32 = vpop.xlane.xlu0 %7867 }
0x4fe9   :  { %12979 = vrcp.f32 %v7868_v32 }
0x4fea   :  { %v7871_v60 = vpop.xlane.xlu1 %7870 }
0x4feb   :  { %12981 = vrcp.f32 %v7871_v60 }
0x4fec   :  { %v7879_v53 = vpop.permute.xlu0 %7878 }
0x4fed   :  { %12040 = vmatpush3.bf16.msra.mxu1 %v7879_v53 }
0x4fee   :  { %12053 = vmatprep.subr.bf16.mxu1 %v13175_v0  ;;  %v8045_v31 = vpop.permute.xlu1 %8044 }
0x4fef   :  { %v8050_v15 = vsel %vm695_vm1, %v8045_v31, 0 }
0x4ff2   :  { %v8043_v22 = vpop.permute.xlu1 %8042 }
0x4ff3   :  { %v12980_v25 = vpop.eup %12979 }
0x4ff4   :  { %v7874_v63 = vmul.f32 %v12980_v25, %v12972_v54 }
0x4ff5   :  { %v12982_v35 = vpop.eup %12981 }
0x4ff6   :  { %v7875_v57 = vmul.f32 %v12982_v35, %v12974_v18 }
0x4ff8   :  { %v7876_v5 = vpack.c.bf16 %v7875_v57, %v7874_v63 }
0x4ffa   :  { %12042 = vmatmul.mubr.msk.bf16.vlgmr.msra.gmra.mrb[200].mxu1 %vm745_vm3, %v7876_v5 }
0x4ffb   :  { %12054 = vmatpush3.bf16.msra.mxu1 %v12671_v38  ;;  %12057 = vmatprep.mubr.msk.bf16.mxu1 %vm13176_vm0, %v13175_v0 }
0x4ffc   :  { %12055 = vmatprep.subr.bf16.mxu1 %v13175_v0 }
0x4fff   :  { %12056 = vmatpush3.bf16.msra.mxu1 %v12672_v4  ;;  %v12676_v4 = vld [vmem:[#allocation6 + $0x788] ss:$180 sps:$4 sm:$0xff]  }
0x5000   :  { %12067 = vmatprep.subr.bf16.mxu1 %v13175_v0 }
0x505a   :  { %v7787_v6 = vpop.f32.mrb[196].mxu1 }
0x505b   :  { %v12031_v44 = vpop.f32.mrb[197].mxu1 }
0x505c   :  { %v7790_v40 = vpop.f32.mrb[198].mxu1 }
0x505d   :  { %v7798_v46 = vpack.c.bf16 %v7790_v40, %v7787_v6  ;;  %v12032_v59 = vpop.f32.mrb[199].mxu1 }
0x505f   :  { %12058 = vmatmul.mubr.msk.bf16.vlgmr.msra.gmra.mrb[204].mxu1 %vm695_vm1, %v7798_v46 }
0x5060   :  { %12069 = vmatprep.mubr.msk.bf16.mxu1 %vm13176_vm0, %v13175_v0 }
0x50cd   :  { %v7918_v41 = vpop.f32.mrb[200].mxu1 }
0x50ce   :  { %v12043_v27 = vpop.f32.mrb[201].mxu1 }
0x50cf   :  { %v7921_v34 = vpop.f32.mrb[202].mxu1 }
0x50d0   :  { %v7929_v55 = vpack.c.bf16 %v7921_v34, %v7918_v41  ;;  %v12044_v56 = vpop.f32.mrb[203].mxu1 }
0x50d2   :  { %12050 = vmatmul.mubr.msk.bf16.vlgmr.msra.gmra.mrb[188].mxu0 %vm695_vm1, %v7929_v55 }
0x50d3   :  { %12062 = vmatpush3.bf16.xpose.msra.mxu0 %v8050_v15  ;;  %12063 = vmatprep.mubr.msk.bf16.mxu0 %vm13176_vm0, %v13175_v0 }
0x50d4   :  { %12073 = vmatprep.subr.bf16.mxu0 %v13175_v0 }
0x50da   :  { %12064 = vmatmul.mubr.msk.bf16.vlgmr.msra.gmra.mrb[192].mxu0 %vm695_vm1, %v8043_v22 }
0x50db   :  { %12077 = vmatprep.mubr.msk.bf16.mxu0 %vm13176_vm0, %v13175_v0 }
0x5132   :  { %v8035_v37 = vpop.f32.mrb[204].mxu1 }
0x5133   :  { %v12059_v3 = vpop.f32.mrb[205].mxu1 }
0x5134   :  { %v8038_v1 = vpop.f32.mrb[206].mxu1 }
0x5135   :  { %v12060_v51 = vpop.f32.mrb[207].mxu1 }
0x51a5   :  { %v7979_v61 = vpop.f32.mrb[188].mxu0 }
0x51a6   :  { %v14338_v62 = vadd.f32 %v8035_v37, %v7979_v61  ;;  %v12051_v17 = vpop.f32.mrb[189].mxu0 }
0x51a7   :  { %v7982_v52 = vpop.f32.mrb[190].mxu0 }
0x51a8   :  { %v14340_v2 = vadd.f32 %v8038_v1, %v7982_v52  ;;  %v12052_v7 = vpop.f32.mrb[191].mxu0 }
0x51ad   :  { %v8086_v48 = vpop.f32.mrb[192].mxu0 }
0x51ae   :  { %v8093_v49 = vsel %vm13332_vm2, %v8086_v48, -1e+30  ;;  %v12065_v11 = vpop.f32.mrb[193].mxu0 }
0x51af   :  { %v8095_v13 = vsel %vm745_vm3, %v8093_v49, -inf  ;;  %v8089_v50 = vpop.f32.mrb[194].mxu0  ;;  %v12677_v11 = vld [vmem:[#allocation6 + $0x8f0] ss:$180 sps:$4 sm:$0xff]  }
0x51b0   :  { %v8094_v43 = vsel %vm13336_vm4, %v8089_v50, -1e+30  ;;  %8096 = vmax.xlane.f32.xlu1 %v8095_v13  ;;  %v12066_v54 = vpop.f32.mrb[195].mxu0 }
0x51b1   :  { %v8098_v21 = vsel %vm745_vm3, %v8094_v43, -inf }
0x51b2   :  { %8099 = vmax.xlane.f32.xlu0 %v8098_v21 }
0x51c1   :  { %8118 = vrot.lane.b32.xlu1 %v14272_v12, %s13179_s25 }
0x51c5   :  { %8228 = vrot.lane.b32.xlu1 %v14270_v33, %s13180_s26  ;;  %v12675_v33 = vld [vmem:[#allocation6 + $0x620] ss:$180 sps:$4 sm:$0xff]  }
0x51c6   :  { %12074 = vmatpush3.bf16.msra.mxu0 %v12675_v33 }
0x51c7   :  { %12075 = vmatprep.subr.bf16.mxu0 %v13175_v0 }
0x51ca   :  { %12076 = vmatpush3.bf16.msra.mxu0 %v12676_v4 }
0x51cb   :  { %12087 = vmatprep.subr.bf16.mxu0 %v13175_v0 }
0x523d   :  { %v8097_v18 = vpop.xlane.xlu1 %8096 }
0x523e   :  { %v8101_v8 = vsub.f32 %v8093_v49, %v8097_v18 }
0x523f   :  { %v8100_v19 = vpop.xlane.xlu0 %8099 }
0x5240   :  { %v8103_v42 = vmul.f32 1.442695, %v8101_v8  ;;  %v8102_v9 = vsub.f32 %v8094_v43, %v8100_v19 }
0x5241   :  { %v8119_v20 = vpop.permute.xlu1 %8118 }
0x5242   :  { %12983 = vpow2.f32 %v8103_v42  ;;  %v8105_v23 = vmul.f32 1.442695, %v8102_v9  ;;  %12068 = vmatpush3.bf16.msra.mxu1 %v8119_v20 }
0x5243   :  { %12081 = vmatprep.subr.bf16.mxu1 %v13175_v0 }
0x5244   :  { %12985 = vpow2.f32 %v8105_v23 }
0x524c   :  { %v12984_v39 = vpop.eup %12983 }
0x524d   :  { %v8107_v10 = vsel %vm745_vm3, %v12984_v39, 0.0 }
0x524e   :  { %v12986_v30 = vpop.eup %12985  ;;  %8108 = vadd.xlane.f32.xlu0 %v8107_v10 }
0x524f   :  { %v8110_v26 = vsel %vm745_vm3, %v12986_v30, 0.0 }
0x5252   :  { %8111 = vadd.xlane.f32.xlu0 %v8110_v26 }
0x5268   :  { %8230 = vrot.lane.b32.xlu0 %v14274_v36, %s13180_s26  ;;  %v8229_v36 = vpop.permute.xlu1 %8228 }
0x52db   :  { %v8109_v32 = vpop.xlane.xlu0 %8108 }
0x52dc   :  { %12987 = vrcp.f32 %v8109_v32 }
0x52df   :  { %v8112_v60 = vpop.xlane.xlu0 %8111 }
0x52e0   :  { %12989 = vrcp.f32 %v8112_v60  ;;  %v10707_v60 = vld [vmem:[#allocation7 + $0x3a] ss:$0 sm:$0xff] }
0x52e3   :  { %v8231_v57 = vpop.permute.xlu0 %8230 }
0x52e4   :  { %v8236_v5 = vsel %vm695_vm1, %v8231_v57, 0 }
0x52e6   :  { %v12988_v53 = vpop.eup %12987 }
0x52e7   :  { %v8115_v35 = vmul.f32 %v12988_v53, %v12984_v39 }
0x52ea   :  { %v12990_v25 = vpop.eup %12989 }
0x52eb   :  { %v8116_v63 = vmul.f32 %v12990_v25, %v12986_v30 }
0x52ed   :  { %v8117_v38 = vpack.c.bf16 %v8116_v63, %v8115_v35 }
0x52ef   :  { %12070 = vmatmul.mubr.msk.bf16.vlgmr.msra.gmra.mrb[208].mxu1 %vm745_vm3, %v8117_v38 }
0x52f0   :  { %12082 = vmatpush3.bf16.xpose.msra.mxu1 %v8236_v5  ;;  %12083 = vmatprep.mubr.msk.bf16.mxu1 %vm13176_vm0, %v13175_v0 }
0x52f1   :  { %12093 = vmatprep.subr.bf16.mxu1 %v13175_v0 }
0x52f7   :  { %12084 = vmatmul.mubr.msk.bf16.vlgmr.msra.gmra.mrb[212].mxu1 %vm695_vm1, %v8229_v36 }
0x52f8   :  { %12097 = vmatprep.mubr.msk.bf16.mxu1 %vm13176_vm0, %v13175_v0  ;;  %12094 = vmatpush3.bf16.msra.mxu1 %v12677_v11 }
0x52f9   :  { %12095 = vmatprep.subr.bf16.mxu1 %v13175_v0 }
0x53c2   :  { %v8158_v6 = vpop.f32.mrb[208].mxu1 }
0x53c3   :  { %v12071_v44 = vpop.f32.mrb[209].mxu1 }
0x53c4   :  { %v8161_v40 = vpop.f32.mrb[210].mxu1  ;;  %v12680_v44 = vld [vmem:[#allocation6 + $0x1ec] ss:$180 sps:$4 sm:$0xff]  }
0x53c5   :  { %v8169_v46 = vpack.c.bf16 %v8161_v40, %v8158_v6  ;;  %v12072_v59 = vpop.f32.mrb[211].mxu1  ;;  %v12679_v6 = vld [vmem:[#allocation6 + $0x84] ss:$180 sps:$4 sm:$0xff]  }
0x53c7   :  { %12078 = vmatmul.mubr.msk.bf16.vlgmr.msra.gmra.mrb[196].mxu0 %vm695_vm1, %v8169_v46 }
0x53c8   :  { %12089 = vmatprep.mubr.msk.bf16.mxu0 %vm13176_vm0, %v13175_v0 }
0x53ca   :  { %v8272_v41 = vpop.f32.mrb[212].mxu1 }
0x53cb   :  { %v8279_v27 = vsel %vm13332_vm2, %v8272_v41, -1e+30  ;;  %v12085_v31 = vpop.f32.mrb[213].mxu1 }
0x53cc   :  { %v8281_v34 = vsel %vm745_vm3, %v8279_v27, -inf  ;;  %v8275_v55 = vpop.f32.mrb[214].mxu1 }
0x53cd   :  { %v8280_v56 = vsel %vm13336_vm4, %v8275_v55, -1e+30  ;;  %8282 = vmax.xlane.f32.xlu1 %v8281_v34  ;;  %v12086_v15 = vpop.f32.mrb[215].mxu1  ;;  %v12682_v55 = vld [vmem:[#allocation6 + $0x4bc] ss:$180 sps:$4 sm:$0xff]  }
0x53ce   :  { %v8284_v22 = vsel %vm745_vm3, %v8280_v56, -inf  ;;  %v12684_v15 = vld [vmem:[#allocation6 + $0x78c] ss:$180 sps:$4 sm:$0xff]  }
0x53cf   :  { %8285 = vmax.xlane.f32.xlu0 %v8284_v22  ;;  %v12685_v22 = vld [vmem:[#allocation6 + $0x8f4] ss:$180 sps:$4 sm:$0xff]  }
0x545a   :  { %v8283_v37 = vpop.xlane.xlu1 %8282 }
0x545b   :  { %v8287_v3 = vsub.f32 %v8279_v27, %v8283_v37  ;;  %v12686_v37 = vld [vmem:[#allocation6 + $0xa5c] ss:$180 sps:$4 sm:$0xff]  }
0x545c   :  { %v8286_v1 = vpop.xlane.xlu0 %8285 }
0x545d   :  { %v8289_v51 = vmul.f32 1.442695, %v8287_v3  ;;  %v8288_v61 = vsub.f32 %v8280_v56, %v8286_v1  ;;  %v12683_v56 = vld [vmem:[#allocation6 + $0x624] ss:$180 sps:$4 sm:$0xff]   ;;  %v12695_v3 = vld [vmem:[#allocation6 + $0x88] ss:$180 sps:$4 sm:$0xff]  }
0x545e   :  { %v12696_v1 = vld [vmem:[#allocation6 + $0x1f0] ss:$180 sps:$4 sm:$0xff]  }
0x545f   :  { %12991 = vpow2.f32 %v8289_v51  ;;  %v8291_v17 = vmul.f32 1.442695, %v8288_v61  ;;  %v12697_v51 = vld [vmem:[#allocation6 + $0x358] ss:$180 sps:$4 sm:$0xff]   ;;  %v12698_v61 = vld [vmem:[#allocation6 + $0x4c0] ss:$180 sps:$4 sm:$0xff]  }
0x5461   :  { %12993 = vpow2.f32 %v8291_v17  ;;  %v12699_v17 = vld [vmem:[#allocation6 + $0x628] ss:$180 sps:$4 sm:$0xff]  }
0x5469   :  { %v12992_v52 = vpop.eup %12991 }
0x546a   :  { %v8293_v7 = vsel %vm745_vm3, %v12992_v52, 0.0 }
0x546b   :  { %v12994_v48 = vpop.eup %12993  ;;  %8294 = vadd.xlane.f32.xlu0 %v8293_v7 }
0x546c   :  { %v8296_v49 = vsel %vm745_vm3, %v12994_v48, 0.0 }
0x546d   :  { %8297 = vadd.xlane.f32.xlu1 %v8296_v49 }
0x5481   :  { %8304 = vrot.lane.b32.xlu0 %v14272_v12, %s13180_s26 }
0x549a   :  { %v8219_v13 = vpop.f32.mrb[196].mxu0 }
0x549b   :  { %v8226_v50 = vadd.f32 %v8219_v13, %v14338_v62  ;;  %v12079_v43 = vpop.f32.mrb[197].mxu0  ;;  %v12678_v62 = vld [vmem:[#allocation6 + $0xa58] ss:$180 sps:$4 sm:$0xff]  }
0x549c   :  { %v8222_v54 = vpop.f32.mrb[198].mxu0  ;;  %12096 = vmatpush3.bf16.msra.mxu1 %v12678_v62  ;;  %v12688_v62 = vld [vmem:[#allocation6 + $0x204] ss:$180 sps:$4 sm:$0xff]  }
0x549d   :  { %v8227_v21 = vadd.f32 %v8222_v54, %v14340_v2  ;;  %v12080_v18 = vpop.f32.mrb[199].mxu0  ;;  %12121 = vmatprep.subr.bf16.mxu1 %v13175_v0 }
0x54f8   :  { %v8295_v8 = vpop.xlane.xlu0 %8294 }
0x54f9   :  { %12995 = vrcp.f32 %v8295_v8 }
0x54fa   :  { %v8298_v19 = vpop.xlane.xlu1 %8297 }
0x54fb   :  { %12997 = vrcp.f32 %v8298_v19 }
0x54fc   :  { %v8305_v42 = vpop.permute.xlu0 %8304 }
0x54fd   :  { %12088 = vmatpush3.bf16.msra.mxu0 %v8305_v42  ;;  %v10709_v42 = vld [vmem:[#allocation7 + $0x3c] ss:$0 sm:$0xff] }
0x54fe   :  { %12101 = vmatprep.subr.bf16.mxu0 %v13175_v0 }
0x5503   :  { %v12996_v12 = vpop.eup %12995 }
0x5504   :  { %v8301_v20 = vmul.f32 %v12996_v12, %v12992_v52  ;;  %v12700_v52 = vld [vmem:[#allocation6 + $0x790] ss:$180 sps:$4 sm:$0xff]  }
0x5505   :  { %v12998_v9 = vpop.eup %12997 }
0x5506   :  { %v8302_v23 = vmul.f32 %v12998_v9, %v12994_v48 }
0x5508   :  { %v8303_v39 = vpack.c.bf16 %v8302_v23, %v8301_v20  ;;  %v12687_v23 = vld [vmem:[#allocation6 + $0x9c] ss:$180 sps:$4 sm:$0xff]  }
0x550a   :  { %12090 = vmatmul.mubr.msk.bf16.vlgmr.msra.gmra.mrb[200].mxu0 %vm745_vm3, %v8303_v39 }
0x550b   :  { %12117 = vmatprep.mubr.msk.bf16.mxu0 %vm13176_vm0, %v13175_v0  ;;  %12102 = vmatpush3.bf16.msra.mxu0 %v12679_v6 }
0x550c   :  { %12103 = vmatprep.subr.bf16.mxu0 %v13175_v0 }
0x550f   :  { %12104 = vmatpush3.bf16.msra.mxu0 %v12680_v44 }
0x5510   :  { %12105 = vmatprep.subr.bf16.mxu0 %v13175_v0 }
0x55dd   :  { %v8344_v2 = vpop.f32.mrb[200].mxu0 }
0x55de   :  { %v12091_v10 = vpop.f32.mrb[201].mxu0 }
0x55df   :  { %v8347_v30 = vpop.f32.mrb[202].mxu0  ;;  %v12690_v10 = vld [vmem:[#allocation6 + $0x4d4] ss:$180 sps:$4 sm:$0xff]  }
0x55e0   :  { %v8355_v26 = vpack.c.bf16 %v8347_v30, %v8344_v2  ;;  %v12092_v33 = vpop.f32.mrb[203].mxu0  ;;  %v12689_v2 = vld [vmem:[#allocation6 + $0x36c] ss:$180 sps:$4 sm:$0xff]   ;;  %v12691_v30 = vld [vmem:[#allocation6 + $0x63c] ss:$180 sps:$4 sm:$0xff]  }
0x55e1   :  { %v12693_v33 = vld [vmem:[#allocation6 + $0x90c] ss:$180 sps:$4 sm:$0xff]  }
0x55e2   :  { %12098 = vmatmul.mubr.msk.bf16.vlgmr.msra.gmra.mrb[216].mxu1 %vm695_vm1, %v8355_v26  ;;  %v12692_v26 = vld [vmem:[#allocation6 + $0x7a4] ss:$180 sps:$4 sm:$0xff]  }
0x55e3   :  { %12137 = vmatprep.mubr.msk.bf16.mxu1 %vm13176_vm0, %v13175_v0  ;;  %12122 = vmatpush3.bf16.msra.mxu1 %v12695_v3 }
0x55e4   :  { %12123 = vmatprep.subr.bf16.mxu1 %v13175_v0 }
0x55e7   :  { %12124 = vmatpush3.bf16.msra.mxu1 %v12696_v1 }
0x55e8   :  { %12125 = vmatprep.subr.bf16.mxu1 %v13175_v0 }
0x55eb   :  { %12126 = vmatpush3.bf16.msra.mxu1 %v12697_v51  ;;  %v12705_v51 = vld [vmem:[#allocation6 + $0xa4] ss:$180 sps:$4 sm:$0xff]  }
0x55ec   :  { %12127 = vmatprep.subr.bf16.mxu1 %v13175_v0 }
0x55ef   :  { %12128 = vmatpush3.bf16.msra.mxu1 %v12698_v61  ;;  %v12708_v61 = vld [vmem:[#allocation6 + $0x20c] ss:$180 sps:$4 sm:$0xff]  }
0x55f0   :  { %12129 = vmatprep.subr.bf16.mxu1 %v13175_v0 }
0x55f3   :  { %12130 = vmatpush3.bf16.msra.mxu1 %v12699_v17  ;;  %v12706_v17 = vld [vmem:[#allocation6 + $0x208] ss:$180 sps:$4 sm:$0xff]  }
0x55f4   :  { %12131 = vmatprep.subr.bf16.mxu1 %v13175_v0 }
0x55f7   :  { %12132 = vmatpush3.bf16.msra.mxu1 %v12700_v52 }
0x55f8   :  { %12133 = vmatprep.subr.bf16.mxu1 %v13175_v0 }
0x56b5   :  { %v8405_v32 = vpop.f32.mrb[216].mxu1 }
0x56b6   :  { %v8412_v53 = vadd.f32 %v8405_v32, %v8226_v50  ;;  %v12099_v25 = vpop.f32.mrb[217].mxu1  ;;  %v12694_v32 = vld [vmem:[#allocation6 + $0xa74] ss:$180 sps:$4 sm:$0xff]  }
0x56b7   :  { %v8408_v35 = vpop.f32.mrb[218].mxu1  ;;  %v10710_v25 = vld [vmem:[#allocation7 + $0x3d] ss:$0 sm:$0xff] }
0x56b8   :  { %v8419_v63 = vadd.f32 %v10707_v60, %v8412_v53  ;;  %v8413_v57 = vadd.f32 %v8408_v35, %v8227_v21  ;;  %v12100_v38 = vpop.f32.mrb[219].mxu1  ;;  %v10708_v21 = vld [vmem:[#allocation7 + $0x3b] ss:$0 sm:$0xff]  ;;  %v12702_v53 = vld [vmem:[#allocation6 + $0xa60] ss:$180 sps:$4 sm:$0xff]  }
0x56ba   :  { %v8420_v5 = vadd.f32 %v10707_v60, %v8413_v57  ;;  %v8421_v36 = vadd.f32 %v8419_v63, %v14259_v16  ;;  %v12701_v60 = vld [vmem:[#allocation6 + $0x8f8] ss:$180 sps:$4 sm:$0xff]  }
0x56bb   :  { %12134 = vmatpush3.bf16.msra.mxu1 %v12701_v60 }
0x56bc   :  { %8423 = vadd.xlane.f32.xlu1 %v8421_v36  ;;  %v8422_v4 = vadd.f32 %v8420_v5, %v14262_v14  ;;  %v12681_v14 = vld [vmem:[#allocation6 + $0x354] ss:$180 sps:$4 sm:$0xff]   ;;  %12135 = vmatprep.subr.bf16.mxu1 %v13175_v0 }
0x56bd   :  { %12106 = vmatpush3.bf16.msra.mxu0 %v12681_v14  ;;  %v10727_v14 = vld [vmem:[#allocation7 + $0x3e] ss:$0 sm:$0xff] }
0x56be   :  { %12107 = vmatprep.subr.bf16.mxu0 %v13175_v0 }
0x56bf   :  { %12136 = vmatpush3.bf16.msra.mxu1 %v12702_v53 }
0x56c0   :  { %8425 = vadd.xlane.f32.xlu1 %v8422_v4  ;;  %8930 = vmatprep.subr.bf16.mxu1 %v12705_v51 }
0x56c1   :  { %12108 = vmatpush3.bf16.msra.mxu0 %v12682_v55 }
0x56c2   :  { %12109 = vmatprep.subr.bf16.mxu0 %v13175_v0 }
0x56c5   :  { %12110 = vmatpush3.bf16.msra.mxu0 %v12683_v56 }
0x56c6   :  { %12111 = vmatprep.subr.bf16.mxu0 %v13175_v0 }
0x56c9   :  { %12112 = vmatpush3.bf16.msra.mxu0 %v12684_v15 }
0x56ca   :  { %12113 = vmatprep.subr.bf16.mxu0 %v13175_v0 }
0x56cd   :  { %12114 = vmatpush3.bf16.msra.mxu0 %v12685_v22 }
0x56ce   :  { %12115 = vmatprep.subr.bf16.mxu0 %v13175_v0 }
0x56d1   :  { %12116 = vmatpush3.bf16.msra.mxu0 %v12686_v37 }
0x56d2   :  { %12141 = vmatprep.subr.bf16.mxu0 %v13175_v0 }
0x5749   :  { %v8424_v40 = vpop.xlane.xlu1 %8423 }
0x574a   :  { %v8427_v46 = vmul.f32 0.0078125, %v8424_v40 }
0x574c   :  { %v8429_v59 = vsub.f32 %v8421_v36, %v8427_v46 }
0x574d   :  { %v8426_v41 = vpop.xlane.xlu1 %8425 }
0x574e   :  { %v8428_v27 = vmul.f32 0.0078125, %v8426_v41  ;;  %v8431_v31 = vmul.f32 %v8429_v59, %v8429_v59 }
0x5750   :  { %v8430_v34 = vsub.f32 %v8422_v4, %v8428_v27  ;;  %8433 = vadd.xlane.f32.xlu1 %v8431_v31 }
0x5752   :  { %v8432_v16 = vmul.f32 %v8430_v34, %v8430_v34 }
0x5754   :  { %8435 = vadd.xlane.f32.xlu1 %v8432_v16 }
0x57dd   :  { %v8434_v7 = vpop.xlane.xlu1 %8433 }
0x57de   :  { %v8437_v48 = vmul.f32 0.0078125, %v8434_v7 }
0x57e0   :  { %v8439_v49 = vadd.f32 1e-05, %v8437_v48 }
0x57e1   :  { %v8436_v11 = vpop.xlane.xlu1 %8435 }
0x57e2   :  { %12999 = vrsqrt.f32 %v8439_v49  ;;  %v8438_v13 = vmul.f32 0.0078125, %v8436_v11 }
0x57e4   :  { %v8440_v50 = vadd.f32 1e-05, %v8438_v13 }
0x57e6   :  { %13001 = vrsqrt.f32 %v8440_v50 }
0x57ec   :  { %v13000_v43 = vpop.eup %12999 }
0x57ed   :  { %v8443_v54 = vmul.f32 %v13000_v43, %v8429_v59 }
0x57ef   :  { %v8450_v19 = vmul.f32 %v10708_v21, %v8443_v54  ;;  %v12711_v54 = vld [vmem:[#allocation6 + $0x374] ss:$180 sps:$4 sm:$0xff]  }
0x57f0   :  { %v13002_v18 = vpop.eup %13001 }
0x57f1   :  { %v8444_v8 = vmul.f32 %v13002_v18, %v8430_v34  ;;  %v8457_v9 = vadd.f32 %v10709_v42, %v8450_v19  ;;  %v12714_v18 = vld [vmem:[#allocation6 + $0x4dc] ss:$180 sps:$4 sm:$0xff]   ;;  %v12717_v19 = vld [vmem:[#allocation6 + $0x644] ss:$180 sps:$4 sm:$0xff]  }
0x57f3   :  { %v8451_v12 = vmul.f32 %v10708_v21, %v8444_v8  ;;  %v12709_v21 = vld [vmem:[#allocation6 + $0x370] ss:$180 sps:$4 sm:$0xff]   ;;  %v12712_v8 = vld [vmem:[#allocation6 + $0x4d8] ss:$180 sps:$4 sm:$0xff]  }
0x57f5   :  { %v8458_v20 = vadd.f32 %v10709_v42, %v8451_v12  ;;  %v12715_v42 = vld [vmem:[#allocation6 + $0x640] ss:$180 sps:$4 sm:$0xff]  }
0x57f6   :  { %v12720_v12 = vld [vmem:[#allocation6 + $0x7ac] ss:$180 sps:$4 sm:$0xff]  }
0x57f7   :  { %v8475_v39 = vpack.c.bf16 %v8458_v20, %v8457_v9 }
0x57f9   :  { %12118 = vmatmul.mubr.bf16.vlgmr.msra.gmra.mrb[204].mxu0 %v8475_v39  ;;  %v12726_v39 = vld [vmem:[#allocation6 + $0xa7c] ss:$180 sps:$4 sm:$0xff]  }
0x57fa   :  { %12142 = vmatpush3.bf16.msra.mxu0 %v12687_v23  ;;  %12157 = vmatprep.mubr.msk.bf16.mxu0 %vm13176_vm0, %v13175_v0  ;;  %v12721_v23 = vld [vmem:[#allocation6 + $0x910] ss:$180 sps:$4 sm:$0xff]  }
0x57fb   :  { %12143 = vmatprep.subr.bf16.mxu0 %v13175_v0 }
0x57fe   :  { %12144 = vmatpush3.bf16.msra.mxu0 %v12688_v62  ;;  %v12724_v62 = vld [vmem:[#allocation6 + $0xa78] ss:$180 sps:$4 sm:$0xff]  }
0x57ff   :  { %12145 = vmatprep.subr.bf16.mxu0 %v13175_v0 }
0x5802   :  { %12146 = vmatpush3.bf16.msra.mxu0 %v12689_v2 }
0x5803   :  { %12147 = vmatprep.subr.bf16.mxu0 %v13175_v0 }
0x5806   :  { %12148 = vmatpush3.bf16.msra.mxu0 %v12690_v10 }
0x5807   :  { %12149 = vmatprep.subr.bf16.mxu0 %v13175_v0 }
0x580a   :  { %12150 = vmatpush3.bf16.msra.mxu0 %v12691_v30 }
0x580b   :  { %12151 = vmatprep.subr.bf16.mxu0 %v13175_v0 }
0x580e   :  { %12152 = vmatpush3.bf16.msra.mxu0 %v12692_v26 }
0x580f   :  { %12153 = vmatprep.subr.bf16.mxu0 %v13175_v0 }
0x5812   :  { %12154 = vmatpush3.bf16.msra.mxu0 %v12693_v33 }
0x5813   :  { %12155 = vmatprep.subr.bf16.mxu0 %v13175_v0 }
0x5816   :  { %12156 = vmatpush3.bf16.msra.mxu0 %v12694_v32 }
0x5817   :  { %12161 = vmatprep.subr.bf16.mxu0 %v13175_v0 }
0x5819   :  { %12158 = vmatmul.mubr.bf16.vlgmr.msra.gmra.mrb[208].mxu0 %v14121_v29  ;;  %v10730_v29 = vld [vmem:[#allocation7 + $0x45] ss:$0 sm:$0xff] }
0x581a   :  { %12163 = vmatprep.mubr.msk.bf16.mxu0 %vm13176_vm0, %v13175_v0 }
0x58cc   :  { %v8563_v35 = vpop.f32.mrb[204].mxu0 }
0x58cd   :  { %v8564_v63 = vadd.f32 %v10710_v25, %v8563_v35  ;;  %v12119_v57 = vpop.f32.mrb[205].mxu0 }
0x58ce   :  { %v8566_v38 = vpop.f32.mrb[206].mxu0 }
0x58cf   :  { %v8567_v5 = vadd.f32 %v10710_v25, %v8566_v38  ;;  %v12120_v36 = vpop.f32.mrb[207].mxu0  ;;  %v8570_v4 = vmax.f32 %v8564_v63, 0.0  ;;  %v10728_v25 = vld [vmem:[#allocation7 + $0x3f] ss:$0 sm:$0xff]  ;;  %v10729_v38 = vld [vmem:[#allocation7 + $0x40] ss:$0 sm:$0xff] }
0x58d1   :  { %v8571_v6 = vmax.f32 %v8567_v5, 0.0 }
0x58d3   :  { %v8588_v44 = vpack.c.bf16 %v8571_v6, %v8570_v4 }
0x58d5   :  { %12138 = vmatmul.mubr.bf16.vlgmr.msra.gmra.mrb[220].mxu1 %v8588_v44 }
0x58d6   :  { %8962 = vmatprep.mubr.bf16.mxu1 %v13177_v58  ;;  %v12703_v58 = vld [vmem:[#allocation6 + $0xa0] ss:$180 sps:$4 sm:$0xff]  }
0x58d7   :  { %8931 = vmatpush1.bf16.msra.mxu1 %v12703_v58 }
0x58d8   :  { %8932 = vmatprep.subr.bf16.mxu1 %v12708_v61 }
0x58db   :  { %8933 = vmatpush1.bf16.msra.mxu1 %v12706_v17 }
0x58dc   :  { %8934 = vmatprep.subr.bf16.mxu1 %v12711_v54 }
0x58df   :  { %8935 = vmatpush1.bf16.msra.mxu1 %v12709_v21 }
0x58e0   :  { %8936 = vmatprep.subr.bf16.mxu1 %v12714_v18 }
0x58e3   :  { %8937 = vmatpush1.bf16.msra.mxu1 %v12712_v8 }
0x58e4   :  { %8938 = vmatprep.subr.bf16.mxu1 %v12717_v19 }
0x58e7   :  { %8939 = vmatpush1.bf16.msra.mxu1 %v12715_v42 }
0x58e8   :  { %8940 = vmatprep.subr.bf16.mxu1 %v12720_v12 }
0x58ec   :  { %v8826_v40 = vpop.f32.mrb[208].mxu0 }
0x58ed   :  { %v12159_v46 = vpop.f32.mrb[209].mxu0  ;;  %v8827_v41 = vadd.f32 %v10730_v29, %v8826_v40 }
0x58ee   :  { %v8829_v59 = vpop.f32.mrb[210].mxu0  ;;  %v10756_v46 = vld [vmem:[#allocation7 + $0x47] ss:$0 sm:$0xff] }
0x58ef   :  { %v8830_v27 = vadd.f32 %v10730_v29, %v8829_v59  ;;  %v12160_v31 = vpop.f32.mrb[211].mxu0  ;;  %v10755_v29 = vld [vmem:[#allocation7 + $0x46] ss:$0 sm:$0xff] }
0x58f1   :  { %v14422_v34 = vpack.c.bf16 %v8830_v27, %v8827_v41 }
0x59a8   :  { %v8671_v16 = vpop.f32.mrb[220].mxu1 }
0x59a9   :  { %v8678_v55 = vadd.f32 %v8671_v16, %v8457_v9  ;;  %v12139_v56 = vpop.f32.mrb[221].mxu1  ;;  %v12718_v9 = vld [vmem:[#allocation6 + $0x7a8] ss:$180 sps:$4 sm:$0xff]  }
0x59aa   :  { %v8674_v15 = vpop.f32.mrb[222].mxu1  ;;  %8941 = vmatpush1.bf16.msra.mxu1 %v12718_v9 }
0x59ab   :  { %v8685_v22 = vadd.f32 %v10727_v14, %v8678_v55  ;;  %v8679_v37 = vadd.f32 %v8674_v15, %v8458_v20  ;;  %v12140_v3 = vpop.f32.mrb[223].mxu1  ;;  %v12723_v20 = vld [vmem:[#allocation6 + $0x914] ss:$180 sps:$4 sm:$0xff]  }
0x59ac   :  { %8942 = vmatprep.subr.bf16.mxu1 %v12723_v20 }
0x59ad   :  { %8687 = vadd.xlane.f32.xlu1 %v8685_v22  ;;  %v8686_v1 = vadd.f32 %v10727_v14, %v8679_v37 }
0x59ae   :  { %8943 = vmatpush1.bf16.msra.mxu1 %v12721_v23 }
0x59af   :  { %8944 = vmatprep.subr.bf16.mxu1 %v12726_v39 }
0x59b1   :  { %8689 = vadd.xlane.f32.xlu1 %v8686_v1 }
0x59b2   :  { %8945 = vmatpush1.bf16.msra.mxu1 %v12724_v62 }
0x59b3   :  { %12167 = vmatprep.subr.bf16.mxu1 %v13175_v0 }
0x5a3a   :  { %v8688_v52 = vpop.xlane.xlu1 %8687 }
0x5a3b   :  { %v8691_v7 = vmul.f32 0.0078125, %v8688_v52 }
0x5a3d   :  { %v8693_v48 = vsub.f32 %v8685_v22, %v8691_v7 }
0x5a3e   :  { %v8690_v49 = vpop.xlane.xlu1 %8689 }
0x5a3f   :  { %v8692_v11 = vmul.f32 0.0078125, %v8690_v49  ;;  %v8695_v13 = vmul.f32 %v8693_v48, %v8693_v48 }
0x5a41   :  { %v8694_v50 = vsub.f32 %v8686_v1, %v8692_v11  ;;  %8697 = vadd.xlane.f32.xlu0 %v8695_v13 }
0x5a43   :  { %v8696_v43 = vmul.f32 %v8694_v50, %v8694_v50 }
0x5a45   :  { %8699 = vadd.xlane.f32.xlu1 %v8696_v43 }
0x5ace   :  { %v8698_v2 = vpop.xlane.xlu0 %8697 }
0x5acf   :  { %v8701_v10 = vmul.f32 0.0078125, %v8698_v2 }
0x5ad1   :  { %v8703_v30 = vadd.f32 1e-05, %v8701_v10 }
0x5ad2   :  { %v8700_v26 = vpop.xlane.xlu1 %8699 }
0x5ad3   :  { %13003 = vrsqrt.f32 %v8703_v30  ;;  %v8702_v33 = vmul.f32 0.0078125, %v8700_v26 }
0x5ad5   :  { %v8704_v32 = vadd.f32 1e-05, %v8702_v33 }
0x5ad7   :  { %13005 = vrsqrt.f32 %v8704_v32 }
0x5add   :  { %v13004_v60 = vpop.eup %13003 }
0x5ade   :  { %v8707_v53 = vmul.f32 %v13004_v60, %v8693_v48 }
0x5ae0   :  { %v8714_v57 = vmul.f32 %v10728_v25, %v8707_v53 }
0x5ae1   :  { %v13006_v35 = vpop.eup %13005 }
0x5ae2   :  { %v8708_v63 = vmul.f32 %v13006_v35, %v8694_v50  ;;  %v8721_v36 = vadd.f32 %v10729_v38, %v8714_v57 }
0x5ae4   :  { %v8715_v5 = vmul.f32 %v10728_v25, %v8708_v63 }
0x5ae6   :  { %v8722_v4 = vadd.f32 %v10729_v38, %v8715_v5 }
0x5ae8   :  { %v14425_v6 = vpack.c.bf16 %v8722_v4, %v8721_v36 }
0x5aea   :  { %8963 = vmatmul.mubr.bf16.vlgmr.msra.gmra.mrb[224].mxu1 %v14425_v6 }
0x5aeb   :  { %12169 = vmatprep.mubr.msk.bf16.mxu1 %vm13176_vm0, %v13175_v0 }
0x5bbd   :  { %v8964_v44 = vpop.f32.mrb[224].mxu1 }
0x5bbe   :  { %v8966_v40 = vpop.f32.mrb[225].mxu1  ;;  %v8978_v41 = vadd.f32 %v10755_v29, %v8964_v44 }
0x5bbf   :  { %v8968_v59 = vpop.f32.mrb[226].mxu1  ;;  %v8985_v16 = vadd.f32 %v10756_v46, %v8966_v40  ;;  %v12729_v40 = vld [vmem:[#allocation6 + $0x378] ss:$180 sps:$4 sm:$0xff]  }
0x5bc0   :  { %v8979_v27 = vadd.f32 %v10755_v29, %v8968_v59  ;;  %v8970_v31 = vpop.f32.mrb[227].mxu1 }
0x5bc1   :  { %v8986_v14 = vadd.f32 %v10756_v46, %v8970_v31  ;;  %v12730_v46 = vld [vmem:[#allocation6 + $0x4e0] ss:$180 sps:$4 sm:$0xff]  }
0x5bc2   :  { %v14430_v55 = vpack.c.bf16 %v8979_v27, %v8978_v41 }
0x5bc3   :  { %v14432_v56 = vpack.c.bf16 %v8986_v14, %v8985_v16 }
0x5bc4   :  { %9115 = vrot.lane.b32.xlu1 %v14430_v55, %s13178_s3  ;;  %v8993_v15 = vsel %vm695_vm1, %v14430_v55, 0 }
0x5bc5   :  { %12162 = vmatpush3.bf16.xpose.msra.mxu0 %v8993_v15  ;;  %12168 = vmatpush3.bf16.msra.mxu1 %v14432_v56 }
0x5bc6   :  { %12173 = vmatprep.subr.bf16.mxu0 %v13175_v0  ;;  %12179 = vmatprep.subr.bf16.mxu1 %v13175_v0 }
0x5bc8   :  { %9112 = vrot.lane.b32.xlu1 %v14422_v34, %s13178_s3 }
0x5bcc   :  { %12164 = vmatmul.mubr.msk.bf16.vlgmr.msra.gmra.mrb[212].mxu0 %vm695_vm1, %v14422_v34 }
0x5bcd   :  { %12175 = vmatprep.mubr.msk.bf16.mxu0 %vm13176_vm0, %v13175_v0 }
0x5c36   :  { %v9116_v22 = vpop.permute.xlu1 %9115 }
0x5c37   :  { %v9121_v37 = vsel %vm695_vm1, %v9116_v22, 0  ;;  %v12727_v22 = vld [vmem:[#allocation6 + $0xa8] ss:$180 sps:$4 sm:$0xff]  }
0x5c38   :  { %12174 = vmatpush3.bf16.xpose.msra.mxu0 %v9121_v37 }
0x5c39   :  { %12185 = vmatprep.subr.bf16.mxu0 %v13175_v0 }
0x5c3a   :  { %v9113_v3 = vpop.permute.xlu1 %9112 }
0x5c3f   :  { %12176 = vmatmul.mubr.msk.bf16.vlgmr.msra.gmra.mrb[216].mxu0 %vm695_vm1, %v9113_v3  ;;  %v12728_v3 = vld [vmem:[#allocation6 + $0x210] ss:$180 sps:$4 sm:$0xff]  }
0x5c40   :  { %12189 = vmatprep.mubr.msk.bf16.mxu0 %vm13176_vm0, %v13175_v0  ;;  %12186 = vmatpush3.bf16.msra.mxu0 %v12729_v40 }
0x5c41   :  { %12187 = vmatprep.subr.bf16.mxu0 %v13175_v0 }
0x5c44   :  { %12188 = vmatpush3.bf16.msra.mxu0 %v12730_v46 }
0x5c45   :  { %12201 = vmatprep.subr.bf16.mxu0 %v13175_v0 }
0x5c9f   :  { %v9029_v1 = vpop.f32.mrb[212].mxu0 }
0x5ca0   :  { %v9036_v58 = vsel %vm13332_vm2, %v9029_v1, -1e+30  ;;  %v12165_v51 = vpop.f32.mrb[213].mxu0 }
0x5ca1   :  { %v9038_v61 = vsel %vm745_vm3, %v9036_v58, -inf  ;;  %v9032_v17 = vpop.f32.mrb[214].mxu0 }
0x5ca2   :  { %v9037_v52 = vsel %vm13336_vm4, %v9032_v17, -1e+30  ;;  %9039 = vmax.xlane.f32.xlu1 %v9038_v61  ;;  %v12166_v7 = vpop.f32.mrb[215].mxu0 }
0x5ca3   :  { %v9041_v48 = vsel %vm745_vm3, %v9037_v52, -inf }
0x5ca4   :  { %9042 = vmax.xlane.f32.xlu0 %v9041_v48 }
0x5cb3   :  { %9356 = vrot.lane.b32.xlu1 %v14430_v55, %s13179_s25 }
0x5cb7   :  { %9354 = vrot.lane.b32.xlu1 %v14422_v34, %s13179_s25 }
0x5d12   :  { %v9157_v49 = vpop.f32.mrb[216].mxu0 }
0x5d13   :  { %v9164_v11 = vsel %vm13332_vm2, %v9157_v49, -1e+30  ;;  %v12177_v13 = vpop.f32.mrb[217].mxu0 }
0x5d14   :  { %v9166_v50 = vsel %vm745_vm3, %v9164_v11, -inf  ;;  %v9160_v43 = vpop.f32.mrb[218].mxu0 }
0x5d15   :  { %v9165_v54 = vsel %vm13336_vm4, %v9160_v43, -1e+30  ;;  %9167 = vmax.xlane.f32.xlu0 %v9166_v50  ;;  %v12178_v21 = vpop.f32.mrb[219].mxu0 }
0x5d16   :  { %v9169_v18 = vsel %vm745_vm3, %v9165_v54, -inf }
0x5d19   :  { %9170 = vmax.xlane.f32.xlu0 %v9169_v18 }
0x5d2f   :  { %v9040_v8 = vpop.xlane.xlu1 %9039 }
0x5d30   :  { %v9044_v19 = vsub.f32 %v9036_v58, %v9040_v8 }
0x5d31   :  { %v9043_v42 = vpop.xlane.xlu0 %9042 }
0x5d32   :  { %v9046_v12 = vmul.f32 1.442695, %v9044_v19  ;;  %v9045_v9 = vsub.f32 %v9037_v52, %v9043_v42 }
0x5d33   :  { %v9357_v48 = vpop.permute.xlu1 %9356 }
0x5d34   :  { %13007 = vpow2.f32 %v9046_v12  ;;  %v9048_v20 = vmul.f32 1.442695, %v9045_v9  ;;  %v9362_v50 = vsel %vm695_vm1, %v9357_v48, 0 }
0x5d36   :  { %13009 = vpow2.f32 %v9048_v20 }
0x5d37   :  { %v9355_v43 = vpop.permute.xlu1 %9354 }
0x5d3e   :  { %v13008_v23 = vpop.eup %13007 }
0x5d3f   :  { %v9050_v39 = vsel %vm745_vm3, %v13008_v23, 0.0 }
0x5d40   :  { %v13010_v62 = vpop.eup %13009  ;;  %9051 = vadd.xlane.f32.xlu0 %v9050_v39 }
0x5d41   :  { %v9053_v2 = vsel %vm745_vm3, %v13010_v62, 0.0 }
0x5d44   :  { %9054 = vadd.xlane.f32.xlu0 %v9053_v2 }
0x5da2   :  { %v9168_v10 = vpop.xlane.xlu0 %9167 }
0x5da3   :  { %v9172_v30 = vsub.f32 %v9164_v11, %v9168_v10 }
0x5da5   :  { %v9174_v26 = vmul.f32 1.442695, %v9172_v30 }
0x5da6   :  { %v9171_v33 = vpop.xlane.xlu0 %9170 }
0x5da7   :  { %13011 = vpow2.f32 %v9174_v26  ;;  %v9173_v32 = vsub.f32 %v9165_v54, %v9171_v33 }
0x5da9   :  { %v9176_v60 = vmul.f32 1.442695, %v9173_v32 }
0x5dab   :  { %13013 = vpow2.f32 %v9176_v60 }
0x5db1   :  { %v13012_v53 = vpop.eup %13011 }
0x5db2   :  { %v9178_v25 = vsel %vm745_vm3, %v13012_v53, 0.0 }
0x5db3   :  { %9179 = vadd.xlane.f32.xlu0 %v9178_v25 }
0x5db5   :  { %v13014_v35 = vpop.eup %13013 }
0x5db6   :  { %v9181_v63 = vsel %vm745_vm3, %v13014_v35, 0.0 }
0x5db7   :  { %9182 = vadd.xlane.f32.xlu0 %v9181_v63 }
0x5dcd   :  { %9190 = vrot.lane.b32.xlu0 %v14432_v56, %s13178_s3  ;;  %v9052_v57 = vpop.xlane.xlu0 %9051 }
0x5dce   :  { %13015 = vrcp.f32 %v9052_v57 }
0x5dd1   :  { %v9055_v38 = vpop.xlane.xlu0 %9054 }
0x5dd2   :  { %13017 = vrcp.f32 %v9055_v38 }
0x5dd8   :  { %v13016_v5 = vpop.eup %13015 }
0x5dd9   :  { %v9058_v4 = vmul.f32 %v13016_v5, %v13008_v23 }
0x5ddc   :  { %v13018_v36 = vpop.eup %13017 }
0x5ddd   :  { %v9059_v44 = vmul.f32 %v13018_v36, %v13010_v62 }
0x5ddf   :  { %v9060_v29 = vpack.c.bf16 %v9059_v44, %v9058_v4 }
0x5de1   :  { %12170 = vmatmul.mubr.msk.bf16.vlgmr.msra.gmra.mrb[228].mxu1 %vm745_vm3, %v9060_v29 }
0x5de2   :  { %12181 = vmatprep.mubr.msk.bf16.mxu1 %vm13176_vm0, %v13175_v0 }
0x5e40   :  { %v9180_v59 = vpop.xlane.xlu0 %9179 }
0x5e41   :  { %13019 = vrcp.f32 %v9180_v59 }
0x5e44   :  { %v9183_v41 = vpop.xlane.xlu0 %9182 }
0x5e45   :  { %13021 = vrcp.f32 %v9183_v41 }
0x5e48   :  { %v9191_v27 = vpop.permute.xlu0 %9190 }
0x5e49   :  { %12180 = vmatpush3.bf16.msra.mxu1 %v9191_v27 }
0x5e4a   :  { %12193 = vmatprep.subr.bf16.mxu1 %v13175_v0 }
0x5e4b   :  { %v13020_v31 = vpop.eup %13019 }
0x5e4c   :  { %v9186_v14 = vmul.f32 %v13020_v31, %v13012_v53 }
0x5e4f   :  { %v13022_v16 = vpop.eup %13021 }
0x5e50   :  { %v9187_v15 = vmul.f32 %v13022_v16, %v13014_v35 }
0x5e52   :  { %v9188_v37 = vpack.c.bf16 %v9187_v15, %v9186_v14  ;;  %v12732_v15 = vld [vmem:[#allocation6 + $0x7b0] ss:$180 sps:$4 sm:$0xff]  }
0x5e54   :  { %12182 = vmatmul.mubr.msk.bf16.vlgmr.msra.gmra.mrb[232].mxu1 %vm745_vm3, %v9188_v37 }
0x5e55   :  { %12194 = vmatpush3.bf16.msra.mxu1 %v12727_v22  ;;  %12197 = vmatprep.mubr.msk.bf16.mxu1 %vm13176_vm0, %v13175_v0 }
0x5e56   :  { %12195 = vmatprep.subr.bf16.mxu1 %v13175_v0 }
0x5e59   :  { %12196 = vmatpush3.bf16.msra.mxu1 %v12728_v3 }
0x5e5a   :  { %12207 = vmatprep.subr.bf16.mxu1 %v13175_v0 }
0x5eb4   :  { %v9099_v1 = vpop.f32.mrb[228].mxu1 }
0x5eb5   :  { %v12171_v58 = vpop.f32.mrb[229].mxu1 }
0x5eb6   :  { %v9102_v51 = vpop.f32.mrb[230].mxu1 }
0x5eb7   :  { %v9110_v61 = vpack.c.bf16 %v9102_v51, %v9099_v1  ;;  %v12172_v17 = vpop.f32.mrb[231].mxu1 }
0x5eb9   :  { %12198 = vmatmul.mubr.msk.bf16.vlgmr.msra.gmra.mrb[236].mxu1 %vm695_vm1, %v9110_v61 }
0x5eba   :  { %12209 = vmatprep.mubr.msk.bf16.mxu1 %vm13176_vm0, %v13175_v0 }
0x5f27   :  { %v9230_v52 = vpop.f32.mrb[232].mxu1 }
0x5f28   :  { %v12183_v7 = vpop.f32.mrb[233].mxu1 }
0x5f29   :  { %v9233_v49 = vpop.f32.mrb[234].mxu1 }
0x5f2a   :  { %v9241_v11 = vpack.c.bf16 %v9233_v49, %v9230_v52  ;;  %v12184_v13 = vpop.f32.mrb[235].mxu1 }
0x5f2c   :  { %12190 = vmatmul.mubr.msk.bf16.vlgmr.msra.gmra.mrb[220].mxu0 %vm695_vm1, %v9241_v11 }
0x5f2d   :  { %12202 = vmatpush3.bf16.xpose.msra.mxu0 %v9362_v50  ;;  %12203 = vmatprep.mubr.msk.bf16.mxu0 %vm13176_vm0, %v13175_v0 }
0x5f2e   :  { %12213 = vmatprep.subr.bf16.mxu0 %v13175_v0 }
0x5f34   :  { %12204 = vmatmul.mubr.msk.bf16.vlgmr.msra.gmra.mrb[224].mxu0 %vm695_vm1, %v9355_v43 }
0x5f35   :  { %12217 = vmatprep.mubr.msk.bf16.mxu0 %vm13176_vm0, %v13175_v0 }
0x5f8c   :  { %v9347_v54 = vpop.f32.mrb[236].mxu1 }
0x5f8d   :  { %v12199_v21 = vpop.f32.mrb[237].mxu1 }
0x5f8e   :  { %v9350_v18 = vpop.f32.mrb[238].mxu1 }
0x5f8f   :  { %v12200_v8 = vpop.f32.mrb[239].mxu1 }
0x5fff   :  { %v9291_v19 = vpop.f32.mrb[220].mxu0 }
0x6000   :  { %v14496_v42 = vadd.f32 %v9347_v54, %v9291_v19  ;;  %v12191_v12 = vpop.f32.mrb[221].mxu0 }
0x6001   :  { %v9294_v9 = vpop.f32.mrb[222].mxu0 }
0x6002   :  { %v14498_v20 = vadd.f32 %v9350_v18, %v9294_v9  ;;  %v12192_v23 = vpop.f32.mrb[223].mxu0 }
0x6007   :  { %v9398_v39 = vpop.f32.mrb[224].mxu0 }
0x6008   :  { %v9405_v62 = vsel %vm13332_vm2, %v9398_v39, -1e+30  ;;  %v12205_v2 = vpop.f32.mrb[225].mxu0 }
0x6009   :  { %v9407_v10 = vsel %vm745_vm3, %v9405_v62, -inf  ;;  %v9401_v30 = vpop.f32.mrb[226].mxu0 }
0x600a   :  { %v9406_v26 = vsel %vm13336_vm4, %v9401_v30, -1e+30  ;;  %9408 = vmax.xlane.f32.xlu0 %v9407_v10  ;;  %v12206_v33 = vpop.f32.mrb[227].mxu0 }
0x600b   :  { %v9410_v32 = vsel %vm745_vm3, %v9406_v26, -inf }
0x600c   :  { %9411 = vmax.xlane.f32.xlu1 %v9410_v32 }
0x601d   :  { %9542 = vrot.lane.b32.xlu1 %v14430_v55, %s13180_s26 }
0x6021   :  { %9540 = vrot.lane.b32.xlu1 %v14422_v34, %s13180_s26  ;;  %v12731_v34 = vld [vmem:[#allocation6 + $0x648] ss:$180 sps:$4 sm:$0xff]  }
0x6022   :  { %12214 = vmatpush3.bf16.msra.mxu0 %v12731_v34  ;;  %v12740_v34 = vld [vmem:[#allocation6 + $0xa84] ss:$180 sps:$4 sm:$0xff]  }
0x6023   :  { %12215 = vmatprep.subr.bf16.mxu0 %v13175_v0 }
0x6026   :  { %12216 = vmatpush3.bf16.msra.mxu0 %v12732_v15 }
0x6027   :  { %12227 = vmatprep.subr.bf16.mxu0 %v13175_v0 }
0x6097   :  { %v9409_v60 = vpop.xlane.xlu0 %9408 }
0x6098   :  { %v9413_v53 = vsub.f32 %v9405_v62, %v9409_v60 }
0x6099   :  { %v9412_v25 = vpop.xlane.xlu1 %9411 }
0x609a   :  { %v9415_v35 = vmul.f32 1.442695, %v9413_v53  ;;  %v9414_v63 = vsub.f32 %v9406_v26, %v9412_v25  ;;  %v12741_v26 = vld [vmem:[#allocation6 + $0x918] ss:$180 sps:$4 sm:$0xff]  }
0x609c   :  { %13023 = vpow2.f32 %v9415_v35  ;;  %v9417_v57 = vmul.f32 1.442695, %v9414_v63 }
0x609d   :  { %v9543_v27 = vpop.permute.xlu1 %9542 }
0x609e   :  { %13025 = vpow2.f32 %v9417_v57  ;;  %v9548_v16 = vsel %vm695_vm1, %v9543_v27, 0  ;;  %v12735_v57 = vld [vmem:[#allocation6 + $0x37c] ss:$180 sps:$4 sm:$0xff]   ;;  %v12745_v27 = vld [vmem:[#allocation6 + $0x380] ss:$180 sps:$4 sm:$0xff]  }
0x60a1   :  { %v9541_v14 = vpop.permute.xlu1 %9540 }
0x60a6   :  { %v13024_v38 = vpop.eup %13023 }
0x60a7   :  { %v9419_v5 = vsel %vm745_vm3, %v13024_v38, 0.0 }
0x60a8   :  { %v13026_v36 = vpop.eup %13025  ;;  %9420 = vadd.xlane.f32.xlu0 %v9419_v5  ;;  %v12737_v5 = vld [vmem:[#allocation6 + $0x64c] ss:$180 sps:$4 sm:$0xff]  }
0x60a9   :  { %v9422_v4 = vsel %vm745_vm3, %v13026_v36, 0.0 }
0x60ac   :  { %9423 = vadd.xlane.f32.xlu0 %v9422_v4  ;;  %v12739_v4 = vld [vmem:[#allocation6 + $0x91c] ss:$180 sps:$4 sm:$0xff]  }
0x60c2   :  { %9430 = vrot.lane.b32.xlu0 %v14432_v56, %s13179_s25 }
0x6135   :  { %v9421_v55 = vpop.xlane.xlu0 %9420 }
0x6136   :  { %13027 = vrcp.f32 %v9421_v55  ;;  %v12742_v55 = vld [vmem:[#allocation6 + $0xa80] ss:$180 sps:$4 sm:$0xff]  }
0x6139   :  { %v9424_v44 = vpop.xlane.xlu0 %9423 }
0x613a   :  { %13029 = vrcp.f32 %v9424_v44 }
0x613d   :  { %v9431_v29 = vpop.permute.xlu0 %9430 }
0x613e   :  { %12208 = vmatpush3.bf16.msra.mxu1 %v9431_v29 }
0x613f   :  { %12221 = vmatprep.subr.bf16.mxu1 %v13175_v0 }
0x6140   :  { %v13028_v40 = vpop.eup %13027 }
0x6141   :  { %v9427_v59 = vmul.f32 %v13028_v40, %v13024_v38  ;;  %v12736_v38 = vld [vmem:[#allocation6 + $0x4e4] ss:$180 sps:$4 sm:$0xff]  }
0x6144   :  { %v13030_v46 = vpop.eup %13029 }
0x6145   :  { %v9428_v41 = vmul.f32 %v13030_v46, %v13026_v36  ;;  %v12738_v36 = vld [vmem:[#allocation6 + $0x7b4] ss:$180 sps:$4 sm:$0xff]  }
0x6147   :  { %v9429_v31 = vpack.c.bf16 %v9428_v41, %v9427_v59  ;;  %v12743_v41 = vld [vmem:[#allocation6 + $0xb0] ss:$180 sps:$4 sm:$0xff]  }
0x6149   :  { %12210 = vmatmul.mubr.msk.bf16.vlgmr.msra.gmra.mrb[240].mxu1 %vm745_vm3, %v9429_v31  ;;  %v10778_v31 = vld [vmem:[#allocation7 + $0x49] ss:$0 sm:$0xff] }
0x614a   :  { %12222 = vmatpush3.bf16.xpose.msra.mxu1 %v9548_v16  ;;  %12223 = vmatprep.mubr.msk.bf16.mxu1 %vm13176_vm0, %v13175_v0 }
0x614b   :  { %12233 = vmatprep.subr.bf16.mxu1 %v13175_v0 }
0x6151   :  { %12224 = vmatmul.mubr.msk.bf16.vlgmr.msra.gmra.mrb[244].mxu1 %vm695_vm1, %v9541_v14 }
0x6152   :  { %12237 = vmatprep.mubr.msk.bf16.mxu1 %vm13176_vm0, %v13175_v0  ;;  %12234 = vmatpush3.bf16.msra.mxu1 %v12741_v26 }
0x6153   :  { %12235 = vmatprep.subr.bf16.mxu1 %v13175_v0 }
0x6156   :  { %12236 = vmatpush3.bf16.msra.mxu1 %v12742_v55 }
0x6157   :  { %12261 = vmatprep.subr.bf16.mxu1 %v13175_v0 }
0x621c   :  { %v9470_v22 = vpop.f32.mrb[240].mxu1 }
0x621d   :  { %v12211_v37 = vpop.f32.mrb[241].mxu1 }
0x621e   :  { %v9473_v3 = vpop.f32.mrb[242].mxu1 }
0x621f   :  { %v9481_v1 = vpack.c.bf16 %v9473_v3, %v9470_v22  ;;  %v12212_v58 = vpop.f32.mrb[243].mxu1 }
0x6221   :  { %12218 = vmatmul.mubr.msk.bf16.vlgmr.msra.gmra.mrb[228].mxu0 %vm695_vm1, %v9481_v1  ;;  %v12746_v1 = vld [vmem:[#allocation6 + $0x4e8] ss:$180 sps:$4 sm:$0xff]  }
0x6222   :  { %12229 = vmatprep.mubr.msk.bf16.mxu0 %vm13176_vm0, %v13175_v0 }
0x6224   :  { %v9584_v51 = vpop.f32.mrb[244].mxu1 }
0x6225   :  { %v9591_v61 = vsel %vm13332_vm2, %v9584_v51, -1e+30  ;;  %v12225_v17 = vpop.f32.mrb[245].mxu1  ;;  %v12747_v51 = vld [vmem:[#allocation6 + $0x650] ss:$180 sps:$4 sm:$0xff]  }
0x6226   :  { %v9593_v52 = vsel %vm745_vm3, %v9591_v61, -inf  ;;  %v9587_v7 = vpop.f32.mrb[246].mxu1  ;;  %v12749_v17 = vld [vmem:[#allocation6 + $0x920] ss:$180 sps:$4 sm:$0xff]  }
0x6227   :  { %v9592_v48 = vsel %vm13336_vm4, %v9587_v7, -1e+30  ;;  %9594 = vmax.xlane.f32.xlu1 %v9593_v52  ;;  %v12226_v49 = vpop.f32.mrb[247].mxu1  ;;  %v12750_v52 = vld [vmem:[#allocation6 + $0xa88] ss:$180 sps:$4 sm:$0xff]  }
0x6228   :  { %v9596_v11 = vsel %vm745_vm3, %v9592_v48, -inf }
0x6229   :  { %9597 = vmax.xlane.f32.xlu0 %v9596_v11 }
0x6238   :  { %9616 = vrot.lane.b32.xlu1 %v14432_v56, %s13180_s26 }
0x62b4   :  { %v9595_v13 = vpop.xlane.xlu1 %9594 }
0x62b5   :  { %v9599_v50 = vsub.f32 %v9591_v61, %v9595_v13  ;;  %v12748_v61 = vld [vmem:[#allocation6 + $0x7b8] ss:$180 sps:$4 sm:$0xff]  }
0x62b6   :  { %v9598_v43 = vpop.xlane.xlu0 %9597 }
0x62b7   :  { %v9601_v54 = vmul.f32 1.442695, %v9599_v50  ;;  %v9600_v21 = vsub.f32 %v9592_v48, %v9598_v43  ;;  %v10777_v48 = vld [vmem:[#allocation7 + $0x48] ss:$0 sm:$0xff] }
0x62b8   :  { %v9617_v18 = vpop.permute.xlu1 %9616 }
0x62b9   :  { %13031 = vpow2.f32 %v9601_v54  ;;  %v9603_v8 = vmul.f32 1.442695, %v9600_v21  ;;  %12228 = vmatpush3.bf16.msra.mxu0 %v9617_v18 }
0x62ba   :  { %12241 = vmatprep.subr.bf16.mxu0 %v13175_v0 }
0x62bb   :  { %13033 = vpow2.f32 %v9603_v8 }
0x62c3   :  { %v13032_v19 = vpop.eup %13031 }
0x62c4   :  { %v9605_v12 = vsel %vm745_vm3, %v13032_v19, 0.0 }
0x62c5   :  { %v13034_v9 = vpop.eup %13033  ;;  %9606 = vadd.xlane.f32.xlu0 %v9605_v12  ;;  %v10787_v12 = vld [vmem:[#allocation7 + $0x4a] ss:$0 sm:$0xff] }
0x62c6   :  { %v9608_v23 = vsel %vm745_vm3, %v13034_v9, 0.0 }
0x62c9   :  { %9609 = vadd.xlane.f32.xlu0 %v9608_v23 }
0x62f4   :  { %v9531_v56 = vpop.f32.mrb[228].mxu0 }
0x62f5   :  { %v14540_v39 = vadd.f32 %v9531_v56, %v14496_v42  ;;  %v12219_v62 = vpop.f32.mrb[229].mxu0  ;;  %v12733_v42 = vld [vmem:[#allocation6 + $0xac] ss:$180 sps:$4 sm:$0xff]  }
0x62f6   :  { %v9534_v2 = vpop.f32.mrb[230].mxu0 }
0x62f7   :  { %v14543_v10 = vadd.f32 %v9534_v2, %v14498_v20  ;;  %v12220_v30 = vpop.f32.mrb[231].mxu0  ;;  %v12734_v20 = vld [vmem:[#allocation6 + $0x214] ss:$180 sps:$4 sm:$0xff]  }
0x6352   :  { %v9607_v33 = vpop.xlane.xlu0 %9606 }
0x6353   :  { %13035 = vrcp.f32 %v9607_v33 }
0x6356   :  { %v9610_v32 = vpop.xlane.xlu0 %9609 }
0x6357   :  { %13037 = vrcp.f32 %v9610_v32 }
0x635d   :  { %v13036_v60 = vpop.eup %13035 }
0x635e   :  { %v9613_v25 = vmul.f32 %v13036_v60, %v13032_v19 }
0x6361   :  { %v13038_v53 = vpop.eup %13037 }
0x6362   :  { %v9614_v35 = vmul.f32 %v13038_v53, %v13034_v9 }
0x6364   :  { %v9615_v63 = vpack.c.bf16 %v9614_v35, %v9613_v25 }
0x6366   :  { %12230 = vmatmul.mubr.msk.bf16.vlgmr.msra.gmra.mrb[232].mxu0 %vm745_vm3, %v9615_v63 }
0x6367   :  { %12242 = vmatpush3.bf16.msra.mxu0 %v12733_v42  ;;  %12257 = vmatprep.mubr.msk.bf16.mxu0 %vm13176_vm0, %v13175_v0 }
0x6368   :  { %12243 = vmatprep.subr.bf16.mxu0 %v13175_v0 }
0x636b   :  { %12244 = vmatpush3.bf16.msra.mxu0 %v12734_v20 }
0x636c   :  { %12245 = vmatprep.subr.bf16.mxu0 %v13175_v0 }
0x636f   :  { %12246 = vmatpush3.bf16.msra.mxu0 %v12735_v57 }
0x6370   :  { %12247 = vmatprep.subr.bf16.mxu0 %v13175_v0 }
0x6373   :  { %12248 = vmatpush3.bf16.msra.mxu0 %v12736_v38 }
0x6374   :  { %12249 = vmatprep.subr.bf16.mxu0 %v13175_v0 }
0x6377   :  { %12250 = vmatpush3.bf16.msra.mxu0 %v12737_v5 }
0x6378   :  { %12251 = vmatprep.subr.bf16.mxu0 %v13175_v0 }
0x637b   :  { %12252 = vmatpush3.bf16.msra.mxu0 %v12738_v36 }
0x637c   :  { %12253 = vmatprep.subr.bf16.mxu0 %v13175_v0 }
0x637f   :  { %12254 = vmatpush3.bf16.msra.mxu0 %v12739_v4 }
0x6380   :  { %12255 = vmatprep.subr.bf16.mxu0 %v13175_v0 }
0x6383   :  { %12256 = vmatpush3.bf16.msra.mxu0 %v12740_v34 }
0x6384   :  { %12281 = vmatprep.subr.bf16.mxu0 %v13175_v0 }
0x6386   :  { %12258 = vmatmul.mubr.bf16.vlgmr.msra.gmra.mrb[236].mxu0 %v14425_v6  ;;  %v12744_v6 = vld [vmem:[#allocation6 + $0x218] ss:$180 sps:$4 sm:$0xff]  }
0x6387   :  { %12283 = vmatprep.mubr.msk.bf16.mxu0 %vm13176_vm0, %v13175_v0 }
0x6439   :  { %v9656_v44 = vpop.f32.mrb[232].mxu0 }
0x643a   :  { %v12231_v29 = vpop.f32.mrb[233].mxu0 }
0x643b   :  { %v9659_v40 = vpop.f32.mrb[234].mxu0 }
0x643c   :  { %v9667_v46 = vpack.c.bf16 %v9659_v40, %v9656_v44  ;;  %v12232_v59 = vpop.f32.mrb[235].mxu0 }
0x643e   :  { %12238 = vmatmul.mubr.msk.bf16.vlgmr.msra.gmra.mrb[248].mxu1 %vm695_vm1, %v9667_v46 }
0x643f   :  { %12277 = vmatprep.mubr.msk.bf16.mxu1 %vm13176_vm0, %v13175_v0  ;;  %12262 = vmatpush3.bf16.msra.mxu1 %v12743_v41 }
0x6440   :  { %12263 = vmatprep.subr.bf16.mxu1 %v13175_v0 }
0x6443   :  { %12264 = vmatpush3.bf16.msra.mxu1 %v12744_v6 }
0x6444   :  { %12265 = vmatprep.subr.bf16.mxu1 %v13175_v0 }
0x6447   :  { %12266 = vmatpush3.bf16.msra.mxu1 %v12745_v27 }
0x6448   :  { %12267 = vmatprep.subr.bf16.mxu1 %v13175_v0 }
0x644b   :  { %12268 = vmatpush3.bf16.msra.mxu1 %v12746_v1 }
0x644c   :  { %12269 = vmatprep.subr.bf16.mxu1 %v13175_v0 }
0x644f   :  { %12270 = vmatpush3.bf16.msra.mxu1 %v12747_v51 }
0x6450   :  { %12271 = vmatprep.subr.bf16.mxu1 %v13175_v0 }
0x6453   :  { %12272 = vmatpush3.bf16.msra.mxu1 %v12748_v61 }
0x6454   :  { %12273 = vmatprep.subr.bf16.mxu1 %v13175_v0 }
0x6457   :  { %12274 = vmatpush3.bf16.msra.mxu1 %v12749_v17 }
0x6458   :  { %12275 = vmatprep.subr.bf16.mxu1 %v13175_v0 }
0x6459   :  { %v9838_v16 = vpop.f32.mrb[236].mxu0 }
0x645a   :  { %v12259_v14 = vpop.f32.mrb[237].mxu0  ;;  %v9839_v22 = vadd.f32 %v10778_v31, %v9838_v16 }
0x645b   :  { %v9841_v15 = vpop.f32.mrb[238].mxu0  ;;  %12276 = vmatpush3.bf16.msra.mxu1 %v12750_v52 }
0x645c   :  { %v9842_v37 = vadd.f32 %v10778_v31, %v9841_v15  ;;  %v12260_v3 = vpop.f32.mrb[239].mxu0  ;;  %12287 = vmatprep.subr.bf16.mxu1 %v13175_v0 }
0x645e   :  { %v9956_v58 = vpack.c.bf16 %v9842_v37, %v9839_v22 }
0x6460   :  { %10030 = vrot.lane.b32.xlu1 %v9956_v58, %s13178_s3 }
0x6511   :  { %v9717_v7 = vpop.f32.mrb[248].mxu1 }
0x6512   :  { %v9724_v49 = vadd.f32 %v9717_v7, %v14540_v39  ;;  %v12239_v11 = vpop.f32.mrb[249].mxu1 }
0x6513   :  { %v9720_v13 = vpop.f32.mrb[250].mxu1 }
0x6514   :  { %v9731_v50 = vadd.f32 %v10777_v48, %v9724_v49  ;;  %v9725_v43 = vadd.f32 %v9720_v13, %v14543_v10  ;;  %v12240_v54 = vpop.f32.mrb[251].mxu1 }
0x6516   :  { %v9732_v21 = vadd.f32 %v10777_v48, %v9725_v43  ;;  %v9733_v18 = vadd.f32 %v9731_v50, %v14115_v24 }
0x6518   :  { %v9734_v8 = vadd.f32 %v9732_v21, %v14117_v28  ;;  %v10031_v28 = vpop.permute.xlu1 %10030 }
0x651a   :  { %v9861_v19 = vpack.c.bf16 %v9734_v8, %v9733_v18 }
0x651c   :  { %12278 = vmatmul.mubr.bf16.vlgmr.msra.gmra.mrb[252].mxu1 %v9861_v19 }
0x651d   :  { %12289 = vmatprep.mubr.msk.bf16.mxu1 %vm13176_vm0, %v13175_v0 }
0x65ef   :  { %v9949_v9 = vpop.f32.mrb[252].mxu1 }
0x65f0   :  { %v12279_v23 = vpop.f32.mrb[253].mxu1  ;;  %v9950_v39 = vadd.f32 %v10787_v12, %v9949_v9 }
0x65f1   :  { %v9952_v56 = vpop.f32.mrb[254].mxu1 }
0x65f2   :  { %v9953_v62 = vadd.f32 %v10787_v12, %v9952_v56  ;;  %v12280_v2 = vpop.f32.mrb[255].mxu1 }
0x65f4   :  { %v9957_v30 = vpack.c.bf16 %v9953_v62, %v9950_v39 }
0x65f6   :  { %10033 = vrot.lane.b32.xlu0 %v9957_v30, %s13178_s3  ;;  %10110 = vrot.lane.b32.xlu1 %v9957_v30, %s13179_s25  ;;  %v9962_v24 = vsel %vm695_vm1, %v9957_v30, 0 }
0x65f7   :  { %12282 = vmatpush3.bf16.xpose.msra.mxu0 %v9962_v24 }
0x65f8   :  { %12293 = vmatprep.subr.bf16.mxu0 %v13175_v0 }
0x65fa   :  { %10108 = vrot.lane.b32.xlu0 %v9956_v58, %s13179_s25  ;;  %10187 = vrot.lane.b32.xlu1 %v9957_v30, %s13180_s26 }
0x65fe   :  { %10185 = vrot.lane.b32.xlu1 %v9956_v58, %s13180_s26  ;;  %12284 = vmatmul.mubr.msk.bf16.vlgmr.msra.gmra.mrb[240].mxu0 %vm695_vm1, %v9956_v58 }
0x65ff   :  { %12295 = vmatprep.mubr.msk.bf16.mxu0 %vm13176_vm0, %v13175_v0 }
0x6668   :  { %v10034_v10 = vpop.permute.xlu0 %10033  ;;  %v10111_v26 = vpop.permute.xlu1 %10110 }
0x6669   :  { %v10039_v33 = vsel %vm695_vm1, %v10034_v10, 0  ;;  %v10116_v32 = vsel %vm695_vm1, %v10111_v26, 0 }
0x666a   :  { %12288 = vmatpush3.bf16.xpose.msra.mxu1 %v10039_v33  ;;  %12294 = vmatpush3.bf16.xpose.msra.mxu0 %v10116_v32 }
0x666b   :  { %12299 = vmatprep.subr.bf16.mxu1 %v13175_v0 }
0x666c   :  { %v10188_v60 = vpop.permute.xlu1 %10187  ;;  %v10109_v53 = vpop.permute.xlu0 %10108 }
0x666d   :  { %v10193_v25 = vsel %vm695_vm1, %v10188_v60, 0 }
0x6670   :  { %v10186_v35 = vpop.permute.xlu1 %10185 }
0x6671   :  { %12290 = vmatmul.mubr.msk.bf16.vlgmr.msra.gmra.mrb[0].mxu1 %vm695_vm1, %v10031_v28  ;;  %12296 = vmatmul.mubr.msk.bf16.vlgmr.msra.gmra.mrb[244].mxu0 %vm695_vm1, %v10109_v53 }
0x6672   :  { %12300 = vmatpush3.bf16.xpose.msra.mxu1 %v10193_v25  ;;  %12301 = vmatprep.mubr.msk.bf16.mxu1 %vm13176_vm0, %v13175_v0 }
0x6679   :  { %12302 = vmatmul.mubr.msk.bf16.vlgmr.msra.gmra.mrb[4].mxu1 %vm695_vm1, %v10186_v35 }
0x66d1   :  { %v9998_v42 = vpop.f32.mrb[240].mxu0 }
0x66d2   :  { %v10005_v63 = vsel %vm13332_vm2, %v9998_v42, -1e+30  ;;  %v12285_v20 = vpop.f32.mrb[241].mxu0 }
0x66d3   :  { %v10007_v57 = vsel %vm745_vm3, %v10005_v63, -inf  ;;  %v10001_v38 = vpop.f32.mrb[242].mxu0 }
0x66d4   :  { %v10006_v5 = vsel %vm13336_vm4, %v10001_v38, -1e+30  ;;  %10008 = vmax.xlane.f32.xlu0 %v10007_v57  ;;  %v12286_v36 = vpop.f32.mrb[243].mxu0 }
0x66d5   :  { %v10010_v4 = vsel %vm745_vm3, %v10006_v5, -inf }
0x66d6   :  { %10011 = vmax.xlane.f32.xlu1 %v10010_v4 }
0x6744   :  { %v10075_v0 = vpop.f32.mrb[0].mxu1  ;;  %v10152_v34 = vpop.f32.mrb[244].mxu0 }
0x6745   :  { %v10082_v55 = vsel %vm13332_vm2, %v10075_v0, -1e+30  ;;  %v12291_v44 = vpop.f32.mrb[1].mxu1  ;;  %v12297_v29 = vpop.f32.mrb[245].mxu0  ;;  %v10159_v41 = vsel %vm13332_vm2, %v10152_v34, -1e+30 }
0x6746   :  { %v10084_v40 = vsel %vm745_vm3, %v10082_v55, -inf  ;;  %v10078_v46 = vpop.f32.mrb[2].mxu1  ;;  %v10155_v59 = vpop.f32.mrb[246].mxu0  ;;  %v10161_v14 = vsel %vm745_vm3, %v10159_v41, -inf }
0x6747   :  { %v10160_v6 = vsel %vm13336_vm4, %v10155_v59, -1e+30  ;;  %v12292_v27 = vpop.f32.mrb[3].mxu1  ;;  %10085 = vmax.xlane.f32.xlu0 %v10084_v40  ;;  %v12298_v31 = vpop.f32.mrb[247].mxu0  ;;  %v10083_v15 = vsel %vm13336_vm4, %v10078_v46, -1e+30 }
0x6748   :  { %v10164_v16 = vsel %vm745_vm3, %v10160_v6, -inf  ;;  %v10087_v3 = vsel %vm745_vm3, %v10083_v15, -inf }
0x6749   :  { %10165 = vmax.xlane.f32.xlu1 %v10164_v16 }
0x674b   :  { %10162 = vmax.xlane.f32.xlu0 %v10161_v14 }
0x674c   :  { %v10229_v22 = vpop.f32.mrb[4].mxu1 }
0x674d   :  { %v12303_v37 = vpop.f32.mrb[5].mxu1  ;;  %v10236_v58 = vsel %vm13332_vm2, %v10229_v22, -1e+30 }
0x674e   :  { %v10232_v1 = vpop.f32.mrb[6].mxu1  ;;  %v10238_v52 = vsel %vm745_vm3, %v10236_v58, -inf }
0x674f   :  { %v10237_v51 = vsel %vm13336_vm4, %v10232_v1, -1e+30  ;;  %v12304_v61 = vpop.f32.mrb[7].mxu1  ;;  %10088 = vmax.xlane.f32.xlu0 %v10087_v3 }
0x6750   :  { %v10241_v17 = vsel %vm745_vm3, %v10237_v51, -inf }
0x6751   :  { %10242 = vmax.xlane.f32.xlu1 %v10241_v17 }
0x6753   :  { %10239 = vmax.xlane.f32.xlu0 %v10238_v52 }
0x6761   :  { %v10009_v7 = vpop.xlane.xlu0 %10008 }
0x6762   :  { %v10013_v48 = vsub.f32 %v10005_v63, %v10009_v7 }
0x6763   :  { %v10012_v49 = vpop.xlane.xlu1 %10011 }
0x6764   :  { %v10015_v11 = vmul.f32 1.442695, %v10013_v48  ;;  %v10014_v13 = vsub.f32 %v10006_v5, %v10012_v49 }
0x6766   :  { %13039 = vpow2.f32 %v10015_v11  ;;  %v10017_v50 = vmul.f32 1.442695, %v10014_v13 }
0x6768   :  { %13041 = vpow2.f32 %v10017_v50 }
0x6770   :  { %v14622_v45 = vpop.eup %13039 }
0x6771   :  { %v10019_v47 = vsel %vm745_vm3, %v14622_v45, 0.0 }
0x6772   :  { %v14626_v43 = vpop.eup %13041  ;;  %10020 = vadd.xlane.f32.xlu0 %v10019_v47 }
0x6773   :  { %v10022_v54 = vsel %vm745_vm3, %v14626_v43, 0.0 }
0x6774   :  { %10023 = vadd.xlane.f32.xlu1 %v10022_v54 }
0x67d4   :  { %v10086_v21 = vpop.xlane.xlu0 %10085 }
0x67d5   :  { %v10090_v18 = vsub.f32 %v10082_v55, %v10086_v21 }
0x67d6   :  { %v10166_v19 = vpop.xlane.xlu1 %10165 }
0x67d7   :  { %v10092_v8 = vmul.f32 1.442695, %v10090_v18  ;;  %v10168_v23 = vsub.f32 %v10160_v6, %v10166_v19 }
0x67d8   :  { %v10163_v12 = vpop.xlane.xlu0 %10162 }
0x67d9   :  { %13043 = vpow2.f32 %v10092_v8  ;;  %v10167_v9 = vsub.f32 %v10159_v41, %v10163_v12  ;;  %v10171_v30 = vmul.f32 1.442695, %v10168_v23 }
0x67db   :  { %v10169_v56 = vmul.f32 1.442695, %v10167_v9 }
0x67dc   :  { %v10089_v39 = vpop.xlane.xlu0 %10088 }
0x67dd   :  { %13045 = vpow2.f32 %v10169_v56  ;;  %v10091_v62 = vsub.f32 %v10083_v15, %v10089_v39 }
0x67de   :  { %v10243_v2 = vpop.xlane.xlu1 %10242 }
0x67df   :  { %v10094_v24 = vmul.f32 1.442695, %v10091_v62  ;;  %v10245_v28 = vsub.f32 %v10237_v51, %v10243_v2 }
0x67e0   :  { %v10240_v10 = vpop.xlane.xlu0 %10239 }
0x67e1   :  { %13047 = vpow2.f32 %v10094_v24  ;;  %v10244_v26 = vsub.f32 %v10236_v58, %v10240_v10  ;;  %v10248_v32 = vmul.f32 1.442695, %v10245_v28 }
0x67e2   :  { %13049 = vpow2.f32 %v10171_v30 }
0x67e3   :  { %v13044_v33 = vpop.eup %13043  ;;  %v10246_v60 = vmul.f32 1.442695, %v10244_v26 }
0x67e4   :  { %v10096_v53 = vsel %vm745_vm3, %v13044_v33, 0.0 }
0x67e5   :  { %13051 = vpow2.f32 %v10246_v60  ;;  %10097 = vadd.xlane.f32.xlu0 %v10096_v53 }
0x67e6   :  { %13053 = vpow2.f32 %v10248_v32 }
0x67e7   :  { %v13046_v25 = vpop.eup %13045 }
0x67e8   :  { %v10173_v35 = vsel %vm745_vm3, %v13046_v25, 0.0 }
0x67e9   :  { %10174 = vadd.xlane.f32.xlu0 %v10173_v35 }
0x67eb   :  { %v13048_v42 = vpop.eup %13047 }
0x67ec   :  { %v10099_v63 = vsel %vm745_vm3, %v13048_v42, 0.0  ;;  %v13050_v20 = vpop.eup %13049 }
0x67ed   :  { %10100 = vadd.xlane.f32.xlu1 %v10099_v63  ;;  %v10176_v5 = vsel %vm745_vm3, %v13050_v20, 0.0 }
0x67ef   :  { %v13052_v57 = vpop.eup %13051 }
0x67f0   :  { %v10250_v38 = vsel %vm745_vm3, %v13052_v57, 0.0  ;;  %v13054_v36 = vpop.eup %13053 }
0x67f1   :  { %10251 = vadd.xlane.f32.xlu0 %v10250_v38  ;;  %10177 = vadd.xlane.f32.xlu1 %v10176_v5  ;;  %v10253_v4 = vsel %vm745_vm3, %v13054_v36, 0.0 }
0x67f5   :  { %10254 = vadd.xlane.f32.xlu1 %v10253_v4 }
0x67ff   :  { %v10021_v0 = vpop.xlane.xlu0 %10020 }
0x6800   :  { %13055 = vrcp.f32 %v10021_v0 }
0x6801   :  { %v10024_v55 = vpop.xlane.xlu1 %10023 }
0x680a   :  { %v13056_v59 = vpop.eup %13055 }
0x680b   :  { %v10026_v15 = vmul.f32 %v13056_v59, %v14622_v45 }
0x6872   :  { %v10098_v34 = vpop.xlane.xlu0 %10097 }
0x6873   :  { %13057 = vrcp.f32 %v10098_v34 }
0x6876   :  { %v10175_v44 = vpop.xlane.xlu0 %10174 }
0x6877   :  { %13059 = vrcp.f32 %v10175_v44 }
0x687a   :  { %v10101_v29 = vpop.xlane.xlu1 %10100 }
0x687b   :  { %13061 = vrcp.f32 %v10101_v29 }
0x687c   :  { %13063 = vrcp.f32 %v10024_v55 }
0x687d   :  { %v13058_v6 = vpop.eup %13057 }
0x687e   :  { %v10252_v40 = vpop.xlane.xlu0 %10251  ;;  %v10178_v46 = vpop.xlane.xlu1 %10177  ;;  %v10103_v16 = vmul.f32 %v13058_v6, %v13044_v33 }
0x687f   :  { %13065 = vrcp.f32 %v10252_v40 }
0x6880   :  { %13067 = vrcp.f32 %v10178_v46  ;;  %v10106_v51 = vadd.f32 %v10103_v16, %v10026_v15 }
0x6881   :  { %v13060_v27 = vpop.eup %13059 }
0x6882   :  { %v10255_v41 = vpop.xlane.xlu1 %10254  ;;  %v10180_v22 = vmul.f32 %v13060_v27, %v13046_v25 }
0x6883   :  { %13069 = vrcp.f32 %v10255_v41 }
0x6884   :  { %v10183_v52 = vadd.f32 %v10180_v22, %v10106_v51 }
0x6885   :  { %v13062_v31 = vpop.eup %13061 }
0x6886   :  { %v13064_v14 = vpop.eup %13063  ;;  %v10105_v37 = vmul.f32 %v13062_v31, %v13048_v42 }
0x6887   :  { %v10028_v58 = vmul.f32 %v13064_v14, %v14626_v43 }
0x6889   :  { %v13066_v3 = vpop.eup %13065  ;;  %v10107_v7 = vadd.f32 %v10105_v37, %v10028_v58 }
0x688a   :  { %v13068_v1 = vpop.eup %13067  ;;  %v10257_v61 = vmul.f32 %v13066_v3, %v13052_v57 }
0x688b   :  { %v10182_v17 = vmul.f32 %v13068_v1, %v13050_v20 }
0x688c   :  { %v10260_v49 = vadd.f32 %v10257_v61, %v10183_v52 }
0x688d   :  { %v13070_v48 = vpop.eup %13069  ;;  %v10184_v11 = vadd.f32 %v10182_v17, %v10107_v7 }
0x688e   :  { %v10259_v13 = vmul.f32 %v13070_v48, %v13054_v36  ;;  %v10262_v47 = vsel %vm745_vm3, %v10260_v49, 0.0 }
0x6890   :  { %v10261_v50 = vadd.f32 %v10259_v13, %v10184_v11 }
0x6892   :  { %v10263_v45 = vsel %vm745_vm3, %v10261_v50, 0.0 }
0x6893   :  { %v10264_v54 = vadd.f32 %v10263_v45, %v10262_v47 }
0x6895   :  { %v10265_v21 = vrot.slane %v10264_v54, 4 }
0x6897   :  { %v10266_v18 = vadd.f32 %v10265_v21, %v10264_v54 }
0x6899   :  { %v10267_v8 = vrot.slane %v10266_v18, 2 }
0x689b   :  { %v10268_v19 = vadd.f32 %v10267_v8, %v10266_v18 }
0x689d   :  { %v10269_v43 = vrot.slane %v10268_v19, 1 }
0x689f   :  { %v10270_v12 = vadd.f32 %v10269_v43, %v10268_v19 }
0x68a1   :  { %v10271_v9 = vmul.f32 0.03125, %v10270_v12 }
0x68a3   :  { %10273 = vst.msk [vmem:[%s14647_s4] sm:$0x1] %vm10272_vm5, %v10271_v9 }
0x68a4   :  { %10278 = vsyncpa [#allocation3], 1 }
0x68a5   :  { %10279 = vsyncpa [#allocation5], 1 }
0x68a6   :  { %10280 = vsyncpa [#allocation8], 1 }

</bundles_post_ra>
